<compile_context>
chip_gen: v5e
topology: v5e:2x2
jax: 0.10.0
libtpu: 0.0.40
codegen_flags: <defaults>
</compile_context>

<pallas_src>
import functools

import jax
import jax.numpy as jnp
from jax.experimental import pallas as pl
from jax.experimental.pallas import tpu as pltpu


FC_PAD = 128      # padded hidden width for fc1/fc2/fc3 outputs
FC1_TK = 2048     # K tile for the fc1 reduction
CONV_TN = 2048    # pixel tile for the conv matmuls


def _round_up(x, m):
    return ((x + m - 1) // m) * m


# ----------------------------------------------------------------------------
# Kernel 1: conv-as-matmul, transposed orientation (lane-dense output).
#   out(Cout_p, tn) = relu(W(Cout_p, CKK_p) @ patches(CKK_p, tn) + b(Cout_p, 1))
# Grid = (Npix_p // tn,); M and K are single full blocks.
# ----------------------------------------------------------------------------
def _conv_mm_kernel(w_ref, p_ref, b_ref, o_ref):
    acc = jnp.dot(w_ref[...], p_ref[...], preferred_element_type=jnp.float32)
    acc = jnp.maximum(acc + b_ref[...], 0.0)
    o_ref[...] = acc.astype(o_ref.dtype)


def conv_matmul(w_p, b_p, patches, *, tn=CONV_TN):
    cout_p, ckk_p = w_p.shape
    _, npix_p = patches.shape
    return pl.pallas_call(
        _conv_mm_kernel,
        out_shape=jax.ShapeDtypeStruct((cout_p, npix_p), jnp.bfloat16),
        grid_spec=pltpu.PrefetchScalarGridSpec(
            num_scalar_prefetch=0,
            grid=(npix_p // tn,),
            in_specs=[
                pl.BlockSpec((cout_p, ckk_p), lambda j: (0, 0)),
                pl.BlockSpec((ckk_p, tn), lambda j: (0, j)),
                pl.BlockSpec((cout_p, 1), lambda j: (0, 0)),
            ],
            out_specs=pl.BlockSpec((cout_p, tn), lambda j: (0, j)),
        ),
        compiler_params=pltpu.CompilerParams(
            dimension_semantics=("parallel",)),
    )(w_p, patches, b_p)


def _im2col_T(x, ksize, ckk_p, tn):
    """Transposed im2col.  x: (N, C, Hp, Wp) bf16, already spatially padded.
    Returns (patches (ckk_p, Npix_p) bf16, Ho, Wo, Npix); feature order is
    (c, kh, kw), pixel order is (n, h, w) -- both match the PyTorch layout."""
    n, c, hp, wp = x.shape
    ho, wo = hp - ksize + 1, wp - ksize + 1
    taps = []
    for kh in range(ksize):
        for kw in range(ksize):
            taps.append(x[:, :, kh:kh + ho, kw:kw + wo])     # (N, C, Ho, Wo)
    p = jnp.stack(taps, axis=0)                              # (KK, N, C, Ho, Wo)
    p = p.transpose(2, 0, 1, 3, 4).reshape(c * ksize * ksize, n * ho * wo)
    npix = n * ho * wo
    npix_p = _round_up(npix, tn)
    p = jnp.pad(p, ((0, ckk_p - c * ksize * ksize), (0, npix_p - npix)))
    return p, ho, wo, npix


def conv2d_relu(x, w_p, b_p, *, cout, ksize, tn=CONV_TN):
    """x: (N, Cin, H, W) bf16 (already padded spatially if needed).
    w_p: (Cout_p, CKK_p) bf16 prepared weight; b_p: (Cout_p, 1) f32."""
    n = x.shape[0]
    ckk_p = w_p.shape[1]
    patches, ho, wo, npix = _im2col_T(x, ksize, ckk_p, tn)
    y = conv_matmul(w_p, b_p, patches, tn=tn)                # (Cout_p, Npix_p)
    y = y[:cout, :npix].reshape(cout, n, ho, wo)
    return y.transpose(1, 0, 2, 3)                           # (N, Cout, Ho, Wo)


# ----------------------------------------------------------------------------
# Kernel 2: AvgPool2d(2, 2) as P @ x @ Q, all channels of one batch element
# per grid step (MXU does the averaging; XLU/VPU stay free).
# ----------------------------------------------------------------------------
def _avgpool2_kernel(x_ref, p_ref, q_ref, o_ref, *, num_ch):
    for c in range(num_ch):                                  # unrolled (<=16)
        t = jnp.dot(p_ref[...], x_ref[0, c], preferred_element_type=jnp.float32)
        o_ref[0, c] = jnp.dot(t.astype(jnp.bfloat16), q_ref[...],
                              preferred_element_type=jnp.float32
                              ).astype(o_ref.dtype)


def avgpool2(x):
    """x: (N, C, H, W) bf16, H and W even."""
    n, c, h, w = x.shape
    hh, wh = h // 2, w // 2
    rows = jnp.arange(hh)
    p = jnp.zeros((hh, h), jnp.bfloat16)
    p = p.at[rows, 2 * rows].set(0.5).at[rows, 2 * rows + 1].set(0.5)
    cols = jnp.arange(wh)
    q = jnp.zeros((w, wh), jnp.bfloat16)
    q = q.at[2 * cols, cols].set(0.5).at[2 * cols + 1, cols].set(0.5)

    return pl.pallas_call(
        functools.partial(_avgpool2_kernel, num_ch=c),
        out_shape=jax.ShapeDtypeStruct((n, c, hh, wh), jnp.bfloat16),
        grid_spec=pltpu.PrefetchScalarGridSpec(
            num_scalar_prefetch=0,
            grid=(n,),
            in_specs=[
                pl.BlockSpec((1, c, h, w), lambda i: (i, 0, 0, 0)),
                pl.BlockSpec((hh, h), lambda i: (0, 0)),
                pl.BlockSpec((w, wh), lambda i: (0, 0)),
            ],
            out_specs=pl.BlockSpec((1, c, hh, wh), lambda i: (i, 0, 0, 0)),
        ),
        compiler_params=pltpu.CompilerParams(
            dimension_semantics=("parallel",)),
    )(x, p, q)


# ----------------------------------------------------------------------------
# Kernel 3: fused FC head.  Grid is the fc1 K reduction only; on the last K
# step the kernel applies bias+ReLU and runs fc2 (+ReLU) and fc3 in-register.
# ----------------------------------------------------------------------------
def _fc_head_kernel(a_ref, w1_ref, b1_ref, w2_ref, b2_ref, w3_ref, b3_ref,
                    o_ref, acc_ref):
    k = pl.program_id(0)

    @pl.when(k == 0)
    def _():
        acc_ref[...] = jnp.zeros_like(acc_ref)

    acc_ref[...] += jnp.dot(a_ref[...], w1_ref[...],
                            preferred_element_type=jnp.float32)

    @pl.when(k == pl.num_programs(0) - 1)
    def _():
        h1 = jnp.maximum(acc_ref[...] + b1_ref[...], 0.0)
        h2 = jnp.dot(h1.astype(jnp.bfloat16), w2_ref[...],
                     preferred_element_type=jnp.float32) + b2_ref[...]
        h2 = jnp.maximum(h2, 0.0)
        out = jnp.dot(h2.astype(jnp.bfloat16), w3_ref[...],
                      preferred_element_type=jnp.float32) + b3_ref[...]
        o_ref[...] = out.astype(o_ref.dtype)


def fc_head(a_p, w1_p, b1_p, w2_p, b2_p, w3_p, b3_p, *, tk=FC1_TK):
    mp, kp = a_p.shape
    np_ = w1_p.shape[1]
    return pl.pallas_call(
        _fc_head_kernel,
        out_shape=jax.ShapeDtypeStruct((mp, np_), jnp.float32),
        grid_spec=pltpu.PrefetchScalarGridSpec(
            num_scalar_prefetch=0,
            grid=(kp // tk,),
            in_specs=[
                pl.BlockSpec((mp, tk), lambda k: (0, k)),
                pl.BlockSpec((tk, np_), lambda k: (k, 0)),
                pl.BlockSpec((1, np_), lambda k: (0, 0)),
                pl.BlockSpec((np_, np_), lambda k: (0, 0)),
                pl.BlockSpec((1, np_), lambda k: (0, 0)),
                pl.BlockSpec((np_, np_), lambda k: (0, 0)),
                pl.BlockSpec((1, np_), lambda k: (0, 0)),
            ],
            out_specs=pl.BlockSpec((mp, np_), lambda k: (0, 0)),
            scratch_shapes=[pltpu.VMEM((mp, np_), jnp.float32)],
        ),
        compiler_params=pltpu.CompilerParams(
            dimension_semantics=("arbitrary",)),
    )(a_p, w1_p, b1_p, w2_p, b2_p, w3_p, b3_p)


# ----------------------------------------------------------------------------
# Parameters: PyTorch-layout init + one-time Pallas-friendly preparation.
# ----------------------------------------------------------------------------
def init_lenet_params(key, num_classes=10):
    ks = jax.random.split(key, 10)

    def uinit(k, shape, fan_in):
        bound = 1.0 / (fan_in ** 0.5)
        return jax.random.uniform(k, shape, jnp.float32, -bound, bound)

    return {
        "conv1_w": uinit(ks[0], (6, 3, 5, 5), 3 * 5 * 5),
        "conv1_b": uinit(ks[1], (6,), 3 * 5 * 5),
        "conv2_w": uinit(ks[2], (16, 6, 5, 5), 6 * 5 * 5),
        "conv2_b": uinit(ks[3], (16,), 6 * 5 * 5),
        "fc1_w": uinit(ks[4], (120, 16 * 54 * 54), 16 * 54 * 54),
        "fc1_b": uinit(ks[5], (120,), 16 * 54 * 54),
        "fc2_w": uinit(ks[6], (84, 120), 120),
        "fc2_b": uinit(ks[7], (84,), 120),
        "fc3_w": uinit(ks[8], (num_classes, 84), 84),
        "fc3_b": uinit(ks[9], (num_classes,), 84),
    }


def prepare_params(params):
    """One-time prep: transpose / pad / cast all weights for the kernels."""
    def conv_prep(w, b):
        cout, cin, k, _ = w.shape
        ckk = cin * k * k
        cout_p = _round_up(cout, 8)
        ckk_p = _round_up(ckk, 16)
        wm = jnp.pad(w.reshape(cout, ckk).astype(jnp.bfloat16),
                     ((0, cout_p - cout), (0, ckk_p - ckk)))
        bm = jnp.pad(b.astype(jnp.float32)[:, None], ((0, cout_p - cout), (0, 0)))
        return wm, bm

    def fc_w(w, kp, np_):                       # w: (out, in) torch layout
        out_f, in_f = w.shape
        return jnp.pad(w.T.astype(jnp.bfloat16),
                       ((0, kp - in_f), (0, np_ - out_f)))

    def fc_b(b, np_):
        return jnp.pad(b.astype(jnp.float32)[None, :],
                       ((0, 0), (0, np_ - b.shape[0])))

    c1w, c1b = conv_prep(params["conv1_w"], params["conv1_b"])
    c2w, c2b = conv_prep(params["conv2_w"], params["conv2_b"])
    k1p = _round_up(params["fc1_w"].shape[1], FC1_TK)
    return {
        "conv1_w": c1w, "conv1_b": c1b,
        "conv2_w": c2w, "conv2_b": c2b,
        "fc1_w": fc_w(params["fc1_w"], k1p, FC_PAD),
        "fc1_b": fc_b(params["fc1_b"], FC_PAD),
        "fc2_w": fc_w(params["fc2_w"], FC_PAD, FC_PAD),
        "fc2_b": fc_b(params["fc2_b"], FC_PAD),
        "fc3_w": fc_w(params["fc3_w"], FC_PAD, FC_PAD),
        "fc3_b": fc_b(params["fc3_b"], FC_PAD),
    }


# ----------------------------------------------------------------------------
# Forward pass
# ----------------------------------------------------------------------------
def lenet_forward(prep, x, *, num_classes=10):
    n = x.shape[0]
    x = x.astype(jnp.bfloat16)

    # conv1 (3->6, k=5, padding=2) + ReLU, then pool
    xp = jnp.pad(x, ((0, 0), (0, 0), (2, 2), (2, 2)))
    x = conv2d_relu(xp, prep["conv1_w"], prep["conv1_b"], cout=6, ksize=5)
    x = avgpool2(x)                                       # (N, 6, 112, 112)

    # conv2 (6->16, k=5, no padding) + ReLU, then pool
    x = conv2d_relu(x, prep["conv2_w"], prep["conv2_b"], cout=16, ksize=5)
    x = avgpool2(x)                                       # (N, 16, 54, 54)

    # flatten in (C, H, W) order (== torch .view), pad batch to 8 rows and
    # K to the padded fc1 reduction length.
    a = x.reshape(n, -1)                                  # (N, 46656) bf16
    kp = prep["fc1_w"].shape[0]
    mp = _round_up(max(n, 1), 8)
    a = jnp.pad(a, ((0, mp - n), (0, kp - a.shape[1])))

    logits = fc_head(a, prep["fc1_w"], prep["fc1_b"],
                     prep["fc2_w"], prep["fc2_b"],
                     prep["fc3_w"], prep["fc3_b"], tk=FC1_TK)
    return logits[:n, :num_classes]


if __name__ == "__main__":
    key = jax.random.PRNGKey(0)
    k_param, k_x = jax.random.split(key)
    params = init_lenet_params(k_param, num_classes=10)
    prep = prepare_params(params)                         # one-time weight prep
    prep = jax.tree_util.tree_map(jnp.asarray, prep)
    jax.block_until_ready(prep)

    # batch 2; 3x224x224 is the spatial size that fc1 (16*54*54) implies.
    x = jax.random.normal(k_x, (2, 3, 224, 224), dtype=jnp.float32)

    fwd = jax.jit(lenet_forward)
    out = fwd(prep, x)
    jax.block_until_ready(out)
    assert out.shape == (2, 10) and out.dtype == jnp.float32
    print("KERNEL_OK")
</pallas_src>

<mosaic_0001>
module attributes {stable_mosaic.version = 11 : i64} {
  func.func @_conv_mm_kernel(%arg0: i32, %arg1: memref<8x80xbf16, #tpu.memory_space<vmem>>, %arg2: memref<80x2048xbf16, #tpu.memory_space<vmem>>, %arg3: memref<8x1xf32, #tpu.memory_space<vmem>>, %arg4: memref<8x2048xbf16, #tpu.memory_space<vmem>>) attributes {dimension_semantics = [#tpu.dimension_semantics<parallel>], iteration_bounds = array<i64: 49>, scalar_prefetch = 0 : i64, scratch_operands = 0 : i64, tpu.core_type = #tpu.core_type<tc>, window_params = [{pipeline_mode = #tpu.pipeline_mode<synchronous>, transform_indices = @transform_0, window_bounds = array<i64: 8, 80>}, {transform_indices = @transform_1, window_bounds = array<i64: 80, 2048>}, {pipeline_mode = #tpu.pipeline_mode<synchronous>, transform_indices = @transform_2, window_bounds = array<i64: 8, 1>}, {transform_indices = @transform_3, window_bounds = array<i64: 8, 2048>}]} {
    %c0 = arith.constant 0 : index
    %c0_0 = arith.constant 0 : index
    %0 = vector.load %arg1[%c0, %c0_0] : memref<8x80xbf16, #tpu.memory_space<vmem>>, vector<8x80xbf16>
    %c0_1 = arith.constant 0 : index
    %c0_2 = arith.constant 0 : index
    %1 = vector.load %arg2[%c0_1, %c0_2] : memref<80x2048xbf16, #tpu.memory_space<vmem>>, vector<80x2048xbf16>
    %cst = arith.constant dense<0.000000e+00> : vector<8x2048xf32>
    %2 = tpu.matmul %0, %1, %cst {dimension_numbers = #tpu.dot_dimension_numbers<[1], [0], [0], [1], [0, 0, 1, 1], [], []>} : vector<8x80xbf16>, vector<80x2048xbf16>, vector<8x2048xf32> -> vector<8x2048xf32>
    %c0_3 = arith.constant 0 : index
    %c0_4 = arith.constant 0 : index
    %3 = vector.load %arg3[%c0_3, %c0_4] : memref<8x1xf32, #tpu.memory_space<vmem>>, vector<8x1xf32>
    %4 = vector.broadcast %3 : vector<8x1xf32> to vector<8x2048xf32>
    %5 = arith.addf %2, %4 : vector<8x2048xf32>
    %cst_5 = arith.constant 0.000000e+00 : f32
    %6 = vector.broadcast %cst_5 : f32 to vector<8x2048xf32>
    %7 = arith.maximumf %5, %6 : vector<8x2048xf32>
    %8 = arith.truncf %7 : vector<8x2048xf32> to vector<8x2048xbf16>
    %c0_6 = arith.constant 0 : index
    %c0_7 = arith.constant 0 : index
    %9 = vector.load %arg4[%c0_6, %c0_7] : memref<8x2048xbf16, #tpu.memory_space<vmem>>, vector<8x2048xbf16>
    tpu.vector_store %arg4[%c0_6, %c0_7], %8 {strides = array<i32>} : memref<8x2048xbf16, #tpu.memory_space<vmem>>, vector<8x2048xbf16>,
    return
  }
  func.func @transform_0(%arg0: i32) -> (i32, i32) {
    %c0_i32 = arith.constant 0 : i32
    %c0_i32_0 = arith.constant 0 : i32
    %c0_i32_1 = arith.constant 0 : i32
    return %c0_i32, %c0_i32_0 : i32, i32
  }
  func.func @transform_1(%arg0: i32) -> (i32, i32) {
    %c0_i32 = arith.constant 0 : i32
    %c0_i32_0 = arith.constant 0 : i32
    return %c0_i32, %arg0 : i32, i32
  }
  func.func @transform_2(%arg0: i32) -> (i32, i32) {
    %c0_i32 = arith.constant 0 : i32
    %c0_i32_0 = arith.constant 0 : i32
    %c0_i32_1 = arith.constant 0 : i32
    return %c0_i32, %c0_i32_0 : i32, i32
  }
  func.func @transform_3(%arg0: i32) -> (i32, i32) {
    %c0_i32 = arith.constant 0 : i32
    %c0_i32_0 = arith.constant 0 : i32
    return %c0_i32, %arg0 : i32, i32
  }
}

module attributes {stable_mosaic.version = 11 : i64} {
  func.func @_avgpool2_kernel(%arg0: i32, %arg1: memref<1x6x224x224xbf16, #tpu.memory_space<vmem>>, %arg2: memref<112x224xbf16, #tpu.memory_space<vmem>>, %arg3: memref<224x112xbf16, #tpu.memory_space<vmem>>, %arg4: memref<1x6x112x112xbf16, #tpu.memory_space<vmem>>) attributes {dimension_semantics = [#tpu.dimension_semantics<parallel>], iteration_bounds = array<i64: 2>, scalar_prefetch = 0 : i64, scratch_operands = 0 : i64, tpu.core_type = #tpu.core_type<tc>, window_params = [{transform_indices = @transform_0, window_bounds = array<i64: 1, 6, 224, 224>}, {pipeline_mode = #tpu.pipeline_mode<synchronous>, transform_indices = @transform_1, window_bounds = array<i64: 112, 224>}, {pipeline_mode = #tpu.pipeline_mode<synchronous>, transform_indices = @transform_2, window_bounds = array<i64: 224, 112>}, {transform_indices = @transform_3, window_bounds = array<i64: 1, 6, 112, 112>}]} {
    %c0 = arith.constant 0 : index
    %c0_0 = arith.constant 0 : index
    %0 = vector.load %arg2[%c0, %c0_0] : memref<112x224xbf16, #tpu.memory_space<vmem>>, vector<112x224xbf16>
    %c0_1 = arith.constant 0 : index
    %c0_2 = arith.constant 0 : index
    %c0_3 = arith.constant 0 : index
    %c0_4 = arith.constant 0 : index
    %1 = vector.load %arg1[%c0_1, %c0_2, %c0_3, %c0_4] : memref<1x6x224x224xbf16, #tpu.memory_space<vmem>>, vector<1x1x224x224xbf16>
    %2 = vector.shape_cast %1 : vector<1x1x224x224xbf16> to vector<224x224xbf16>
    %cst = arith.constant dense<0.000000e+00> : vector<112x224xf32>
    %3 = tpu.matmul %0, %2, %cst {dimension_numbers = #tpu.dot_dimension_numbers<[1], [0], [0], [1], [0, 0, 1, 1], [], []>} : vector<112x224xbf16>, vector<224x224xbf16>, vector<112x224xf32> -> vector<112x224xf32>
    %4 = arith.truncf %3 : vector<112x224xf32> to vector<112x224xbf16>
    %c0_5 = arith.constant 0 : index
    %c0_6 = arith.constant 0 : index
    %5 = vector.load %arg3[%c0_5, %c0_6] : memref<224x112xbf16, #tpu.memory_space<vmem>>, vector<224x112xbf16>
    %cst_7 = arith.constant dense<0.000000e+00> : vector<112x112xf32>
    %6 = tpu.matmul %4, %5, %cst_7 {dimension_numbers = #tpu.dot_dimension_numbers<[1], [0], [0], [1], [0, 0, 1, 1], [], []>} : vector<112x224xbf16>, vector<224x112xbf16>, vector<112x112xf32> -> vector<112x112xf32>
    %7 = arith.truncf %6 : vector<112x112xf32> to vector<112x112xbf16>
    %c0_8 = arith.constant 0 : index
    %c0_9 = arith.constant 0 : index
    %c0_10 = arith.constant 0 : index
    %c0_11 = arith.constant 0 : index
    %8 = vector.load %arg4[%c0_8, %c0_9, %c0_10, %c0_11] : memref<1x6x112x112xbf16, #tpu.memory_space<vmem>>, vector<1x1x112x112xbf16>
    %9 = vector.shape_cast %8 : vector<1x1x112x112xbf16> to vector<112x112xbf16>
    %10 = vector.shape_cast %7 : vector<112x112xbf16> to vector<1x1x112x112xbf16>
    tpu.vector_store %arg4[%c0_8, %c0_9, %c0_10, %c0_11], %10 {strides = array<i32>} : memref<1x6x112x112xbf16, #tpu.memory_space<vmem>>, vector<1x1x112x112xbf16>,
    %c0_12 = arith.constant 0 : index
    %c0_13 = arith.constant 0 : index
    %11 = vector.load %arg2[%c0_12, %c0_13] : memref<112x224xbf16, #tpu.memory_space<vmem>>, vector<112x224xbf16>
    %c0_14 = arith.constant 0 : index
    %c1 = arith.constant 1 : index
    %c0_15 = arith.constant 0 : index
    %c0_16 = arith.constant 0 : index
    %12 = vector.load %arg1[%c0_14, %c1, %c0_15, %c0_16] : memref<1x6x224x224xbf16, #tpu.memory_space<vmem>>, vector<1x1x224x224xbf16>
    %13 = vector.shape_cast %12 : vector<1x1x224x224xbf16> to vector<224x224xbf16>
    %cst_17 = arith.constant dense<0.000000e+00> : vector<112x224xf32>
    %14 = tpu.matmul %11, %13, %cst_17 {dimension_numbers = #tpu.dot_dimension_numbers<[1], [0], [0], [1], [0, 0, 1, 1], [], []>} : vector<112x224xbf16>, vector<224x224xbf16>, vector<112x224xf32> -> vector<112x224xf32>
    %15 = arith.truncf %14 : vector<112x224xf32> to vector<112x224xbf16>
    %c0_18 = arith.constant 0 : index
    %c0_19 = arith.constant 0 : index
    %16 = vector.load %arg3[%c0_18, %c0_19] : memref<224x112xbf16, #tpu.memory_space<vmem>>, vector<224x112xbf16>
    %cst_20 = arith.constant dense<0.000000e+00> : vector<112x112xf32>
    %17 = tpu.matmul %15, %16, %cst_20 {dimension_numbers = #tpu.dot_dimension_numbers<[1], [0], [0], [1], [0, 0, 1, 1], [], []>} : vector<112x224xbf16>, vector<224x112xbf16>, vector<112x112xf32> -> vector<112x112xf32>
    %18 = arith.truncf %17 : vector<112x112xf32> to vector<112x112xbf16>
    %c0_21 = arith.constant 0 : index
    %c1_22 = arith.constant 1 : index
    %c0_23 = arith.constant 0 : index
    %c0_24 = arith.constant 0 : index
    %19 = vector.load %arg4[%c0_21, %c1_22, %c0_23, %c0_24] : memref<1x6x112x112xbf16, #tpu.memory_space<vmem>>, vector<1x1x112x112xbf16>
    %20 = vector.shape_cast %19 : vector<1x1x112x112xbf16> to vector<112x112xbf16>
    %21 = vector.shape_cast %18 : vector<112x112xbf16> to vector<1x1x112x112xbf16>
    tpu.vector_store %arg4[%c0_21, %c1_22, %c0_23, %c0_24], %21 {strides = array<i32>} : memref<1x6x112x112xbf16, #tpu.memory_space<vmem>>, vector<1x1x112x112xbf16>,
    %c0_25 = arith.constant 0 : index
    %c0_26 = arith.constant 0 : index
    %22 = vector.load %arg2[%c0_25, %c0_26] : memref<112x224xbf16, #tpu.memory_space<vmem>>, vector<112x224xbf16>
    %c0_27 = arith.constant 0 : index
    %c2 = arith.constant 2 : index
    %c0_28 = arith.constant 0 : index
    %c0_29 = arith.constant 0 : index
    %23 = vector.load %arg1[%c0_27, %c2, %c0_28, %c0_29] : memref<1x6x224x224xbf16, #tpu.memory_space<vmem>>, vector<1x1x224x224xbf16>
    %24 = vector.shape_cast %23 : vector<1x1x224x224xbf16> to vector<224x224xbf16>
    %cst_30 = arith.constant dense<0.000000e+00> : vector<112x224xf32>
    %25 = tpu.matmul %22, %24, %cst_30 {dimension_numbers = #tpu.dot_dimension_numbers<[1], [0], [0], [1], [0, 0, 1, 1], [], []>} : vector<112x224xbf16>, vector<224x224xbf16>, vector<112x224xf32> -> vector<112x224xf32>
    %26 = arith.truncf %25 : vector<112x224xf32> to vector<112x224xbf16>
    %c0_31 = arith.constant 0 : index
    %c0_32 = arith.constant 0 : index
    %27 = vector.load %arg3[%c0_31, %c0_32] : memref<224x112xbf16, #tpu.memory_space<vmem>>, vector<224x112xbf16>
    %cst_33 = arith.constant dense<0.000000e+00> : vector<112x112xf32>
    %28 = tpu.matmul %26, %27, %cst_33 {dimension_numbers = #tpu.dot_dimension_numbers<[1], [0], [0], [1], [0, 0, 1, 1], [], []>} : vector<112x224xbf16>, vector<224x112xbf16>, vector<112x112xf32> -> vector<112x112xf32>
    %29 = arith.truncf %28 : vector<112x112xf32> to vector<112x112xbf16>
    %c0_34 = arith.constant 0 : index
    %c2_35 = arith.constant 2 : index
    %c0_36 = arith.constant 0 : index
    %c0_37 = arith.constant 0 : index
    %30 = vector.load %arg4[%c0_34, %c2_35, %c0_36, %c0_37] : memref<1x6x112x112xbf16, #tpu.memory_space<vmem>>, vector<1x1x112x112xbf16>
    %31 = vector.shape_cast %30 : vector<1x1x112x112xbf16> to vector<112x112xbf16>
    %32 = vector.shape_cast %29 : vector<112x112xbf16> to vector<1x1x112x112xbf16>
    tpu.vector_store %arg4[%c0_34, %c2_35, %c0_36, %c0_37], %32 {strides = array<i32>} : memref<1x6x112x112xbf16, #tpu.memory_space<vmem>>, vector<1x1x112x112xbf16>,
    %c0_38 = arith.constant 0 : index
    %c0_39 = arith.constant 0 : index
    %33 = vector.load %arg2[%c0_38, %c0_39] : memref<112x224xbf16, #tpu.memory_space<vmem>>, vector<112x224xbf16>
    %c0_40 = arith.constant 0 : index
    %c3 = arith.constant 3 : index
    %c0_41 = arith.constant 0 : index
    %c0_42 = arith.constant 0 : index
    %34 = vector.load %arg1[%c0_40, %c3, %c0_41, %c0_42] : memref<1x6x224x224xbf16, #tpu.memory_space<vmem>>, vector<1x1x224x224xbf16>
    %35 = vector.shape_cast %34 : vector<1x1x224x224xbf16> to vector<224x224xbf16>
    %cst_43 = arith.constant dense<0.000000e+00> : vector<112x224xf32>
    %36 = tpu.matmul %33, %35, %cst_43 {dimension_numbers = #tpu.dot_dimension_numbers<[1], [0], [0], [1], [0, 0, 1, 1], [], []>} : vector<112x224xbf16>, vector<224x224xbf16>, vector<112x224xf32> -> vector<112x224xf32>
    %37 = arith.truncf %36 : vector<112x224xf32> to vector<112x224xbf16>
    %c0_44 = arith.constant 0 : index
    %c0_45 = arith.constant 0 : index
    %38 = vector.load %arg3[%c0_44, %c0_45] : memref<224x112xbf16, #tpu.memory_space<vmem>>, vector<224x112xbf16>
    %cst_46 = arith.constant dense<0.000000e+00> : vector<112x112xf32>
    %39 = tpu.matmul %37, %38, %cst_46 {dimension_numbers = #tpu.dot_dimension_numbers<[1], [0], [0], [1], [0, 0, 1, 1], [], []>} : vector<112x224xbf16>, vector<224x112xbf16>, vector<112x112xf32> -> vector<112x112xf32>
    %40 = arith.truncf %39 : vector<112x112xf32> to vector<112x112xbf16>
    %c0_47 = arith.constant 0 : index
    %c3_48 = arith.constant 3 : index
    %c0_49 = arith.constant 0 : index
    %c0_50 = arith.constant 0 : index
    %41 = vector.load %arg4[%c0_47, %c3_48, %c0_49, %c0_50] : memref<1x6x112x112xbf16, #tpu.memory_space<vmem>>, vector<1x1x112x112xbf16>
    %42 = vector.shape_cast %41 : vector<1x1x112x112xbf16> to vector<112x112xbf16>
    %43 = vector.shape_cast %40 : vector<112x112xbf16> to vector<1x1x112x112xbf16>
    tpu.vector_store %arg4[%c0_47, %c3_48, %c0_49, %c0_50], %43 {strides = array<i32>} : memref<1x6x112x112xbf16, #tpu.memory_space<vmem>>, vector<1x1x112x112xbf16>,
    %c0_51 = arith.constant 0 : index
    %c0_52 = arith.constant 0 : index
    %44 = vector.load %arg2[%c0_51, %c0_52] : memref<112x224xbf16, #tpu.memory_space<vmem>>, vector<112x224xbf16>
    %c0_53 = arith.constant 0 : index
    %c4 = arith.constant 4 : index
    %c0_54 = arith.constant 0 : index
    %c0_55 = arith.constant 0 : index
    %45 = vector.load %arg1[%c0_53, %c4, %c0_54, %c0_55] : memref<1x6x224x224xbf16, #tpu.memory_space<vmem>>, vector<1x1x224x224xbf16>
    %46 = vector.shape_cast %45 : vector<1x1x224x224xbf16> to vector<224x224xbf16>
    %cst_56 = arith.constant dense<0.000000e+00> : vector<112x224xf32>
    %47 = tpu.matmul %44, %46, %cst_56 {dimension_numbers = #tpu.dot_dimension_numbers<[1], [0], [0], [1], [0, 0, 1, 1], [], []>} : vector<112x224xbf16>, vector<224x224xbf16>, vector<112x224xf32> -> vector<112x224xf32>
    %48 = arith.truncf %47 : vector<112x224xf32> to vector<112x224xbf16>
    %c0_57 = arith.constant 0 : index
    %c0_58 = arith.constant 0 : index
    %49 = vector.load %arg3[%c0_57, %c0_58] : memref<224x112xbf16, #tpu.memory_space<vmem>>, vector<224x112xbf16>
    %cst_59 = arith.constant dense<0.000000e+00> : vector<112x112xf32>
    %50 = tpu.matmul %48, %49, %cst_59 {dimension_numbers = #tpu.dot_dimension_numbers<[1], [0], [0], [1], [0, 0, 1, 1], [], []>} : vector<112x224xbf16>, vector<224x112xbf16>, vector<112x112xf32> -> vector<112x112xf32>
    %51 = arith.truncf %50 : vector<112x112xf32> to vector<112x112xbf16>
    %c0_60 = arith.constant 0 : index
    %c4_61 = arith.constant 4 : index
    %c0_62 = arith.constant 0 : index
    %c0_63 = arith.constant 0 : index
    %52 = vector.load %arg4[%c0_60, %c4_61, %c0_62, %c0_63] : memref<1x6x112x112xbf16, #tpu.memory_space<vmem>>, vector<1x1x112x112xbf16>
    %53 = vector.shape_cast %52 : vector<1x1x112x112xbf16> to vector<112x112xbf16>
    %54 = vector.shape_cast %51 : vector<112x112xbf16> to vector<1x1x112x112xbf16>
    tpu.vector_store %arg4[%c0_60, %c4_61, %c0_62, %c0_63], %54 {strides = array<i32>} : memref<1x6x112x112xbf16, #tpu.memory_space<vmem>>, vector<1x1x112x112xbf16>,
    %c0_64 = arith.constant 0 : index
    %c0_65 = arith.constant 0 : index
    %55 = vector.load %arg2[%c0_64, %c0_65] : memref<112x224xbf16, #tpu.memory_space<vmem>>, vector<112x224xbf16>
    %c0_66 = arith.constant 0 : index
    %c5 = arith.constant 5 : index
    %c0_67 = arith.constant 0 : index
    %c0_68 = arith.constant 0 : index
    %56 = vector.load %arg1[%c0_66, %c5, %c0_67, %c0_68] : memref<1x6x224x224xbf16, #tpu.memory_space<vmem>>, vector<1x1x224x224xbf16>
    %57 = vector.shape_cast %56 : vector<1x1x224x224xbf16> to vector<224x224xbf16>
    %cst_69 = arith.constant dense<0.000000e+00> : vector<112x224xf32>
    %58 = tpu.matmul %55, %57, %cst_69 {dimension_numbers = #tpu.dot_dimension_numbers<[1], [0], [0], [1], [0, 0, 1, 1], [], []>} : vector<112x224xbf16>, vector<224x224xbf16>, vector<112x224xf32> -> vector<112x224xf32>
    %59 = arith.truncf %58 : vector<112x224xf32> to vector<112x224xbf16>
    %c0_70 = arith.constant 0 : index
    %c0_71 = arith.constant 0 : index
    %60 = vector.load %arg3[%c0_70, %c0_71] : memref<224x112xbf16, #tpu.memory_space<vmem>>, vector<224x112xbf16>
    %cst_72 = arith.constant dense<0.000000e+00> : vector<112x112xf32>
    %61 = tpu.matmul %59, %60, %cst_72 {dimension_numbers = #tpu.dot_dimension_numbers<[1], [0], [0], [1], [0, 0, 1, 1], [], []>} : vector<112x224xbf16>, vector<224x112xbf16>, vector<112x112xf32> -> vector<112x112xf32>
    %62 = arith.truncf %61 : vector<112x112xf32> to vector<112x112xbf16>
    %c0_73 = arith.constant 0 : index
    %c5_74 = arith.constant 5 : index
    %c0_75 = arith.constant 0 : index
    %c0_76 = arith.constant 0 : index
    %63 = vector.load %arg4[%c0_73, %c5_74, %c0_75, %c0_76] : memref<1x6x112x112xbf16, #tpu.memory_space<vmem>>, vector<1x1x112x112xbf16>
    %64 = vector.shape_cast %63 : vector<1x1x112x112xbf16> to vector<112x112xbf16>
    %65 = vector.shape_cast %62 : vector<112x112xbf16> to vector<1x1x112x112xbf16>
    tpu.vector_store %arg4[%c0_73, %c5_74, %c0_75, %c0_76], %65 {strides = array<i32>} : memref<1x6x112x112xbf16, #tpu.memory_space<vmem>>, vector<1x1x112x112xbf16>,
    return
  }
  func.func @transform_0(%arg0: i32) -> (i32, i32, i32, i32) {
    %c0_i32 = arith.constant 0 : i32
    %c0_i32_0 = arith.constant 0 : i32
    %c0_i32_1 = arith.constant 0 : i32
    %c0_i32_2 = arith.constant 0 : i32
    return %arg0, %c0_i32, %c0_i32_0, %c0_i32_1 : i32, i32, i32, i32
  }
  func.func @transform_1(%arg0: i32) -> (i32, i32) {
    %c0_i32 = arith.constant 0 : i32
    %c0_i32_0 = arith.constant 0 : i32
    %c0_i32_1 = arith.constant 0 : i32
    return %c0_i32, %c0_i32_0 : i32, i32
  }
  func.func @transform_2(%arg0: i32) -> (i32, i32) {
    %c0_i32 = arith.constant 0 : i32
    %c0_i32_0 = arith.constant 0 : i32
    %c0_i32_1 = arith.constant 0 : i32
    return %c0_i32, %c0_i32_0 : i32, i32
  }
  func.func @transform_3(%arg0: i32) -> (i32, i32, i32, i32) {
    %c0_i32 = arith.constant 0 : i32
    %c0_i32_0 = arith.constant 0 : i32
    %c0_i32_1 = arith.constant 0 : i32
    %c0_i32_2 = arith.constant 0 : i32
    return %arg0, %c0_i32, %c0_i32_0, %c0_i32_1 : i32, i32, i32, i32
  }
}

module attributes {stable_mosaic.version = 11 : i64} {
  func.func @_conv_mm_kernel(%arg0: i32, %arg1: memref<16x160xbf16, #tpu.memory_space<vmem>>, %arg2: memref<160x2048xbf16, #tpu.memory_space<vmem>>, %arg3: memref<16x1xf32, #tpu.memory_space<vmem>>, %arg4: memref<16x2048xbf16, #tpu.memory_space<vmem>>) attributes {dimension_semantics = [#tpu.dimension_semantics<parallel>], iteration_bounds = array<i64: 12>, scalar_prefetch = 0 : i64, scratch_operands = 0 : i64, tpu.core_type = #tpu.core_type<tc>, window_params = [{pipeline_mode = #tpu.pipeline_mode<synchronous>, transform_indices = @transform_0, window_bounds = array<i64: 16, 160>}, {transform_indices = @transform_1, window_bounds = array<i64: 160, 2048>}, {pipeline_mode = #tpu.pipeline_mode<synchronous>, transform_indices = @transform_2, window_bounds = array<i64: 16, 1>}, {transform_indices = @transform_3, window_bounds = array<i64: 16, 2048>}]} {
    %c0 = arith.constant 0 : index
    %c0_0 = arith.constant 0 : index
    %0 = vector.load %arg1[%c0, %c0_0] : memref<16x160xbf16, #tpu.memory_space<vmem>>, vector<16x160xbf16>
    %c0_1 = arith.constant 0 : index
    %c0_2 = arith.constant 0 : index
    %1 = vector.load %arg2[%c0_1, %c0_2] : memref<160x2048xbf16, #tpu.memory_space<vmem>>, vector<160x2048xbf16>
    %cst = arith.constant dense<0.000000e+00> : vector<16x2048xf32>
    %2 = tpu.matmul %0, %1, %cst {dimension_numbers = #tpu.dot_dimension_numbers<[1], [0], [0], [1], [0, 0, 1, 1], [], []>} : vector<16x160xbf16>, vector<160x2048xbf16>, vector<16x2048xf32> -> vector<16x2048xf32>
    %c0_3 = arith.constant 0 : index
    %c0_4 = arith.constant 0 : index
    %3 = vector.load %arg3[%c0_3, %c0_4] : memref<16x1xf32, #tpu.memory_space<vmem>>, vector<16x1xf32>
    %4 = vector.broadcast %3 : vector<16x1xf32> to vector<16x2048xf32>
    %5 = arith.addf %2, %4 : vector<16x2048xf32>
    %cst_5 = arith.constant 0.000000e+00 : f32
    %6 = vector.broadcast %cst_5 : f32 to vector<16x2048xf32>
    %7 = arith.maximumf %5, %6 : vector<16x2048xf32>
    %8 = arith.truncf %7 : vector<16x2048xf32> to vector<16x2048xbf16>
    %c0_6 = arith.constant 0 : index
    %c0_7 = arith.constant 0 : index
    %9 = vector.load %arg4[%c0_6, %c0_7] : memref<16x2048xbf16, #tpu.memory_space<vmem>>, vector<16x2048xbf16>
    tpu.vector_store %arg4[%c0_6, %c0_7], %8 {strides = array<i32>} : memref<16x2048xbf16, #tpu.memory_space<vmem>>, vector<16x2048xbf16>,
    return
  }
  func.func @transform_0(%arg0: i32) -> (i32, i32) {
    %c0_i32 = arith.constant 0 : i32
    %c0_i32_0 = arith.constant 0 : i32
    %c0_i32_1 = arith.constant 0 : i32
    return %c0_i32, %c0_i32_0 : i32, i32
  }
  func.func @transform_1(%arg0: i32) -> (i32, i32) {
    %c0_i32 = arith.constant 0 : i32
    %c0_i32_0 = arith.constant 0 : i32
    return %c0_i32, %arg0 : i32, i32
  }
  func.func @transform_2(%arg0: i32) -> (i32, i32) {
    %c0_i32 = arith.constant 0 : i32
    %c0_i32_0 = arith.constant 0 : i32
    %c0_i32_1 = arith.constant 0 : i32
    return %c0_i32, %c0_i32_0 : i32, i32
  }
  func.func @transform_3(%arg0: i32) -> (i32, i32) {
    %c0_i32 = arith.constant 0 : i32
    %c0_i32_0 = arith.constant 0 : i32
    return %c0_i32, %arg0 : i32, i32
  }
}

module attributes {stable_mosaic.version = 11 : i64} {
  func.func @_avgpool2_kernel(%arg0: i32, %arg1: memref<1x16x108x108xbf16, #tpu.memory_space<vmem>>, %arg2: memref<54x108xbf16, #tpu.memory_space<vmem>>, %arg3: memref<108x54xbf16, #tpu.memory_space<vmem>>, %arg4: memref<1x16x54x54xbf16, #tpu.memory_space<vmem>>) attributes {dimension_semantics = [#tpu.dimension_semantics<parallel>], iteration_bounds = array<i64: 2>, scalar_prefetch = 0 : i64, scratch_operands = 0 : i64, tpu.core_type = #tpu.core_type<tc>, window_params = [{transform_indices = @transform_0, window_bounds = array<i64: 1, 16, 108, 108>}, {pipeline_mode = #tpu.pipeline_mode<synchronous>, transform_indices = @transform_1, window_bounds = array<i64: 54, 108>}, {pipeline_mode = #tpu.pipeline_mode<synchronous>, transform_indices = @transform_2, window_bounds = array<i64: 108, 54>}, {transform_indices = @transform_3, window_bounds = array<i64: 1, 16, 54, 54>}]} {
    %c0 = arith.constant 0 : index
    %c0_0 = arith.constant 0 : index
    %0 = vector.load %arg2[%c0, %c0_0] : memref<54x108xbf16, #tpu.memory_space<vmem>>, vector<54x108xbf16>
    %c0_1 = arith.constant 0 : index
    %c0_2 = arith.constant 0 : index
    %c0_3 = arith.constant 0 : index
    %c0_4 = arith.constant 0 : index
    %1 = vector.load %arg1[%c0_1, %c0_2, %c0_3, %c0_4] : memref<1x16x108x108xbf16, #tpu.memory_space<vmem>>, vector<1x1x108x108xbf16>
    %2 = vector.shape_cast %1 : vector<1x1x108x108xbf16> to vector<108x108xbf16>
    %cst = arith.constant dense<0.000000e+00> : vector<54x108xf32>
    %3 = tpu.matmul %0, %2, %cst {dimension_numbers = #tpu.dot_dimension_numbers<[1], [0], [0], [1], [0, 0, 1, 1], [], []>} : vector<54x108xbf16>, vector<108x108xbf16>, vector<54x108xf32> -> vector<54x108xf32>
    %4 = arith.truncf %3 : vector<54x108xf32> to vector<54x108xbf16>
    %c0_5 = arith.constant 0 : index
    %c0_6 = arith.constant 0 : index
    %5 = vector.load %arg3[%c0_5, %c0_6] : memref<108x54xbf16, #tpu.memory_space<vmem>>, vector<108x54xbf16>
    %cst_7 = arith.constant dense<0.000000e+00> : vector<54x54xf32>
    %6 = tpu.matmul %4, %5, %cst_7 {dimension_numbers = #tpu.dot_dimension_numbers<[1], [0], [0], [1], [0, 0, 1, 1], [], []>} : vector<54x108xbf16>, vector<108x54xbf16>, vector<54x54xf32> -> vector<54x54xf32>
    %7 = arith.truncf %6 : vector<54x54xf32> to vector<54x54xbf16>
    %c0_8 = arith.constant 0 : index
    %c0_9 = arith.constant 0 : index
    %c0_10 = arith.constant 0 : index
    %c0_11 = arith.constant 0 : index
    %8 = vector.load %arg4[%c0_8, %c0_9, %c0_10, %c0_11] : memref<1x16x54x54xbf16, #tpu.memory_space<vmem>>, vector<1x1x54x54xbf16>
    %9 = vector.shape_cast %8 : vector<1x1x54x54xbf16> to vector<54x54xbf16>
    %10 = vector.shape_cast %7 : vector<54x54xbf16> to vector<1x1x54x54xbf16>
    tpu.vector_store %arg4[%c0_8, %c0_9, %c0_10, %c0_11], %10 {strides = array<i32>} : memref<1x16x54x54xbf16, #tpu.memory_space<vmem>>, vector<1x1x54x54xbf16>,
    %c0_12 = arith.constant 0 : index
    %c0_13 = arith.constant 0 : index
    %11 = vector.load %arg2[%c0_12, %c0_13] : memref<54x108xbf16, #tpu.memory_space<vmem>>, vector<54x108xbf16>
    %c0_14 = arith.constant 0 : index
    %c1 = arith.constant 1 : index
    %c0_15 = arith.constant 0 : index
    %c0_16 = arith.constant 0 : index
    %12 = vector.load %arg1[%c0_14, %c1, %c0_15, %c0_16] : memref<1x16x108x108xbf16, #tpu.memory_space<vmem>>, vector<1x1x108x108xbf16>
    %13 = vector.shape_cast %12 : vector<1x1x108x108xbf16> to vector<108x108xbf16>
    %cst_17 = arith.constant dense<0.000000e+00> : vector<54x108xf32>
    %14 = tpu.matmul %11, %13, %cst_17 {dimension_numbers = #tpu.dot_dimension_numbers<[1], [0], [0], [1], [0, 0, 1, 1], [], []>} : vector<54x108xbf16>, vector<108x108xbf16>, vector<54x108xf32> -> vector<54x108xf32>
    %15 = arith.truncf %14 : vector<54x108xf32> to vector<54x108xbf16>
    %c0_18 = arith.constant 0 : index
    %c0_19 = arith.constant 0 : index
    %16 = vector.load %arg3[%c0_18, %c0_19] : memref<108x54xbf16, #tpu.memory_space<vmem>>, vector<108x54xbf16>
    %cst_20 = arith.constant dense<0.000000e+00> : vector<54x54xf32>
    %17 = tpu.matmul %15, %16, %cst_20 {dimension_numbers = #tpu.dot_dimension_numbers<[1], [0], [0], [1], [0, 0, 1, 1], [], []>} : vector<54x108xbf16>, vector<108x54xbf16>, vector<54x54xf32> -> vector<54x54xf32>
    %18 = arith.truncf %17 : vector<54x54xf32> to vector<54x54xbf16>
    %c0_21 = arith.constant 0 : index
    %c1_22 = arith.constant 1 : index
    %c0_23 = arith.constant 0 : index
    %c0_24 = arith.constant 0 : index
    %19 = vector.load %arg4[%c0_21, %c1_22, %c0_23, %c0_24] : memref<1x16x54x54xbf16, #tpu.memory_space<vmem>>, vector<1x1x54x54xbf16>
    %20 = vector.shape_cast %19 : vector<1x1x54x54xbf16> to vector<54x54xbf16>
    %21 = vector.shape_cast %18 : vector<54x54xbf16> to vector<1x1x54x54xbf16>
    tpu.vector_store %arg4[%c0_21, %c1_22, %c0_23, %c0_24], %21 {strides = array<i32>} : memref<1x16x54x54xbf16, #tpu.memory_space<vmem>>, vector<1x1x54x54xbf16>,
    %c0_25 = arith.constant 0 : index
    %c0_26 = arith.constant 0 : index
    %22 = vector.load %arg2[%c0_25, %c0_26] : memref<54x108xbf16, #tpu.memory_space<vmem>>, vector<54x108xbf16>
    %c0_27 = arith.constant 0 : index
    %c2 = arith.constant 2 : index
    %c0_28 = arith.constant 0 : index
    %c0_29 = arith.constant 0 : index
    %23 = vector.load %arg1[%c0_27, %c2, %c0_28, %c0_29] : memref<1x16x108x108xbf16, #tpu.memory_space<vmem>>, vector<1x1x108x108xbf16>
    %24 = vector.shape_cast %23 : vector<1x1x108x108xbf16> to vector<108x108xbf16>
    %cst_30 = arith.constant dense<0.000000e+00> : vector<54x108xf32>
    %25 = tpu.matmul %22, %24, %cst_30 {dimension_numbers = #tpu.dot_dimension_numbers<[1], [0], [0], [1], [0, 0, 1, 1], [], []>} : vector<54x108xbf16>, vector<108x108xbf16>, vector<54x108xf32> -> vector<54x108xf32>
    %26 = arith.truncf %25 : vector<54x108xf32> to vector<54x108xbf16>
    %c0_31 = arith.constant 0 : index
    %c0_32 = arith.constant 0 : index
    %27 = vector.load %arg3[%c0_31, %c0_32] : memref<108x54xbf16, #tpu.memory_space<vmem>>, vector<108x54xbf16>
    %cst_33 = arith.constant dense<0.000000e+00> : vector<54x54xf32>
    %28 = tpu.matmul %26, %27, %cst_33 {dimension_numbers = #tpu.dot_dimension_numbers<[1], [0], [0], [1], [0, 0, 1, 1], [], []>} : vector<54x108xbf16>, vector<108x54xbf16>, vector<54x54xf32> -> vector<54x54xf32>
    %29 = arith.truncf %28 : vector<54x54xf32> to vector<54x54xbf16>
    %c0_34 = arith.constant 0 : index
    %c2_35 = arith.constant 2 : index
    %c0_36 = arith.constant 0 : index
    %c0_37 = arith.constant 0 : index
    %30 = vector.load %arg4[%c0_34, %c2_35, %c0_36, %c0_37] : memref<1x16x54x54xbf16, #tpu.memory_space<vmem>>, vector<1x1x54x54xbf16>
    %31 = vector.shape_cast %30 : vector<1x1x54x54xbf16> to vector<54x54xbf16>
    %32 = vector.shape_cast %29 : vector<54x54xbf16> to vector<1x1x54x54xbf16>
    tpu.vector_store %arg4[%c0_34, %c2_35, %c0_36, %c0_37], %32 {strides = array<i32>} : memref<1x16x54x54xbf16, #tpu.memory_space<vmem>>, vector<1x1x54x54xbf16>,
    %c0_38 = arith.constant 0 : index
    %c0_39 = arith.constant 0 : index
    %33 = vector.load %arg2[%c0_38, %c0_39] : memref<54x108xbf16, #tpu.memory_space<vmem>>, vector<54x108xbf16>
    %c0_40 = arith.constant 0 : index
    %c3 = arith.constant 3 : index
    %c0_41 = arith.constant 0 : index
    %c0_42 = arith.constant 0 : index
    %34 = vector.load %arg1[%c0_40, %c3, %c0_41, %c0_42] : memref<1x16x108x108xbf16, #tpu.memory_space<vmem>>, vector<1x1x108x108xbf16>
    %35 = vector.shape_cast %34 : vector<1x1x108x108xbf16> to vector<108x108xbf16>
    %cst_43 = arith.constant dense<0.000000e+00> : vector<54x108xf32>
    %36 = tpu.matmul %33, %35, %cst_43 {dimension_numbers = #tpu.dot_dimension_numbers<[1], [0], [0], [1], [0, 0, 1, 1], [], []>} : vector<54x108xbf16>, vector<108x108xbf16>, vector<54x108xf32> -> vector<54x108xf32>
    %37 = arith.truncf %36 : vector<54x108xf32> to vector<54x108xbf16>
    %c0_44 = arith.constant 0 : index
    %c0_45 = arith.constant 0 : index
    %38 = vector.load %arg3[%c0_44, %c0_45] : memref<108x54xbf16, #tpu.memory_space<vmem>>, vector<108x54xbf16>
    %cst_46 = arith.constant dense<0.000000e+00> : vector<54x54xf32>
    %39 = tpu.matmul %37, %38, %cst_46 {dimension_numbers = #tpu.dot_dimension_numbers<[1], [0], [0], [1], [0, 0, 1, 1], [], []>} : vector<54x108xbf16>, vector<108x54xbf16>, vector<54x54xf32> -> vector<54x54xf32>
    %40 = arith.truncf %39 : vector<54x54xf32> to vector<54x54xbf16>
    %c0_47 = arith.constant 0 : index
    %c3_48 = arith.constant 3 : index
    %c0_49 = arith.constant 0 : index
    %c0_50 = arith.constant 0 : index
    %41 = vector.load %arg4[%c0_47, %c3_48, %c0_49, %c0_50] : memref<1x16x54x54xbf16, #tpu.memory_space<vmem>>, vector<1x1x54x54xbf16>
    %42 = vector.shape_cast %41 : vector<1x1x54x54xbf16> to vector<54x54xbf16>
    %43 = vector.shape_cast %40 : vector<54x54xbf16> to vector<1x1x54x54xbf16>
    tpu.vector_store %arg4[%c0_47, %c3_48, %c0_49, %c0_50], %43 {strides = array<i32>} : memref<1x16x54x54xbf16, #tpu.memory_space<vmem>>, vector<1x1x54x54xbf16>,
    %c0_51 = arith.constant 0 : index
    %c0_52 = arith.constant 0 : index
    %44 = vector.load %arg2[%c0_51, %c0_52] : memref<54x108xbf16, #tpu.memory_space<vmem>>, vector<54x108xbf16>
    %c0_53 = arith.constant 0 : index
    %c4 = arith.constant 4 : index
    %c0_54 = arith.constant 0 : index
    %c0_55 = arith.constant 0 : index
    %45 = vector.load %arg1[%c0_53, %c4, %c0_54, %c0_55] : memref<1x16x108x108xbf16, #tpu.memory_space<vmem>>, vector<1x1x108x108xbf16>
    %46 = vector.shape_cast %45 : vector<1x1x108x108xbf16> to vector<108x108xbf16>
    %cst_56 = arith.constant dense<0.000000e+00> : vector<54x108xf32>
    %47 = tpu.matmul %44, %46, %cst_56 {dimension_numbers = #tpu.dot_dimension_numbers<[1], [0], [0], [1], [0, 0, 1, 1], [], []>} : vector<54x108xbf16>, vector<108x108xbf16>, vector<54x108xf32> -> vector<54x108xf32>
    %48 = arith.truncf %47 : vector<54x108xf32> to vector<54x108xbf16>
    %c0_57 = arith.constant 0 : index
    %c0_58 = arith.constant 0 : index
    %49 = vector.load %arg3[%c0_57, %c0_58] : memref<108x54xbf16, #tpu.memory_space<vmem>>, vector<108x54xbf16>
    %cst_59 = arith.constant dense<0.000000e+00> : vector<54x54xf32>
    %50 = tpu.matmul %48, %49, %cst_59 {dimension_numbers = #tpu.dot_dimension_numbers<[1], [0], [0], [1], [0, 0, 1, 1], [], []>} : vector<54x108xbf16>, vector<108x54xbf16>, vector<54x54xf32> -> vector<54x54xf32>
    %51 = arith.truncf %50 : vector<54x54xf32> to vector<54x54xbf16>
    %c0_60 = arith.constant 0 : index
    %c4_61 = arith.constant 4 : index
    %c0_62 = arith.constant 0 : index
    %c0_63 = arith.constant 0 : index
    %52 = vector.load %arg4[%c0_60, %c4_61, %c0_62, %c0_63] : memref<1x16x54x54xbf16, #tpu.memory_space<vmem>>, vector<1x1x54x54xbf16>
    %53 = vector.shape_cast %52 : vector<1x1x54x54xbf16> to vector<54x54xbf16>
    %54 = vector.shape_cast %51 : vector<54x54xbf16> to vector<1x1x54x54xbf16>
    tpu.vector_store %arg4[%c0_60, %c4_61, %c0_62, %c0_63], %54 {strides = array<i32>} : memref<1x16x54x54xbf16, #tpu.memory_space<vmem>>, vector<1x1x54x54xbf16>,
    %c0_64 = arith.constant 0 : index
    %c0_65 = arith.constant 0 : index
    %55 = vector.load %arg2[%c0_64, %c0_65] : memref<54x108xbf16, #tpu.memory_space<vmem>>, vector<54x108xbf16>
    %c0_66 = arith.constant 0 : index
    %c5 = arith.constant 5 : index
    %c0_67 = arith.constant 0 : index
    %c0_68 = arith.constant 0 : index
    %56 = vector.load %arg1[%c0_66, %c5, %c0_67, %c0_68] : memref<1x16x108x108xbf16, #tpu.memory_space<vmem>>, vector<1x1x108x108xbf16>
    %57 = vector.shape_cast %56 : vector<1x1x108x108xbf16> to vector<108x108xbf16>
    %cst_69 = arith.constant dense<0.000000e+00> : vector<54x108xf32>
    %58 = tpu.matmul %55, %57, %cst_69 {dimension_numbers = #tpu.dot_dimension_numbers<[1], [0], [0], [1], [0, 0, 1, 1], [], []>} : vector<54x108xbf16>, vector<108x108xbf16>, vector<54x108xf32> -> vector<54x108xf32>
    %59 = arith.truncf %58 : vector<54x108xf32> to vector<54x108xbf16>
    %c0_70 = arith.constant 0 : index
    %c0_71 = arith.constant 0 : index
    %60 = vector.load %arg3[%c0_70, %c0_71] : memref<108x54xbf16, #tpu.memory_space<vmem>>, vector<108x54xbf16>
    %cst_72 = arith.constant dense<0.000000e+00> : vector<54x54xf32>
    %61 = tpu.matmul %59, %60, %cst_72 {dimension_numbers = #tpu.dot_dimension_numbers<[1], [0], [0], [1], [0, 0, 1, 1], [], []>} : vector<54x108xbf16>, vector<108x54xbf16>, vector<54x54xf32> -> vector<54x54xf32>
    %62 = arith.truncf %61 : vector<54x54xf32> to vector<54x54xbf16>
    %c0_73 = arith.constant 0 : index
    %c5_74 = arith.constant 5 : index
    %c0_75 = arith.constant 0 : index
    %c0_76 = arith.constant 0 : index
    %63 = vector.load %arg4[%c0_73, %c5_74, %c0_75, %c0_76] : memref<1x16x54x54xbf16, #tpu.memory_space<vmem>>, vector<1x1x54x54xbf16>
    %64 = vector.shape_cast %63 : vector<1x1x54x54xbf16> to vector<54x54xbf16>
    %65 = vector.shape_cast %62 : vector<54x54xbf16> to vector<1x1x54x54xbf16>
    tpu.vector_store %arg4[%c0_73, %c5_74, %c0_75, %c0_76], %65 {strides = array<i32>} : memref<1x16x54x54xbf16, #tpu.memory_space<vmem>>, vector<1x1x54x54xbf16>,
    %c0_77 = arith.constant 0 : index
    %c0_78 = arith.constant 0 : index
    %66 = vector.load %arg2[%c0_77, %c0_78] : memref<54x108xbf16, #tpu.memory_space<vmem>>, vector<54x108xbf16>
    %c0_79 = arith.constant 0 : index
    %c6 = arith.constant 6 : index
    %c0_80 = arith.constant 0 : index
    %c0_81 = arith.constant 0 : index
    %67 = vector.load %arg1[%c0_79, %c6, %c0_80, %c0_81] : memref<1x16x108x108xbf16, #tpu.memory_space<vmem>>, vector<1x1x108x108xbf16>
    %68 = vector.shape_cast %67 : vector<1x1x108x108xbf16> to vector<108x108xbf16>
    %cst_82 = arith.constant dense<0.000000e+00> : vector<54x108xf32>
    %69 = tpu.matmul %66, %68, %cst_82 {dimension_numbers = #tpu.dot_dimension_numbers<[1], [0], [0], [1], [0, 0, 1, 1], [], []>} : vector<54x108xbf16>, vector<108x108xbf16>, vector<54x108xf32> -> vector<54x108xf32>
    %70 = arith.truncf %69 : vector<54x108xf32> to vector<54x108xbf16>
    %c0_83 = arith.constant 0 : index
    %c0_84 = arith.constant 0 : index
    %71 = vector.load %arg3[%c0_83, %c0_84] : memref<108x54xbf16, #tpu.memory_space<vmem>>, vector<108x54xbf16>
    %cst_85 = arith.constant dense<0.000000e+00> : vector<54x54xf32>
    %72 = tpu.matmul %70, %71, %cst_85 {dimension_numbers = #tpu.dot_dimension_numbers<[1], [0], [0], [1], [0, 0, 1, 1], [], []>} : vector<54x108xbf16>, vector<108x54xbf16>, vector<54x54xf32> -> vector<54x54xf32>
    %73 = arith.truncf %72 : vector<54x54xf32> to vector<54x54xbf16>
    %c0_86 = arith.constant 0 : index
    %c6_87 = arith.constant 6 : index
    %c0_88 = arith.constant 0 : index
    %c0_89 = arith.constant 0 : index
    %74 = vector.load %arg4[%c0_86, %c6_87, %c0_88, %c0_89] : memref<1x16x54x54xbf16, #tpu.memory_space<vmem>>, vector<1x1x54x54xbf16>
    %75 = vector.shape_cast %74 : vector<1x1x54x54xbf16> to vector<54x54xbf16>
    %76 = vector.shape_cast %73 : vector<54x54xbf16> to vector<1x1x54x54xbf16>
    tpu.vector_store %arg4[%c0_86, %c6_87, %c0_88, %c0_89], %76 {strides = array<i32>} : memref<1x16x54x54xbf16, #tpu.memory_space<vmem>>, vector<1x1x54x54xbf16>,
    %c0_90 = arith.constant 0 : index
    %c0_91 = arith.constant 0 : index
    %77 = vector.load %arg2[%c0_90, %c0_91] : memref<54x108xbf16, #tpu.memory_space<vmem>>, vector<54x108xbf16>
    %c0_92 = arith.constant 0 : index
    %c7 = arith.constant 7 : index
    %c0_93 = arith.constant 0 : index
    %c0_94 = arith.constant 0 : index
    %78 = vector.load %arg1[%c0_92, %c7, %c0_93, %c0_94] : memref<1x16x108x108xbf16, #tpu.memory_space<vmem>>, vector<1x1x108x108xbf16>
    %79 = vector.shape_cast %78 : vector<1x1x108x108xbf16> to vector<108x108xbf16>
    %cst_95 = arith.constant dense<0.000000e+00> : vector<54x108xf32>
    %80 = tpu.matmul %77, %79, %cst_95 {dimension_numbers = #tpu.dot_dimension_numbers<[1], [0], [0], [1], [0, 0, 1, 1], [], []>} : vector<54x108xbf16>, vector<108x108xbf16>, vector<54x108xf32> -> vector<54x108xf32>
    %81 = arith.truncf %80 : vector<54x108xf32> to vector<54x108xbf16>
    %c0_96 = arith.constant 0 : index
    %c0_97 = arith.constant 0 : index
    %82 = vector.load %arg3[%c0_96, %c0_97] : memref<108x54xbf16, #tpu.memory_space<vmem>>, vector<108x54xbf16>
    %cst_98 = arith.constant dense<0.000000e+00> : vector<54x54xf32>
    %83 = tpu.matmul %81, %82, %cst_98 {dimension_numbers = #tpu.dot_dimension_numbers<[1], [0], [0], [1], [0, 0, 1, 1], [], []>} : vector<54x108xbf16>, vector<108x54xbf16>, vector<54x54xf32> -> vector<54x54xf32>
    %84 = arith.truncf %83 : vector<54x54xf32> to vector<54x54xbf16>
    %c0_99 = arith.constant 0 : index
    %c7_100 = arith.constant 7 : index
    %c0_101 = arith.constant 0 : index
    %c0_102 = arith.constant 0 : index
    %85 = vector.load %arg4[%c0_99, %c7_100, %c0_101, %c0_102] : memref<1x16x54x54xbf16, #tpu.memory_space<vmem>>, vector<1x1x54x54xbf16>
    %86 = vector.shape_cast %85 : vector<1x1x54x54xbf16> to vector<54x54xbf16>
    %87 = vector.shape_cast %84 : vector<54x54xbf16> to vector<1x1x54x54xbf16>
    tpu.vector_store %arg4[%c0_99, %c7_100, %c0_101, %c0_102], %87 {strides = array<i32>} : memref<1x16x54x54xbf16, #tpu.memory_space<vmem>>, vector<1x1x54x54xbf16>,
    %c0_103 = arith.constant 0 : index
    %c0_104 = arith.constant 0 : index
    %88 = vector.load %arg2[%c0_103, %c0_104] : memref<54x108xbf16, #tpu.memory_space<vmem>>, vector<54x108xbf16>
    %c0_105 = arith.constant 0 : index
    %c8 = arith.constant 8 : index
    %c0_106 = arith.constant 0 : index
    %c0_107 = arith.constant 0 : index
    %89 = vector.load %arg1[%c0_105, %c8, %c0_106, %c0_107] : memref<1x16x108x108xbf16, #tpu.memory_space<vmem>>, vector<1x1x108x108xbf16>
    %90 = vector.shape_cast %89 : vector<1x1x108x108xbf16> to vector<108x108xbf16>
    %cst_108 = arith.constant dense<0.000000e+00> : vector<54x108xf32>
    %91 = tpu.matmul %88, %90, %cst_108 {dimension_numbers = #tpu.dot_dimension_numbers<[1], [0], [0], [1], [0, 0, 1, 1], [], []>} : vector<54x108xbf16>, vector<108x108xbf16>, vector<54x108xf32> -> vector<54x108xf32>
    %92 = arith.truncf %91 : vector<54x108xf32> to vector<54x108xbf16>
    %c0_109 = arith.constant 0 : index
    %c0_110 = arith.constant 0 : index
    %93 = vector.load %arg3[%c0_109, %c0_110] : memref<108x54xbf16, #tpu.memory_space<vmem>>, vector<108x54xbf16>
    %cst_111 = arith.constant dense<0.000000e+00> : vector<54x54xf32>
    %94 = tpu.matmul %92, %93, %cst_111 {dimension_numbers = #tpu.dot_dimension_numbers<[1], [0], [0], [1], [0, 0, 1, 1], [], []>} : vector<54x108xbf16>, vector<108x54xbf16>, vector<54x54xf32> -> vector<54x54xf32>
    %95 = arith.truncf %94 : vector<54x54xf32> to vector<54x54xbf16>
    %c0_112 = arith.constant 0 : index
    %c8_113 = arith.constant 8 : index
    %c0_114 = arith.constant 0 : index
    %c0_115 = arith.constant 0 : index
    %96 = vector.load %arg4[%c0_112, %c8_113, %c0_114, %c0_115] : memref<1x16x54x54xbf16, #tpu.memory_space<vmem>>, vector<1x1x54x54xbf16>
    %97 = vector.shape_cast %96 : vector<1x1x54x54xbf16> to vector<54x54xbf16>
    %98 = vector.shape_cast %95 : vector<54x54xbf16> to vector<1x1x54x54xbf16>
    tpu.vector_store %arg4[%c0_112, %c8_113, %c0_114, %c0_115], %98 {strides = array<i32>} : memref<1x16x54x54xbf16, #tpu.memory_space<vmem>>, vector<1x1x54x54xbf16>,
    %c0_116 = arith.constant 0 : index
    %c0_117 = arith.constant 0 : index
    %99 = vector.load %arg2[%c0_116, %c0_117] : memref<54x108xbf16, #tpu.memory_space<vmem>>, vector<54x108xbf16>
    %c0_118 = arith.constant 0 : index
    %c9 = arith.constant 9 : index
    %c0_119 = arith.constant 0 : index
    %c0_120 = arith.constant 0 : index
    %100 = vector.load %arg1[%c0_118, %c9, %c0_119, %c0_120] : memref<1x16x108x108xbf16, #tpu.memory_space<vmem>>, vector<1x1x108x108xbf16>
    %101 = vector.shape_cast %100 : vector<1x1x108x108xbf16> to vector<108x108xbf16>
    %cst_121 = arith.constant dense<0.000000e+00> : vector<54x108xf32>
    %102 = tpu.matmul %99, %101, %cst_121 {dimension_numbers = #tpu.dot_dimension_numbers<[1], [0], [0], [1], [0, 0, 1, 1], [], []>} : vector<54x108xbf16>, vector<108x108xbf16>, vector<54x108xf32> -> vector<54x108xf32>
    %103 = arith.truncf %102 : vector<54x108xf32> to vector<54x108xbf16>
    %c0_122 = arith.constant 0 : index
    %c0_123 = arith.constant 0 : index
    %104 = vector.load %arg3[%c0_122, %c0_123] : memref<108x54xbf16, #tpu.memory_space<vmem>>, vector<108x54xbf16>
    %cst_124 = arith.constant dense<0.000000e+00> : vector<54x54xf32>
    %105 = tpu.matmul %103, %104, %cst_124 {dimension_numbers = #tpu.dot_dimension_numbers<[1], [0], [0], [1], [0, 0, 1, 1], [], []>} : vector<54x108xbf16>, vector<108x54xbf16>, vector<54x54xf32> -> vector<54x54xf32>
    %106 = arith.truncf %105 : vector<54x54xf32> to vector<54x54xbf16>
    %c0_125 = arith.constant 0 : index
    %c9_126 = arith.constant 9 : index
    %c0_127 = arith.constant 0 : index
    %c0_128 = arith.constant 0 : index
    %107 = vector.load %arg4[%c0_125, %c9_126, %c0_127, %c0_128] : memref<1x16x54x54xbf16, #tpu.memory_space<vmem>>, vector<1x1x54x54xbf16>
    %108 = vector.shape_cast %107 : vector<1x1x54x54xbf16> to vector<54x54xbf16>
    %109 = vector.shape_cast %106 : vector<54x54xbf16> to vector<1x1x54x54xbf16>
    tpu.vector_store %arg4[%c0_125, %c9_126, %c0_127, %c0_128], %109 {strides = array<i32>} : memref<1x16x54x54xbf16, #tpu.memory_space<vmem>>, vector<1x1x54x54xbf16>,
    %c0_129 = arith.constant 0 : index
    %c0_130 = arith.constant 0 : index
    %110 = vector.load %arg2[%c0_129, %c0_130] : memref<54x108xbf16, #tpu.memory_space<vmem>>, vector<54x108xbf16>
    %c0_131 = arith.constant 0 : index
    %c10 = arith.constant 10 : index
    %c0_132 = arith.constant 0 : index
    %c0_133 = arith.constant 0 : index
    %111 = vector.load %arg1[%c0_131, %c10, %c0_132, %c0_133] : memref<1x16x108x108xbf16, #tpu.memory_space<vmem>>, vector<1x1x108x108xbf16>
    %112 = vector.shape_cast %111 : vector<1x1x108x108xbf16> to vector<108x108xbf16>
    %cst_134 = arith.constant dense<0.000000e+00> : vector<54x108xf32>
    %113 = tpu.matmul %110, %112, %cst_134 {dimension_numbers = #tpu.dot_dimension_numbers<[1], [0], [0], [1], [0, 0, 1, 1], [], []>} : vector<54x108xbf16>, vector<108x108xbf16>, vector<54x108xf32> -> vector<54x108xf32>
    %114 = arith.truncf %113 : vector<54x108xf32> to vector<54x108xbf16>
    %c0_135 = arith.constant 0 : index
    %c0_136 = arith.constant 0 : index
    %115 = vector.load %arg3[%c0_135, %c0_136] : memref<108x54xbf16, #tpu.memory_space<vmem>>, vector<108x54xbf16>
    %cst_137 = arith.constant dense<0.000000e+00> : vector<54x54xf32>
    %116 = tpu.matmul %114, %115, %cst_137 {dimension_numbers = #tpu.dot_dimension_numbers<[1], [0], [0], [1], [0, 0, 1, 1], [], []>} : vector<54x108xbf16>, vector<108x54xbf16>, vector<54x54xf32> -> vector<54x54xf32>
    %117 = arith.truncf %116 : vector<54x54xf32> to vector<54x54xbf16>
    %c0_138 = arith.constant 0 : index
    %c10_139 = arith.constant 10 : index
    %c0_140 = arith.constant 0 : index
    %c0_141 = arith.constant 0 : index
    %118 = vector.load %arg4[%c0_138, %c10_139, %c0_140, %c0_141] : memref<1x16x54x54xbf16, #tpu.memory_space<vmem>>, vector<1x1x54x54xbf16>
    %119 = vector.shape_cast %118 : vector<1x1x54x54xbf16> to vector<54x54xbf16>
    %120 = vector.shape_cast %117 : vector<54x54xbf16> to vector<1x1x54x54xbf16>
    tpu.vector_store %arg4[%c0_138, %c10_139, %c0_140, %c0_141], %120 {strides = array<i32>} : memref<1x16x54x54xbf16, #tpu.memory_space<vmem>>, vector<1x1x54x54xbf16>,
    %c0_142 = arith.constant 0 : index
    %c0_143 = arith.constant 0 : index
    %121 = vector.load %arg2[%c0_142, %c0_143] : memref<54x108xbf16, #tpu.memory_space<vmem>>, vector<54x108xbf16>
    %c0_144 = arith.constant 0 : index
    %c11 = arith.constant 11 : index
    %c0_145 = arith.constant 0 : index
    %c0_146 = arith.constant 0 : index
    %122 = vector.load %arg1[%c0_144, %c11, %c0_145, %c0_146] : memref<1x16x108x108xbf16, #tpu.memory_space<vmem>>, vector<1x1x108x108xbf16>
    %123 = vector.shape_cast %122 : vector<1x1x108x108xbf16> to vector<108x108xbf16>
    %cst_147 = arith.constant dense<0.000000e+00> : vector<54x108xf32>
    %124 = tpu.matmul %121, %123, %cst_147 {dimension_numbers = #tpu.dot_dimension_numbers<[1], [0], [0], [1], [0, 0, 1, 1], [], []>} : vector<54x108xbf16>, vector<108x108xbf16>, vector<54x108xf32> -> vector<54x108xf32>
    %125 = arith.truncf %124 : vector<54x108xf32> to vector<54x108xbf16>
    %c0_148 = arith.constant 0 : index
    %c0_149 = arith.constant 0 : index
    %126 = vector.load %arg3[%c0_148, %c0_149] : memref<108x54xbf16, #tpu.memory_space<vmem>>, vector<108x54xbf16>
    %cst_150 = arith.constant dense<0.000000e+00> : vector<54x54xf32>
    %127 = tpu.matmul %125, %126, %cst_150 {dimension_numbers = #tpu.dot_dimension_numbers<[1], [0], [0], [1], [0, 0, 1, 1], [], []>} : vector<54x108xbf16>, vector<108x54xbf16>, vector<54x54xf32> -> vector<54x54xf32>
    %128 = arith.truncf %127 : vector<54x54xf32> to vector<54x54xbf16>
    %c0_151 = arith.constant 0 : index
    %c11_152 = arith.constant 11 : index
    %c0_153 = arith.constant 0 : index
    %c0_154 = arith.constant 0 : index
    %129 = vector.load %arg4[%c0_151, %c11_152, %c0_153, %c0_154] : memref<1x16x54x54xbf16, #tpu.memory_space<vmem>>, vector<1x1x54x54xbf16>
    %130 = vector.shape_cast %129 : vector<1x1x54x54xbf16> to vector<54x54xbf16>
    %131 = vector.shape_cast %128 : vector<54x54xbf16> to vector<1x1x54x54xbf16>
    tpu.vector_store %arg4[%c0_151, %c11_152, %c0_153, %c0_154], %131 {strides = array<i32>} : memref<1x16x54x54xbf16, #tpu.memory_space<vmem>>, vector<1x1x54x54xbf16>,
    %c0_155 = arith.constant 0 : index
    %c0_156 = arith.constant 0 : index
    %132 = vector.load %arg2[%c0_155, %c0_156] : memref<54x108xbf16, #tpu.memory_space<vmem>>, vector<54x108xbf16>
    %c0_157 = arith.constant 0 : index
    %c12 = arith.constant 12 : index
    %c0_158 = arith.constant 0 : index
    %c0_159 = arith.constant 0 : index
    %133 = vector.load %arg1[%c0_157, %c12, %c0_158, %c0_159] : memref<1x16x108x108xbf16, #tpu.memory_space<vmem>>, vector<1x1x108x108xbf16>
    %134 = vector.shape_cast %133 : vector<1x1x108x108xbf16> to vector<108x108xbf16>
    %cst_160 = arith.constant dense<0.000000e+00> : vector<54x108xf32>
    %135 = tpu.matmul %132, %134, %cst_160 {dimension_numbers = #tpu.dot_dimension_numbers<[1], [0], [0], [1], [0, 0, 1, 1], [], []>} : vector<54x108xbf16>, vector<108x108xbf16>, vector<54x108xf32> -> vector<54x108xf32>
    %136 = arith.truncf %135 : vector<54x108xf32> to vector<54x108xbf16>
    %c0_161 = arith.constant 0 : index
    %c0_162 = arith.constant 0 : index
    %137 = vector.load %arg3[%c0_161, %c0_162] : memref<108x54xbf16, #tpu.memory_space<vmem>>, vector<108x54xbf16>
    %cst_163 = arith.constant dense<0.000000e+00> : vector<54x54xf32>
    %138 = tpu.matmul %136, %137, %cst_163 {dimension_numbers = #tpu.dot_dimension_numbers<[1], [0], [0], [1], [0, 0, 1, 1], [], []>} : vector<54x108xbf16>, vector<108x54xbf16>, vector<54x54xf32> -> vector<54x54xf32>
    %139 = arith.truncf %138 : vector<54x54xf32> to vector<54x54xbf16>
    %c0_164 = arith.constant 0 : index
    %c12_165 = arith.constant 12 : index
    %c0_166 = arith.constant 0 : index
    %c0_167 = arith.constant 0 : index
    %140 = vector.load %arg4[%c0_164, %c12_165, %c0_166, %c0_167] : memref<1x16x54x54xbf16, #tpu.memory_space<vmem>>, vector<1x1x54x54xbf16>
    %141 = vector.shape_cast %140 : vector<1x1x54x54xbf16> to vector<54x54xbf16>
    %142 = vector.shape_cast %139 : vector<54x54xbf16> to vector<1x1x54x54xbf16>
    tpu.vector_store %arg4[%c0_164, %c12_165, %c0_166, %c0_167], %142 {strides = array<i32>} : memref<1x16x54x54xbf16, #tpu.memory_space<vmem>>, vector<1x1x54x54xbf16>,
    %c0_168 = arith.constant 0 : index
    %c0_169 = arith.constant 0 : index
    %143 = vector.load %arg2[%c0_168, %c0_169] : memref<54x108xbf16, #tpu.memory_space<vmem>>, vector<54x108xbf16>
    %c0_170 = arith.constant 0 : index
    %c13 = arith.constant 13 : index
    %c0_171 = arith.constant 0 : index
    %c0_172 = arith.constant 0 : index
    %144 = vector.load %arg1[%c0_170, %c13, %c0_171, %c0_172] : memref<1x16x108x108xbf16, #tpu.memory_space<vmem>>, vector<1x1x108x108xbf16>
    %145 = vector.shape_cast %144 : vector<1x1x108x108xbf16> to vector<108x108xbf16>
    %cst_173 = arith.constant dense<0.000000e+00> : vector<54x108xf32>
    %146 = tpu.matmul %143, %145, %cst_173 {dimension_numbers = #tpu.dot_dimension_numbers<[1], [0], [0], [1], [0, 0, 1, 1], [], []>} : vector<54x108xbf16>, vector<108x108xbf16>, vector<54x108xf32> -> vector<54x108xf32>
    %147 = arith.truncf %146 : vector<54x108xf32> to vector<54x108xbf16>
    %c0_174 = arith.constant 0 : index
    %c0_175 = arith.constant 0 : index
    %148 = vector.load %arg3[%c0_174, %c0_175] : memref<108x54xbf16, #tpu.memory_space<vmem>>, vector<108x54xbf16>
    %cst_176 = arith.constant dense<0.000000e+00> : vector<54x54xf32>
    %149 = tpu.matmul %147, %148, %cst_176 {dimension_numbers = #tpu.dot_dimension_numbers<[1], [0], [0], [1], [0, 0, 1, 1], [], []>} : vector<54x108xbf16>, vector<108x54xbf16>, vector<54x54xf32> -> vector<54x54xf32>
    %150 = arith.truncf %149 : vector<54x54xf32> to vector<54x54xbf16>
    %c0_177 = arith.constant 0 : index
    %c13_178 = arith.constant 13 : index
    %c0_179 = arith.constant 0 : index
    %c0_180 = arith.constant 0 : index
    %151 = vector.load %arg4[%c0_177, %c13_178, %c0_179, %c0_180] : memref<1x16x54x54xbf16, #tpu.memory_space<vmem>>, vector<1x1x54x54xbf16>
    %152 = vector.shape_cast %151 : vector<1x1x54x54xbf16> to vector<54x54xbf16>
    %153 = vector.shape_cast %150 : vector<54x54xbf16> to vector<1x1x54x54xbf16>
    tpu.vector_store %arg4[%c0_177, %c13_178, %c0_179, %c0_180], %153 {strides = array<i32>} : memref<1x16x54x54xbf16, #tpu.memory_space<vmem>>, vector<1x1x54x54xbf16>,
    %c0_181 = arith.constant 0 : index
    %c0_182 = arith.constant 0 : index
    %154 = vector.load %arg2[%c0_181, %c0_182] : memref<54x108xbf16, #tpu.memory_space<vmem>>, vector<54x108xbf16>
    %c0_183 = arith.constant 0 : index
    %c14 = arith.constant 14 : index
    %c0_184 = arith.constant 0 : index
    %c0_185 = arith.constant 0 : index
    %155 = vector.load %arg1[%c0_183, %c14, %c0_184, %c0_185] : memref<1x16x108x108xbf16, #tpu.memory_space<vmem>>, vector<1x1x108x108xbf16>
    %156 = vector.shape_cast %155 : vector<1x1x108x108xbf16> to vector<108x108xbf16>
    %cst_186 = arith.constant dense<0.000000e+00> : vector<54x108xf32>
    %157 = tpu.matmul %154, %156, %cst_186 {dimension_numbers = #tpu.dot_dimension_numbers<[1], [0], [0], [1], [0, 0, 1, 1], [], []>} : vector<54x108xbf16>, vector<108x108xbf16>, vector<54x108xf32> -> vector<54x108xf32>
    %158 = arith.truncf %157 : vector<54x108xf32> to vector<54x108xbf16>
    %c0_187 = arith.constant 0 : index
    %c0_188 = arith.constant 0 : index
    %159 = vector.load %arg3[%c0_187, %c0_188] : memref<108x54xbf16, #tpu.memory_space<vmem>>, vector<108x54xbf16>
    %cst_189 = arith.constant dense<0.000000e+00> : vector<54x54xf32>
    %160 = tpu.matmul %158, %159, %cst_189 {dimension_numbers = #tpu.dot_dimension_numbers<[1], [0], [0], [1], [0, 0, 1, 1], [], []>} : vector<54x108xbf16>, vector<108x54xbf16>, vector<54x54xf32> -> vector<54x54xf32>
    %161 = arith.truncf %160 : vector<54x54xf32> to vector<54x54xbf16>
    %c0_190 = arith.constant 0 : index
    %c14_191 = arith.constant 14 : index
    %c0_192 = arith.constant 0 : index
    %c0_193 = arith.constant 0 : index
    %162 = vector.load %arg4[%c0_190, %c14_191, %c0_192, %c0_193] : memref<1x16x54x54xbf16, #tpu.memory_space<vmem>>, vector<1x1x54x54xbf16>
    %163 = vector.shape_cast %162 : vector<1x1x54x54xbf16> to vector<54x54xbf16>
    %164 = vector.shape_cast %161 : vector<54x54xbf16> to vector<1x1x54x54xbf16>
    tpu.vector_store %arg4[%c0_190, %c14_191, %c0_192, %c0_193], %164 {strides = array<i32>} : memref<1x16x54x54xbf16, #tpu.memory_space<vmem>>, vector<1x1x54x54xbf16>,
    %c0_194 = arith.constant 0 : index
    %c0_195 = arith.constant 0 : index
    %165 = vector.load %arg2[%c0_194, %c0_195] : memref<54x108xbf16, #tpu.memory_space<vmem>>, vector<54x108xbf16>
    %c0_196 = arith.constant 0 : index
    %c15 = arith.constant 15 : index
    %c0_197 = arith.constant 0 : index
    %c0_198 = arith.constant 0 : index
    %166 = vector.load %arg1[%c0_196, %c15, %c0_197, %c0_198] : memref<1x16x108x108xbf16, #tpu.memory_space<vmem>>, vector<1x1x108x108xbf16>
    %167 = vector.shape_cast %166 : vector<1x1x108x108xbf16> to vector<108x108xbf16>
    %cst_199 = arith.constant dense<0.000000e+00> : vector<54x108xf32>
    %168 = tpu.matmul %165, %167, %cst_199 {dimension_numbers = #tpu.dot_dimension_numbers<[1], [0], [0], [1], [0, 0, 1, 1], [], []>} : vector<54x108xbf16>, vector<108x108xbf16>, vector<54x108xf32> -> vector<54x108xf32>
    %169 = arith.truncf %168 : vector<54x108xf32> to vector<54x108xbf16>
    %c0_200 = arith.constant 0 : index
    %c0_201 = arith.constant 0 : index
    %170 = vector.load %arg3[%c0_200, %c0_201] : memref<108x54xbf16, #tpu.memory_space<vmem>>, vector<108x54xbf16>
    %cst_202 = arith.constant dense<0.000000e+00> : vector<54x54xf32>
    %171 = tpu.matmul %169, %170, %cst_202 {dimension_numbers = #tpu.dot_dimension_numbers<[1], [0], [0], [1], [0, 0, 1, 1], [], []>} : vector<54x108xbf16>, vector<108x54xbf16>, vector<54x54xf32> -> vector<54x54xf32>
    %172 = arith.truncf %171 : vector<54x54xf32> to vector<54x54xbf16>
    %c0_203 = arith.constant 0 : index
    %c15_204 = arith.constant 15 : index
    %c0_205 = arith.constant 0 : index
    %c0_206 = arith.constant 0 : index
    %173 = vector.load %arg4[%c0_203, %c15_204, %c0_205, %c0_206] : memref<1x16x54x54xbf16, #tpu.memory_space<vmem>>, vector<1x1x54x54xbf16>
    %174 = vector.shape_cast %173 : vector<1x1x54x54xbf16> to vector<54x54xbf16>
    %175 = vector.shape_cast %172 : vector<54x54xbf16> to vector<1x1x54x54xbf16>
    tpu.vector_store %arg4[%c0_203, %c15_204, %c0_205, %c0_206], %175 {strides = array<i32>} : memref<1x16x54x54xbf16, #tpu.memory_space<vmem>>, vector<1x1x54x54xbf16>,
    return
  }
  func.func @transform_0(%arg0: i32) -> (i32, i32, i32, i32) {
    %c0_i32 = arith.constant 0 : i32
    %c0_i32_0 = arith.constant 0 : i32
    %c0_i32_1 = arith.constant 0 : i32
    %c0_i32_2 = arith.constant 0 : i32
    return %arg0, %c0_i32, %c0_i32_0, %c0_i32_1 : i32, i32, i32, i32
  }
  func.func @transform_1(%arg0: i32) -> (i32, i32) {
    %c0_i32 = arith.constant 0 : i32
    %c0_i32_0 = arith.constant 0 : i32
    %c0_i32_1 = arith.constant 0 : i32
    return %c0_i32, %c0_i32_0 : i32, i32
  }
  func.func @transform_2(%arg0: i32) -> (i32, i32) {
    %c0_i32 = arith.constant 0 : i32
    %c0_i32_0 = arith.constant 0 : i32
    %c0_i32_1 = arith.constant 0 : i32
    return %c0_i32, %c0_i32_0 : i32, i32
  }
  func.func @transform_3(%arg0: i32) -> (i32, i32, i32, i32) {
    %c0_i32 = arith.constant 0 : i32
    %c0_i32_0 = arith.constant 0 : i32
    %c0_i32_1 = arith.constant 0 : i32
    %c0_i32_2 = arith.constant 0 : i32
    return %arg0, %c0_i32, %c0_i32_0, %c0_i32_1 : i32, i32, i32, i32
  }
}

module attributes {stable_mosaic.version = 11 : i64} {
  func.func @_fc_head_kernel(%arg0: i32, %arg1: memref<8x2048xbf16, #tpu.memory_space<vmem>>, %arg2: memref<2048x128xbf16, #tpu.memory_space<vmem>>, %arg3: memref<1x128xf32, #tpu.memory_space<vmem>>, %arg4: memref<128x128xbf16, #tpu.memory_space<vmem>>, %arg5: memref<1x128xf32, #tpu.memory_space<vmem>>, %arg6: memref<128x128xbf16, #tpu.memory_space<vmem>>, %arg7: memref<1x128xf32, #tpu.memory_space<vmem>>, %arg8: memref<8x128xf32, #tpu.memory_space<vmem>>, %arg9: memref<8x128xf32, #tpu.memory_space<vmem>>) attributes {dimension_semantics = [#tpu.dimension_semantics<arbitrary>], iteration_bounds = array<i64: 23>, scalar_prefetch = 0 : i64, scratch_operands = 1 : i64, tpu.core_type = #tpu.core_type<tc>, window_params = [{transform_indices = @transform_0, window_bounds = array<i64: 8, 2048>}, {transform_indices = @transform_1, window_bounds = array<i64: 2048, 128>}, {pipeline_mode = #tpu.pipeline_mode<synchronous>, transform_indices = @transform_2, window_bounds = array<i64: 1, 128>}, {pipeline_mode = #tpu.pipeline_mode<synchronous>, transform_indices = @transform_3, window_bounds = array<i64: 128, 128>}, {pipeline_mode = #tpu.pipeline_mode<synchronous>, transform_indices = @transform_4, window_bounds = array<i64: 1, 128>}, {pipeline_mode = #tpu.pipeline_mode<synchronous>, transform_indices = @transform_5, window_bounds = array<i64: 128, 128>}, {pipeline_mode = #tpu.pipeline_mode<synchronous>, transform_indices = @transform_6, window_bounds = array<i64: 1, 128>}, {pipeline_mode = #tpu.pipeline_mode<synchronous>, transform_indices = @transform_7, window_bounds = array<i64: 8, 128>}]} {
    %c0_i32 = arith.constant 0 : i32
    %0 = arith.cmpi eq, %arg0, %c0_i32 : i32
    %1 = arith.extui %0 : i1 to i32
    %c0_i32_0 = arith.constant 0 : i32
    %2 = arith.cmpi ne, %1, %c0_i32_0 : i32
    scf.if %2 {
      %cst_9 = arith.constant 0.000000e+00 : f32
      %12 = vector.broadcast %cst_9 : f32 to vector<8x128xf32>
      %c0_10 = arith.constant 0 : index
      %c0_11 = arith.constant 0 : index
      %13 = vector.load %arg9[%c0_10, %c0_11] : memref<8x128xf32, #tpu.memory_space<vmem>>, vector<8x128xf32>
      tpu.vector_store %arg9[%c0_10, %c0_11], %12 {strides = array<i32>} : memref<8x128xf32, #tpu.memory_space<vmem>>, vector<8x128xf32>,
    } else {
    }
    %c0 = arith.constant 0 : index
    %c0_1 = arith.constant 0 : index
    %3 = vector.load %arg9[%c0, %c0_1] : memref<8x128xf32, #tpu.memory_space<vmem>>, vector<8x128xf32>
    %c0_2 = arith.constant 0 : index
    %c0_3 = arith.constant 0 : index
    %4 = vector.load %arg1[%c0_2, %c0_3] : memref<8x2048xbf16, #tpu.memory_space<vmem>>, vector<8x2048xbf16>
    %c0_4 = arith.constant 0 : index
    %c0_5 = arith.constant 0 : index
    %5 = vector.load %arg2[%c0_4, %c0_5] : memref<2048x128xbf16, #tpu.memory_space<vmem>>, vector<2048x128xbf16>
    %cst = arith.constant dense<0.000000e+00> : vector<8x128xf32>
    %6 = tpu.matmul %4, %5, %cst {dimension_numbers = #tpu.dot_dimension_numbers<[1], [0], [0], [1], [0, 0, 1, 1], [], []>} : vector<8x2048xbf16>, vector<2048x128xbf16>, vector<8x128xf32> -> vector<8x128xf32>
    %7 = arith.addf %3, %6 : vector<8x128xf32>
    %c0_6 = arith.constant 0 : index
    %c0_7 = arith.constant 0 : index
    %8 = vector.load %arg9[%c0_6, %c0_7] : memref<8x128xf32, #tpu.memory_space<vmem>>, vector<8x128xf32>
    tpu.vector_store %arg9[%c0_6, %c0_7], %7 {strides = array<i32>} : memref<8x128xf32, #tpu.memory_space<vmem>>, vector<8x128xf32>,
    %c22_i32 = arith.constant 22 : i32
    %9 = arith.cmpi eq, %arg0, %c22_i32 : i32
    %10 = arith.extui %9 : i1 to i32
    %c0_i32_8 = arith.constant 0 : i32
    %11 = arith.cmpi ne, %10, %c0_i32_8 : i32
    scf.if %11 {
      %c0_9 = arith.constant 0 : index
      %c0_10 = arith.constant 0 : index
      %12 = vector.load %arg9[%c0_9, %c0_10] : memref<8x128xf32, #tpu.memory_space<vmem>>, vector<8x128xf32>
      %c0_11 = arith.constant 0 : index
      %c0_12 = arith.constant 0 : index
      %13 = vector.load %arg3[%c0_11, %c0_12] : memref<1x128xf32, #tpu.memory_space<vmem>>, vector<1x128xf32>
      %14 = vector.broadcast %13 : vector<1x128xf32> to vector<8x128xf32>
      %15 = arith.addf %12, %14 : vector<8x128xf32>
      %cst_13 = arith.constant 0.000000e+00 : f32
      %16 = vector.broadcast %cst_13 : f32 to vector<8x128xf32>
      %17 = arith.maximumf %15, %16 : vector<8x128xf32>
      %18 = arith.truncf %17 : vector<8x128xf32> to vector<8x128xbf16>
      %c0_14 = arith.constant 0 : index
      %c0_15 = arith.constant 0 : index
      %19 = vector.load %arg4[%c0_14, %c0_15] : memref<128x128xbf16, #tpu.memory_space<vmem>>, vector<128x128xbf16>
      %cst_16 = arith.constant dense<0.000000e+00> : vector<8x128xf32>
      %20 = tpu.matmul %18, %19, %cst_16 {dimension_numbers = #tpu.dot_dimension_numbers<[1], [0], [0], [1], [0, 0, 1, 1], [], []>} : vector<8x128xbf16>, vector<128x128xbf16>, vector<8x128xf32> -> vector<8x128xf32>
      %c0_17 = arith.constant 0 : index
      %c0_18 = arith.constant 0 : index
      %21 = vector.load %arg5[%c0_17, %c0_18] : memref<1x128xf32, #tpu.memory_space<vmem>>, vector<1x128xf32>
      %22 = vector.broadcast %21 : vector<1x128xf32> to vector<8x128xf32>
      %23 = arith.addf %20, %22 : vector<8x128xf32>
      %cst_19 = arith.constant 0.000000e+00 : f32
      %24 = vector.broadcast %cst_19 : f32 to vector<8x128xf32>
      %25 = arith.maximumf %23, %24 : vector<8x128xf32>
      %26 = arith.truncf %25 : vector<8x128xf32> to vector<8x128xbf16>
      %c0_20 = arith.constant 0 : index
      %c0_21 = arith.constant 0 : index
      %27 = vector.load %arg6[%c0_20, %c0_21] : memref<128x128xbf16, #tpu.memory_space<vmem>>, vector<128x128xbf16>
      %cst_22 = arith.constant dense<0.000000e+00> : vector<8x128xf32>
      %28 = tpu.matmul %26, %27, %cst_22 {dimension_numbers = #tpu.dot_dimension_numbers<[1], [0], [0], [1], [0, 0, 1, 1], [], []>} : vector<8x128xbf16>, vector<128x128xbf16>, vector<8x128xf32> -> vector<8x128xf32>
      %c0_23 = arith.constant 0 : index
      %c0_24 = arith.constant 0 : index
      %29 = vector.load %arg7[%c0_23, %c0_24] : memref<1x128xf32, #tpu.memory_space<vmem>>, vector<1x128xf32>
      %30 = vector.broadcast %29 : vector<1x128xf32> to vector<8x128xf32>
      %31 = arith.addf %28, %30 : vector<8x128xf32>
      %c0_25 = arith.constant 0 : index
      %c0_26 = arith.constant 0 : index
      %32 = vector.load %arg8[%c0_25, %c0_26] : memref<8x128xf32, #tpu.memory_space<vmem>>, vector<8x128xf32>
      tpu.vector_store %arg8[%c0_25, %c0_26], %31 {strides = array<i32>} : memref<8x128xf32, #tpu.memory_space<vmem>>, vector<8x128xf32>,
    } else {
    }
    return
  }
  func.func @transform_0(%arg0: i32) -> (i32, i32) {
    %c0_i32 = arith.constant 0 : i32
    %c0_i32_0 = arith.constant 0 : i32
    return %c0_i32, %arg0 : i32, i32
  }
  func.func @transform_1(%arg0: i32) -> (i32, i32) {
    %c0_i32 = arith.constant 0 : i32
    %c0_i32_0 = arith.constant 0 : i32
    return %arg0, %c0_i32 : i32, i32
  }
  func.func @transform_2(%arg0: i32) -> (i32, i32) {
    %c0_i32 = arith.constant 0 : i32
    %c0_i32_0 = arith.constant 0 : i32
    %c0_i32_1 = arith.constant 0 : i32
    return %c0_i32, %c0_i32_0 : i32, i32
  }
  func.func @transform_3(%arg0: i32) -> (i32, i32) {
    %c0_i32 = arith.constant 0 : i32
    %c0_i32_0 = arith.constant 0 : i32
    %c0_i32_1 = arith.constant 0 : i32
    return %c0_i32, %c0_i32_0 : i32, i32
  }
  func.func @transform_4(%arg0: i32) -> (i32, i32) {
    %c0_i32 = arith.constant 0 : i32
    %c0_i32_0 = arith.constant 0 : i32
    %c0_i32_1 = arith.constant 0 : i32
    return %c0_i32, %c0_i32_0 : i32, i32
  }
  func.func @transform_5(%arg0: i32) -> (i32, i32) {
    %c0_i32 = arith.constant 0 : i32
    %c0_i32_0 = arith.constant 0 : i32
    %c0_i32_1 = arith.constant 0 : i32
    return %c0_i32, %c0_i32_0 : i32, i32
  }
  func.func @transform_6(%arg0: i32) -> (i32, i32) {
    %c0_i32 = arith.constant 0 : i32
    %c0_i32_0 = arith.constant 0 : i32
    %c0_i32_1 = arith.constant 0 : i32
    return %c0_i32, %c0_i32_0 : i32, i32
  }
  func.func @transform_7(%arg0: i32) -> (i32, i32) {
    %c0_i32 = arith.constant 0 : i32
    %c0_i32_0 = arith.constant 0 : i32
    %c0_i32_1 = arith.constant 0 : i32
    return %c0_i32, %c0_i32_0 : i32, i32
  }
}

</mosaic_0001>

<bundles_post_ra>
// kernel: lenet_forward.5
= control target key start
LH: loop header
LB: loop body
LE: loop exit
PB: predicated region body
PF: predicated region fallthrough
CT: control target
= control target key end

     0   :  { %s1646_s12 = smov 0   ;;  %s1648_s13 = smov 0   ;;  %s2092_s0 = inlined_call_operand.vmem [shape: bf16[8,80], index: 0, kind: input, shape index: {}]   ;;  %s2093_s1 = inlined_call_operand.vmem [shape: bf16[80,100352], index: 1, kind: input, shape index: {}]   ;;  %s2094_s2 = inlined_call_operand.vmem [shape: f32[8,1], index: 2, kind: input, shape index: {}]   ;;  %s2095_s3 = inlined_call_operand.vmem [shape: bf16[8,100352], index: 3, kind: output, shape index: {}]  }
   0x1   :  { %s1650_s14 = smov 0  }
   0x2 LB: > { %s1145_s15 = sadd.s32 4294967295, %s1623_s14   ;;  %s1663_s16 = sadd.s32 1, %s1623_s14   ;;  %s1623_s14 = sphi %s1650_s14, %s2098_s14   ;;  %s1619_s13 = sphi %s1648_s13, %s2097_s13   ;;  %s1615_s12 = sphi %s1646_s12, %s2096_s12  }
   0x3   : > { %s38_s17 = ssub.s32 %s1623_s14, %s1663_s16  ;;  %s41_s18 = sadd.s32 1, %s1619_s13 }
   0x4   : > { %p39_p0 = scmp.eq.s32.totalorder %s38_s17, 0  ;;  %p48_p1 = scmp.ne.s32.totalorder %s1619_s13, %s1615_s12 }
   0x5   : > { %p49_p2 = scmp.eq.s32.totalorder %s1623_s14, 0  ;;  %p1148_p4 = scmp.ge.s32.totalorder %s1623_s14, 49 }
   0x6   : > { %s1672_s19 = scalar_select %p39_p0, %s1619_s13, %s41_s18  }
   0x7   : > { %p50_p3 = por %p49_p2, %p48_p1  ;;  %127 = sbr.rel (%p1148_p4) target bundleno = 96 (0x60), region = 24 }
   0xc   : > { %130 = sbr.rel (!%p50_p3) target bundleno = 96 (0x60), region = 28  ;;  %s132_s20 = sand.u32 (%p50_p3), 1, %s1619_s13  }
   0xd   : > { %s1492_s21 = sshll.u32 (%p50_p3), %s1623_s14, 6  ;;  %s1573_s22 = smul.u32 (%p50_p3), 640, %s132_s20 }
   0xe   : > { %s1680_s25 = scalar_lea.vmem (%p50_p3), %s2093_s1, %s1492_s21 }
   0xf   : > { %v150_v0 = vld [vmem:[%s1680_s25] sm:$0xff] (%p50_p3)  ;;  %v152_v1 = vld [vmem:[%s1680_s25 + $0x8] sm:$0xff] (%p50_p3)  ;;  %v154_v2 = vld [vmem:[%s1680_s25 + $0x10] sm:$0xff] (%p50_p3)  ;;  %s1685_s26 = scalar_lea.vmem (%p50_p3), [#allocation2], %s1573_s22 }
  0x10   : > { %151 = vst [vmem:[%s1685_s26] sm:$0xff] (%p50_p3), %v150_v0  ;;  %v156_v3 = vld [vmem:[%s1680_s25 + $0x18] sm:$0xff] (%p50_p3)  ;;  %v158_v4 = vld [vmem:[%s1680_s25 + $0x20] sm:$0xff] (%p50_p3)  ;;  %v160_v5 = vld [vmem:[%s1680_s25 + $0x28] sm:$0xff] (%p50_p3) }
  0x11   : > { %153 = vst [vmem:[%s1685_s26 + $0x8] sm:$0xff] %v152_v1  ;;  %v162_v6 = vld [vmem:[%s1680_s25 + $0x30] sm:$0xff]  ;;  %v164_v7 = vld [vmem:[%s1680_s25 + $0x38] sm:$0xff]  ;;  %v166_v8 = vld [vmem:[%s1680_s25 + $0xc40] sm:$0xff] }
  0x12   : > { %155 = vst [vmem:[%s1685_s26 + $0x10] sm:$0xff] %v154_v2  ;;  %v168_v9 = vld [vmem:[%s1680_s25 + $0xc48] sm:$0xff]  ;;  %v170_v10 = vld [vmem:[%s1680_s25 + $0xc50] sm:$0xff]  ;;  %v172_v11 = vld [vmem:[%s1680_s25 + $0xc58] sm:$0xff] }
  0x13   : > { %157 = vst [vmem:[%s1685_s26 + $0x18] sm:$0xff] %v156_v3  ;;  %v174_v12 = vld [vmem:[%s1680_s25 + $0xc60] sm:$0xff]  ;;  %v176_v13 = vld [vmem:[%s1680_s25 + $0xc68] sm:$0xff]  ;;  %v178_v14 = vld [vmem:[%s1680_s25 + $0xc70] sm:$0xff] }
  0x14   : > { %159 = vst [vmem:[%s1685_s26 + $0x20] sm:$0xff] %v158_v4  ;;  %v180_v15 = vld [vmem:[%s1680_s25 + $0xc78] sm:$0xff]  ;;  %v182_v16 = vld [vmem:[%s1680_s25 + $0x1880] sm:$0xff]  ;;  %v184_v17 = vld [vmem:[%s1680_s25 + $0x1888] sm:$0xff] }
  0x15   : > { %161 = vst [vmem:[%s1685_s26 + $0x28] sm:$0xff] %v160_v5  ;;  %v186_v18 = vld [vmem:[%s1680_s25 + $0x1890] sm:$0xff]  ;;  %v188_v19 = vld [vmem:[%s1680_s25 + $0x1898] sm:$0xff]  ;;  %v190_v20 = vld [vmem:[%s1680_s25 + $0x18a0] sm:$0xff] }
  0x16   : > { %163 = vst [vmem:[%s1685_s26 + $0x30] sm:$0xff] %v162_v6  ;;  %v192_v21 = vld [vmem:[%s1680_s25 + $0x18a8] sm:$0xff]  ;;  %v194_v22 = vld [vmem:[%s1680_s25 + $0x18b0] sm:$0xff]  ;;  %v196_v23 = vld [vmem:[%s1680_s25 + $0x18b8] sm:$0xff] }
  0x17   : > { %165 = vst [vmem:[%s1685_s26 + $0x38] sm:$0xff] %v164_v7  ;;  %v198_v24 = vld [vmem:[%s1680_s25 + $0x24c0] sm:$0xff]  ;;  %v200_v25 = vld [vmem:[%s1680_s25 + $0x24c8] sm:$0xff]  ;;  %v202_v26 = vld [vmem:[%s1680_s25 + $0x24d0] sm:$0xff] }
  0x18   : > { %167 = vst [vmem:[%s1685_s26 + $0x40] sm:$0xff] %v166_v8  ;;  %v204_v27 = vld [vmem:[%s1680_s25 + $0x24d8] sm:$0xff]  ;;  %v206_v28 = vld [vmem:[%s1680_s25 + $0x24e0] sm:$0xff]  ;;  %v208_v29 = vld [vmem:[%s1680_s25 + $0x24e8] sm:$0xff] }
  0x19   : > { %169 = vst [vmem:[%s1685_s26 + $0x48] sm:$0xff] %v168_v9  ;;  %v210_v30 = vld [vmem:[%s1680_s25 + $0x24f0] sm:$0xff]  ;;  %v212_v31 = vld [vmem:[%s1680_s25 + $0x24f8] sm:$0xff]  ;;  %v214_v32 = vld [vmem:[%s1680_s25 + $0x3100] sm:$0xff] }
  0x1a   : > { %171 = vst [vmem:[%s1685_s26 + $0x50] sm:$0xff] %v170_v10  ;;  %v216_v33 = vld [vmem:[%s1680_s25 + $0x3108] sm:$0xff]  ;;  %v218_v34 = vld [vmem:[%s1680_s25 + $0x3110] sm:$0xff]  ;;  %v220_v35 = vld [vmem:[%s1680_s25 + $0x3118] sm:$0xff] }
  0x1b   : > { %173 = vst [vmem:[%s1685_s26 + $0x58] sm:$0xff] %v172_v11  ;;  %v222_v36 = vld [vmem:[%s1680_s25 + $0x3120] sm:$0xff]  ;;  %v224_v37 = vld [vmem:[%s1680_s25 + $0x3128] sm:$0xff]  ;;  %v226_v38 = vld [vmem:[%s1680_s25 + $0x3130] sm:$0xff] }
  0x1c   : > { %175 = vst [vmem:[%s1685_s26 + $0x60] sm:$0xff] %v174_v12  ;;  %v228_v39 = vld [vmem:[%s1680_s25 + $0x3138] sm:$0xff]  ;;  %v230_v40 = vld [vmem:[%s1680_s25 + $0x3d40] sm:$0xff]  ;;  %v232_v41 = vld [vmem:[%s1680_s25 + $0x3d48] sm:$0xff] }
  0x1d   : > { %177 = vst [vmem:[%s1685_s26 + $0x68] sm:$0xff] %v176_v13  ;;  %v234_v42 = vld [vmem:[%s1680_s25 + $0x3d50] sm:$0xff]  ;;  %v236_v43 = vld [vmem:[%s1680_s25 + $0x3d58] sm:$0xff]  ;;  %v238_v44 = vld [vmem:[%s1680_s25 + $0x3d60] sm:$0xff] }
  0x1e   : > { %179 = vst [vmem:[%s1685_s26 + $0x70] sm:$0xff] %v178_v14  ;;  %v240_v45 = vld [vmem:[%s1680_s25 + $0x3d68] sm:$0xff]  ;;  %v242_v46 = vld [vmem:[%s1680_s25 + $0x3d70] sm:$0xff]  ;;  %v244_v47 = vld [vmem:[%s1680_s25 + $0x3d78] sm:$0xff] }
  0x1f   : > { %181 = vst [vmem:[%s1685_s26 + $0x78] sm:$0xff] %v180_v15  ;;  %v246_v48 = vld [vmem:[%s1680_s25 + $0x4980] sm:$0xff]  ;;  %v248_v49 = vld [vmem:[%s1680_s25 + $0x4988] sm:$0xff]  ;;  %v250_v50 = vld [vmem:[%s1680_s25 + $0x4990] sm:$0xff] }
  0x20   : > { %183 = vst [vmem:[%s1685_s26 + $0x80] sm:$0xff] %v182_v16  ;;  %v252_v51 = vld [vmem:[%s1680_s25 + $0x4998] sm:$0xff]  ;;  %v254_v52 = vld [vmem:[%s1680_s25 + $0x49a0] sm:$0xff]  ;;  %v256_v53 = vld [vmem:[%s1680_s25 + $0x49a8] sm:$0xff] }
  0x21   : > { %185 = vst [vmem:[%s1685_s26 + $0x88] sm:$0xff] %v184_v17  ;;  %v258_v54 = vld [vmem:[%s1680_s25 + $0x49b0] sm:$0xff]  ;;  %v260_v55 = vld [vmem:[%s1680_s25 + $0x49b8] sm:$0xff]  ;;  %v262_v56 = vld [vmem:[%s1680_s25 + $0x55c0] sm:$0xff] }
  0x22   : > { %187 = vst [vmem:[%s1685_s26 + $0x90] sm:$0xff] %v186_v18  ;;  %v264_v57 = vld [vmem:[%s1680_s25 + $0x55c8] sm:$0xff]  ;;  %v266_v58 = vld [vmem:[%s1680_s25 + $0x55d0] sm:$0xff]  ;;  %v268_v59 = vld [vmem:[%s1680_s25 + $0x55d8] sm:$0xff] }
  0x23   : > { %189 = vst [vmem:[%s1685_s26 + $0x98] sm:$0xff] %v188_v19  ;;  %v270_v60 = vld [vmem:[%s1680_s25 + $0x55e0] sm:$0xff]  ;;  %v272_v61 = vld [vmem:[%s1680_s25 + $0x55e8] sm:$0xff]  ;;  %v274_v62 = vld [vmem:[%s1680_s25 + $0x55f0] sm:$0xff] }
  0x24   : > { %191 = vst [vmem:[%s1685_s26 + $0xa0] sm:$0xff] %v190_v20  ;;  %v276_v63 = vld [vmem:[%s1680_s25 + $0x55f8] sm:$0xff]  ;;  %v278_v0 = vld [vmem:[%s1680_s25 + $0x6200] sm:$0xff]  ;;  %v280_v1 = vld [vmem:[%s1680_s25 + $0x6208] sm:$0xff] }
  0x25   : > { %193 = vst [vmem:[%s1685_s26 + $0xa8] sm:$0xff] %v192_v21  ;;  %v282_v2 = vld [vmem:[%s1680_s25 + $0x6210] sm:$0xff]  ;;  %v284_v3 = vld [vmem:[%s1680_s25 + $0x6218] sm:$0xff]  ;;  %v286_v4 = vld [vmem:[%s1680_s25 + $0x6220] sm:$0xff] }
  0x26   : > { %195 = vst [vmem:[%s1685_s26 + $0xb0] sm:$0xff] %v194_v22  ;;  %v288_v5 = vld [vmem:[%s1680_s25 + $0x6228] sm:$0xff]  ;;  %v290_v6 = vld [vmem:[%s1680_s25 + $0x6230] sm:$0xff]  ;;  %v292_v7 = vld [vmem:[%s1680_s25 + $0x6238] sm:$0xff] }
  0x27   : > { %197 = vst [vmem:[%s1685_s26 + $0xb8] sm:$0xff] %v196_v23  ;;  %v294_v8 = vld [vmem:[%s1680_s25 + $0x6e40] sm:$0xff]  ;;  %v296_v9 = vld [vmem:[%s1680_s25 + $0x6e48] sm:$0xff]  ;;  %v298_v10 = vld [vmem:[%s1680_s25 + $0x6e50] sm:$0xff] }
  0x28   : > { %199 = vst [vmem:[%s1685_s26 + $0xc0] sm:$0xff] %v198_v24  ;;  %v300_v11 = vld [vmem:[%s1680_s25 + $0x6e58] sm:$0xff]  ;;  %v302_v12 = vld [vmem:[%s1680_s25 + $0x6e60] sm:$0xff]  ;;  %v304_v13 = vld [vmem:[%s1680_s25 + $0x6e68] sm:$0xff] }
  0x29   : > { %201 = vst [vmem:[%s1685_s26 + $0xc8] sm:$0xff] %v200_v25  ;;  %v306_v14 = vld [vmem:[%s1680_s25 + $0x6e70] sm:$0xff]  ;;  %v308_v15 = vld [vmem:[%s1680_s25 + $0x6e78] sm:$0xff] }
  0x2a   : > { %203 = vst [vmem:[%s1685_s26 + $0xd0] sm:$0xff] %v202_v26 }
  0x2b   : > { %205 = vst [vmem:[%s1685_s26 + $0xd8] sm:$0xff] %v204_v27 }
  0x2c   : > { %207 = vst [vmem:[%s1685_s26 + $0xe0] sm:$0xff] %v206_v28 }
  0x2d   : > { %209 = vst [vmem:[%s1685_s26 + $0xe8] sm:$0xff] %v208_v29 }
  0x2e   : > { %211 = vst [vmem:[%s1685_s26 + $0xf0] sm:$0xff] %v210_v30 }
  0x2f   : > { %213 = vst [vmem:[%s1685_s26 + $0xf8] sm:$0xff] %v212_v31 }
  0x30   : > { %215 = vst [vmem:[%s1685_s26 + $0x100] sm:$0xff] %v214_v32 }
  0x31   : > { %217 = vst [vmem:[%s1685_s26 + $0x108] sm:$0xff] %v216_v33 }
  0x32   : > { %219 = vst [vmem:[%s1685_s26 + $0x110] sm:$0xff] %v218_v34 }
  0x33   : > { %221 = vst [vmem:[%s1685_s26 + $0x118] sm:$0xff] %v220_v35 }
  0x34   : > { %223 = vst [vmem:[%s1685_s26 + $0x120] sm:$0xff] %v222_v36 }
  0x35   : > { %225 = vst [vmem:[%s1685_s26 + $0x128] sm:$0xff] %v224_v37 }
  0x36   : > { %227 = vst [vmem:[%s1685_s26 + $0x130] sm:$0xff] %v226_v38 }
  0x37   : > { %229 = vst [vmem:[%s1685_s26 + $0x138] sm:$0xff] %v228_v39 }
  0x38   : > { %231 = vst [vmem:[%s1685_s26 + $0x140] sm:$0xff] %v230_v40 }
  0x39   : > { %233 = vst [vmem:[%s1685_s26 + $0x148] sm:$0xff] %v232_v41 }
  0x3a   : > { %235 = vst [vmem:[%s1685_s26 + $0x150] sm:$0xff] %v234_v42 }
  0x3b   : > { %237 = vst [vmem:[%s1685_s26 + $0x158] sm:$0xff] %v236_v43 }
  0x3c   : > { %239 = vst [vmem:[%s1685_s26 + $0x160] sm:$0xff] %v238_v44 }
  0x3d   : > { %241 = vst [vmem:[%s1685_s26 + $0x168] sm:$0xff] %v240_v45 }
  0x3e   : > { %243 = vst [vmem:[%s1685_s26 + $0x170] sm:$0xff] %v242_v46 }
  0x3f   : > { %245 = vst [vmem:[%s1685_s26 + $0x178] sm:$0xff] %v244_v47 }
  0x40   : > { %247 = vst [vmem:[%s1685_s26 + $0x180] sm:$0xff] %v246_v48 }
  0x41   : > { %249 = vst [vmem:[%s1685_s26 + $0x188] sm:$0xff] %v248_v49 }
  0x42   : > { %251 = vst [vmem:[%s1685_s26 + $0x190] sm:$0xff] %v250_v50 }
  0x43   : > { %253 = vst [vmem:[%s1685_s26 + $0x198] sm:$0xff] %v252_v51 }
  0x44   : > { %255 = vst [vmem:[%s1685_s26 + $0x1a0] sm:$0xff] %v254_v52 }
  0x45   : > { %257 = vst [vmem:[%s1685_s26 + $0x1a8] sm:$0xff] %v256_v53 }
  0x46   : > { %259 = vst [vmem:[%s1685_s26 + $0x1b0] sm:$0xff] %v258_v54 }
  0x47   : > { %261 = vst [vmem:[%s1685_s26 + $0x1b8] sm:$0xff] %v260_v55 }
  0x48   : > { %263 = vst [vmem:[%s1685_s26 + $0x1c0] sm:$0xff] %v262_v56 }
  0x49   : > { %265 = vst [vmem:[%s1685_s26 + $0x1c8] sm:$0xff] %v264_v57 }
  0x4a   : > { %267 = vst [vmem:[%s1685_s26 + $0x1d0] sm:$0xff] %v266_v58 }
  0x4b   : > { %269 = vst [vmem:[%s1685_s26 + $0x1d8] sm:$0xff] %v268_v59 }
  0x4c   : > { %271 = vst [vmem:[%s1685_s26 + $0x1e0] sm:$0xff] %v270_v60 }
  0x4d   : > { %273 = vst [vmem:[%s1685_s26 + $0x1e8] sm:$0xff] %v272_v61 }
  0x4e   : > { %275 = vst [vmem:[%s1685_s26 + $0x1f0] sm:$0xff] %v274_v62 }
  0x4f   : > { %277 = vst [vmem:[%s1685_s26 + $0x1f8] sm:$0xff] %v276_v63 }
  0x50   : > { %279 = vst [vmem:[%s1685_s26 + $0x200] sm:$0xff] %v278_v0 }
  0x51   : > { %281 = vst [vmem:[%s1685_s26 + $0x208] sm:$0xff] %v280_v1 }
  0x52   : > { %283 = vst [vmem:[%s1685_s26 + $0x210] sm:$0xff] %v282_v2 }
  0x53   : > { %285 = vst [vmem:[%s1685_s26 + $0x218] sm:$0xff] %v284_v3 }
  0x54   : > { %287 = vst [vmem:[%s1685_s26 + $0x220] sm:$0xff] %v286_v4 }
  0x55   : > { %289 = vst [vmem:[%s1685_s26 + $0x228] sm:$0xff] %v288_v5 }
  0x56   : > { %291 = vst [vmem:[%s1685_s26 + $0x230] sm:$0xff] %v290_v6 }
  0x57   : > { %293 = vst [vmem:[%s1685_s26 + $0x238] sm:$0xff] %v292_v7 }
  0x58   : > { %295 = vst [vmem:[%s1685_s26 + $0x240] sm:$0xff] %v294_v8 }
  0x59   : > { %297 = vst [vmem:[%s1685_s26 + $0x248] sm:$0xff] %v296_v9 }
  0x5a   : > { %299 = vst [vmem:[%s1685_s26 + $0x250] sm:$0xff] %v298_v10 }
  0x5b   : > { %301 = vst [vmem:[%s1685_s26 + $0x258] sm:$0xff] %v300_v11 }
  0x5c   : > { %303 = vst [vmem:[%s1685_s26 + $0x260] sm:$0xff] %v302_v12 }
  0x5d   : > { %305 = vst [vmem:[%s1685_s26 + $0x268] sm:$0xff] %v304_v13 }
  0x5e   : > { %307 = vst [vmem:[%s1685_s26 + $0x270] sm:$0xff] %v306_v14 }
  0x5f   : > { %309 = vst [vmem:[%s1685_s26 + $0x278] sm:$0xff] %v308_v15 }
  0x60 PF: > { %p1151_p5 = scmp.ge.s32.totalorder %s1623_s14, 1  ;;  %p314_p6 = scmp.lt.s32.totalorder %s1623_s14, 50 }
  0x62   : > { %p315_p7 = pnand %p1151_p5, %p314_p6 }
  0x63   : > { %s321_s27 = sand.u32 (!%p315_p7), 1, %s1615_s12   ;;  %s1152_s7 = sshll.u32 (!%p315_p7), %s1145_s15, 4 }
  0x64   : > { %318 = sbr.rel (%p315_p7) target bundleno = 330 (0x14a), region = 51  ;;  %p346_p8 = scmp.lt.s32.totalorder (!%p315_p7), %s1152_s7, 783 }
  0x65   : > { %s1574_s28 = smul.u32 (!%p315_p7), 640, %s321_s27 }
  0x67   : > { %s1847_s29 = scalar_lea.vmem (!%p315_p7), [#allocation2], %s1574_s28 }
  0x69   : > { %v1412_v16 = vld [vmem:[%s1847_s29 + $0x200] sm:$0xf]  ;;  %v1557_v18 = vld [vmem:[%s1847_s29 + $0x204] sm:$0xf]  ;;  %v1420_v21 = vld [vmem:[%s1847_s29 + $0x208] sm:$0xf] }
  0x6a   : > { %v1565_v17 = vld [vmem:[%s1847_s29 + $0x23c] sm:$0xf0]  ;;  %v1414_v20 = vld [vmem:[%s1847_s29 + $0x240] sm:$0xf0]  ;;  %v1566_v22 = vld [vmem:[%s1847_s29 + $0x244] sm:$0xf0] }
  0x6b   : > { %v1413_v19 = vor.u32 %v1565_v17, %v1412_v16  ;;  %v1417_v23 = vor.u32 %v1557_v18, %v1414_v20  ;;  %v1421_v24 = vor.u32 %v1566_v22, %v1420_v21  ;;  %v1558_v25 = vld [vmem:[%s1847_s29 + $0x20c] sm:$0xf]  ;;  %v1348_v27 = vld [vmem:[%s1847_s29 + $0x180] sm:$0xf]  ;;  %v1541_v30 = vld [vmem:[%s1847_s29 + $0x184] sm:$0xf] }
  0x6c   : > { %v1422_v26 = vld [vmem:[%s1847_s29 + $0x248] sm:$0xf0]  ;;  %v1549_v29 = vld [vmem:[%s1847_s29 + $0x1bc] sm:$0xf0]  ;;  %v1350_v31 = vld [vmem:[%s1847_s29 + $0x1c0] sm:$0xf0] }
  0x6d   : > { %846 = vmatpush.bf16.msra.mxu0 %v1413_v19  ;;  %v1425_v28 = vor.u32 %v1558_v25, %v1422_v26  ;;  %859 = vmatpush.bf16.msra.mxu1 %v1417_v23  ;;  %v1349_v32 = vor.u32 %v1549_v29, %v1348_v27  ;;  %v1353_v33 = vor.u32 %v1541_v30, %v1350_v31  ;;  %v1356_v34 = vld [vmem:[%s1847_s29 + $0x188] sm:$0xf]  ;;  %v1542_v36 = vld [vmem:[%s1847_s29 + $0x18c] sm:$0xf]  ;;  %v1284_v39 = vld [vmem:[%s1847_s29 + $0x100] sm:$0xf] }
  0x6e   : > { %872 = vmatpush.bf16.msra.mxu2 %v1421_v24  ;;  %v1550_v35 = vld [vmem:[%s1847_s29 + $0x1c4] sm:$0xf0]  ;;  %v1358_v38 = vld [vmem:[%s1847_s29 + $0x1c8] sm:$0xf0]  ;;  %v1533_v40 = vld [vmem:[%s1847_s29 + $0x13c] sm:$0xf0] }
  0x6f   : > { %885 = vmatpush.bf16.msra.mxu3 %v1425_v28  ;;  %v1357_v37 = vor.u32 %v1550_v35, %v1356_v34  ;;  %v1361_v41 = vor.u32 %v1542_v36, %v1358_v38  ;;  %v1525_v42 = vld [vmem:[%s1847_s29 + $0x104] sm:$0xf]  ;;  %v1292_v44 = vld [vmem:[%s1847_s29 + $0x108] sm:$0xf]  ;;  %v1285_v45 = vor.u32 %v1533_v40, %v1284_v39  ;;  %v1526_v47 = vld [vmem:[%s1847_s29 + $0x10c] sm:$0xf] }
  0x70   : > { %v1286_v43 = vld [vmem:[%s1847_s29 + $0x140] sm:$0xf0]  ;;  %v1534_v46 = vld [vmem:[%s1847_s29 + $0x144] sm:$0xf0]  ;;  %v1294_v48 = vld [vmem:[%s1847_s29 + $0x148] sm:$0xf0] }
  0x71   : > { %847 = vmatpush.bf16.msra.mxu0 %v1349_v32  ;;  %860 = vmatpush.bf16.msra.mxu1 %v1353_v33  ;;  %v1289_v49 = vor.u32 %v1525_v42, %v1286_v43  ;;  %v1293_v50 = vor.u32 %v1534_v46, %v1292_v44  ;;  %v1220_v51 = vld [vmem:[%s1847_s29 + $0x80] sm:$0xf]  ;;  %v1509_v53 = vld [vmem:[%s1847_s29 + $0x84] sm:$0xf]  ;;  %v1297_v54 = vor.u32 %v1526_v47, %v1294_v48  ;;  %v1228_v56 = vld [vmem:[%s1847_s29 + $0x88] sm:$0xf] }
  0x72   : > { %873 = vmatpush.bf16.msra.mxu2 %v1357_v37  ;;  %v1517_v52 = vld [vmem:[%s1847_s29 + $0xbc] sm:$0xf0]  ;;  %v1222_v55 = vld [vmem:[%s1847_s29 + $0xc0] sm:$0xf0]  ;;  %v1518_v57 = vld [vmem:[%s1847_s29 + $0xc4] sm:$0xf0] }
  0x73   : > { %886 = vmatpush.bf16.msra.mxu3 %v1361_v41  ;;  %v1510_v58 = vld [vmem:[%s1847_s29 + $0x8c] sm:$0xf]  ;;  %v1221_v60 = vor.u32 %v1517_v52, %v1220_v51  ;;  %v1156_v61 = vld [vmem:[%s1847_s29] sm:$0xf]  ;;  %v1225_v63 = vor.u32 %v1509_v53, %v1222_v55  ;;  %v1229_v0 = vor.u32 %v1518_v57, %v1228_v56  ;;  %v1493_v1 = vld [vmem:[%s1847_s29 + $0x4] sm:$0xf] }
  0x74   : > { %v1230_v59 = vld [vmem:[%s1847_s29 + $0xc8] sm:$0xf0]  ;;  %v1501_v62 = vld [vmem:[%s1847_s29 + $0x3c] sm:$0xf0]  ;;  %v1158_v2 = vld [vmem:[%s1847_s29 + $0x40] sm:$0xf0] }
  0x75   : > { %848 = vmatpush.bf16.msra.mxu0 %v1285_v45  ;;  %861 = vmatpush.bf16.msra.mxu1 %v1289_v49  ;;  %v1164_v3 = vld [vmem:[%s1847_s29 + $0x8] sm:$0xf]  ;;  %v1233_v4 = vor.u32 %v1510_v58, %v1230_v59  ;;  %v1494_v6 = vld [vmem:[%s1847_s29 + $0xc] sm:$0xf]  ;;  %v1428_v8 = vld [vmem:[%s1847_s29 + $0x210] sm:$0xf]  ;;  %v1157_v11 = vor.u32 %v1501_v62, %v1156_v61  ;;  %v1161_v15 = vor.u32 %v1493_v1, %v1158_v2 }
  0x76   : > { %874 = vmatpush.bf16.msra.mxu2 %v1293_v50  ;;  %v1502_v5 = vld [vmem:[%s1847_s29 + $0x44] sm:$0xf0]  ;;  %v1166_v7 = vld [vmem:[%s1847_s29 + $0x48] sm:$0xf0]  ;;  %v1567_v9 = vld [vmem:[%s1847_s29 + $0x24c] sm:$0xf0] }
  0x77   : > { %887 = vmatpush.bf16.msra.mxu3 %v1297_v54  ;;  %v1559_v10 = vld [vmem:[%s1847_s29 + $0x214] sm:$0xf]  ;;  %v1436_v13 = vld [vmem:[%s1847_s29 + $0x218] sm:$0xf]  ;;  %v1165_v16 = vor.u32 %v1502_v5, %v1164_v3  ;;  %v1560_v17 = vld [vmem:[%s1847_s29 + $0x21c] sm:$0xf]  ;;  %v1169_v19 = vor.u32 %v1494_v6, %v1166_v7  ;;  %v1429_v20 = vor.u32 %v1567_v9, %v1428_v8 }
  0x78   : > { %v1430_v12 = vld [vmem:[%s1847_s29 + $0x250] sm:$0xf0]  ;;  %v1568_v14 = vld [vmem:[%s1847_s29 + $0x254] sm:$0xf0]  ;;  %v1438_v18 = vld [vmem:[%s1847_s29 + $0x258] sm:$0xf0] }
  0x79   : > { %849 = vmatpush.bf16.msra.mxu0 %v1221_v60  ;;  %862 = vmatpush.bf16.msra.mxu1 %v1225_v63  ;;  %v1433_v21 = vor.u32 %v1559_v10, %v1430_v12  ;;  %v1437_v22 = vor.u32 %v1568_v14, %v1436_v13  ;;  %v1900_v23 = vld [vmem:[%s2092_s0] sm:$0xf]  ;;  %v1364_v24 = vld [vmem:[%s1847_s29 + $0x190] sm:$0xf]  ;;  %v1543_v26 = vld [vmem:[%s1847_s29 + $0x194] sm:$0xf]  ;;  %v1441_v27 = vor.u32 %v1560_v17, %v1438_v18 }
  0x7a   : > { %875 = vmatpush.bf16.msra.mxu2 %v1229_v0  ;;  %v1551_v25 = vld [vmem:[%s1847_s29 + $0x1cc] sm:$0xf0]  ;;  %v1366_v28 = vld [vmem:[%s1847_s29 + $0x1d0] sm:$0xf0]  ;;  %v1372_v29 = vld [vmem:[%s1847_s29 + $0x198] sm:$0xf] }
  0x7b   : > { %888 = vmatpush.bf16.msra.mxu3 %v1233_v4  ;;  %v1552_v30 = vld [vmem:[%s1847_s29 + $0x1d4] sm:$0xf0]  ;;  %vm839_vm0 = vcmask 654336   ;;  %v1544_v31 = vld [vmem:[%s1847_s29 + $0x19c] sm:$0xf]  ;;  %v1365_v33 = vor.u32 %v1551_v25, %v1364_v24  ;;  %v1369_v34 = vor.u32 %v1543_v26, %v1366_v28  ;;  %v433_v60 = vld [vmem:[%s2094_s2] sm:$0xff] }
  0x7c   : > { %v1374_v32 = vld [vmem:[%s1847_s29 + $0x1d8] sm:$0xf0]  ;;  %v1373_v35 = vor.u32 %v1552_v30, %v1372_v29  ;;  %v1300_v36 = vld [vmem:[%s1847_s29 + $0x110] sm:$0xf]  ;;  %v1527_v38 = vld [vmem:[%s1847_s29 + $0x114] sm:$0xf] }
  0x7d   : > { %850 = vmatpush.bf16.msra.mxu0 %v1157_v11  ;;  %863 = vmatpush.bf16.msra.mxu1 %v1161_v15  ;;  %v1535_v37 = vld [vmem:[%s1847_s29 + $0x14c] sm:$0xf0]  ;;  %v1377_v39 = vor.u32 %v1544_v31, %v1374_v32  ;;  %v1302_v40 = vld [vmem:[%s1847_s29 + $0x150] sm:$0xf0]  ;;  %v1308_v41 = vld [vmem:[%s1847_s29 + $0x118] sm:$0xf] }
  0x7e   : > { %876 = vmatpush.bf16.msra.mxu2 %v1165_v16  ;;  %v1536_v42 = vld [vmem:[%s1847_s29 + $0x154] sm:$0xf0]  ;;  %v1528_v43 = vld [vmem:[%s1847_s29 + $0x11c] sm:$0xf]  ;;  %v1301_v45 = vor.u32 %v1535_v37, %v1300_v36  ;;  %v1305_v46 = vor.u32 %v1527_v38, %v1302_v40  ;;  %v1236_v48 = vld [vmem:[%s1847_s29 + $0x90] sm:$0xf] }
  0x7f   : > { %889 = vmatpush.bf16.msra.mxu3 %v1169_v19  ;;  %v1310_v44 = vld [vmem:[%s1847_s29 + $0x158] sm:$0xf0]  ;;  %v1309_v47 = vor.u32 %v1536_v42, %v1308_v41  ;;  %v1519_v49 = vld [vmem:[%s1847_s29 + $0xcc] sm:$0xf0]  ;;  %v1511_v50 = vld [vmem:[%s1847_s29 + $0x94] sm:$0xf] }
  0x80   : > { %1474 = vmatmul.msk.bf16.vlgmr.msra.gmra.mxu0 %vm839_vm0, %v1900_v23  ;;  %1475 = vmatmul.msk.bf16.vlgmr.msra.gmra.mxu1 %vm839_vm0, %v1900_v23  ;;  %v1313_v51 = vor.u32 %v1528_v43, %v1310_v44  ;;  %v1238_v52 = vld [vmem:[%s1847_s29 + $0xd0] sm:$0xf0]  ;;  %v1244_v53 = vld [vmem:[%s1847_s29 + $0x98] sm:$0xf]  ;;  %v1512_v55 = vld [vmem:[%s1847_s29 + $0x9c] sm:$0xf]  ;;  %v1237_v57 = vor.u32 %v1519_v49, %v1236_v48 }
  0x81   : > { %898 = vmatpush.bf16.msrb.mxu0 %v1429_v20  ;;  %911 = vmatpush.bf16.msrb.mxu1 %v1433_v21  ;;  %v1520_v54 = vld [vmem:[%s1847_s29 + $0xd4] sm:$0xf0]  ;;  %v1246_v56 = vld [vmem:[%s1847_s29 + $0xd8] sm:$0xf0]  ;;  %v1172_v58 = vld [vmem:[%s1847_s29 + $0x10] sm:$0xf]  ;;  %v1241_v61 = vor.u32 %v1511_v50, %v1238_v52 }
  0x82   : > { %924 = vmatpush.bf16.msrb.mxu2 %v1437_v22  ;;  %1477 = vmatmul.msk.bf16.vlgmr.msra.gmra.mxu3 %vm839_vm0, %v1900_v23  ;;  %v1503_v59 = vld [vmem:[%s1847_s29 + $0x4c] sm:$0xf0]  ;;  %v1245_v62 = vor.u32 %v1520_v54, %v1244_v53  ;;  %v1495_v63 = vld [vmem:[%s1847_s29 + $0x14] sm:$0xf]  ;;  %v1180_v1 = vld [vmem:[%s1847_s29 + $0x18] sm:$0xf]  ;;  %v1249_v2 = vor.u32 %v1512_v55, %v1246_v56 }
  0x83   : > { %937 = vmatpush.bf16.msrb.mxu3 %v1441_v27  ;;  %1476 = vmatmul.msk.bf16.vlgmr.msra.gmra.mxu2 %vm839_vm0, %v1900_v23  ;;  %v1174_v0 = vld [vmem:[%s1847_s29 + $0x50] sm:$0xf0]  ;;  %v1504_v3 = vld [vmem:[%s1847_s29 + $0x54] sm:$0xf0]  ;;  %v1496_v4 = vld [vmem:[%s1847_s29 + $0x1c] sm:$0xf]  ;;  %v1173_v10 = vor.u32 %v1503_v59, %v1172_v58 }
  0x84   : > { %v1182_v5 = vld [vmem:[%s1847_s29 + $0x58] sm:$0xf0]  ;;  %v1625_v6 = vmov 0   ;;  %v1444_v7 = vld [vmem:[%s1847_s29 + $0x220] sm:$0xf]  ;;  %v1177_v14 = vor.u32 %v1495_v63, %v1174_v0  ;;  %v1181_v15 = vor.u32 %v1504_v3, %v1180_v1  ;;  %s2100_s7 = smov (!%p346_p8, %s1152_s7), 783 }
  0x85   : > { %899 = vmatpush.bf16.msrb.mxu0 %v1365_v33  ;;  %912 = vmatpush.bf16.msrb.mxu1 %v1369_v34  ;;  %v1569_v8 = vld [vmem:[%s1847_s29 + $0x25c] sm:$0xf0]  ;;  %v1561_v9 = vld [vmem:[%s1847_s29 + $0x224] sm:$0xf]  ;;  %v1452_v12 = vld [vmem:[%s1847_s29 + $0x228] sm:$0xf]  ;;  %v1185_v18 = vor.u32 %v1496_v4, %v1182_v5 }
  0x86   : > { %925 = vmatpush.bf16.msrb.mxu2 %v1373_v35  ;;  %1600 = vset.pattern.permute.xlu0 %v1625_v6  ;;  %v1446_v11 = vld [vmem:[%s1847_s29 + $0x260] sm:$0xf0]  ;;  %v1570_v13 = vld [vmem:[%s1847_s29 + $0x264] sm:$0xf0]  ;;  %v1562_v16 = vld [vmem:[%s1847_s29 + $0x22c] sm:$0xf]  ;;  %v1445_v19 = vor.u32 %v1569_v8, %v1444_v7 }
  0x87   : > { %938 = vmatpush.bf16.msrb.mxu3 %v1377_v39  ;;  %436 = vperm.xlu0 %1600, %v433_v60   ;;  %v1454_v17 = vld [vmem:[%s1847_s29 + $0x268] sm:$0xf0]  ;;  %v1449_v20 = vor.u32 %v1561_v9, %v1446_v11  ;;  %v1453_v21 = vor.u32 %v1570_v13, %v1452_v12  ;;  %v1380_v22 = vld [vmem:[%s1847_s29 + $0x1a0] sm:$0xf]  ;;  %v1545_v25 = vld [vmem:[%s1847_s29 + $0x1a4] sm:$0xf] }
  0x88   : > { %v1553_v24 = vld [vmem:[%s1847_s29 + $0x1dc] sm:$0xf0]  ;;  %v1457_v26 = vor.u32 %v1562_v16, %v1454_v17  ;;  %v1382_v27 = vld [vmem:[%s1847_s29 + $0x1e0] sm:$0xf0]  ;;  %v1388_v28 = vld [vmem:[%s1847_s29 + $0x1a8] sm:$0xf] }
  0x89   : > { %900 = vmatpush.bf16.msrb.mxu0 %v1301_v45  ;;  %913 = vmatpush.bf16.msrb.mxu1 %v1305_v46  ;;  %v1554_v29 = vld [vmem:[%s1847_s29 + $0x1e4] sm:$0xf0]  ;;  %v1546_v30 = vld [vmem:[%s1847_s29 + $0x1ac] sm:$0xf]  ;;  %v1381_v32 = vor.u32 %v1553_v24, %v1380_v22  ;;  %v1385_v33 = vor.u32 %v1545_v25, %v1382_v27  ;;  %v1316_v35 = vld [vmem:[%s1847_s29 + $0x120] sm:$0xf] }
  0x8a   : > { %926 = vmatpush.bf16.msrb.mxu2 %v1309_v47  ;;  %v1390_v31 = vld [vmem:[%s1847_s29 + $0x1e8] sm:$0xf0]  ;;  %v1389_v34 = vor.u32 %v1554_v29, %v1388_v28  ;;  %v1537_v36 = vld [vmem:[%s1847_s29 + $0x15c] sm:$0xf0]  ;;  %v1529_v37 = vld [vmem:[%s1847_s29 + $0x124] sm:$0xf] }
  0x8b   : > { %939 = vmatpush.bf16.msrb.mxu3 %v1313_v51  ;;  %v1393_v38 = vor.u32 %v1546_v30, %v1390_v31  ;;  %v1318_v39 = vld [vmem:[%s1847_s29 + $0x160] sm:$0xf0]  ;;  %v1324_v40 = vld [vmem:[%s1847_s29 + $0x128] sm:$0xf]  ;;  %v1530_v42 = vld [vmem:[%s1847_s29 + $0x12c] sm:$0xf]  ;;  %v1317_v44 = vor.u32 %v1537_v36, %v1316_v35 }
  0x8c   : > { %v1538_v41 = vld [vmem:[%s1847_s29 + $0x164] sm:$0xf0]  ;;  %v1326_v43 = vld [vmem:[%s1847_s29 + $0x168] sm:$0xf0]  ;;  %v1321_v45 = vor.u32 %v1529_v37, %v1318_v39  ;;  %v1252_v47 = vld [vmem:[%s1847_s29 + $0xa0] sm:$0xf] }
  0x8d   : > { %901 = vmatpush.bf16.msrb.mxu0 %v1237_v57  ;;  %914 = vmatpush.bf16.msrb.mxu1 %v1241_v61  ;;  %v1325_v46 = vor.u32 %v1538_v41, %v1324_v40  ;;  %v1521_v48 = vld [vmem:[%s1847_s29 + $0xdc] sm:$0xf0]  ;;  %v1513_v49 = vld [vmem:[%s1847_s29 + $0xa4] sm:$0xf]  ;;  %v1329_v50 = vor.u32 %v1530_v42, %v1326_v43  ;;  %v1260_v52 = vld [vmem:[%s1847_s29 + $0xa8] sm:$0xf] }
  0x8e   : > { %927 = vmatpush.bf16.msrb.mxu2 %v1245_v62  ;;  %v1254_v51 = vld [vmem:[%s1847_s29 + $0xe0] sm:$0xf0]  ;;  %v1522_v53 = vld [vmem:[%s1847_s29 + $0xe4] sm:$0xf0]  ;;  %v1514_v54 = vld [vmem:[%s1847_s29 + $0xac] sm:$0xf]  ;;  %v1253_v56 = vor.u32 %v1521_v48, %v1252_v47 }
  0x8f   : > { %940 = vmatpush.bf16.msrb.mxu3 %v1249_v2  ;;  %v1262_v55 = vld [vmem:[%s1847_s29 + $0xe8] sm:$0xf0]  ;;  %v1188_v57 = vld [vmem:[%s1847_s29 + $0x20] sm:$0xf]  ;;  %v1257_v59 = vor.u32 %v1513_v49, %v1254_v51  ;;  %v1261_v60 = vor.u32 %v1522_v53, %v1260_v52  ;;  %v1497_v61 = vld [vmem:[%s1847_s29 + $0x24] sm:$0xf] }
  0x90   : > { %v1505_v58 = vld [vmem:[%s1847_s29 + $0x5c] sm:$0xf0]  ;;  %v1190_v62 = vld [vmem:[%s1847_s29 + $0x60] sm:$0xf0]  ;;  %v1196_v63 = vld [vmem:[%s1847_s29 + $0x28] sm:$0xf]  ;;  %v1265_v0 = vor.u32 %v1514_v54, %v1262_v55 }
  0x91   : > { %902 = vmatpush.bf16.msrb.mxu0 %v1173_v10  ;;  %915 = vmatpush.bf16.msrb.mxu1 %v1177_v14  ;;  %v1506_v1 = vld [vmem:[%s1847_s29 + $0x64] sm:$0xf0]  ;;  %v1498_v2 = vld [vmem:[%s1847_s29 + $0x2c] sm:$0xf]  ;;  %v1460_v4 = vld [vmem:[%s1847_s29 + $0x230] sm:$0xf]  ;;  %v1189_v7 = vor.u32 %v1505_v58, %v1188_v57  ;;  %v1193_v11 = vor.u32 %v1497_v61, %v1190_v62 }
  0x92   : > { %928 = vmatpush.bf16.msrb.mxu2 %v1181_v15  ;;  %v1198_v3 = vld [vmem:[%s1847_s29 + $0x68] sm:$0xf0]  ;;  %v1571_v5 = vld [vmem:[%s1847_s29 + $0x26c] sm:$0xf0]  ;;  %v1563_v6 = vld [vmem:[%s1847_s29 + $0x234] sm:$0xf]  ;;  %v1197_v12 = vor.u32 %v1506_v1, %v1196_v63 }
  0x93   : > { %941 = vmatpush.bf16.msrb.mxu3 %v1185_v18  ;;  %v1462_v8 = vld [vmem:[%s1847_s29 + $0x270] sm:$0xf0]  ;;  %v1468_v9 = vld [vmem:[%s1847_s29 + $0x238] sm:$0xf]  ;;  %v1564_v13 = vld [vmem:[%s1847_s29 + $0x23c] sm:$0xf]  ;;  %v1201_v15 = vor.u32 %v1498_v2, %v1198_v3  ;;  %v1461_v16 = vor.u32 %v1571_v5, %v1460_v4 }
  0x94   : > { %1478 = vmatmul.msk.bf16.vlgmr.msrb.gmra.mxu0 %vm839_vm0, %v1900_v23  ;;  %1479 = vmatmul.msk.bf16.vlgmr.msrb.gmra.mxu1 %vm839_vm0, %v1900_v23  ;;  %v1572_v10 = vld [vmem:[%s1847_s29 + $0x274] sm:$0xf0]  ;;  %v1470_v14 = vld [vmem:[%s1847_s29 + $0x278] sm:$0xf0]  ;;  %v1465_v17 = vor.u32 %v1563_v6, %v1462_v8  ;;  %v1398_v24 = vld [vmem:[%s1847_s29 + $0x1f0] sm:$0xf0] }
  0x95   : > { %950 = vmatpush.bf16.msra.mxu0 %v1445_v19  ;;  %963 = vmatpush.bf16.msra.mxu1 %v1449_v20  ;;  %v1469_v18 = vor.u32 %v1572_v10, %v1468_v9  ;;  %v1396_v19 = vld [vmem:[%s1847_s29 + $0x1b0] sm:$0xf]  ;;  %v1473_v22 = vor.u32 %v1564_v13, %v1470_v14  ;;  %v1404_v25 = vld [vmem:[%s1847_s29 + $0x1b8] sm:$0xf]  ;;  %v1548_v27 = vld [vmem:[%s1847_s29 + $0x1bc] sm:$0xf] }
  0x96   : > { %976 = vmatpush.bf16.msra.mxu2 %v1453_v21  ;;  %1481 = vmatmul.msk.bf16.vlgmr.msrb.gmra.mxu3 %vm839_vm0, %v1900_v23  ;;  %v1555_v20 = vld [vmem:[%s1847_s29 + $0x1ec] sm:$0xf0]  ;;  %v1547_v21 = vld [vmem:[%s1847_s29 + $0x1b4] sm:$0xf]  ;;  %v1406_v28 = vld [vmem:[%s1847_s29 + $0x1f8] sm:$0xf0] }
  0x97   : > { %989 = vmatpush.bf16.msra.mxu3 %v1457_v26  ;;  %1480 = vmatmul.msk.bf16.vlgmr.msrb.gmra.mxu2 %vm839_vm0, %v1900_v23  ;;  %v1556_v26 = vld [vmem:[%s1847_s29 + $0x1f4] sm:$0xf0]  ;;  %v1397_v29 = vor.u32 %v1555_v20, %v1396_v19  ;;  %v1401_v30 = vor.u32 %v1547_v21, %v1398_v24  ;;  %v1409_v35 = vor.u32 %v1548_v27, %v1406_v28  ;;  %v1334_v36 = vld [vmem:[%s1847_s29 + $0x170] sm:$0xf0]  ;;  %v1532_v39 = vld [vmem:[%s1847_s29 + $0x13c] sm:$0xf] }
  0x98   : > { %v1405_v31 = vor.u32 %v1556_v26, %v1404_v25  ;;  %v1340_v37 = vld [vmem:[%s1847_s29 + $0x138] sm:$0xf]  ;;  %v1342_v40 = vld [vmem:[%s1847_s29 + $0x178] sm:$0xf0]  ;;  %v1270_v48 = vld [vmem:[%s1847_s29 + $0xf0] sm:$0xf0] }
  0x99   : > { %951 = vmatpush.bf16.msra.mxu0 %v1381_v32  ;;  %964 = vmatpush.bf16.msra.mxu1 %v1385_v33  ;;  %v1332_v32 = vld [vmem:[%s1847_s29 + $0x130] sm:$0xf]  ;;  %v1345_v47 = vor.u32 %v1532_v39, %v1342_v40  ;;  %v1276_v49 = vld [vmem:[%s1847_s29 + $0xb8] sm:$0xf]  ;;  %v1516_v51 = vld [vmem:[%s1847_s29 + $0xbc] sm:$0xf] }
  0x9a   : > { %977 = vmatpush.bf16.msra.mxu2 %v1389_v34  ;;  %v1539_v33 = vld [vmem:[%s1847_s29 + $0x16c] sm:$0xf0]  ;;  %v1531_v34 = vld [vmem:[%s1847_s29 + $0x134] sm:$0xf]  ;;  %v1278_v52 = vld [vmem:[%s1847_s29 + $0xf8] sm:$0xf0] }
  0x9b   : > { %990 = vmatpush.bf16.msra.mxu3 %v1393_v38  ;;  %v1540_v38 = vld [vmem:[%s1847_s29 + $0x174] sm:$0xf0]  ;;  %v1333_v41 = vor.u32 %v1539_v33, %v1332_v32  ;;  %v1337_v42 = vor.u32 %v1531_v34, %v1334_v36  ;;  %v1507_v57 = vld [vmem:[%s1847_s29 + $0x6c] sm:$0xf0]  ;;  %v1499_v58 = vld [vmem:[%s1847_s29 + $0x34] sm:$0xf] }
  0x9c   : > { %v1341_v43 = vor.u32 %v1540_v38, %v1340_v37  ;;  %v1212_v61 = vld [vmem:[%s1847_s29 + $0x38] sm:$0xf]  ;;  %v1500_v63 = vld [vmem:[%s1847_s29 + $0x3c] sm:$0xf]  ;;  %s1153_s8 = sshll.u32 %s2100_s7, 2 }
  0x9d   : > { %952 = vmatpush.bf16.msra.mxu0 %v1317_v44  ;;  %965 = vmatpush.bf16.msra.mxu1 %v1321_v45  ;;  %v1268_v44 = vld [vmem:[%s1847_s29 + $0xb0] sm:$0xf]  ;;  %v1508_v62 = vld [vmem:[%s1847_s29 + $0x74] sm:$0xf0]  ;;  %s2058_s11 = scalar_lea.vmem %s2095_s3, %s1153_s8 }
  0x9e   : > { %978 = vmatpush.bf16.msra.mxu2 %v1325_v46  ;;  %v1523_v45 = vld [vmem:[%s1847_s29 + $0xec] sm:$0xf0]  ;;  %v1515_v46 = vld [vmem:[%s1847_s29 + $0xb4] sm:$0xf]  ;;  %v1213_v3 = vor.u32 %v1508_v62, %v1212_v61 }
  0x9f   : > { %991 = vmatpush.bf16.msra.mxu3 %v1329_v50  ;;  %v1524_v50 = vld [vmem:[%s1847_s29 + $0xf4] sm:$0xf0]  ;;  %v1269_v53 = vor.u32 %v1523_v45, %v1268_v44  ;;  %v1273_v54 = vor.u32 %v1515_v46, %v1270_v48 }
  0xa0   : > { %v1277_v55 = vor.u32 %v1524_v50, %v1276_v49 }
  0xa1   : > { %953 = vmatpush.bf16.msra.mxu0 %v1253_v56  ;;  %966 = vmatpush.bf16.msra.mxu1 %v1257_v59  ;;  %v1204_v56 = vld [vmem:[%s1847_s29 + $0x30] sm:$0xf]  ;;  %v1281_v59 = vor.u32 %v1516_v51, %v1278_v52 }
  0xa2   : > { %979 = vmatpush.bf16.msra.mxu2 %v1261_v60  ;;  %v1206_v60 = vld [vmem:[%s1847_s29 + $0x70] sm:$0xf0]  ;;  %v1205_v1 = vor.u32 %v1507_v57, %v1204_v56 }
  0xa3   : > { %992 = vmatpush.bf16.msra.mxu3 %v1265_v0  ;;  %v1214_v0 = vld [vmem:[%s1847_s29 + $0x78] sm:$0xf0]  ;;  %v1209_v2 = vor.u32 %v1499_v58, %v1206_v60 }
  0xa4   : > { %v1217_v4 = vor.u32 %v1500_v63, %v1214_v0 }
  0xa5   : > { %954 = vmatpush.bf16.msra.mxu0 %v1189_v7  ;;  %967 = vmatpush.bf16.msra.mxu1 %v1193_v11 }
  0xa6   : > { %980 = vmatpush.bf16.msra.mxu2 %v1197_v12 }
  0xa7   : > { %993 = vmatpush.bf16.msra.mxu3 %v1201_v15 }
  0xa8   : > { %1482 = vmatmul.msk.bf16.vlgmr.msra.gmra.mxu0 %vm839_vm0, %v1900_v23  ;;  %1483 = vmatmul.msk.bf16.vlgmr.msra.gmra.mxu1 %vm839_vm0, %v1900_v23 }
  0xa9   : > { %1002 = vmatpush.bf16.msrb.mxu0 %v1461_v16  ;;  %1015 = vmatpush.bf16.msrb.mxu1 %v1465_v17 }
  0xaa   : > { %1028 = vmatpush.bf16.msrb.mxu2 %v1469_v18  ;;  %1485 = vmatmul.msk.bf16.vlgmr.msra.gmra.mxu3 %vm839_vm0, %v1900_v23 }
  0xab   : > { %1041 = vmatpush.bf16.msrb.mxu3 %v1473_v22  ;;  %1484 = vmatmul.msk.bf16.vlgmr.msra.gmra.mxu2 %vm839_vm0, %v1900_v23 }
  0xad   : > { %1003 = vmatpush.bf16.msrb.mxu0 %v1397_v29  ;;  %1016 = vmatpush.bf16.msrb.mxu1 %v1401_v30 }
  0xae   : > { %1029 = vmatpush.bf16.msrb.mxu2 %v1405_v31 }
  0xaf   : > { %1042 = vmatpush.bf16.msrb.mxu3 %v1409_v35 }
  0xb1   : > { %1004 = vmatpush.bf16.msrb.mxu0 %v1333_v41  ;;  %1017 = vmatpush.bf16.msrb.mxu1 %v1337_v42 }
  0xb2   : > { %1030 = vmatpush.bf16.msrb.mxu2 %v1341_v43 }
  0xb3   : > { %1043 = vmatpush.bf16.msrb.mxu3 %v1345_v47 }
  0xb5   : > { %1005 = vmatpush.bf16.msrb.mxu0 %v1269_v53  ;;  %1018 = vmatpush.bf16.msrb.mxu1 %v1273_v54 }
  0xb6   : > { %1031 = vmatpush.bf16.msrb.mxu2 %v1277_v55 }
  0xb7   : > { %1044 = vmatpush.bf16.msrb.mxu3 %v1281_v59 }
  0xb9   : > { %1006 = vmatpush.bf16.msrb.mxu0 %v1205_v1  ;;  %1019 = vmatpush.bf16.msrb.mxu1 %v1209_v2 }
  0xba   : > { %1032 = vmatpush.bf16.msrb.mxu2 %v1213_v3 }
  0xbb   : > { %1045 = vmatpush.bf16.msrb.mxu3 %v1217_v4 }
  0xbc   : > { %1486 = vmatmul.msk.bf16.vlgmr.msrb.gmra.mxu0 %vm839_vm0, %v1900_v23  ;;  %1487 = vmatmul.msk.bf16.vlgmr.msrb.gmra.mxu1 %vm839_vm0, %v1900_v23 }
  0xbd   : > { %1488 = vmatmul.msk.bf16.vlgmr.msrb.gmra.mxu2 %vm839_vm0, %v1900_v23 }
  0xbe   : > { %1489 = vmatmul.msk.bf16.vlgmr.msrb.gmra.mxu3 %vm839_vm0, %v1900_v23 }
  0xf9   : > { %v2051_v5 = vpop.permute.xlu0 %436 }
  0xfd   : > { %v852_v6 = vpop.f32.mrf.mxu0  ;;  %v865_v7 = vpop.f32.mrf.mxu1 }
  0xfe   : > { %v853_v8 = vadd.f32 %v852_v6, %v2051_v5  ;;  %v866_v9 = vadd.f32 %v865_v7, %v2051_v5 }
 0x100   : > { %v1051_v10 = vmax.f32 %v853_v8, 0.0  ;;  %v1052_v11 = vmax.f32 %v866_v9, 0.0 }
 0x102   : > { %v1067_v14 = vpack.c.bf16 %v1052_v11, %v1051_v10 }
 0x104   : > { %1075 = vst [vmem:[%s2058_s11] sm:$0xff] %v1067_v14 }
 0x105   : > { %v891_v23 = vpop.f32.mrf.mxu3  ;;  %v854_v16 = vpop.f32.mrf.mxu0 }
 0x106   : > { %v878_v12 = vpop.f32.mrf.mxu2  ;;  %v892_v15 = vadd.f32 %v891_v23, %v2051_v5  ;;  %v867_v18 = vpop.f32.mrf.mxu1 }
 0x107   : > { %v879_v13 = vadd.f32 %v878_v12, %v2051_v5 }
 0x108   : > { %v1054_v19 = vmax.f32 %v892_v15, 0.0 }
 0x109   : > { %v1053_v17 = vmax.f32 %v879_v13, 0.0 }
 0x10b   : > { %v1068_v20 = vpack.c.bf16 %v1054_v19, %v1053_v17 }
 0x10d   : > { %1076 = vst [vmem:[%s2058_s11 + $0x8] sm:$0xff] %v1068_v20  ;;  %v893_v22 = vpop.f32.mrf.mxu3 }
 0x10e   : > { %v880_v21 = vpop.f32.mrf.mxu2 }
 0x111   : > { %v904_v24 = vpop.f32.mrf.mxu0  ;;  %v917_v26 = vpop.f32.mrf.mxu1 }
 0x112   : > { %v905_v25 = vadd.f32 %v904_v24, %v2051_v5  ;;  %v918_v27 = vadd.f32 %v917_v26, %v2051_v5 }
 0x114   : > { %v1055_v28 = vmax.f32 %v905_v25, 0.0  ;;  %v1056_v29 = vmax.f32 %v918_v27, 0.0 }
 0x116   : > { %v1069_v30 = vpack.c.bf16 %v1056_v29, %v1055_v28 }
 0x118   : > { %1077 = vst [vmem:[%s2058_s11 + $0x10] sm:$0xff] %v1069_v30 }
 0x119   : > { %v943_v33 = vpop.f32.mrf.mxu3  ;;  %v906_v34 = vpop.f32.mrf.mxu0 }
 0x11a   : > { %v930_v31 = vpop.f32.mrf.mxu2  ;;  %v944_v35 = vadd.f32 %v943_v33, %v2051_v5  ;;  %v919_v36 = vpop.f32.mrf.mxu1 }
 0x11b   : > { %v931_v32 = vadd.f32 %v930_v31, %v2051_v5 }
 0x11c   : > { %v1058_v38 = vmax.f32 %v944_v35, 0.0 }
 0x11d   : > { %v1057_v37 = vmax.f32 %v931_v32, 0.0 }
 0x11f   : > { %v1070_v39 = vpack.c.bf16 %v1058_v38, %v1057_v37 }
 0x121   : > { %1078 = vst [vmem:[%s2058_s11 + $0x18] sm:$0xff] %v1070_v39  ;;  %v945_v41 = vpop.f32.mrf.mxu3 }
 0x122   : > { %v932_v40 = vpop.f32.mrf.mxu2 }
 0x125   : > { %v956_v42 = vpop.f32.mrf.mxu0  ;;  %v969_v44 = vpop.f32.mrf.mxu1 }
 0x126   : > { %v957_v43 = vadd.f32 %v956_v42, %v2051_v5  ;;  %v970_v45 = vadd.f32 %v969_v44, %v2051_v5 }
 0x128   : > { %v1059_v46 = vmax.f32 %v957_v43, 0.0  ;;  %v1060_v47 = vmax.f32 %v970_v45, 0.0 }
 0x12a   : > { %v1071_v48 = vpack.c.bf16 %v1060_v47, %v1059_v46 }
 0x12c   : > { %1079 = vst [vmem:[%s2058_s11 + $0x20] sm:$0xff] %v1071_v48 }
 0x12d   : > { %v995_v51 = vpop.f32.mrf.mxu3  ;;  %v958_v52 = vpop.f32.mrf.mxu0 }
 0x12e   : > { %v982_v49 = vpop.f32.mrf.mxu2  ;;  %v996_v53 = vadd.f32 %v995_v51, %v2051_v5  ;;  %v971_v54 = vpop.f32.mrf.mxu1 }
 0x12f   : > { %v983_v50 = vadd.f32 %v982_v49, %v2051_v5 }
 0x130   : > { %v1062_v56 = vmax.f32 %v996_v53, 0.0 }
 0x131   : > { %v1061_v55 = vmax.f32 %v983_v50, 0.0 }
 0x133   : > { %v1072_v57 = vpack.c.bf16 %v1062_v56, %v1061_v55 }
 0x135   : > { %1080 = vst [vmem:[%s2058_s11 + $0x28] sm:$0xff] %v1072_v57  ;;  %v997_v59 = vpop.f32.mrf.mxu3 }
 0x136   : > { %v984_v58 = vpop.f32.mrf.mxu2 }
 0x139   : > { %v1008_v60 = vpop.f32.mrf.mxu0  ;;  %v1021_v62 = vpop.f32.mrf.mxu1 }
 0x13a   : > { %v1009_v61 = vadd.f32 %v1008_v60, %v2051_v5  ;;  %v1022_v63 = vadd.f32 %v1021_v62, %v2051_v5 }
 0x13c   : > { %v1063_v0 = vmax.f32 %v1009_v61, 0.0  ;;  %v1064_v1 = vmax.f32 %v1022_v63, 0.0 }
 0x13e   : > { %v1073_v2 = vpack.c.bf16 %v1064_v1, %v1063_v0 }
 0x140   : > { %v1034_v3 = vpop.f32.mrf.mxu2  ;;  %1081 = vst [vmem:[%s2058_s11 + $0x30] sm:$0xff] %v1073_v2 }
 0x141   : > { %v1035_v4 = vadd.f32 %v1034_v3, %v2051_v5  ;;  %v1047_v6 = vpop.f32.mrf.mxu3  ;;  %v1010_v7 = vpop.f32.mrf.mxu0 }
 0x142   : > { %v1048_v8 = vadd.f32 %v1047_v6, %v2051_v5  ;;  %v1023_v9 = vpop.f32.mrf.mxu1 }
 0x143   : > { %v1065_v10 = vmax.f32 %v1035_v4, 0.0 }
 0x144   : > { %v1066_v11 = vmax.f32 %v1048_v8, 0.0 }
 0x146   : > { %v1074_v12 = vpack.c.bf16 %v1066_v11, %v1065_v10 }
 0x148   : > { %1082 = vst [vmem:[%s2058_s11 + $0x38] sm:$0xff] %v1074_v12  ;;  %v1036_v23 = vpop.f32.mrf.mxu2 }
 0x149   : > { %v1049_v13 = vpop.f32.mrf.mxu3 }
 0x14a PF: > { %p10_p9 = scmp.ge.s32.totalorder %s1663_s16, 51   ;;  %s2096_s12 = smov %s1619_s13 }
 0x14b   : > { %s2097_s13 = smov %s1672_s19  ;;  %s2098_s14 = smov %s1663_s16 }
 0x14c   :  { %12 = sbr.rel (!%p10_p9) target bundleno = 2 (0x2), region = 90 }

// kernel: lenet_forward.6
= control target key start
LH: loop header
LB: loop body
LE: loop exit
PB: predicated region body
PF: predicated region fallthrough
CT: control target
= control target key end

     0   :  { %s6532_s12 = smov 0   ;;  %s7996_s0 = inlined_call_operand.vmem [shape: bf16[2,6,224,224], index: 0, kind: input, shape index: {}]   ;;  %s7997_s1 = inlined_call_operand.vmem [shape: bf16[112,224], index: 1, kind: input, shape index: {}]   ;;  %s7998_s2 = inlined_call_operand.vmem [shape: bf16[224,112], index: 2, kind: input, shape index: {}]   ;;  %s7999_s3 = inlined_call_operand.vmem [shape: bf16[2,6,112,112], index: 3, kind: output, shape index: {}]  }
   0x1 LB: > { %s4469_s13 = sadd.s32 4294967295, %s6510_s12   ;;  %p4473_p0 = scmp.ge.s32.totalorder %s6510_s12, 1  ;;  %s6510_s12 = sphi %s6532_s12, %s13_s12  }
   0x2   : > { %p137_p1 = scmp.lt.s32.totalorder %s6510_s12, 3 }
   0x4   : > { %p138_p2 = pnand %p4473_p0, %p137_p1 }
   0x5   : > { %p161_p3 = scmp.lt.s32.totalorder (!%p138_p2), %s4469_s13, 1 }
   0x6   : > { %141 = sbr.rel (%p138_p2) target bundleno = 1715 (0x6b3), region = 32 }
   0xb   : > { %s8001_s13 = smov (!%p161_p3, %s4469_s13), 1  ;;  %vm417_vm0 = vcmask 785408   ;;  %vm864_vm1 = vcmask 912384  }
   0xc   : > { %s6494_s14 = smul.u32 1344, %s8001_s13 }
   0xd   : > { %s6495_s18 = smul.u32 336, %s8001_s13 }
   0xe   : > { %s6546_s17 = scalar_lea.vmem %s7996_s0, %s6494_s14 }
   0xf   : > { %v4590_v0 = vld [vmem:[%s6546_s17 + $0x70] sm:$0xf]  ;;  %v6187_v1 = vld [vmem:[%s6546_s17 + $0x74] sm:$0xf0]  ;;  %v6186_v2 = vld [vmem:[%s6546_s17 + $0x74] sm:$0xf]  ;;  %s6879_s25 = scalar_lea.vmem %s7999_s3, %s6495_s18 }
  0x10   : > { %v4591_v3 = vor.u32 %v6187_v1, %v4590_v0  ;;  %v4592_v4 = vld [vmem:[%s6546_s17 + $0x78] sm:$0xf0]  ;;  %v6198_v5 = vld [vmem:[%s6546_s17 + $0xd4] sm:$0xf]  ;;  %v4582_v9 = vld [vmem:[%s6546_s17 + $0x60] sm:$0xf] }
  0x11   : > { %v4640_v6 = vld [vmem:[%s6546_s17 + $0xd8] sm:$0xf0]  ;;  %v4595_v7 = vor.u32 %v6186_v2, %v4592_v4  ;;  %v6185_v10 = vld [vmem:[%s6546_s17 + $0x64] sm:$0xf0]  ;;  %v6184_v11 = vld [vmem:[%s6546_s17 + $0x64] sm:$0xf] }
  0x12   : > { %v4643_v8 = vor.u32 %v6198_v5, %v4640_v6  ;;  %439 = vmatpush.bf16.msra.mxu0 %v4591_v3  ;;  %v4583_v12 = vor.u32 %v6185_v10, %v4582_v9  ;;  %v4584_v13 = vld [vmem:[%s6546_s17 + $0x68] sm:$0xf0]  ;;  %v6196_v14 = vld [vmem:[%s6546_s17 + $0xc4] sm:$0xf]  ;;  %v4574_v18 = vld [vmem:[%s6546_s17 + $0x50] sm:$0xf] }
  0x13   : > { %v4632_v15 = vld [vmem:[%s6546_s17 + $0xc8] sm:$0xf0]  ;;  %527 = vmatpush.bf16.msra.mxu2 %v4595_v7  ;;  %v4587_v16 = vor.u32 %v6184_v11, %v4584_v13  ;;  %v6183_v19 = vld [vmem:[%s6546_s17 + $0x54] sm:$0xf0]  ;;  %v4638_v20 = vld [vmem:[%s6546_s17 + $0xd0] sm:$0xf] }
  0x14   : > { %573 = vmatpush.bf16.msra.mxu3 %v4643_v8  ;;  %v4635_v17 = vor.u32 %v6196_v14, %v4632_v15  ;;  %v6199_v21 = vld [vmem:[%s6546_s17 + $0xd4] sm:$0xf0]  ;;  %v6182_v22 = vld [vmem:[%s6546_s17 + $0x54] sm:$0xf]  ;;  %v4576_v23 = vld [vmem:[%s6546_s17 + $0x58] sm:$0xf0]  ;;  %v4575_v27 = vor.u32 %v6183_v19, %v4574_v18 }
  0x15   : > { %v4639_v24 = vor.u32 %v6199_v21, %v4638_v20  ;;  %v6194_v25 = vld [vmem:[%s6546_s17 + $0xb4] sm:$0xf]  ;;  %v4624_v26 = vld [vmem:[%s6546_s17 + $0xb8] sm:$0xf0]  ;;  %v4630_v28 = vld [vmem:[%s6546_s17 + $0xc0] sm:$0xf]  ;;  %v4579_v30 = vor.u32 %v6182_v22, %v4576_v23 }
  0x16   : > { %440 = vmatpush.bf16.msra.mxu0 %v4583_v12  ;;  %v6197_v29 = vld [vmem:[%s6546_s17 + $0xc4] sm:$0xf0]  ;;  %v4627_v31 = vor.u32 %v6194_v25, %v4624_v26  ;;  %v4566_v32 = vld [vmem:[%s6546_s17 + $0x40] sm:$0xf]  ;;  %v6180_v34 = vld [vmem:[%s6546_s17 + $0x44] sm:$0xf] }
  0x17   : > { %528 = vmatpush.bf16.msra.mxu2 %v4587_v16  ;;  %v6181_v33 = vld [vmem:[%s6546_s17 + $0x44] sm:$0xf0]  ;;  %485 = vmatpush.bf16.msra.mxu1 %v4639_v24  ;;  %v4631_v35 = vor.u32 %v6197_v29, %v4630_v28  ;;  %v4568_v36 = vld [vmem:[%s6546_s17 + $0x48] sm:$0xf0]  ;;  %v6192_v37 = vld [vmem:[%s6546_s17 + $0xa4] sm:$0xf] }
  0x18   : > { %574 = vmatpush.bf16.msra.mxu3 %v4635_v17  ;;  %v4616_v38 = vld [vmem:[%s6546_s17 + $0xa8] sm:$0xf0]  ;;  %v4622_v39 = vld [vmem:[%s6546_s17 + $0xb0] sm:$0xf]  ;;  %v6195_v40 = vld [vmem:[%s6546_s17 + $0xb4] sm:$0xf0]  ;;  %v4567_v41 = vor.u32 %v6181_v33, %v4566_v32  ;;  %v4571_v42 = vor.u32 %v6180_v34, %v4568_v36 }
  0x19   : > { %v4619_v43 = vor.u32 %v6192_v37, %v4616_v38  ;;  %v4558_v44 = vld [vmem:[%s6546_s17 + $0x30] sm:$0xf]  ;;  %v6179_v45 = vld [vmem:[%s6546_s17 + $0x34] sm:$0xf0]  ;;  %v6178_v46 = vld [vmem:[%s6546_s17 + $0x34] sm:$0xf]  ;;  %v4623_v47 = vor.u32 %v6195_v40, %v4622_v39 }
  0x1a   : > { %441 = vmatpush.bf16.msra.mxu0 %v4575_v27  ;;  %v4560_v48 = vld [vmem:[%s6546_s17 + $0x38] sm:$0xf0]  ;;  %v6190_v49 = vld [vmem:[%s6546_s17 + $0x94] sm:$0xf]  ;;  %v4614_v51 = vld [vmem:[%s6546_s17 + $0xa0] sm:$0xf]  ;;  %v4559_v53 = vor.u32 %v6179_v45, %v4558_v44 }
  0x1b   : > { %529 = vmatpush.bf16.msra.mxu2 %v4579_v30  ;;  %486 = vmatpush.bf16.msra.mxu1 %v4631_v35  ;;  %v4608_v50 = vld [vmem:[%s6546_s17 + $0x98] sm:$0xf0]  ;;  %v6193_v52 = vld [vmem:[%s6546_s17 + $0xa4] sm:$0xf0]  ;;  %v4563_v54 = vor.u32 %v6178_v46, %v4560_v48  ;;  %v4550_v56 = vld [vmem:[%s6546_s17 + $0x20] sm:$0xf] }
  0x1c   : > { %575 = vmatpush.bf16.msra.mxu3 %v4627_v31  ;;  %v4611_v55 = vor.u32 %v6190_v49, %v4608_v50  ;;  %v6177_v57 = vld [vmem:[%s6546_s17 + $0x24] sm:$0xf0]  ;;  %v6176_v58 = vld [vmem:[%s6546_s17 + $0x24] sm:$0xf]  ;;  %v4615_v59 = vor.u32 %v6193_v52, %v4614_v51  ;;  %v4552_v60 = vld [vmem:[%s6546_s17 + $0x28] sm:$0xf0] }
  0x1d   : > { %v6188_v61 = vld [vmem:[%s6546_s17 + $0x84] sm:$0xf]  ;;  %v4600_v62 = vld [vmem:[%s6546_s17 + $0x88] sm:$0xf0]  ;;  %v4606_v63 = vld [vmem:[%s6546_s17 + $0x90] sm:$0xf]  ;;  %v4551_v1 = vor.u32 %v6177_v57, %v4550_v56  ;;  %v4555_v3 = vor.u32 %v6176_v58, %v4552_v60 }
  0x1e   : > { %442 = vmatpush.bf16.msra.mxu0 %v4567_v41  ;;  %v6191_v0 = vld [vmem:[%s6546_s17 + $0x94] sm:$0xf0]  ;;  %v6158_v2 = vld [vmem:[%s7997_s1 + $0x4] sm:$0xf]  ;;  %v4603_v4 = vor.u32 %v6188_v61, %v4600_v62  ;;  %v4480_v5 = vld [vmem:[%s7997_s1 + $0x8] sm:$0xf0] }
  0x1f   : > { %530 = vmatpush.bf16.msra.mxu2 %v4571_v42  ;;  %487 = vmatpush.bf16.msra.mxu1 %v4623_v47  ;;  %v4542_v6 = vld [vmem:[%s6546_s17 + $0x10] sm:$0xf]  ;;  %v6175_v7 = vld [vmem:[%s6546_s17 + $0x14] sm:$0xf0]  ;;  %v4607_v8 = vor.u32 %v6191_v0, %v4606_v63  ;;  %v6174_v9 = vld [vmem:[%s6546_s17 + $0x14] sm:$0xf]  ;;  %v4483_v13 = vor.u32 %v6158_v2, %v4480_v5 }
  0x20   : > { %576 = vmatpush.bf16.msra.mxu3 %v4619_v43  ;;  %v4544_v10 = vld [vmem:[%s6546_s17 + $0x18] sm:$0xf0]  ;;  %v4598_v11 = vld [vmem:[%s6546_s17 + $0x80] sm:$0xf]  ;;  %v6189_v12 = vld [vmem:[%s6546_s17 + $0x84] sm:$0xf0]  ;;  %v4543_v14 = vor.u32 %v6175_v7, %v4542_v6 }
  0x21   : > { %v4547_v15 = vor.u32 %v6174_v9, %v4544_v10  ;;  %v4534_v16 = vld [vmem:[%s6546_s17] sm:$0xf]  ;;  %v6173_v17 = vld [vmem:[%s6546_s17 + $0x4] sm:$0xf0]  ;;  %v4599_v18 = vor.u32 %v6189_v12, %v4598_v11  ;;  %v6172_v19 = vld [vmem:[%s6546_s17 + $0x4] sm:$0xf] }
  0x22   : > { %443 = vmatpush.bf16.msra.mxu0 %v4559_v53  ;;  %v4536_v20 = vld [vmem:[%s6546_s17 + $0x8] sm:$0xf0]  ;;  %v4535_v21 = vor.u32 %v6173_v17, %v4534_v16  ;;  %v4478_v22 = vld [vmem:[%s7997_s1] sm:$0xf]  ;;  %v6159_v23 = vld [vmem:[%s7997_s1 + $0x4] sm:$0xf0] }
  0x23   : > { %531 = vmatpush.bf16.msra.mxu2 %v4563_v54  ;;  %488 = vmatpush.bf16.msra.mxu1 %v4615_v59  ;;  %v4539_v24 = vor.u32 %v6172_v19, %v4536_v20  ;;  %v4479_v25 = vor.u32 %v6159_v23, %v4478_v22  ;;  %v6213_v26 = vld [vmem:[%s7998_s2 + $0x68] sm:$0xff]  ;;  %v6207_v27 = vld [vmem:[%s7998_s2 + $0x38] sm:$0xff]  ;;  %v6160_v28 = vld [vmem:[%s7997_s1 + $0x14] sm:$0xf] }
  0x24   : > { %577 = vmatpush.bf16.msra.mxu3 %v4611_v55  ;;  %v4488_v29 = vld [vmem:[%s7997_s1 + $0x18] sm:$0xf0]  ;;  %v4486_v31 = vld [vmem:[%s7997_s1 + $0x10] sm:$0xf]  ;;  %v6161_v32 = vld [vmem:[%s7997_s1 + $0x14] sm:$0xf0] }
  0x25   : > { %v4491_v30 = vor.u32 %v6160_v28, %v4488_v29  ;;  %v4487_v33 = vor.u32 %v6161_v32, %v4486_v31  ;;  %v6212_v34 = vld [vmem:[%s7998_s2 + $0x60] sm:$0xff]  ;;  %v6206_v35 = vld [vmem:[%s7998_s2 + $0x30] sm:$0xff]  ;;  %v4496_v37 = vld [vmem:[%s7997_s1 + $0x28] sm:$0xf0] }
  0x26   : > { %444 = vmatpush.bf16.msra.mxu0 %v4551_v1  ;;  %v6162_v36 = vld [vmem:[%s7997_s1 + $0x24] sm:$0xf]  ;;  %v4494_v39 = vld [vmem:[%s7997_s1 + $0x20] sm:$0xf]  ;;  %v6163_v40 = vld [vmem:[%s7997_s1 + $0x24] sm:$0xf0] }
  0x27   : > { %532 = vmatpush.bf16.msra.mxu2 %v4555_v3  ;;  %489 = vmatpush.bf16.msra.mxu1 %v4607_v8  ;;  %v4499_v38 = vor.u32 %v6162_v36, %v4496_v37  ;;  %v4495_v41 = vor.u32 %v6163_v40, %v4494_v39  ;;  %v6205_v42 = vld [vmem:[%s7998_s2 + $0x28] sm:$0xff]  ;;  %v6211_v43 = vld [vmem:[%s7998_s2 + $0x58] sm:$0xff]  ;;  %v6164_v44 = vld [vmem:[%s7997_s1 + $0x34] sm:$0xf] }
  0x28   : > { %578 = vmatpush.bf16.msra.mxu3 %v4603_v4  ;;  %v4504_v45 = vld [vmem:[%s7997_s1 + $0x38] sm:$0xf0]  ;;  %v4502_v47 = vld [vmem:[%s7997_s1 + $0x30] sm:$0xf]  ;;  %v6165_v48 = vld [vmem:[%s7997_s1 + $0x34] sm:$0xf0] }
  0x29   : > { %v4507_v46 = vor.u32 %v6164_v44, %v4504_v45  ;;  %v4503_v49 = vor.u32 %v6165_v48, %v4502_v47  ;;  %v6204_v50 = vld [vmem:[%s7998_s2 + $0x20] sm:$0xff]  ;;  %v4512_v52 = vld [vmem:[%s7997_s1 + $0x48] sm:$0xf0]  ;;  %v6167_v55 = vld [vmem:[%s7997_s1 + $0x44] sm:$0xf0] }
  0x2a   : > { %445 = vmatpush.bf16.msra.mxu0 %v4543_v14  ;;  %v6166_v51 = vld [vmem:[%s7997_s1 + $0x44] sm:$0xf]  ;;  %v4510_v54 = vld [vmem:[%s7997_s1 + $0x40] sm:$0xf]  ;;  %v6210_v56 = vld [vmem:[%s7998_s2 + $0x50] sm:$0xff] }
  0x2b   : > { %4651 = vmatmul.msk.bf16.vlgmr.msra.gmra.mxu3 %vm417_vm0, %v4483_v13  ;;  %533 = vmatpush.bf16.msra.mxu2 %v4547_v15  ;;  %v4515_v53 = vor.u32 %v6166_v51, %v4512_v52  ;;  %v6203_v57 = vld [vmem:[%s7998_s2 + $0x18] sm:$0xff]  ;;  %v4511_v58 = vor.u32 %v6167_v55, %v4510_v54  ;;  %v6209_v59 = vld [vmem:[%s7998_s2 + $0x48] sm:$0xff]  ;;  %v6202_v60 = vld [vmem:[%s7998_s2 + $0x10] sm:$0xff] }
  0x2c   : > { %490 = vmatpush.bf16.msra.mxu1 %v4599_v18  ;;  %808 = vmatpush.bf16.msrb.mxu3 %v6213_v26  ;;  %v6168_v61 = vld [vmem:[%s7997_s1 + $0x54] sm:$0xf]  ;;  %v4520_v62 = vld [vmem:[%s7997_s1 + $0x58] sm:$0xf0]  ;;  %v6201_v63 = vld [vmem:[%s7998_s2 + $0x8] sm:$0xff] }
  0x2d   : > { %v4523_v0 = vor.u32 %v6168_v61, %v4520_v62  ;;  %v4518_v1 = vld [vmem:[%s7997_s1 + $0x50] sm:$0xf]  ;;  %v6169_v2 = vld [vmem:[%s7997_s1 + $0x54] sm:$0xf0]  ;;  %v6170_v4 = vld [vmem:[%s7997_s1 + $0x64] sm:$0xf] }
  0x2e   : > { %446 = vmatpush.bf16.msra.mxu0 %v4535_v21  ;;  %v4519_v3 = vor.u32 %v6169_v2, %v4518_v1  ;;  %v4528_v5 = vld [vmem:[%s7997_s1 + $0x68] sm:$0xf0]  ;;  %v4526_v7 = vld [vmem:[%s7997_s1 + $0x60] sm:$0xf]  ;;  %v6171_v8 = vld [vmem:[%s7997_s1 + $0x64] sm:$0xf0] }
  0x2f   : > { %534 = vmatpush.bf16.msra.mxu2 %v4539_v24  ;;  %4644 = vmatmul.msk.bf16.vlgmr.msra.gmra.mxu1 %vm417_vm0, %v4483_v13  ;;  %v4531_v6 = vor.u32 %v6170_v4, %v4528_v5  ;;  %v4527_v9 = vor.u32 %v6171_v8, %v4526_v7  ;;  %v6208_v10 = vld [vmem:[%s7998_s2 + $0x40] sm:$0xff]  ;;  %v6254_v12 = vld [vmem:[%s6546_s17 + $0x1b4] sm:$0xf]  ;;  %v4913_v13 = vld [vmem:[%s6546_s17 + $0x1b8] sm:$0xf0] }
  0x30   : > { %762 = vmatpush.bf16.msrb.mxu1 %v6207_v27  ;;  %809 = vmatpush.bf16.msrb.mxu3 %v6212_v34  ;;  %v6200_v11 = vld [vmem:[%s7998_s2] sm:$0xff]  ;;  %v4916_v14 = vor.u32 %v6254_v12, %v4913_v13  ;;  %v4911_v15 = vld [vmem:[%s6546_s17 + $0x1b0] sm:$0xf]  ;;  %v6255_v16 = vld [vmem:[%s6546_s17 + $0x1b4] sm:$0xf0] }
  0x31   : > { %447 = vmatmul.bf16.vlgmr.msra.gmra.mxu0 %v4479_v25  ;;  %v6242_v17 = vld [vmem:[%s6546_s17 + $0x154] sm:$0xf]  ;;  %v4912_v18 = vor.u32 %v6255_v16, %v4911_v15  ;;  %v4865_v19 = vld [vmem:[%s6546_s17 + $0x158] sm:$0xf0]  ;;  %v4863_v24 = vld [vmem:[%s6546_s17 + $0x150] sm:$0xf] }
  0x32   : > { %535 = vmatmul.bf16.vlgmr.msra.gmra.mxu2 %v4479_v25  ;;  %v4868_v20 = vor.u32 %v6242_v17, %v4865_v19  ;;  %v6243_v25 = vld [vmem:[%s6546_s17 + $0x154] sm:$0xf0]  ;;  %v6252_v32 = vld [vmem:[%s6546_s17 + $0x1a4] sm:$0xf]  ;;  %v4857_v37 = vld [vmem:[%s6546_s17 + $0x148] sm:$0xf0] }
  0x33   : > { %1192 = vmatpush.bf16.msrb.mxu2 %v4912_v18  ;;  %v4864_v26 = vor.u32 %v6243_v25, %v4863_v24  ;;  %v6240_v34 = vld [vmem:[%s6546_s17 + $0x144] sm:$0xf]  ;;  %v6253_v39 = vld [vmem:[%s6546_s17 + $0x1a4] sm:$0xf0]  ;;  %v4849_v54 = vld [vmem:[%s6546_s17 + $0x138] sm:$0xf0] }
  0x34   : > { %763 = vmatpush.bf16.msrb.mxu1 %v6206_v35  ;;  %810 = vmatpush.bf16.msrb.mxu3 %v6211_v43  ;;  %v4860_v40 = vor.u32 %v6240_v34, %v4857_v37  ;;  %v4855_v43 = vld [vmem:[%s6546_s17 + $0x140] sm:$0xf]  ;;  %v6241_v44 = vld [vmem:[%s6546_s17 + $0x144] sm:$0xf0]  ;;  %v6250_v62 = vld [vmem:[%s6546_s17 + $0x194] sm:$0xf] }
  0x35   : > { %1146 = vmatpush.bf16.msrb.mxu0 %v4864_v26  ;;  %v6239_v2 = vld [vmem:[%s6546_s17 + $0x134] sm:$0xf0]  ;;  %v4895_v12 = vld [vmem:[%s6546_s17 + $0x190] sm:$0xf]  ;;  %v6236_v15 = vld [vmem:[%s6546_s17 + $0x124] sm:$0xf] }
  0x36   : > { %v6251_v13 = vld [vmem:[%s6546_s17 + $0x194] sm:$0xf0]  ;;  %v4841_v16 = vld [vmem:[%s6546_s17 + $0x128] sm:$0xf0]  ;;  %v4839_v24 = vld [vmem:[%s6546_s17 + $0x120] sm:$0xf] }
  0x37   : > { %v4844_v17 = vor.u32 %v6236_v15, %v4841_v16  ;;  %v6237_v25 = vld [vmem:[%s6546_s17 + $0x124] sm:$0xf0]  ;;  %v6248_v26 = vld [vmem:[%s6546_s17 + $0x184] sm:$0xf]  ;;  %v6230_v16 = vld [vmem:[%s6546_s17 + $0xf4] sm:$0xf] }
  0x38   : > { %764 = vmatpush.bf16.msrb.mxu1 %v6205_v42  ;;  %811 = vmatpush.bf16.msrb.mxu3 %v6210_v56 }
  0x3b   : > { %4652 = vmatmul.msk.bf16.gmra.mxu3 %vm417_vm0, %v4491_v30 }
  0x3c   : > { %765 = vmatpush.bf16.msrb.mxu1 %v6204_v50  ;;  %812 = vmatpush.bf16.msrb.mxu3 %v6209_v59 }
  0x3f   : > { %4645 = vmatmul.msk.bf16.gmra.mxu1 %vm417_vm0, %v4491_v30 }
  0x40   : > { %766 = vmatpush.bf16.msrb.mxu1 %v6203_v57  ;;  %813 = vmatpush.bf16.msrb.mxu3 %v6208_v10 }
  0x41   : > { %452 = vmatmul.bf16.gmra.mxu0 %v4487_v33 }
  0x42   : > { %540 = vmatmul.bf16.gmra.mxu2 %v4487_v33  ;;  %v4905_v33 = vld [vmem:[%s6546_s17 + $0x1a8] sm:$0xf0] }
  0x43   : > { %v4908_v36 = vor.u32 %v6252_v32, %v4905_v33 }
  0x44   : > { %767 = vmatpush.bf16.msrb.mxu1 %v6202_v60  ;;  %1280 = vmatpush.bf16.msra.mxu3 %v4916_v14  ;;  %v4896_v14 = vor.u32 %v6251_v13, %v4895_v12 }
  0x48   : > { %768 = vmatpush.bf16.msrb.mxu1 %v6201_v63  ;;  %1281 = vmatpush.bf16.msra.mxu3 %v4908_v36  ;;  %v4897_v63 = vld [vmem:[%s6546_s17 + $0x198] sm:$0xf0] }
  0x49   : > { %v4900_v1 = vor.u32 %v6250_v62, %v4897_v63  ;;  %v4881_v62 = vld [vmem:[%s6546_s17 + $0x178] sm:$0xf0]  ;;  %v6232_v63 = vld [vmem:[%s6546_s17 + $0x104] sm:$0xf] }
  0x4b   : > { %4653 = vmatmul.msk.bf16.gmra.mxu3 %vm417_vm0, %v4499_v38 }
  0x4c   : > { %769 = vmatpush.bf16.msrb.mxu1 %v6200_v11  ;;  %1282 = vmatpush.bf16.msra.mxu3 %v4900_v1  ;;  %v4825_v1 = vld [vmem:[%s6546_s17 + $0x108] sm:$0xf0] }
  0x4f   : > { %4646 = vmatmul.msk.bf16.gmra.mxu1 %vm417_vm0, %v4499_v38  ;;  %v4903_v38 = vld [vmem:[%s6546_s17 + $0x1a0] sm:$0xf] }
  0x50   : > { %1234 = vmatpush.bf16.msra.mxu1 %v4868_v20 }
  0x51   : > { %457 = vmatmul.bf16.gmra.mxu0 %v4495_v41 }
  0x52   : > { %545 = vmatmul.bf16.gmra.mxu2 %v4495_v41  ;;  %v4904_v41 = vor.u32 %v6253_v39, %v4903_v38  ;;  %v4887_v38 = vld [vmem:[%s6546_s17 + $0x180] sm:$0xf]  ;;  %v6249_v39 = vld [vmem:[%s6546_s17 + $0x184] sm:$0xf0] }
  0x54   : > { %1235 = vmatpush.bf16.msra.mxu1 %v4860_v40  ;;  %1193 = vmatpush.bf16.msrb.mxu2 %v4904_v41  ;;  %v6234_v40 = vld [vmem:[%s6546_s17 + $0x114] sm:$0xf]  ;;  %v4888_v41 = vor.u32 %v6249_v39, %v4887_v38  ;;  %v6228_v38 = vld [vmem:[%s6546_s17 + $0xe4] sm:$0xf]  ;;  %v4809_v39 = vld [vmem:[%s6546_s17 + $0xe8] sm:$0xf0] }
  0x58   : > { %1194 = vmatpush.bf16.msrb.mxu2 %v4896_v14 }
  0x5b   : > { %4654 = vmatmul.msk.bf16.gmra.mxu3 %vm417_vm0, %v4507_v46 }
  0x5c   : > { %1195 = vmatpush.bf16.msrb.mxu2 %v4888_v41 }
  0x5f   : > { %4647 = vmatmul.msk.bf16.gmra.mxu1 %vm417_vm0, %v4507_v46  ;;  %v4856_v46 = vor.u32 %v6241_v44, %v4855_v43 }
  0x61   : > { %462 = vmatmul.bf16.gmra.mxu0 %v4503_v49 }
  0x62   : > { %550 = vmatmul.bf16.gmra.mxu2 %v4503_v49  ;;  %1147 = vmatpush.bf16.msrb.mxu0 %v4856_v46 }
  0x6b   : > { %4655 = vmatmul.msk.bf16.gmra.mxu3 %vm417_vm0, %v4515_v53 }
  0x6f   : > { %4648 = vmatmul.msk.bf16.gmra.mxu1 %vm417_vm0, %v4515_v53  ;;  %v6238_v53 = vld [vmem:[%s6546_s17 + $0x134] sm:$0xf] }
  0x70   : > { %v4852_v55 = vor.u32 %v6238_v53, %v4849_v54 }
  0x71   : > { %467 = vmatmul.bf16.gmra.mxu0 %v4511_v58 }
  0x72   : > { %555 = vmatmul.bf16.gmra.mxu2 %v4511_v58  ;;  %1236 = vmatpush.bf16.msra.mxu1 %v4852_v55 }
  0x76   : > { %1237 = vmatpush.bf16.msra.mxu1 %v4844_v17  ;;  %v4817_v17 = vld [vmem:[%s6546_s17 + $0xf8] sm:$0xf0] }
  0x7b   : > { %4656 = vmatmul.msk.bf16.gmra.mxu3 %vm417_vm0, %v4523_v0 }
  0x7f   : > { %4649 = vmatmul.msk.bf16.gmra.mxu1 %vm417_vm0, %v4523_v0  ;;  %v4847_v0 = vld [vmem:[%s6546_s17 + $0x130] sm:$0xf] }
  0x80   : > { %v4848_v4 = vor.u32 %v6239_v2, %v4847_v0  ;;  %v4828_v2 = vor.u32 %v6232_v63, %v4825_v1 }
  0x81   : > { %472 = vmatmul.bf16.gmra.mxu0 %v4519_v3 }
  0x82   : > { %560 = vmatmul.bf16.gmra.mxu2 %v4519_v3  ;;  %1148 = vmatpush.bf16.msrb.mxu0 %v4848_v4  ;;  %v6247_v4 = vld [vmem:[%s6546_s17 + $0x174] sm:$0xf0] }
  0x8b   : > { %4657 = vmatmul.msk.bf16.gmra.mxu3 %vm417_vm0, %v4531_v6 }
  0x8f   : > { %4650 = vmatmul.msk.bf16.gmra.mxu1 %vm417_vm0, %v4531_v6 }
  0x91   : > { %477 = vmatmul.bf16.gmra.mxu0 %v4527_v9 }
  0x92   : > { %565 = vmatmul.bf16.gmra.mxu2 %v4527_v9 }
  0xac   : > { %v492_v21 = vpop.f32.mrf.mxu1 }
  0xae   : > { %v580_v22 = vpop.f32.mrf.mxu3  ;;  %v448_v23 = vpop.f32.mrf.mxu0 }
  0xaf   : > { %v493_v28 = vadd.f32 %v492_v21, %v448_v23 }
  0xb4   : > { %v494_v27 = vpop.f32.mrf.mxu1 }
  0xb5   : > { %v536_v29 = vpop.f32.mrf.mxu2 }
  0xb6   : > { %v582_v30 = vpop.f32.mrf.mxu3  ;;  %v450_v31 = vpop.f32.mrf.mxu0  ;;  %v581_v49 = vadd.f32 %v580_v22, %v536_v29 }
  0xb7   : > { %v495_v35 = vadd.f32 %v494_v27, %v450_v31  ;;  %v4840_v27 = vor.u32 %v6237_v25, %v4839_v24 }
  0xb9   : > { %v615_v42 = vpack.c.bf16 %v495_v35, %v493_v28  ;;  %v4889_v28 = vld [vmem:[%s6546_s17 + $0x188] sm:$0xf0]  ;;  %1149 = vmatpush.bf16.msrb.mxu0 %v4840_v27 }
  0xba   : > { %v4873_v27 = vld [vmem:[%s6546_s17 + $0x168] sm:$0xf0] }
  0xbb   : > { %770 = vmatmul.bf16.vlgmr.msrb.gmra.mxu1 %v615_v42  ;;  %v4833_v42 = vld [vmem:[%s6546_s17 + $0x118] sm:$0xf0] }
  0xbc   : > { %v497_v45 = vpop.f32.mrf.mxu1  ;;  %v4836_v43 = vor.u32 %v6234_v40, %v4833_v42  ;;  %v4807_v40 = vld [vmem:[%s6546_s17 + $0xe0] sm:$0xf] }
  0xbd   : > { %v538_v47 = vpop.f32.mrf.mxu2 }
  0xbe   : > { %v585_v48 = vpop.f32.mrf.mxu3  ;;  %v583_v50 = vadd.f32 %v582_v30, %v538_v47  ;;  %v453_v51 = vpop.f32.mrf.mxu0  ;;  %v4892_v30 = vor.u32 %v6248_v26, %v4889_v28  ;;  %1238 = vmatpush.bf16.msra.mxu1 %v4836_v43  ;;  %v6244_v26 = vld [vmem:[%s6546_s17 + $0x164] sm:$0xf] }
  0xbf   : > { %v498_v57 = vadd.f32 %v497_v45, %v453_v51  ;;  %v4876_v28 = vor.u32 %v6244_v26, %v4873_v27  ;;  %v4775_v26 = vld [vmem:[%s7997_s1 + $0x30] sm:$0xf]  ;;  %v6221_v27 = vld [vmem:[%s7997_s1 + $0x34] sm:$0xf0] }
  0xc0   : > { %v616_v52 = vpack.c.bf16 %v583_v50, %v581_v49  ;;  %1283 = vmatpush.bf16.msra.mxu3 %v4892_v30  ;;  %v4831_v49 = vld [vmem:[%s6546_s17 + $0x110] sm:$0xf]  ;;  %v6235_v50 = vld [vmem:[%s6546_s17 + $0x114] sm:$0xf0] }
  0xc1   : > { %v6231_v30 = vld [vmem:[%s6546_s17 + $0xf4] sm:$0xf0] }
  0xc2   : > { %4714 = vmatmul.msk.bf16.vlgmr.msrb.gmra.mxu3 %vm417_vm0, %v616_v52  ;;  %v4832_v52 = vor.u32 %v6235_v50, %v4831_v49  ;;  %1239 = vmatpush.bf16.msra.mxu1 %v4828_v2 }
  0xc4   : > { %v499_v56 = vpop.f32.mrf.mxu1  ;;  %1150 = vmatpush.bf16.msrb.mxu0 %v4832_v52 }
  0xc5   : > { %v541_v58 = vpop.f32.mrf.mxu2 }
  0xc6   : > { %v587_v59 = vpop.f32.mrf.mxu3  ;;  %v455_v60 = vpop.f32.mrf.mxu0  ;;  %v586_v8 = vadd.f32 %v585_v48, %v541_v58 }
  0xc7   : > { %v500_v61 = vadd.f32 %v499_v56, %v455_v60 }
  0xc9   : > { %v617_v3 = vpack.c.bf16 %v500_v61, %v498_v57  ;;  %v6246_v61 = vld [vmem:[%s6546_s17 + $0x174] sm:$0xf] }
  0xca   : > { %v4884_v0 = vor.u32 %v6246_v61, %v4881_v62  ;;  %v4761_v61 = vld [vmem:[%s7997_s1 + $0x18] sm:$0xf0] }
  0xcb   : > { %775 = vmatmul.bf16.gmra.mxu1 %v617_v3  ;;  %v4879_v3 = vld [vmem:[%s6546_s17 + $0x170] sm:$0xf] }
  0xcc   : > { %v502_v5 = vpop.f32.mrf.mxu1  ;;  %1284 = vmatpush.bf16.msra.mxu3 %v4884_v0 }
  0xcd   : > { %v543_v6 = vpop.f32.mrf.mxu2 }
  0xce   : > { %v590_v7 = vpop.f32.mrf.mxu3  ;;  %v588_v9 = vadd.f32 %v587_v59, %v543_v6  ;;  %v458_v10 = vpop.f32.mrf.mxu0  ;;  %v4880_v6 = vor.u32 %v6247_v4, %v4879_v3 }
  0xcf   : > { %v503_v19 = vadd.f32 %v502_v5, %v458_v10  ;;  %v4823_v5 = vld [vmem:[%s6546_s17 + $0x100] sm:$0xf] }
  0xd0   : > { %v618_v11 = vpack.c.bf16 %v588_v9, %v586_v8  ;;  %1196 = vmatpush.bf16.msrb.mxu2 %v4880_v6  ;;  %1285 = vmatpush.bf16.msra.mxu3 %v4876_v28  ;;  %v6217_v6 = vld [vmem:[%s7997_s1 + $0x14] sm:$0xf0]  ;;  %v4776_v28 = vor.u32 %v6221_v27, %v4775_v26 }
  0xd2   : > { %4715 = vmatmul.msk.bf16.gmra.mxu3 %vm417_vm0, %v618_v11 }
  0xd4   : > { %v504_v18 = vpop.f32.mrf.mxu1 }
  0xd5   : > { %v546_v20 = vpop.f32.mrf.mxu2 }
  0xd6   : > { %v592_v21 = vpop.f32.mrf.mxu3  ;;  %v460_v22 = vpop.f32.mrf.mxu0  ;;  %v591_v34 = vadd.f32 %v590_v7, %v546_v20  ;;  %v6233_v7 = vld [vmem:[%s6546_s17 + $0x104] sm:$0xf0] }
  0xd7   : > { %v505_v23 = vadd.f32 %v504_v18, %v460_v22  ;;  %v4824_v9 = vor.u32 %v6233_v7, %v4823_v5  ;;  %v4759_v5 = vld [vmem:[%s7997_s1 + $0x10] sm:$0xf] }
  0xd9   : > { %v619_v29 = vpack.c.bf16 %v505_v23, %v503_v19  ;;  %1151 = vmatpush.bf16.msrb.mxu0 %v4824_v9  ;;  %v4820_v19 = vor.u32 %v6230_v16, %v4817_v17  ;;  %v4767_v17 = vld [vmem:[%s7997_s1 + $0x20] sm:$0xf] }
  0xdb   : > { %780 = vmatmul.bf16.gmra.mxu1 %v619_v29  ;;  %v4815_v29 = vld [vmem:[%s6546_s17 + $0xf0] sm:$0xf] }
  0xdc   : > { %v507_v31 = vpop.f32.mrf.mxu1  ;;  %1240 = vmatpush.bf16.msra.mxu1 %v4820_v19 }
  0xdd   : > { %v548_v32 = vpop.f32.mrf.mxu2 }
  0xde   : > { %v595_v33 = vpop.f32.mrf.mxu3  ;;  %v593_v35 = vadd.f32 %v592_v21, %v548_v32  ;;  %v463_v36 = vpop.f32.mrf.mxu0  ;;  %v4816_v32 = vor.u32 %v6231_v30, %v4815_v29 }
  0xdf   : > { %v508_v45 = vadd.f32 %v507_v31, %v463_v36  ;;  %v4871_v31 = vld [vmem:[%s6546_s17 + $0x160] sm:$0xf] }
  0xe0   : > { %v620_v37 = vpack.c.bf16 %v593_v35, %v591_v34  ;;  %v6214_v34 = vld [vmem:[%s7997_s1 + $0x4] sm:$0xf]  ;;  %v4753_v35 = vld [vmem:[%s7997_s1 + $0x8] sm:$0xf0]  ;;  %1152 = vmatpush.bf16.msrb.mxu0 %v4816_v32 }
  0xe1   : > { %v4756_v43 = vor.u32 %v6214_v34, %v4753_v35  ;;  %v4785_v32 = vld [vmem:[%s7997_s1 + $0x48] sm:$0xf0] }
  0xe2   : > { %4716 = vmatmul.msk.bf16.gmra.mxu3 %vm417_vm0, %v620_v37 }
  0xe4   : > { %v509_v44 = vpop.f32.mrf.mxu1 }
  0xe5   : > { %v551_v46 = vpop.f32.mrf.mxu2 }
  0xe6   : > { %v597_v47 = vpop.f32.mrf.mxu3  ;;  %v465_v48 = vpop.f32.mrf.mxu0  ;;  %v596_v57 = vadd.f32 %v595_v33, %v551_v46  ;;  %v6245_v33 = vld [vmem:[%s6546_s17 + $0x164] sm:$0xf0]  ;;  %v4751_v46 = vld [vmem:[%s7997_s1] sm:$0xf] }
  0xe7   : > { %v510_v51 = vadd.f32 %v509_v44, %v465_v48  ;;  %v4872_v37 = vor.u32 %v6245_v33, %v4871_v31  ;;  %v4812_v44 = vor.u32 %v6228_v38, %v4809_v39  ;;  %v6222_v31 = vld [vmem:[%s7997_s1 + $0x44] sm:$0xf]  ;;  %v6262_v38 = vld [vmem:[%s7998_s2 + $0x30] sm:$0xff]  ;;  %v4783_v39 = vld [vmem:[%s7997_s1 + $0x40] sm:$0xf] }
  0xe8   : > { %v6874_v34 = vor.u32 %v6222_v31, %v4785_v32 }
  0xe9   : > { %v621_v53 = vpack.c.bf16 %v510_v51, %v508_v45  ;;  %v6229_v45 = vld [vmem:[%s6546_s17 + $0xe4] sm:$0xf0]  ;;  %1197 = vmatpush.bf16.msrb.mxu2 %v4872_v37  ;;  %1241 = vmatpush.bf16.msra.mxu1 %v4812_v44  ;;  %v6268_v37 = vld [vmem:[%s7998_s2 + $0x60] sm:$0xff] }
  0xea   : > { %v4808_v49 = vor.u32 %v6229_v45, %v4807_v40  ;;  %v6223_v40 = vld [vmem:[%s7997_s1 + $0x44] sm:$0xf0] }
  0xeb   : > { %785 = vmatmul.bf16.gmra.mxu1 %v621_v53 }
  0xec   : > { %v512_v54 = vpop.f32.mrf.mxu1  ;;  %4917 = vmatmul.msk.bf16.vlgmr.msrb.gmra.mxu2 %vm417_vm0, %v4756_v43  ;;  %1153 = vmatpush.bf16.msrb.mxu0 %v4808_v49  ;;  %v4793_v49 = vld [vmem:[%s7997_s1 + $0x58] sm:$0xf0] }
  0xed   : > { %v553_v55 = vpop.f32.mrf.mxu2 }
  0xee   : > { %v600_v56 = vpop.f32.mrf.mxu3  ;;  %v598_v58 = vadd.f32 %v597_v47, %v553_v55  ;;  %v468_v59 = vpop.f32.mrf.mxu0  ;;  %v6215_v47 = vld [vmem:[%s7997_s1 + $0x4] sm:$0xf0] }
  0xef   : > { %v513_v10 = vadd.f32 %v512_v54, %v468_v59  ;;  %v4752_v51 = vor.u32 %v6215_v47, %v4751_v46  ;;  %v6261_v46 = vld [vmem:[%s7998_s2 + $0x28] sm:$0xff] }
  0xf0   : > { %v622_v60 = vpack.c.bf16 %v598_v58, %v596_v57 }
  0xf1   : > { %1154 = vmatmul.bf16.vlgmr.msrb.gmra.mxu0 %v4752_v51 }
  0xf2   : > { %4717 = vmatmul.msk.bf16.gmra.mxu3 %vm417_vm0, %v622_v60  ;;  %v6216_v60 = vld [vmem:[%s7997_s1 + $0x14] sm:$0xf] }
  0xf3   : > { %v4764_v2 = vor.u32 %v6216_v60, %v4761_v61 }
  0xf4   : > { %v514_v8 = vpop.f32.mrf.mxu1 }
  0xf5   : > { %v556_v11 = vpop.f32.mrf.mxu2 }
  0xf6   : > { %v602_v12 = vpop.f32.mrf.mxu3  ;;  %v470_v13 = vpop.f32.mrf.mxu0  ;;  %v601_v21 = vadd.f32 %v600_v56, %v556_v11 }
  0xf7   : > { %v515_v14 = vadd.f32 %v514_v8, %v470_v13  ;;  %v4760_v8 = vor.u32 %v6217_v6, %v4759_v5  ;;  %v6266_v6 = vld [vmem:[%s7998_s2 + $0x50] sm:$0xff] }
  0xf9   : > { %v623_v15 = vpack.c.bf16 %v515_v14, %v513_v10  ;;  %v6218_v14 = vld [vmem:[%s7997_s1 + $0x24] sm:$0xf] }
  0xfb   : > { %790 = vmatmul.bf16.gmra.mxu1 %v623_v15  ;;  %v4769_v15 = vld [vmem:[%s7997_s1 + $0x28] sm:$0xf0] }
  0xfc   : > { %v517_v18 = vpop.f32.mrf.mxu1  ;;  %4918 = vmatmul.msk.bf16.gmra.mxu2 %vm417_vm0, %v4764_v2  ;;  %v4772_v16 = vor.u32 %v6218_v14, %v4769_v15  ;;  %v6259_v14 = vld [vmem:[%s7998_s2 + $0x18] sm:$0xff] }
  0xfd   : > { %v558_v20 = vpop.f32.mrf.mxu2 }
  0xfe   : > { %v603_v22 = vadd.f32 %v602_v12, %v558_v20  ;;  %v473_v23 = vpop.f32.mrf.mxu0  ;;  %v605_v24 = vpop.f32.mrf.mxu3  ;;  %v6269_v20 = vld [vmem:[%s7998_s2 + $0x68] sm:$0xff] }
  0xff   : > { %v518_v41 = vadd.f32 %v517_v18, %v473_v23  ;;  %v6219_v18 = vld [vmem:[%s7997_s1 + $0x24] sm:$0xf0]  ;;  %1515 = vmatpush.bf16.msra.mxu2 %v6269_v20 }
 0x100   : > { %v624_v25 = vpack.c.bf16 %v603_v22, %v601_v21  ;;  %v4768_v19 = vor.u32 %v6219_v18, %v4767_v17  ;;  %v6220_v21 = vld [vmem:[%s7997_s1 + $0x34] sm:$0xf]  ;;  %v4777_v22 = vld [vmem:[%s7997_s1 + $0x38] sm:$0xf0] }
 0x101   : > { %1159 = vmatmul.bf16.gmra.mxu0 %v4760_v8  ;;  %v4780_v23 = vor.u32 %v6220_v21, %v4777_v22 }
 0x102   : > { %4718 = vmatmul.msk.bf16.gmra.mxu3 %vm417_vm0, %v624_v25  ;;  %v6263_v25 = vld [vmem:[%s7998_s2 + $0x38] sm:$0xff] }
 0x103   : > { %1469 = vmatpush.bf16.msra.mxu0 %v6263_v25  ;;  %1516 = vmatpush.bf16.msra.mxu2 %v6268_v37 }
 0x104   : > { %v519_v36 = vpop.f32.mrf.mxu1 }
 0x105   : > { %v561_v42 = vpop.f32.mrf.mxu2 }
 0x106   : > { %v475_v48 = vpop.f32.mrf.mxu0  ;;  %v607_v52 = vpop.f32.mrf.mxu3  ;;  %v606_v56 = vadd.f32 %v605_v24, %v561_v42 }
 0x107   : > { %v520_v50 = vadd.f32 %v519_v36, %v475_v48  ;;  %1470 = vmatpush.bf16.msra.mxu0 %v6262_v38  ;;  %v6224_v48 = vld [vmem:[%s7997_s1 + $0x54] sm:$0xf] }
 0x109   : > { %v625_v53 = vpack.c.bf16 %v520_v50, %v518_v41  ;;  %v4784_v41 = vor.u32 %v6223_v40, %v4783_v39  ;;  %v6256_v39 = vld [vmem:[%s7998_s2] sm:$0xff] }
 0x10b   : > { %795 = vmatmul.bf16.gmra.mxu1 %v625_v53  ;;  %1471 = vmatpush.bf16.msra.mxu0 %v6261_v46 }
 0x10c   : > { %v522_v54 = vpop.f32.mrf.mxu1  ;;  %4919 = vmatmul.msk.bf16.gmra.mxu2 %vm417_vm0, %v4772_v16 }
 0x10d   : > { %v563_v55 = vpop.f32.mrf.mxu2 }
 0x10e   : > { %v608_v57 = vadd.f32 %v607_v52, %v563_v55  ;;  %v478_v58 = vpop.f32.mrf.mxu0  ;;  %v610_v62 = vpop.f32.mrf.mxu3  ;;  %v4791_v55 = vld [vmem:[%s7997_s1 + $0x50] sm:$0xf] }
 0x10f   : > { %v523_v0 = vadd.f32 %v522_v54, %v478_v58  ;;  %v6267_v54 = vld [vmem:[%s7998_s2 + $0x58] sm:$0xff] }
 0x110   : > { %v626_v59 = vpack.c.bf16 %v608_v57, %v606_v56  ;;  %v6225_v56 = vld [vmem:[%s7997_s1 + $0x54] sm:$0xf0]  ;;  %1517 = vmatpush.bf16.msra.mxu2 %v6267_v54  ;;  %v5200_v54 = vld [vmem:[%s6546_s17 + $0x298] sm:$0xf0] }
 0x111   : > { %1164 = vmatmul.bf16.gmra.mxu0 %v4768_v19  ;;  %v4792_v57 = vor.u32 %v6225_v56, %v4791_v55 }
 0x112   : > { %4719 = vmatmul.msk.bf16.gmra.mxu3 %vm417_vm0, %v626_v59 }
 0x114   : > { %v524_v63 = vpop.f32.mrf.mxu1  ;;  %1518 = vmatpush.bf16.msra.mxu2 %v6266_v6 }
 0x115   : > { %v566_v1 = vpop.f32.mrf.mxu2 }
 0x116   : > { %v480_v3 = vpop.f32.mrf.mxu0  ;;  %v612_v9 = vpop.f32.mrf.mxu3  ;;  %v611_v11 = vadd.f32 %v610_v62, %v566_v1  ;;  %v6260_v62 = vld [vmem:[%s7998_s2 + $0x20] sm:$0xff]  ;;  %v4801_v1 = vld [vmem:[%s7997_s1 + $0x68] sm:$0xf0] }
 0x117   : > { %v525_v4 = vadd.f32 %v524_v63, %v480_v3  ;;  %1472 = vmatpush.bf16.msra.mxu0 %v6260_v62  ;;  %v5198_v62 = vld [vmem:[%s6546_s17 + $0x290] sm:$0xf] }
 0x119   : > { %v627_v7 = vpack.c.bf16 %v525_v4, %v523_v0  ;;  %v6226_v0 = vld [vmem:[%s7997_s1 + $0x64] sm:$0xf] }
 0x11a   : > { %v4804_v3 = vor.u32 %v6226_v0, %v4801_v1  ;;  %v6298_v0 = vld [vmem:[%s6546_s17 + $0x234] sm:$0xf] }
 0x11b   : > { %800 = vmatmul.bf16.gmra.mxu1 %v627_v7  ;;  %v4799_v7 = vld [vmem:[%s7997_s1 + $0x60] sm:$0xf]  ;;  %1473 = vmatpush.bf16.msra.mxu0 %v6259_v14  ;;  %v6299_v14 = vld [vmem:[%s6546_s17 + $0x234] sm:$0xf0] }
 0x11c   : > { %4920 = vmatmul.msk.bf16.gmra.mxu2 %vm417_vm0, %v4780_v23 }
 0x11d   : > { %v568_v10 = vpop.f32.mrf.mxu2 }
 0x11e   : > { %v613_v12 = vadd.f32 %v612_v9, %v568_v10 }
 0x120   : > { %v628_v13 = vpack.c.bf16 %v613_v12, %v611_v11 }
 0x121   : > { %1169 = vmatmul.bf16.gmra.mxu0 %v4776_v28 }
 0x122   : > { %4720 = vmatmul.msk.bf16.gmra.mxu3 %vm417_vm0, %v628_v13 }
 0x12b   : > { %1242 = vmatmul.bf16.vlgmr.msra.gmra.mxu1 %v4752_v51  ;;  %v4796_v51 = vor.u32 %v6224_v48, %v4793_v49 }
 0x12c   : > { %4921 = vmatmul.msk.bf16.gmra.mxu2 %vm417_vm0, %v6874_v34 }
 0x131   : > { %1174 = vmatmul.bf16.gmra.mxu0 %v4784_v41 }
 0x132   : > { %4924 = vmatmul.msk.bf16.vlgmr.msra.gmra.mxu3 %vm417_vm0, %v4756_v43 }
 0x138   : > { %v771_v24 = vpop.f32.mrf.mxu1 }
 0x13b   : > { %1247 = vmatmul.bf16.gmra.mxu1 %v4760_v8  ;;  %v6227_v8 = vld [vmem:[%s7997_s1 + $0x64] sm:$0xf0] }
 0x13c   : > { %4922 = vmatmul.msk.bf16.gmra.mxu2 %vm417_vm0, %v4796_v51  ;;  %v4800_v9 = vor.u32 %v6227_v8, %v4799_v7 }
 0x140   : > { %v773_v29 = vpop.f32.mrf.mxu1 }
 0x141   : > { %1179 = vmatmul.bf16.gmra.mxu0 %v4792_v57 }
 0x142   : > { %4925 = vmatmul.msk.bf16.gmra.mxu3 %vm417_vm0, %v4764_v2 }
 0x145   : > { %v815_v30 = vpop.f32.mrf.mxu3 }
 0x146   : > { %v816_v33 = vadd.f32 %v815_v30, %v771_v24  ;;  %v6258_v24 = vld [vmem:[%s7998_s2 + $0x10] sm:$0xff]  ;;  %v6257_v30 = vld [vmem:[%s7998_s2 + $0x8] sm:$0xff] }
 0x147   : > { %1474 = vmatpush.bf16.msra.mxu0 %v6258_v24 }
 0x148   : > { %v850_v35 = vpack.c.bf16 %v816_v33, %v816_v33  ;;  %v776_v36 = vpop.f32.mrf.mxu1 }
 0x14a   : > { %865 = vst.msk [vmem:[%s6879_s25] sm:$0xf] %vm864_vm1, %v850_v35 }
 0x14b   : > { %1252 = vmatmul.bf16.gmra.mxu1 %v4768_v19  ;;  %1475 = vmatpush.bf16.msra.mxu0 %v6257_v30 }
 0x14c   : > { %4923 = vmatmul.msk.bf16.gmra.mxu2 %vm417_vm0, %v4804_v3 }
 0x14d   : > { %v817_v42 = vpop.f32.mrf.mxu3 }
 0x14e   : > { %v818_v43 = vadd.f32 %v817_v42, %v773_v29 }
 0x14f   : > { %1476 = vmatpush.bf16.msra.mxu0 %v6256_v39 }
 0x150   : > { %v851_v44 = vpack.c.bf16 %v818_v43, %v818_v43  ;;  %v778_v45 = vpop.f32.mrf.mxu1 }
 0x151   : > { %1184 = vmatmul.bf16.gmra.mxu0 %v4800_v9 }
 0x152   : > { %866 = vst.msk [vmem:[%s6879_s25 + $0x4] sm:$0xf] %vm864_vm1, %v851_v44  ;;  %4926 = vmatmul.msk.bf16.gmra.mxu3 %vm417_vm0, %v4772_v16 }
 0x155   : > { %v820_v47 = vpop.f32.mrf.mxu3 }
 0x156   : > { %v821_v50 = vadd.f32 %v820_v47, %v776_v36  ;;  %v6264_v36 = vld [vmem:[%s7998_s2 + $0x40] sm:$0xff] }
 0x158   : > { %v852_v52 = vpack.c.bf16 %v821_v50, %v821_v50  ;;  %v781_v53 = vpop.f32.mrf.mxu1 }
 0x15a   : > { %867 = vst.msk [vmem:[%s6879_s25 + $0x8] sm:$0xf] %vm864_vm1, %v852_v52 }
 0x15b   : > { %1257 = vmatmul.bf16.gmra.mxu1 %v4776_v28 }
 0x15d   : > { %v822_v58 = vpop.f32.mrf.mxu3 }
 0x15e   : > { %v823_v59 = vadd.f32 %v822_v58, %v778_v45 }
 0x160   : > { %v853_v60 = vpack.c.bf16 %v823_v59, %v823_v59  ;;  %v783_v61 = vpop.f32.mrf.mxu1 }
 0x162   : > { %868 = vst.msk [vmem:[%s6879_s25 + $0xc] sm:$0xf] %vm864_vm1, %v853_v60  ;;  %4927 = vmatmul.msk.bf16.gmra.mxu3 %vm417_vm0, %v4780_v23  ;;  %v6265_v23 = vld [vmem:[%s7998_s2 + $0x48] sm:$0xff] }
 0x163   : > { %1519 = vmatpush.bf16.msra.mxu2 %v6265_v23  ;;  %v6296_v23 = vld [vmem:[%s6546_s17 + $0x224] sm:$0xf] }
 0x165   : > { %v825_v63 = vpop.f32.mrf.mxu3 }
 0x166   : > { %v826_v2 = vadd.f32 %v825_v63, %v781_v53  ;;  %v6310_v53 = vld [vmem:[%s6546_s17 + $0x294] sm:$0xf]  ;;  %v6311_v63 = vld [vmem:[%s6546_s17 + $0x294] sm:$0xf0] }
 0x167   : > { %1520 = vmatpush.bf16.msra.mxu2 %v6264_v36 }
 0x168   : > { %v854_v4 = vpack.c.bf16 %v826_v2, %v826_v2  ;;  %v786_v5 = vpop.f32.mrf.mxu1  ;;  %v5199_v2 = vor.u32 %v6311_v63, %v5198_v62 }
 0x16a   : > { %869 = vst.msk [vmem:[%s6879_s25 + $0x10] sm:$0xf] %vm864_vm1, %v854_v4  ;;  %1899 = vmatpush.bf16.msrb.mxu3 %v5199_v2  ;;  %v6307_v2 = vld [vmem:[%s6546_s17 + $0x274] sm:$0xf0] }
 0x16b   : > { %1262 = vmatmul.bf16.gmra.mxu1 %v4784_v41 }
 0x16d   : > { %v827_v10 = vpop.f32.mrf.mxu3 }
 0x16e   : > { %v828_v11 = vadd.f32 %v827_v10, %v783_v61  ;;  %v1155_v29 = vpop.f32.mrf.mxu0 }
 0x16f   : > { %v1199_v31 = vpop.f32.mrf.mxu2 }
 0x170   : > { %v855_v12 = vpack.c.bf16 %v828_v11, %v828_v11  ;;  %v788_v13 = vpop.f32.mrf.mxu1  ;;  %v1200_v38 = vadd.f32 %v1199_v31, %v1155_v29 }
 0x172   : > { %870 = vst.msk [vmem:[%s6879_s25 + $0x14] sm:$0xf] %vm864_vm1, %v855_v12  ;;  %4928 = vmatmul.msk.bf16.gmra.mxu3 %vm417_vm0, %v6874_v34 }
 0x175   : > { %v830_v15 = vpop.f32.mrf.mxu3 }
 0x176   : > { %v831_v16 = vadd.f32 %v830_v15, %v786_v5  ;;  %v1157_v37 = vpop.f32.mrf.mxu0 }
 0x177   : > { %v1201_v40 = vpop.f32.mrf.mxu2 }
 0x178   : > { %v856_v17 = vpack.c.bf16 %v831_v16, %v831_v16  ;;  %v791_v18 = vpop.f32.mrf.mxu1  ;;  %v1202_v42 = vadd.f32 %v1201_v40, %v1157_v37 }
 0x17a   : > { %871 = vst.msk [vmem:[%s6879_s25 + $0x18] sm:$0xf] %vm864_vm1, %v856_v17  ;;  %v1322_v44 = vpack.c.bf16 %v1202_v42, %v1200_v38  ;;  %v6294_v42 = vld [vmem:[%s6546_s17 + $0x214] sm:$0xf] }
 0x17b   : > { %1267 = vmatmul.bf16.gmra.mxu1 %v4792_v57  ;;  %v5203_v57 = vor.u32 %v6310_v53, %v5200_v54 }
 0x17c   : > { %1477 = vmatmul.bf16.vlgmr.msra.gmra.mxu0 %v1322_v44 }
 0x17d   : > { %v832_v19 = vpop.f32.mrf.mxu3  ;;  %1987 = vmatpush.bf16.msrb.mxu2 %v5203_v57 }
 0x17e   : > { %v833_v20 = vadd.f32 %v832_v19, %v788_v13  ;;  %v1160_v47 = vpop.f32.mrf.mxu0  ;;  %v5150_v13 = vld [vmem:[%s6546_s17 + $0x230] sm:$0xf] }
 0x17f   : > { %v1204_v48 = vpop.f32.mrf.mxu2  ;;  %v5151_v15 = vor.u32 %v6299_v14, %v5150_v13  ;;  %v6293_v13 = vld [vmem:[%s6546_s17 + $0x204] sm:$0xf0]  ;;  %v6304_v14 = vld [vmem:[%s6546_s17 + $0x264] sm:$0xf] }
 0x180   : > { %v857_v21 = vpack.c.bf16 %v833_v20, %v833_v20  ;;  %v793_v22 = vpop.f32.mrf.mxu1  ;;  %v1205_v56 = vadd.f32 %v1204_v48, %v1160_v47 }
 0x181   : > { %1853 = vmatpush.bf16.msrb.mxu1 %v5151_v15 }
 0x182   : > { %872 = vst.msk [vmem:[%s6879_s25 + $0x1c] sm:$0xf] %vm864_vm1, %v857_v21  ;;  %4929 = vmatmul.msk.bf16.gmra.mxu3 %vm417_vm0, %v4796_v51  ;;  %v6308_v21 = vld [vmem:[%s6546_s17 + $0x284] sm:$0xf] }
 0x185   : > { %v835_v25 = vpop.f32.mrf.mxu3 }
 0x186   : > { %v836_v26 = vadd.f32 %v835_v25, %v791_v18  ;;  %v1162_v55 = vpop.f32.mrf.mxu0 }
 0x187   : > { %v1206_v58 = vpop.f32.mrf.mxu2 }
 0x188   : > { %v858_v27 = vpack.c.bf16 %v836_v26, %v836_v26  ;;  %v796_v28 = vpop.f32.mrf.mxu1  ;;  %v1207_v60 = vadd.f32 %v1206_v58, %v1162_v55  ;;  %v5144_v26 = vld [vmem:[%s6546_s17 + $0x228] sm:$0xf0]  ;;  %v6295_v55 = vld [vmem:[%s6546_s17 + $0x214] sm:$0xf0] }
 0x189   : > { %v5147_v30 = vor.u32 %v6296_v23, %v5144_v26  ;;  %v5174_v26 = vld [vmem:[%s6546_s17 + $0x260] sm:$0xf] }
 0x18a   : > { %873 = vst.msk [vmem:[%s6879_s25 + $0x20] sm:$0xf] %vm864_vm1, %v858_v27  ;;  %v1324_v1 = vpack.c.bf16 %v1207_v60, %v1205_v56  ;;  %v5190_v27 = vld [vmem:[%s6546_s17 + $0x280] sm:$0xf] }
 0x18b   : > { %1272 = vmatmul.bf16.gmra.mxu1 %v4800_v9 }
 0x18c   : > { %1482 = vmatmul.bf16.gmra.mxu0 %v1324_v1  ;;  %v5182_v1 = vld [vmem:[%s6546_s17 + $0x270] sm:$0xf] }
 0x18d   : > { %v837_v32 = vpop.f32.mrf.mxu3 }
 0x18e   : > { %v838_v33 = vadd.f32 %v837_v32, %v793_v22  ;;  %v1165_v7 = vpop.f32.mrf.mxu0  ;;  %v5192_v22 = vld [vmem:[%s6546_s17 + $0x288] sm:$0xf0]  ;;  %v5142_v32 = vld [vmem:[%s6546_s17 + $0x220] sm:$0xf] }
 0x18f   : > { %v1209_v8 = vpop.f32.mrf.mxu2  ;;  %v5195_v25 = vor.u32 %v6308_v21, %v5192_v22 }
 0x190   : > { %v859_v34 = vpack.c.bf16 %v838_v33, %v838_v33  ;;  %v798_v35 = vpop.f32.mrf.mxu1  ;;  %v1210_v16 = vadd.f32 %v1209_v8, %v1165_v7  ;;  %v6297_v33 = vld [vmem:[%s6546_s17 + $0x224] sm:$0xf0] }
 0x191   : > { %1988 = vmatpush.bf16.msrb.mxu2 %v5195_v25 }
 0x192   : > { %874 = vst.msk [vmem:[%s6879_s25 + $0x24] sm:$0xf] %vm864_vm1, %v859_v34  ;;  %4930 = vmatmul.msk.bf16.gmra.mxu3 %vm417_vm0, %v4804_v3  ;;  %v5152_v3 = vld [vmem:[%s6546_s17 + $0x238] sm:$0xf0]  ;;  %v5143_v34 = vor.u32 %v6297_v33, %v5142_v32 }
 0x193   : > { %v5155_v6 = vor.u32 %v6298_v0, %v5152_v3  ;;  %v5183_v3 = vor.u32 %v6307_v2, %v5182_v1 }
 0x194   : > { %1854 = vmatpush.bf16.msrb.mxu1 %v5143_v34 }
 0x195   : > { %v840_v41 = vpop.f32.mrf.mxu3  ;;  %1941 = vmatpush.bf16.msrb.mxu0 %v5155_v6 }
 0x196   : > { %v841_v43 = vadd.f32 %v840_v41, %v796_v28  ;;  %v1167_v17 = vpop.f32.mrf.mxu0  ;;  %v6309_v28 = vld [vmem:[%s6546_s17 + $0x284] sm:$0xf0] }
 0x197   : > { %v1211_v18 = vpop.f32.mrf.mxu2  ;;  %v5191_v31 = vor.u32 %v6309_v28, %v5190_v27  ;;  %v6305_v27 = vld [vmem:[%s6546_s17 + $0x264] sm:$0xf0]  ;;  %v6290_v28 = vld [vmem:[%s6546_s17 + $0x1f4] sm:$0xf] }
 0x198   : > { %v860_v45 = vpack.c.bf16 %v841_v43, %v841_v43  ;;  %v801_v46 = vpop.f32.mrf.mxu1  ;;  %v1212_v20 = vadd.f32 %v1211_v18, %v1167_v17  ;;  %v5136_v43 = vld [vmem:[%s6546_s17 + $0x218] sm:$0xf0]  ;;  %v5176_v17 = vld [vmem:[%s6546_s17 + $0x268] sm:$0xf0] }
 0x199   : > { %1942 = vmatpush.bf16.msrb.mxu0 %v5147_v30  ;;  %1900 = vmatpush.bf16.msrb.mxu3 %v5191_v31  ;;  %v5175_v30 = vor.u32 %v6305_v27, %v5174_v26  ;;  %v5120_v31 = vld [vmem:[%s6546_s17 + $0x1f8] sm:$0xf0] }
 0x19a   : > { %875 = vst.msk [vmem:[%s6879_s25 + $0x28] sm:$0xf] %vm864_vm1, %v860_v45  ;;  %v1326_v24 = vpack.c.bf16 %v1212_v20, %v1210_v16  ;;  %v5123_v32 = vor.u32 %v6290_v28, %v5120_v31  ;;  %v6271_v31 = vld [vmem:[%s7997_s1 + $0x4] sm:$0xf0] }
 0x19c   : > { %1487 = vmatmul.bf16.gmra.mxu0 %v1326_v24 }
 0x19d   : > { %v842_v49 = vpop.f32.mrf.mxu3  ;;  %1901 = vmatpush.bf16.msrb.mxu3 %v5183_v3  ;;  %v6286_v3 = vld [vmem:[%s6546_s17 + $0x1d4] sm:$0xf] }
 0x19e   : > { %v843_v50 = vadd.f32 %v842_v49, %v798_v35  ;;  %v1170_v35 = vpop.f32.mrf.mxu0 }
 0x19f   : > { %v1214_v36 = vpop.f32.mrf.mxu2 }
 0x1a0   : > { %v861_v51 = vpack.c.bf16 %v843_v50, %v843_v50  ;;  %v803_v52 = vpop.f32.mrf.mxu1  ;;  %v1215_v44 = vadd.f32 %v1214_v36, %v1170_v35  ;;  %v6306_v50 = vld [vmem:[%s6546_s17 + $0x274] sm:$0xf] }
 0x1a1   : > { %1902 = vmatpush.bf16.msrb.mxu3 %v5175_v30  ;;  %v5038_v30 = vld [vmem:[%s7997_s1] sm:$0xf] }
 0x1a2   : > { %876 = vst.msk [vmem:[%s6879_s25 + $0x2c] sm:$0xf] %vm864_vm1, %v861_v51  ;;  %v5184_v51 = vld [vmem:[%s6546_s17 + $0x278] sm:$0xf0] }
 0x1a3   : > { %v5187_v54 = vor.u32 %v6306_v50, %v5184_v51  ;;  %v5168_v50 = vld [vmem:[%s6546_s17 + $0x258] sm:$0xf0]  ;;  %v6288_v51 = vld [vmem:[%s6546_s17 + $0x1e4] sm:$0xf] }
 0x1a5   : > { %v845_v59 = vpop.f32.mrf.mxu3  ;;  %1989 = vmatpush.bf16.msrb.mxu2 %v5187_v54 }
 0x1a6   : > { %v846_v61 = vadd.f32 %v845_v59, %v801_v46  ;;  %v1172_v45 = vpop.f32.mrf.mxu0  ;;  %v5139_v46 = vor.u32 %v6294_v42, %v5136_v43 }
 0x1a7   : > { %v1216_v47 = vpop.f32.mrf.mxu2 }
 0x1a8   : > { %v862_v4 = vpack.c.bf16 %v846_v61, %v846_v61  ;;  %v1243_v5 = vpop.f32.mrf.mxu1  ;;  %v1217_v49 = vadd.f32 %v1216_v47, %v1172_v45  ;;  %1943 = vmatpush.bf16.msrb.mxu0 %v5139_v46 }
 0x1aa   : > { %877 = vst.msk [vmem:[%s6879_s25 + $0x30] sm:$0xf] %vm864_vm1, %v862_v4  ;;  %v1328_v53 = vpack.c.bf16 %v1217_v49, %v1215_v44  ;;  %v6292_v4 = vld [vmem:[%s6546_s17 + $0x204] sm:$0xf]  ;;  %v6302_v49 = vld [vmem:[%s6546_s17 + $0x254] sm:$0xf] }
 0x1ac   : > { %1492 = vmatmul.bf16.gmra.mxu0 %v1328_v53  ;;  %v5112_v53 = vld [vmem:[%s6546_s17 + $0x1e8] sm:$0xf0] }
 0x1ad   : > { %v847_v9 = vpop.f32.mrf.mxu3  ;;  %v5115_v54 = vor.u32 %v6288_v51, %v5112_v53 }
 0x1ae   : > { %v848_v10 = vadd.f32 %v847_v9, %v803_v52  ;;  %v5134_v52 = vld [vmem:[%s6546_s17 + $0x210] sm:$0xf]  ;;  %v1175_v58 = vpop.f32.mrf.mxu0 }
 0x1af   : > { %v5135_v57 = vor.u32 %v6295_v55, %v5134_v52  ;;  %v1219_v59 = vpop.f32.mrf.mxu2  ;;  %v5171_v52 = vor.u32 %v6302_v49, %v5168_v50  ;;  %v5166_v55 = vld [vmem:[%s6546_s17 + $0x250] sm:$0xf] }
 0x1b0   : > { %v863_v11 = vpack.c.bf16 %v848_v10, %v848_v10  ;;  %v1245_v12 = vpop.f32.mrf.mxu1  ;;  %v1220_v6 = vadd.f32 %v1219_v59, %v1175_v58 }
 0x1b1   : > { %1855 = vmatpush.bf16.msrb.mxu1 %v5135_v57  ;;  %v5110_v57 = vld [vmem:[%s6546_s17 + $0x1e0] sm:$0xf] }
 0x1b2   : > { %878 = vst.msk [vmem:[%s6879_s25 + $0x34] sm:$0xf] %vm864_vm1, %v863_v11 }
 0x1b5   : > { %v1287_v19 = vpop.f32.mrf.mxu3 }
 0x1b6   : > { %v1288_v38 = vadd.f32 %v1287_v19, %v1243_v5  ;;  %v5128_v5 = vld [vmem:[%s6546_s17 + $0x208] sm:$0xf0]  ;;  %v1177_v8 = vpop.f32.mrf.mxu0  ;;  %v5179_v19 = vor.u32 %v6304_v14, %v5176_v17  ;;  %v5158_v17 = vld [vmem:[%s6546_s17 + $0x240] sm:$0xf] }
 0x1b7   : > { %v5131_v7 = vor.u32 %v6292_v4, %v5128_v5  ;;  %v1221_v9 = vpop.f32.mrf.mxu2  ;;  %v5104_v4 = vld [vmem:[%s6546_s17 + $0x1d8] sm:$0xf0] }
 0x1b8   : > { %v1248_v29 = vpop.f32.mrf.mxu1  ;;  %v1222_v11 = vadd.f32 %v1221_v9, %v1177_v8  ;;  %1990 = vmatpush.bf16.msrb.mxu2 %v5179_v19  ;;  %v6301_v19 = vld [vmem:[%s6546_s17 + $0x244] sm:$0xf0] }
 0x1b9   : > { %1944 = vmatpush.bf16.msrb.mxu0 %v5131_v7 }
 0x1ba   : > { %v1330_v15 = vpack.c.bf16 %v1222_v11, %v1220_v6  ;;  %v5107_v6 = vor.u32 %v6286_v3, %v5104_v4  ;;  %v6319_v3 = vld [vmem:[%s7998_s2 + $0x38] sm:$0xff]  ;;  %v5062_v4 = vld [vmem:[%s7997_s1 + $0x30] sm:$0xf] }
 0x1bc   : > { %1497 = vmatmul.bf16.gmra.mxu0 %v1330_v15  ;;  %1991 = vmatpush.bf16.msrb.mxu2 %v5171_v52  ;;  %v5102_v15 = vld [vmem:[%s6546_s17 + $0x1d0] sm:$0xf] }
 0x1bd   : > { %v1289_v37 = vpop.f32.mrf.mxu3  ;;  %1945 = vmatpush.bf16.msrb.mxu0 %v5123_v32 }
 0x1be   : > { %v1290_v39 = vadd.f32 %v1289_v37, %v1245_v12  ;;  %v5126_v12 = vld [vmem:[%s6546_s17 + $0x200] sm:$0xf]  ;;  %v1180_v20 = vpop.f32.mrf.mxu0 }
 0x1bf   : > { %v5127_v16 = vor.u32 %v6293_v13, %v5126_v12  ;;  %v1224_v21 = vpop.f32.mrf.mxu2  ;;  %v6300_v12 = vld [vmem:[%s6546_s17 + $0x244] sm:$0xf]  ;;  %v5160_v13 = vld [vmem:[%s6546_s17 + $0x248] sm:$0xf0] }
 0x1c0   : > { %v1323_v40 = vpack.c.bf16 %v1290_v39, %v1288_v38  ;;  %v1250_v41 = vpop.f32.mrf.mxu1  ;;  %v1225_v33 = vadd.f32 %v1224_v21, %v1180_v20  ;;  %v5118_v38 = vld [vmem:[%s6546_s17 + $0x1f0] sm:$0xf]  ;;  %v6291_v39 = vld [vmem:[%s6546_s17 + $0x1f4] sm:$0xf0]  ;;  %v5163_v14 = vor.u32 %v6300_v12, %v5160_v13  ;;  %v6270_v20 = vld [vmem:[%s7997_s1 + $0x4] sm:$0xf] }
 0x1c1   : > { %1856 = vmatpush.bf16.msrb.mxu1 %v5127_v16  ;;  %1946 = vmatpush.bf16.msrb.mxu0 %v5115_v54  ;;  %v6287_v16 = vld [vmem:[%s6546_s17 + $0x1d4] sm:$0xf0]  ;;  %v5040_v21 = vld [vmem:[%s7997_s1 + $0x8] sm:$0xf0]  ;;  %v6274_v54 = vld [vmem:[%s7997_s1 + $0x24] sm:$0xf] }
 0x1c2   : > { %4987 = vmatmul.msk.bf16.vlgmr.msra.gmra.mxu2 %vm417_vm0, %v1323_v40  ;;  %v5043_v27 = vor.u32 %v6270_v20, %v5040_v21 }
 0x1c3   : > { %1992 = vmatpush.bf16.msrb.mxu2 %v5163_v14  ;;  %v6324_v14 = vld [vmem:[%s7998_s2 + $0x60] sm:$0xff] }
 0x1c5   : > { %v1292_v48 = vpop.f32.mrf.mxu3  ;;  %1947 = vmatpush.bf16.msrb.mxu0 %v5107_v6 }
 0x1c6   : > { %v1293_v61 = vadd.f32 %v1292_v48, %v1248_v29  ;;  %v1182_v34 = vpop.f32.mrf.mxu0 }
 0x1c7   : > { %v1226_v35 = vpop.f32.mrf.mxu2 }
 0x1c8   : > { %v1253_v56 = vpop.f32.mrf.mxu1  ;;  %v1227_v37 = vadd.f32 %v1226_v35, %v1182_v34 }
 0x1ca   : > { %v1332_v40 = vpack.c.bf16 %v1227_v37, %v1225_v33  ;;  %v5039_v33 = vor.u32 %v6271_v31, %v5038_v30  ;;  %v6323_v31 = vld [vmem:[%s7998_s2 + $0x58] sm:$0xff] }
 0x1cc   : > { %1502 = vmatmul.bf16.gmra.mxu0 %v1332_v40  ;;  %v5048_v40 = vld [vmem:[%s7997_s1 + $0x18] sm:$0xf0] }
 0x1cd   : > { %v1294_v60 = vpop.f32.mrf.mxu3 }
 0x1ce   : > { %v1295_v62 = vadd.f32 %v1294_v60, %v1250_v41  ;;  %v5119_v41 = vor.u32 %v6291_v39, %v5118_v38  ;;  %v1185_v43 = vpop.f32.mrf.mxu0  ;;  %v6272_v39 = vld [vmem:[%s7997_s1 + $0x14] sm:$0xf] }
 0x1cf   : > { %v1229_v44 = vpop.f32.mrf.mxu2 }
 0x1d0   : > { %v1325_v63 = vpack.c.bf16 %v1295_v62, %v1293_v61  ;;  %v1255_v0 = vpop.f32.mrf.mxu1  ;;  %1857 = vmatpush.bf16.msrb.mxu1 %v5119_v41  ;;  %v1230_v58 = vadd.f32 %v1229_v44, %v1185_v43  ;;  %v6289_v61 = vld [vmem:[%s6546_s17 + $0x1e4] sm:$0xf0]  ;;  %v5051_v43 = vor.u32 %v6272_v39, %v5048_v40  ;;  %v5046_v44 = vld [vmem:[%s7997_s1 + $0x10] sm:$0xf]  ;;  %v6316_v39 = vld [vmem:[%s7998_s2 + $0x20] sm:$0xff] }
 0x1d2   : > { %4988 = vmatmul.msk.bf16.gmra.mxu2 %vm417_vm0, %v1325_v63  ;;  %v5111_v63 = vor.u32 %v6289_v61, %v5110_v57 }
 0x1d4   : > { %1858 = vmatpush.bf16.msrb.mxu1 %v5111_v63  ;;  %v6276_v63 = vld [vmem:[%s7997_s1 + $0x34] sm:$0xf] }
 0x1d5   : > { %v1297_v10 = vpop.f32.mrf.mxu3 }
 0x1d6   : > { %v1298_v23 = vadd.f32 %v1297_v10, %v1253_v56  ;;  %v6303_v56 = vld [vmem:[%s6546_s17 + $0x254] sm:$0xf0]  ;;  %v1187_v59 = vpop.f32.mrf.mxu0 }
 0x1d7   : > { %v5167_v60 = vor.u32 %v6303_v56, %v5166_v55  ;;  %v1231_v62 = vpop.f32.mrf.mxu2  ;;  %v5056_v55 = vld [vmem:[%s7997_s1 + $0x28] sm:$0xf0] }
 0x1d8   : > { %v1258_v18 = vpop.f32.mrf.mxu1  ;;  %v1232_v2 = vadd.f32 %v1231_v62, %v1187_v59  ;;  %v5059_v57 = vor.u32 %v6274_v54, %v5056_v55  ;;  %v6275_v59 = vld [vmem:[%s7997_s1 + $0x24] sm:$0xf0]  ;;  %v6315_v54 = vld [vmem:[%s7998_s2 + $0x18] sm:$0xff] }
 0x1d9   : > { %1903 = vmatpush.bf16.msrb.mxu3 %v5167_v60  ;;  %v6325_v62 = vld [vmem:[%s7998_s2 + $0x68] sm:$0xff] }
 0x1da   : > { %v1334_v5 = vpack.c.bf16 %v1232_v2, %v1230_v58  ;;  %v5054_v58 = vld [vmem:[%s7997_s1 + $0x20] sm:$0xf] }
 0x1db   : > { %v5055_v60 = vor.u32 %v6275_v59, %v5054_v58 }
 0x1dc   : > { %1507 = vmatmul.bf16.gmra.mxu0 %v1334_v5  ;;  %v6277_v5 = vld [vmem:[%s7997_s1 + $0x34] sm:$0xf0] }
 0x1dd   : > { %v1299_v22 = vpop.f32.mrf.mxu3  ;;  %v5063_v6 = vor.u32 %v6277_v5, %v5062_v4 }
 0x1de   : > { %v1300_v24 = vadd.f32 %v1299_v22, %v1255_v0  ;;  %v5159_v22 = vor.u32 %v6301_v19, %v5158_v17  ;;  %v6279_v17 = vld [vmem:[%s7997_s1 + $0x44] sm:$0xf0] }
 0x1e0   : > { %v1327_v25 = vpack.c.bf16 %v1300_v24, %v1298_v23  ;;  %v1260_v29 = vpop.f32.mrf.mxu1  ;;  %v6284_v23 = vld [vmem:[%s6546_s17 + $0x1c4] sm:$0xf]  ;;  %v5096_v24 = vld [vmem:[%s6546_s17 + $0x1c8] sm:$0xf0]  ;;  %1904 = vmatpush.bf16.msrb.mxu3 %v5159_v22 }
 0x1e1   : > { %v5099_v28 = vor.u32 %v6284_v23, %v5096_v24  ;;  %v6317_v23 = vld [vmem:[%s7998_s2 + $0x28] sm:$0xff] }
 0x1e2   : > { %4989 = vmatmul.msk.bf16.gmra.mxu2 %vm417_vm0, %v1327_v25  ;;  %v5094_v25 = vld [vmem:[%s6546_s17 + $0x1c0] sm:$0xf] }
 0x1e3   : > { %1948 = vmatpush.bf16.msrb.mxu0 %v5099_v28  ;;  %5204 = vmatmul.msk.bf16.vlgmr.msrb.gmra.mxu3 %vm417_vm0, %v5043_v27 }
 0x1e4   : > { %2222 = vmatpush.bf16.msra.mxu3 %v6325_v62 }
 0x1e5   : > { %v1302_v36 = vpop.f32.mrf.mxu3 }
 0x1e6   : > { %v1303_v46 = vadd.f32 %v1302_v36, %v1258_v18  ;;  %v5103_v18 = vor.u32 %v6287_v16, %v5102_v15  ;;  %v6318_v15 = vld [vmem:[%s7998_s2 + $0x30] sm:$0xff]  ;;  %v5070_v16 = vld [vmem:[%s7997_s1 + $0x40] sm:$0xf] }
 0x1e8   : > { %v1263_v42 = vpop.f32.mrf.mxu1  ;;  %1859 = vmatpush.bf16.msrb.mxu1 %v5103_v18  ;;  %2223 = vmatpush.bf16.msra.mxu3 %v6324_v14  ;;  %v5071_v18 = vor.u32 %v6279_v17, %v5070_v16 }
 0x1ec   : > { %1949 = vmatmul.bf16.vlgmr.msrb.gmra.mxu0 %v5039_v33  ;;  %2224 = vmatpush.bf16.msra.mxu3 %v6323_v31 }
 0x1ed   : > { %v1304_v45 = vpop.f32.mrf.mxu3 }
 0x1ee   : > { %v1305_v47 = vadd.f32 %v1304_v45, %v1260_v29  ;;  %v6285_v29 = vld [vmem:[%s6546_s17 + $0x1c4] sm:$0xf0]  ;;  %v6273_v45 = vld [vmem:[%s7997_s1 + $0x14] sm:$0xf0] }
 0x1ef   : > { %v5095_v32 = vor.u32 %v6285_v29, %v5094_v25  ;;  %v6280_v25 = vld [vmem:[%s7997_s1 + $0x54] sm:$0xf] }
 0x1f0   : > { %v1329_v48 = vpack.c.bf16 %v1305_v47, %v1303_v46  ;;  %v1265_v0 = vpop.f32.mrf.mxu1  ;;  %v5047_v47 = vor.u32 %v6273_v45, %v5046_v44 }
 0x1f1   : > { %1860 = vmatpush.bf16.msrb.mxu1 %v5095_v32  ;;  %v5078_v32 = vld [vmem:[%s7997_s1 + $0x50] sm:$0xf] }
 0x1f2   : > { %4990 = vmatmul.msk.bf16.gmra.mxu2 %vm417_vm0, %v1329_v48 }
 0x1f3   : > { %5205 = vmatmul.msk.bf16.gmra.mxu3 %vm417_vm0, %v5051_v43 }
 0x1f4   : > { %1861 = vmatmul.bf16.vlgmr.msrb.gmra.mxu1 %v5039_v33  ;;  %v6281_v33 = vld [vmem:[%s7997_s1 + $0x54] sm:$0xf0] }
 0x1f5   : > { %v1307_v1 = vpop.f32.mrf.mxu3  ;;  %2176 = vmatpush.bf16.msra.mxu1 %v6319_v3 }
 0x1f6   : > { %v1308_v8 = vadd.f32 %v1307_v1, %v1263_v42 }
 0x1f8   : > { %v1268_v10 = vpop.f32.mrf.mxu1 }
 0x1f9   : > { %v1478_v46 = vpop.f32.mrf.mxu0  ;;  %2177 = vmatpush.bf16.msra.mxu1 %v6318_v15  ;;  %v6312_v15 = vld [vmem:[%s7998_s2] sm:$0xff] }
 0x1fc   : > { %1954 = vmatmul.bf16.gmra.mxu0 %v5047_v47 }
 0x1fd   : > { %v1309_v7 = vpop.f32.mrf.mxu3  ;;  %2178 = vmatpush.bf16.msra.mxu1 %v6317_v23 }
 0x1fe   : > { %v1310_v9 = vadd.f32 %v1309_v7, %v1265_v0  ;;  %v5064_v0 = vld [vmem:[%s7997_s1 + $0x38] sm:$0xf0] }
 0x1ff   : > { %v5067_v1 = vor.u32 %v6276_v63, %v5064_v0  ;;  %v6321_v63 = vld [vmem:[%s7998_s2 + $0x48] sm:$0xff]  ;;  %v6314_v0 = vld [vmem:[%s7998_s2 + $0x10] sm:$0xff] }
 0x200   : > { %v1331_v11 = vpack.c.bf16 %v1310_v9, %v1308_v8  ;;  %v1270_v34 = vpop.f32.mrf.mxu1  ;;  %v6278_v9 = vld [vmem:[%s7997_s1 + $0x44] sm:$0xf] }
 0x201   : > { %v1480_v52 = vpop.f32.mrf.mxu0  ;;  %2179 = vmatpush.bf16.msra.mxu1 %v6316_v39  ;;  %v6367_v39 = vld [vmem:[%s6546_s17 + $0x374] sm:$0xf0] }
 0x202   : > { %4991 = vmatmul.msk.bf16.gmra.mxu2 %vm417_vm0, %v1331_v11 }
 0x203   : > { %5206 = vmatmul.msk.bf16.gmra.mxu3 %vm417_vm0, %v5059_v57 }
 0x204   : > { %1866 = vmatmul.bf16.gmra.mxu1 %v5047_v47 }
 0x205   : > { %v1312_v26 = vpop.f32.mrf.mxu3  ;;  %2180 = vmatpush.bf16.msra.mxu1 %v6315_v54 }
 0x206   : > { %v1313_v36 = vadd.f32 %v1312_v26, %v1268_v10  ;;  %v5072_v10 = vld [vmem:[%s7997_s1 + $0x48] sm:$0xf0]  ;;  %v5080_v26 = vld [vmem:[%s7997_s1 + $0x58] sm:$0xf0] }
 0x207   : > { %v7118_v12 = vor.u32 %v6278_v9, %v5072_v10  ;;  %v5083_v28 = vor.u32 %v6280_v25, %v5080_v26 }
 0x208   : > { %v1273_v41 = vpop.f32.mrf.mxu1 }
 0x209   : > { %v1483_v56 = vpop.f32.mrf.mxu0  ;;  %2181 = vmatpush.bf16.msra.mxu1 %v6314_v0 }
 0x20c   : > { %1959 = vmatmul.bf16.gmra.mxu0 %v5055_v60 }
 0x20d   : > { %v1314_v35 = vpop.f32.mrf.mxu3 }
 0x20e   : > { %v1315_v37 = vadd.f32 %v1314_v35, %v1270_v34  ;;  %v5079_v34 = vor.u32 %v6281_v33, %v5078_v32 }
 0x210   : > { %v1333_v38 = vpack.c.bf16 %v1315_v37, %v1313_v36  ;;  %v1275_v48 = vpop.f32.mrf.mxu1 }
 0x211   : > { %v1485_v61 = vpop.f32.mrf.mxu0 }
 0x212   : > { %4992 = vmatmul.msk.bf16.gmra.mxu2 %vm417_vm0, %v1333_v38 }
 0x213   : > { %5207 = vmatmul.msk.bf16.gmra.mxu3 %vm417_vm0, %v5067_v1 }
 0x214   : > { %1871 = vmatmul.bf16.gmra.mxu1 %v5055_v60 }
 0x215   : > { %v1317_v42 = vpop.f32.mrf.mxu3 }
 0x216   : > { %v1318_v50 = vadd.f32 %v1317_v42, %v1273_v41  ;;  %v6282_v41 = vld [vmem:[%s7997_s1 + $0x64] sm:$0xf]  ;;  %v5088_v42 = vld [vmem:[%s7997_s1 + $0x68] sm:$0xf0] }
 0x217   : > { %v5091_v44 = vor.u32 %v6282_v41, %v5088_v42 }
 0x219   : > { %v7097_v2 = vpop.f32.mrf.mxu0 }
 0x21c   : > { %1964 = vmatmul.bf16.gmra.mxu0 %v5063_v6 }
 0x21d   : > { %v1319_v49 = vpop.f32.mrf.mxu3 }
 0x21e   : > { %v1320_v51 = vadd.f32 %v1319_v49, %v1275_v48  ;;  %v5086_v48 = vld [vmem:[%s7997_s1 + $0x60] sm:$0xf]  ;;  %v6283_v49 = vld [vmem:[%s7997_s1 + $0x64] sm:$0xf0] }
 0x220   : > { %v1335_v53 = vpack.c.bf16 %v1320_v51, %v1318_v50  ;;  %v5087_v50 = vor.u32 %v6283_v49, %v5086_v48 }
 0x221   : > { %v7110_v7 = vpop.f32.mrf.mxu0 }
 0x222   : > { %4993 = vmatmul.msk.bf16.gmra.mxu2 %vm417_vm0, %v1335_v53 }
 0x223   : > { %5208 = vmatmul.msk.bf16.gmra.mxu3 %vm417_vm0, %v7118_v12 }
 0x224   : > { %1876 = vmatmul.bf16.gmra.mxu1 %v5063_v6  ;;  %v6313_v6 = vld [vmem:[%s7998_s2 + $0x8] sm:$0xff] }
 0x225   : > { %2182 = vmatpush.bf16.msra.mxu1 %v6313_v6  ;;  %v5429_v6 = vld [vmem:[%s6546_s17 + $0x300] sm:$0xf] }
 0x229   : > { %v1493_v20 = vpop.f32.mrf.mxu0  ;;  %2183 = vmatpush.bf16.msra.mxu1 %v6312_v15 }
 0x22c   : > { %1969 = vmatmul.bf16.gmra.mxu0 %v5071_v18 }
 0x231   : > { %v1495_v29 = vpop.f32.mrf.mxu0 }
 0x232   : > { %5211 = vmatmul.msk.bf16.vlgmr.msrb.gmra.mxu2 %vm417_vm0, %v5043_v27 }
 0x233   : > { %5209 = vmatmul.msk.bf16.gmra.mxu3 %vm417_vm0, %v5083_v28 }
 0x234   : > { %1881 = vmatmul.bf16.gmra.mxu1 %v5071_v18 }
 0x239   : > { %v1498_v38 = vpop.f32.mrf.mxu0 }
 0x23c   : > { %1974 = vmatmul.bf16.gmra.mxu0 %v5079_v34 }
 0x241   : > { %v1500_v47 = vpop.f32.mrf.mxu0 }
 0x242   : > { %5212 = vmatmul.msk.bf16.gmra.mxu2 %vm417_vm0, %v5051_v43 }
 0x243   : > { %5210 = vmatmul.msk.bf16.gmra.mxu3 %vm417_vm0, %v5091_v44 }
 0x244   : > { %1886 = vmatmul.bf16.gmra.mxu1 %v5079_v34 }
 0x245   : > { %v1522_v8 = vpop.f32.mrf.mxu2 }
 0x246   : > { %v1523_v11 = vadd.f32 %v1522_v8, %v1478_v46  ;;  %v6322_v46 = vld [vmem:[%s7998_s2 + $0x50] sm:$0xff] }
 0x247   : > { %2225 = vmatpush.bf16.msra.mxu3 %v6322_v46 }
 0x248   : > { %v1557_v13 = vpack.c.bf16 %v1523_v11, %v1523_v11  ;;  %v6320_v11 = vld [vmem:[%s7998_s2 + $0x40] sm:$0xff] }
 0x24a   : > { %4994 = vst.msk [vmem:[%s6879_s25 + $0x38] sm:$0xf] %vm864_vm1, %v1557_v13 }
 0x24b   : > { %2226 = vmatpush.bf16.msra.mxu3 %v6321_v63 }
 0x24c   : > { %1979 = vmatmul.bf16.gmra.mxu0 %v5087_v50 }
 0x24d   : > { %v1524_v19 = vpop.f32.mrf.mxu2 }
 0x24e   : > { %v1525_v21 = vadd.f32 %v1524_v19, %v1480_v52 }
 0x24f   : > { %2227 = vmatpush.bf16.msra.mxu3 %v6320_v11 }
 0x250   : > { %v1558_v22 = vpack.c.bf16 %v1525_v21, %v1525_v21 }
 0x252   : > { %4995 = vst.msk [vmem:[%s6879_s25 + $0x3c] sm:$0xf] %vm864_vm1, %v1558_v22  ;;  %5213 = vmatmul.msk.bf16.gmra.mxu2 %vm417_vm0, %v5059_v57 }
 0x254   : > { %1891 = vmatmul.bf16.gmra.mxu1 %v5087_v50 }
 0x255   : > { %v1527_v24 = vpop.f32.mrf.mxu2 }
 0x256   : > { %v1528_v27 = vadd.f32 %v1527_v24, %v1483_v56  ;;  %v1503_v56 = vpop.f32.mrf.mxu0 }
 0x258   : > { %v1559_v30 = vpack.c.bf16 %v1528_v27, %v1528_v27 }
 0x25a   : > { %4996 = vst.msk [vmem:[%s6879_s25 + $0x40] sm:$0xf] %vm864_vm1, %v1559_v30 }
 0x25d   : > { %v1529_v35 = vpop.f32.mrf.mxu2 }
 0x25e   : > { %v1530_v36 = vadd.f32 %v1529_v35, %v1485_v61  ;;  %v1505_v61 = vpop.f32.mrf.mxu0 }
 0x260   : > { %v1560_v37 = vpack.c.bf16 %v1530_v36, %v1530_v36 }
 0x262   : > { %4997 = vst.msk [vmem:[%s6879_s25 + $0x44] sm:$0xf] %vm864_vm1, %v1560_v37  ;;  %5214 = vmatmul.msk.bf16.gmra.mxu2 %vm417_vm0, %v5067_v1 }
 0x265   : > { %v1532_v40 = vpop.f32.mrf.mxu2 }
 0x266   : > { %v1533_v43 = vadd.f32 %v1532_v40, %v7097_v2  ;;  %v1508_v4 = vpop.f32.mrf.mxu0  ;;  %v6354_v40 = vld [vmem:[%s6546_s17 + $0x314] sm:$0xf] }
 0x268   : > { %v1561_v45 = vpack.c.bf16 %v1533_v43, %v1533_v43  ;;  %v5439_v43 = vld [vmem:[%s6546_s17 + $0x318] sm:$0xf0] }
 0x26a   : > { %4998 = vst.msk [vmem:[%s6879_s25 + $0x48] sm:$0xf] %vm864_vm1, %v1561_v45  ;;  %v5442_v45 = vor.u32 %v6354_v40, %v5439_v43  ;;  %v6363_v40 = vld [vmem:[%s6546_s17 + $0x354] sm:$0xf0]  ;;  %v5415_v43 = vld [vmem:[%s6546_s17 + $0x2e8] sm:$0xf0] }
 0x26c   : > { %2648 = vmatpush.bf16.msrb.mxu1 %v5442_v45 }
 0x26d   : > { %v1534_v51 = vpop.f32.mrf.mxu2 }
 0x26e   : > { %v1535_v52 = vadd.f32 %v1534_v51, %v7110_v7  ;;  %v1906_v7 = vpop.f32.mrf.mxu3  ;;  %v1510_v13 = vpop.f32.mrf.mxu0 }
 0x270   : > { %v1562_v53 = vpack.c.bf16 %v1535_v52, %v1535_v52  ;;  %v5437_v52 = vld [vmem:[%s6546_s17 + $0x310] sm:$0xf] }
 0x271   : > { %v1862_v5 = vpop.f32.mrf.mxu1 }
 0x272   : > { %4999 = vst.msk [vmem:[%s6879_s25 + $0x4c] sm:$0xf] %vm864_vm1, %v1562_v53  ;;  %5215 = vmatmul.msk.bf16.gmra.mxu2 %vm417_vm0, %v7118_v12  ;;  %v1907_v14 = vadd.f32 %v1906_v7, %v1862_v5  ;;  %v6355_v53 = vld [vmem:[%s6546_s17 + $0x314] sm:$0xf0]  ;;  %v6353_v7 = vld [vmem:[%s6546_s17 + $0x304] sm:$0xf0] }
 0x273   : > { %v5438_v54 = vor.u32 %v6355_v53, %v5437_v52  ;;  %v6360_v52 = vld [vmem:[%s6546_s17 + $0x344] sm:$0xf] }
 0x275   : > { %v1537_v55 = vpop.f32.mrf.mxu2  ;;  %2560 = vmatpush.bf16.msra.mxu0 %v5438_v54 }
 0x276   : > { %v1538_v57 = vadd.f32 %v1537_v55, %v1493_v20  ;;  %v1908_v16 = vpop.f32.mrf.mxu3  ;;  %v7220_v23 = vpop.f32.mrf.mxu0 }
 0x278   : > { %v1563_v58 = vpack.c.bf16 %v1538_v57, %v1538_v57 }
 0x279   : > { %v1864_v12 = vpop.f32.mrf.mxu1 }
 0x27a   : > { %5000 = vst.msk [vmem:[%s6879_s25 + $0x50] sm:$0xf] %vm864_vm1, %v1563_v58  ;;  %v1909_v18 = vadd.f32 %v1908_v16, %v1864_v12  ;;  %v6350_v16 = vld [vmem:[%s6546_s17 + $0x2f4] sm:$0xf] }
 0x27c   : > { %v2029_v20 = vpack.c.bf16 %v1909_v18, %v1907_v14 }
 0x27d   : > { %v1539_v59 = vpop.f32.mrf.mxu2 }
 0x27e   : > { %v1540_v60 = vadd.f32 %v1539_v59, %v1495_v29  ;;  %2184 = vmatmul.bf16.vlgmr.msra.gmra.mxu1 %v2029_v20  ;;  %v1911_v24 = vpop.f32.mrf.mxu3  ;;  %v5487_v29 = vld [vmem:[%s6546_s17 + $0x378] sm:$0xf0]  ;;  %v1952_v35 = vpop.f32.mrf.mxu0 }
 0x280   : > { %v1564_v62 = vpack.c.bf16 %v1540_v60, %v1540_v60  ;;  %v6364_v60 = vld [vmem:[%s6546_s17 + $0x364] sm:$0xf] }
 0x281   : > { %v1867_v22 = vpop.f32.mrf.mxu1 }
 0x282   : > { %5001 = vst.msk [vmem:[%s6879_s25 + $0x54] sm:$0xf] %vm864_vm1, %v1564_v62  ;;  %5216 = vmatmul.msk.bf16.gmra.mxu2 %vm417_vm0, %v5083_v28  ;;  %v6366_v28 = vld [vmem:[%s6546_s17 + $0x374] sm:$0xf]  ;;  %v1912_v31 = vadd.f32 %v1911_v24, %v1867_v22  ;;  %v6352_v62 = vld [vmem:[%s6546_s17 + $0x304] sm:$0xf] }
 0x283   : > { %v5490_v32 = vor.u32 %v6366_v28, %v5487_v29 }
 0x285   : > { %v1542_v1 = vpop.f32.mrf.mxu2  ;;  %2694 = vmatpush.bf16.msrb.mxu3 %v5490_v32 }
 0x286   : > { %v1543_v2 = vadd.f32 %v1542_v1, %v1498_v38  ;;  %v1913_v33 = vpop.f32.mrf.mxu3  ;;  %v5485_v38 = vld [vmem:[%s6546_s17 + $0x370] sm:$0xf]  ;;  %v1955_v50 = vpop.f32.mrf.mxu0  ;;  %v5431_v1 = vld [vmem:[%s6546_s17 + $0x308] sm:$0xf0] }
 0x287   : > { %v5486_v42 = vor.u32 %v6367_v39, %v5485_v38  ;;  %v5469_v39 = vld [vmem:[%s6546_s17 + $0x350] sm:$0xf] }
 0x288   : > { %v1565_v3 = vpack.c.bf16 %v1543_v2, %v1543_v2  ;;  %v5477_v2 = vld [vmem:[%s6546_s17 + $0x360] sm:$0xf] }
 0x289   : > { %v1869_v30 = vpop.f32.mrf.mxu1  ;;  %2606 = vmatpush.bf16.msra.mxu2 %v5486_v42  ;;  %v6348_v42 = vld [vmem:[%s6546_s17 + $0x2e4] sm:$0xf] }
 0x28a   : > { %5002 = vst.msk [vmem:[%s6879_s25 + $0x58] sm:$0xf] %vm864_vm1, %v1565_v3  ;;  %v1914_v36 = vadd.f32 %v1913_v33, %v1869_v30  ;;  %v6365_v3 = vld [vmem:[%s6546_s17 + $0x364] sm:$0xf0]  ;;  %v6351_v30 = vld [vmem:[%s6546_s17 + $0x2f4] sm:$0xf0]  ;;  %v5418_v45 = vor.u32 %v6348_v42, %v5415_v43 }
 0x28b   : > { %v5478_v5 = vor.u32 %v6365_v3, %v5477_v2  ;;  %v6346_v2 = vld [vmem:[%s6546_s17 + $0x2d4] sm:$0xf]  ;;  %v5391_v42 = vld [vmem:[%s6546_s17 + $0x2b8] sm:$0xf0] }
 0x28c   : > { %v2031_v41 = vpack.c.bf16 %v1914_v36, %v1912_v31 }
 0x28d   : > { %v1544_v8 = vpop.f32.mrf.mxu2  ;;  %2607 = vmatpush.bf16.msra.mxu2 %v5478_v5  ;;  %v5407_v5 = vld [vmem:[%s6546_s17 + $0x2d8] sm:$0xf0] }
 0x28e   : > { %v1545_v9 = vadd.f32 %v1544_v8, %v1500_v47  ;;  %2189 = vmatmul.bf16.gmra.mxu1 %v2031_v41  ;;  %v1916_v47 = vpop.f32.mrf.mxu3  ;;  %v1957_v8 = vpop.f32.mrf.mxu0  ;;  %v5470_v41 = vor.u32 %v6363_v40, %v5469_v39 }
 0x290   : > { %v1566_v10 = vpack.c.bf16 %v1545_v9, %v1545_v9  ;;  %v5430_v9 = vor.u32 %v6353_v7, %v5429_v6  ;;  %v5410_v6 = vor.u32 %v6346_v2, %v5407_v5  ;;  %v6327_v5 = vld [vmem:[%s7997_s1 + $0x4] sm:$0xf0] }
 0x291   : > { %v1872_v46 = vpop.f32.mrf.mxu1  ;;  %2608 = vmatpush.bf16.msra.mxu2 %v5470_v41  ;;  %v6342_v41 = vld [vmem:[%s6546_s17 + $0x2b4] sm:$0xf] }
 0x292   : > { %5003 = vst.msk [vmem:[%s6879_s25 + $0x5c] sm:$0xf] %vm864_vm1, %v1566_v10  ;;  %5217 = vmatmul.msk.bf16.gmra.mxu2 %vm417_vm0, %v5091_v44  ;;  %v1917_v55 = vadd.f32 %v1916_v47, %v1872_v46  ;;  %2561 = vmatpush.bf16.msra.mxu0 %v5430_v9 }
 0x295   : > { %v1547_v17 = vpop.f32.mrf.mxu2 }
 0x296   : > { %v1548_v19 = vadd.f32 %v1547_v17, %v1503_v56  ;;  %v1918_v57 = vpop.f32.mrf.mxu3  ;;  %v5423_v17 = vld [vmem:[%s6546_s17 + $0x2f8] sm:$0xf0]  ;;  %v1960_v18 = vpop.f32.mrf.mxu0 }
 0x298   : > { %v1567_v21 = vpack.c.bf16 %v1548_v19, %v1548_v19 }
 0x299   : > { %v1874_v56 = vpop.f32.mrf.mxu1 }
 0x29a   : > { %5004 = vst.msk [vmem:[%s6879_s25 + $0x60] sm:$0xf] %vm864_vm1, %v1567_v21  ;;  %v1919_v59 = vadd.f32 %v1918_v57, %v1874_v56  ;;  %v5426_v21 = vor.u32 %v6350_v16, %v5423_v17  ;;  %v5463_v56 = vld [vmem:[%s6546_s17 + $0x348] sm:$0xf0] }
 0x29b   : > { %v5466_v57 = vor.u32 %v6360_v52, %v5463_v56 }
 0x29c   : > { %v2033_v63 = vpack.c.bf16 %v1919_v59, %v1917_v55 }
 0x29d   : > { %v1549_v25 = vpop.f32.mrf.mxu2 }
 0x29e   : > { %v1550_v26 = vadd.f32 %v1549_v25, %v1505_v61  ;;  %v5479_v61 = vld [vmem:[%s6546_s17 + $0x368] sm:$0xf0]  ;;  %2194 = vmatmul.bf16.gmra.mxu1 %v2033_v63  ;;  %v1921_v11 = vpop.f32.mrf.mxu3 }
 0x29f   : > { %v5482_v0 = vor.u32 %v6364_v60, %v5479_v61 }
 0x2a0   : > { %v1568_v27 = vpack.c.bf16 %v1550_v26, %v1550_v26  ;;  %v6362_v26 = vld [vmem:[%s6546_s17 + $0x354] sm:$0xf] }
 0x2a1   : > { %2695 = vmatpush.bf16.msrb.mxu3 %v5482_v0  ;;  %v1877_v10 = vpop.f32.mrf.mxu1  ;;  %v5461_v0 = vld [vmem:[%s6546_s17 + $0x340] sm:$0xf] }
 0x2a2   : > { %5005 = vst.msk [vmem:[%s6879_s25 + $0x64] sm:$0xf] %vm864_vm1, %v1568_v27  ;;  %v1922_v19 = vadd.f32 %v1921_v11, %v1877_v10  ;;  %v5471_v27 = vld [vmem:[%s6546_s17 + $0x358] sm:$0xf0] }
 0x2a3   : > { %v5474_v29 = vor.u32 %v6362_v26, %v5471_v27  ;;  %v6344_v26 = vld [vmem:[%s6546_s17 + $0x2c4] sm:$0xf] }
 0x2a5   : > { %v1552_v34 = vpop.f32.mrf.mxu2  ;;  %2696 = vmatpush.bf16.msrb.mxu3 %v5474_v29  ;;  %v5453_v29 = vld [vmem:[%s6546_s17 + $0x330] sm:$0xf] }
 0x2a6   : > { %v1553_v37 = vadd.f32 %v1552_v34, %v1508_v4  ;;  %v5434_v4 = vor.u32 %v6352_v62, %v5431_v1  ;;  %v1923_v22 = vpop.f32.mrf.mxu3  ;;  %v6361_v1 = vld [vmem:[%s6546_s17 + $0x344] sm:$0xf0] }
 0x2a8   : > { %v1569_v44 = vpack.c.bf16 %v1553_v37, %v1553_v37  ;;  %2649 = vmatpush.bf16.msrb.mxu1 %v5434_v4  ;;  %v5462_v4 = vor.u32 %v6361_v1, %v5461_v0 }
 0x2a9   : > { %v1879_v20 = vpop.f32.mrf.mxu1  ;;  %2697 = vmatpush.bf16.msrb.mxu3 %v5466_v57  ;;  %v6357_v57 = vld [vmem:[%s6546_s17 + $0x324] sm:$0xf0] }
 0x2aa   : > { %5006 = vst.msk [vmem:[%s6879_s25 + $0x68] sm:$0xf] %vm864_vm1, %v1569_v44  ;;  %v1924_v25 = vadd.f32 %v1923_v22, %v1879_v20  ;;  %2609 = vmatpush.bf16.msra.mxu2 %v5462_v4  ;;  %v5325_v4 = vld [vmem:[%s7997_s1] sm:$0xf] }
 0x2ac   : > { %2650 = vmatpush.bf16.msrb.mxu1 %v5426_v21  ;;  %v2035_v28 = vpack.c.bf16 %v1924_v25, %v1922_v19  ;;  %v5455_v25 = vld [vmem:[%s6546_s17 + $0x338] sm:$0xf0] }
 0x2ad   : > { %v1554_v48 = vpop.f32.mrf.mxu2 }
 0x2ae   : > { %v1555_v49 = vadd.f32 %v1554_v48, %v1510_v13  ;;  %2199 = vmatmul.bf16.gmra.mxu1 %v2035_v28  ;;  %v1926_v33 = vpop.f32.mrf.mxu3 }
 0x2b0   : > { %v1570_v51 = vpack.c.bf16 %v1555_v49, %v1555_v49  ;;  %2651 = vmatpush.bf16.msrb.mxu1 %v5418_v45 }
 0x2b1   : > { %v1882_v32 = vpop.f32.mrf.mxu1 }
 0x2b2   : > { %5007 = vst.msk [vmem:[%s6879_s25 + $0x6c] sm:$0xf] %vm864_vm1, %v1570_v51  ;;  %v1927_v44 = vadd.f32 %v1926_v33, %v1882_v32  ;;  %v6349_v51 = vld [vmem:[%s6546_s17 + $0x2e4] sm:$0xf0] }
 0x2b4   : > { %2652 = vmatpush.bf16.msrb.mxu1 %v5410_v6 }
 0x2b5   : > { %v1994_v58 = vpop.f32.mrf.mxu2 }
 0x2b6   : > { %v1995_v13 = vadd.f32 %v1994_v58, %v7220_v23  ;;  %v5421_v23 = vld [vmem:[%s6546_s17 + $0x2f0] sm:$0xf]  ;;  %v1928_v47 = vpop.f32.mrf.mxu3 }
 0x2b7   : > { %v5422_v31 = vor.u32 %v6351_v30, %v5421_v23  ;;  %v5399_v23 = vld [vmem:[%s6546_s17 + $0x2c8] sm:$0xf0]  ;;  %v6359_v30 = vld [vmem:[%s6546_s17 + $0x334] sm:$0xf0] }
 0x2b8   : > { %v5402_v28 = vor.u32 %v6344_v26, %v5399_v23 }
 0x2b9   : > { %2562 = vmatpush.bf16.msra.mxu0 %v5422_v31  ;;  %v1884_v46 = vpop.f32.mrf.mxu1  ;;  %v5397_v31 = vld [vmem:[%s6546_s17 + $0x2c0] sm:$0xf] }
 0x2ba   : > { %v1929_v49 = vadd.f32 %v1928_v47, %v1884_v46  ;;  %2653 = vmatpush.bf16.msrb.mxu1 %v5402_v28  ;;  %v6330_v28 = vld [vmem:[%s7997_s1 + $0x24] sm:$0xf] }
 0x2bc   : > { %v2037_v54 = vpack.c.bf16 %v1929_v49, %v1927_v44  ;;  %v5394_v44 = vor.u32 %v6342_v41, %v5391_v42  ;;  %v6375_v41 = vld [vmem:[%s7998_s2 + $0x38] sm:$0xff]  ;;  %v5349_v42 = vld [vmem:[%s7997_s1 + $0x30] sm:$0xf] }
 0x2bd   : > { %v1996_v12 = vpop.f32.mrf.mxu2 }
 0x2be   : > { %v1997_v14 = vadd.f32 %v1996_v12, %v1952_v35  ;;  %v1962_v35 = vpop.f32.mrf.mxu0  ;;  %2204 = vmatmul.bf16.gmra.mxu1 %v2037_v54  ;;  %v1931_v59 = vpop.f32.mrf.mxu3  ;;  %v5405_v12 = vld [vmem:[%s6546_s17 + $0x2d0] sm:$0xf]  ;;  %v6343_v54 = vld [vmem:[%s6546_s17 + $0x2b4] sm:$0xf0] }
 0x2bf   : > { %2654 = vmatpush.bf16.msrb.mxu1 %v5394_v44 }
 0x2c0   : > { %v2030_v15 = vpack.c.bf16 %v1997_v14, %v1995_v13  ;;  %v6347_v13 = vld [vmem:[%s6546_s17 + $0x2d4] sm:$0xf0] }
 0x2c1   : > { %v1887_v58 = vpop.f32.mrf.mxu1 }
 0x2c2   : > { %5274 = vmatmul.msk.bf16.vlgmr.msra.gmra.mxu3 %vm417_vm0, %v2030_v15  ;;  %v1932_v7 = vadd.f32 %v1931_v59, %v1887_v58  ;;  %v5406_v15 = vor.u32 %v6347_v13, %v5405_v12  ;;  %v6326_v58 = vld [vmem:[%s7997_s1 + $0x4] sm:$0xf]  ;;  %v5327_v59 = vld [vmem:[%s7997_s1 + $0x8] sm:$0xf0]  ;;  %v6328_v13 = vld [vmem:[%s7997_s1 + $0x14] sm:$0xf] }
 0x2c3   : > { %v5330_v1 = vor.u32 %v6326_v58, %v5327_v59 }
 0x2c5   : > { %v1999_v24 = vpop.f32.mrf.mxu2 }
 0x2c6   : > { %v2000_v36 = vadd.f32 %v1999_v24, %v1955_v50  ;;  %v5413_v50 = vld [vmem:[%s6546_s17 + $0x2e0] sm:$0xf]  ;;  %v1965_v53 = vpop.f32.mrf.mxu0  ;;  %v1933_v9 = vpop.f32.mrf.mxu3  ;;  %v6358_v24 = vld [vmem:[%s6546_s17 + $0x334] sm:$0xf] }
 0x2c7   : > { %v5414_v55 = vor.u32 %v6349_v51, %v5413_v50  ;;  %v5458_v27 = vor.u32 %v6358_v24, %v5455_v25  ;;  %v6356_v50 = vld [vmem:[%s6546_s17 + $0x324] sm:$0xf]  ;;  %v5447_v51 = vld [vmem:[%s6546_s17 + $0x328] sm:$0xf0] }
 0x2c8   : > { %v5450_v52 = vor.u32 %v6356_v50, %v5447_v51 }
 0x2c9   : > { %2563 = vmatpush.bf16.msra.mxu0 %v5414_v55  ;;  %2698 = vmatpush.bf16.msrb.mxu3 %v5458_v27  ;;  %v5445_v55 = vld [vmem:[%s6546_s17 + $0x320] sm:$0xf] }
 0x2cd   : > { %v2001_v34 = vpop.f32.mrf.mxu2  ;;  %2564 = vmatpush.bf16.msra.mxu0 %v5406_v15  ;;  %2699 = vmatpush.bf16.msrb.mxu3 %v5450_v52  ;;  %v6380_v52 = vld [vmem:[%s7998_s2 + $0x60] sm:$0xff] }
 0x2ce   : > { %v2002_v37 = vadd.f32 %v2001_v34, %v1957_v8  ;;  %v1967_v3 = vpop.f32.mrf.mxu0  ;;  %v1889_v8 = vpop.f32.mrf.mxu1  ;;  %v5454_v34 = vor.u32 %v6359_v30, %v5453_v29  ;;  %v5343_v29 = vld [vmem:[%s7997_s1 + $0x28] sm:$0xf0] }
 0x2cf   : > { %v1934_v11 = vadd.f32 %v1933_v9, %v1889_v8 }
 0x2d0   : > { %v2032_v38 = vpack.c.bf16 %v2002_v37, %v2000_v36  ;;  %2610 = vmatpush.bf16.msra.mxu2 %v5454_v34 }
 0x2d1   : > { %v2039_v14 = vpack.c.bf16 %v1934_v11, %v1932_v7  ;;  %v5326_v7 = vor.u32 %v6327_v5, %v5325_v4  ;;  %v6379_v5 = vld [vmem:[%s7998_s2 + $0x58] sm:$0xff] }
 0x2d2   : > { %5275 = vmatmul.msk.bf16.gmra.mxu3 %vm417_vm0, %v2032_v38 }
 0x2d3   : > { %2209 = vmatmul.bf16.gmra.mxu1 %v2039_v14  ;;  %v5335_v14 = vld [vmem:[%s7997_s1 + $0x18] sm:$0xf0] }
 0x2d5   : > { %v2004_v48 = vpop.f32.mrf.mxu2 }
 0x2d6   : > { %v2005_v61 = vadd.f32 %v2004_v48, %v1960_v18  ;;  %v1970_v16 = vpop.f32.mrf.mxu0  ;;  %v1892_v17 = vpop.f32.mrf.mxu1 }
 0x2d7   : > { %v1936_v18 = vpop.f32.mrf.mxu3 }
 0x2d8   : > { %v1937_v32 = vadd.f32 %v1936_v18, %v1892_v17  ;;  %v5338_v17 = vor.u32 %v6328_v13, %v5335_v14  ;;  %v5333_v18 = vld [vmem:[%s7997_s1 + $0x10] sm:$0xf]  ;;  %v6372_v13 = vld [vmem:[%s7998_s2 + $0x20] sm:$0xff] }
 0x2dd   : > { %v2006_v60 = vpop.f32.mrf.mxu2 }
 0x2de   : > { %v2007_v62 = vadd.f32 %v2006_v60, %v1962_v35  ;;  %v1894_v33 = vpop.f32.mrf.mxu1  ;;  %v6345_v35 = vld [vmem:[%s6546_s17 + $0x2c4] sm:$0xf0]  ;;  %v1972_v38 = vpop.f32.mrf.mxu0  ;;  %v5446_v60 = vor.u32 %v6357_v57, %v5445_v55 }
 0x2df   : > { %v1938_v36 = vpop.f32.mrf.mxu3  ;;  %v5398_v37 = vor.u32 %v6345_v35, %v5397_v31  ;;  %v5346_v31 = vor.u32 %v6330_v28, %v5343_v29  ;;  %v6335_v55 = vld [vmem:[%s7997_s1 + $0x44] sm:$0xf0]  ;;  %v6371_v28 = vld [vmem:[%s7998_s2 + $0x18] sm:$0xff] }
 0x2e0   : > { %v2034_v63 = vpack.c.bf16 %v2007_v62, %v2005_v61  ;;  %v1939_v40 = vadd.f32 %v1938_v36, %v1894_v33  ;;  %v6340_v61 = vld [vmem:[%s6546_s17 + $0x2a4] sm:$0xf]  ;;  %v5383_v62 = vld [vmem:[%s6546_s17 + $0x2a8] sm:$0xf0]  ;;  %2611 = vmatpush.bf16.msra.mxu2 %v5446_v60  ;;  %v6331_v33 = vld [vmem:[%s7997_s1 + $0x24] sm:$0xf0] }
 0x2e1   : > { %2565 = vmatpush.bf16.msra.mxu0 %v5398_v37  ;;  %v5386_v2 = vor.u32 %v6340_v61, %v5383_v62  ;;  %v6381_v36 = vld [vmem:[%s7998_s2 + $0x68] sm:$0xff]  ;;  %v6332_v37 = vld [vmem:[%s7997_s1 + $0x34] sm:$0xf] }
 0x2e2   : > { %5276 = vmatmul.msk.bf16.gmra.mxu3 %vm417_vm0, %v2034_v63  ;;  %v2041_v43 = vpack.c.bf16 %v1939_v40, %v1937_v32  ;;  %v5381_v63 = vld [vmem:[%s6546_s17 + $0x2a0] sm:$0xf]  ;;  %v6373_v61 = vld [vmem:[%s7998_s2 + $0x28] sm:$0xff] }
 0x2e3   : > { %2655 = vmatpush.bf16.msrb.mxu1 %v5386_v2  ;;  %5491 = vmatmul.msk.bf16.vlgmr.msra.gmra.mxu2 %vm417_vm0, %v5330_v1  ;;  %v5341_v32 = vld [vmem:[%s7997_s1 + $0x20] sm:$0xf] }
 0x2e4   : > { %2214 = vmatmul.bf16.gmra.mxu1 %v2041_v43  ;;  %v5342_v34 = vor.u32 %v6331_v33, %v5341_v32  ;;  %2929 = vmatpush.bf16.msrb.mxu2 %v6381_v36  ;;  %v6333_v43 = vld [vmem:[%s7997_s1 + $0x34] sm:$0xf0] }
 0x2e5   : > { %v2009_v10 = vpop.f32.mrf.mxu2  ;;  %v5350_v44 = vor.u32 %v6333_v43, %v5349_v42 }
 0x2e6   : > { %v2010_v20 = vadd.f32 %v2009_v10, %v1965_v53  ;;  %v1975_v48 = vpop.f32.mrf.mxu0  ;;  %v5389_v53 = vld [vmem:[%s6546_s17 + $0x2b0] sm:$0xf] }
 0x2e7   : > { %v5390_v56 = vor.u32 %v6343_v54, %v5389_v53  ;;  %v6374_v53 = vld [vmem:[%s7998_s2 + $0x30] sm:$0xff]  ;;  %v5357_v54 = vld [vmem:[%s7997_s1 + $0x40] sm:$0xf] }
 0x2e8   : > { %2930 = vmatpush.bf16.msrb.mxu2 %v6380_v52 }
 0x2e9   : > { %2566 = vmatpush.bf16.msra.mxu0 %v5390_v56  ;;  %v5358_v56 = vor.u32 %v6335_v55, %v5357_v54 }
 0x2ec   : > { %2931 = vmatpush.bf16.msrb.mxu2 %v6379_v5 }
 0x2ed   : > { %v2011_v19 = vpop.f32.mrf.mxu2 }
 0x2ee   : > { %v2012_v21 = vadd.f32 %v2011_v19, %v1967_v3  ;;  %v6341_v3 = vld [vmem:[%s6546_s17 + $0x2a4] sm:$0xf0]  ;;  %v1977_v8 = vpop.f32.mrf.mxu0  ;;  %v6329_v19 = vld [vmem:[%s7997_s1 + $0x14] sm:$0xf0] }
 0x2ef   : > { %v5382_v6 = vor.u32 %v6341_v3, %v5381_v63  ;;  %v6336_v63 = vld [vmem:[%s7997_s1 + $0x54] sm:$0xf] }
 0x2f0   : > { %v2036_v22 = vpack.c.bf16 %v2012_v21, %v2010_v20  ;;  %v5334_v21 = vor.u32 %v6329_v19, %v5333_v18 }
 0x2f1   : > { %2567 = vmatpush.bf16.msra.mxu0 %v5382_v6  ;;  %v5365_v6 = vld [vmem:[%s7997_s1 + $0x50] sm:$0xf] }
 0x2f2   : > { %5277 = vmatmul.msk.bf16.gmra.mxu3 %vm417_vm0, %v2036_v22 }
 0x2f3   : > { %5492 = vmatmul.msk.bf16.gmra.mxu2 %vm417_vm0, %v5338_v17 }
 0x2f4   : > { %2656 = vmatmul.bf16.vlgmr.msrb.gmra.mxu1 %v5326_v7  ;;  %2568 = vmatmul.bf16.vlgmr.msra.gmra.mxu0 %v5326_v7  ;;  %v6337_v7 = vld [vmem:[%s7997_s1 + $0x54] sm:$0xf0] }
 0x2f5   : > { %v2014_v39 = vpop.f32.mrf.mxu2  ;;  %2883 = vmatpush.bf16.msrb.mxu0 %v6375_v41 }
 0x2f6   : > { %v2015_v46 = vadd.f32 %v2014_v39, %v1970_v16  ;;  %v1980_v15 = vpop.f32.mrf.mxu0 }
 0x2f9   : > { %2884 = vmatpush.bf16.msrb.mxu0 %v6374_v53  ;;  %v6368_v53 = vld [vmem:[%s7998_s2] sm:$0xff] }
 0x2fb   : > { %v2185_v20 = vpop.f32.mrf.mxu1 }
 0x2fd   : > { %v2016_v45 = vpop.f32.mrf.mxu2  ;;  %2885 = vmatpush.bf16.msrb.mxu0 %v6373_v61 }
 0x2fe   : > { %v2017_v47 = vadd.f32 %v2016_v45, %v1972_v38  ;;  %v1982_v22 = vpop.f32.mrf.mxu0  ;;  %v5351_v38 = vld [vmem:[%s7997_s1 + $0x38] sm:$0xf0] }
 0x2ff   : > { %v5354_v39 = vor.u32 %v6332_v37, %v5351_v38  ;;  %v6377_v37 = vld [vmem:[%s7998_s2 + $0x48] sm:$0xff]  ;;  %v6370_v38 = vld [vmem:[%s7998_s2 + $0x10] sm:$0xff] }
 0x300   : > { %v2038_v49 = vpack.c.bf16 %v2017_v47, %v2015_v46  ;;  %v6334_v47 = vld [vmem:[%s7997_s1 + $0x44] sm:$0xf] }
 0x301   : > { %2886 = vmatpush.bf16.msrb.mxu0 %v6372_v13  ;;  %v6423_v13 = vld [vmem:[%s6546_s17 + $0x454] sm:$0xf0] }
 0x302   : > { %5278 = vmatmul.msk.bf16.gmra.mxu3 %vm417_vm0, %v2038_v49 }
 0x303   : > { %v2187_v27 = vpop.f32.mrf.mxu1  ;;  %5493 = vmatmul.msk.bf16.gmra.mxu2 %vm417_vm0, %v5346_v31 }
 0x304   : > { %2661 = vmatmul.bf16.gmra.mxu1 %v5334_v21  ;;  %2573 = vmatmul.bf16.gmra.mxu0 %v5334_v21 }
 0x305   : > { %v2019_v0 = vpop.f32.mrf.mxu2  ;;  %2887 = vmatpush.bf16.msrb.mxu0 %v6371_v28 }
 0x306   : > { %v2020_v10 = vadd.f32 %v2019_v0, %v1975_v48  ;;  %v5359_v48 = vld [vmem:[%s7997_s1 + $0x48] sm:$0xf0]  ;;  %v5367_v0 = vld [vmem:[%s7997_s1 + $0x58] sm:$0xf0] }
 0x307   : > { %v7362_v50 = vor.u32 %v6334_v47, %v5359_v48  ;;  %v5370_v2 = vor.u32 %v6336_v63, %v5367_v0 }
 0x309   : > { %2888 = vmatpush.bf16.msrb.mxu0 %v6370_v38 }
 0x30b   : > { %v2190_v30 = vpop.f32.mrf.mxu1 }
 0x30d   : > { %v2021_v9 = vpop.f32.mrf.mxu2 }
 0x30e   : > { %v2022_v11 = vadd.f32 %v2021_v9, %v1977_v8  ;;  %v5366_v8 = vor.u32 %v6337_v7, %v5365_v6 }
 0x310   : > { %v2040_v12 = vpack.c.bf16 %v2022_v11, %v2020_v10 }
 0x312   : > { %5279 = vmatmul.msk.bf16.gmra.mxu3 %vm417_vm0, %v2040_v12 }
 0x313   : > { %v2192_v35 = vpop.f32.mrf.mxu1  ;;  %5494 = vmatmul.msk.bf16.gmra.mxu2 %vm417_vm0, %v5354_v39 }
 0x314   : > { %2578 = vmatmul.bf16.gmra.mxu0 %v5342_v34  ;;  %2666 = vmatmul.bf16.gmra.mxu1 %v5342_v34 }
 0x315   : > { %v2024_v16 = vpop.f32.mrf.mxu2 }
 0x316   : > { %v2025_v25 = vadd.f32 %v2024_v16, %v1980_v15  ;;  %v6338_v15 = vld [vmem:[%s7997_s1 + $0x64] sm:$0xf]  ;;  %v5375_v16 = vld [vmem:[%s7997_s1 + $0x68] sm:$0xf0] }
 0x317   : > { %v5378_v18 = vor.u32 %v6338_v15, %v5375_v16 }
 0x31b   : > { %v7341_v40 = vpop.f32.mrf.mxu1 }
 0x31d   : > { %v2026_v24 = vpop.f32.mrf.mxu2 }
 0x31e   : > { %v2027_v26 = vadd.f32 %v2026_v24, %v1982_v22  ;;  %v5373_v22 = vld [vmem:[%s7997_s1 + $0x60] sm:$0xf]  ;;  %v6339_v24 = vld [vmem:[%s7997_s1 + $0x64] sm:$0xf0] }
 0x320   : > { %v2042_v23 = vpack.c.bf16 %v2027_v26, %v2025_v25  ;;  %v5374_v25 = vor.u32 %v6339_v24, %v5373_v22 }
 0x322   : > { %5280 = vmatmul.msk.bf16.gmra.mxu3 %vm417_vm0, %v2042_v23 }
 0x323   : > { %v7354_v45 = vpop.f32.mrf.mxu1  ;;  %5495 = vmatmul.msk.bf16.gmra.mxu2 %vm417_vm0, %v7362_v50 }
 0x324   : > { %2583 = vmatmul.bf16.gmra.mxu0 %v5350_v44  ;;  %2671 = vmatmul.bf16.gmra.mxu1 %v5350_v44  ;;  %v6369_v44 = vld [vmem:[%s7998_s2 + $0x8] sm:$0xff] }
 0x325   : > { %2889 = vmatpush.bf16.msrb.mxu0 %v6369_v44  ;;  %v5716_v44 = vld [vmem:[%s6546_s17 + $0x3e0] sm:$0xf] }
 0x329   : > { %2890 = vmatpush.bf16.msrb.mxu0 %v6368_v53 }
 0x32b   : > { %v2200_v58 = vpop.f32.mrf.mxu1 }
 0x332   : > { %5498 = vmatmul.msk.bf16.vlgmr.msrb.gmra.mxu3 %vm417_vm0, %v5330_v1 }
 0x333   : > { %v2202_v3 = vpop.f32.mrf.mxu1  ;;  %5496 = vmatmul.msk.bf16.gmra.mxu2 %vm417_vm0, %v5370_v2 }
 0x334   : > { %2588 = vmatmul.bf16.gmra.mxu0 %v5358_v56  ;;  %2676 = vmatmul.bf16.gmra.mxu1 %v5358_v56 }
 0x33b   : > { %v2205_v12 = vpop.f32.mrf.mxu1 }
 0x342   : > { %5499 = vmatmul.msk.bf16.gmra.mxu3 %vm417_vm0, %v5338_v17 }
 0x343   : > { %5497 = vmatmul.msk.bf16.gmra.mxu2 %vm417_vm0, %v5378_v18  ;;  %v2207_v21 = vpop.f32.mrf.mxu1 }
 0x344   : > { %2593 = vmatmul.bf16.gmra.mxu0 %v5366_v8  ;;  %2681 = vmatmul.bf16.gmra.mxu1 %v5366_v8 }
 0x345   : > { %v2229_v46 = vpop.f32.mrf.mxu3 }
 0x346   : > { %v2230_v49 = vadd.f32 %v2229_v46, %v2185_v20  ;;  %v6378_v20 = vld [vmem:[%s7998_s2 + $0x50] sm:$0xff] }
 0x347   : > { %2932 = vmatpush.bf16.msrb.mxu2 %v6378_v20 }
 0x348   : > { %v2264_v51 = vpack.c.bf16 %v2230_v49, %v2230_v49  ;;  %v6376_v49 = vld [vmem:[%s7998_s2 + $0x40] sm:$0xff] }
 0x34a   : > { %5281 = vst.msk [vmem:[%s6879_s25 + $0x70] sm:$0xf] %vm864_vm1, %v2264_v51 }
 0x34b   : > { %2933 = vmatpush.bf16.msrb.mxu2 %v6377_v37 }
 0x34d   : > { %v2231_v57 = vpop.f32.mrf.mxu3 }
 0x34e   : > { %v2232_v59 = vadd.f32 %v2231_v57, %v2187_v27 }
 0x34f   : > { %2934 = vmatpush.bf16.msrb.mxu2 %v6376_v49 }
 0x350   : > { %v2265_v60 = vpack.c.bf16 %v2232_v59, %v2232_v59 }
 0x352   : > { %5282 = vst.msk [vmem:[%s6879_s25 + $0x74] sm:$0xf] %vm864_vm1, %v2265_v60  ;;  %5500 = vmatmul.msk.bf16.gmra.mxu3 %vm417_vm0, %v5346_v31 }
 0x354   : > { %2598 = vmatmul.bf16.gmra.mxu0 %v5374_v25  ;;  %2686 = vmatmul.bf16.gmra.mxu1 %v5374_v25 }
 0x355   : > { %v2234_v62 = vpop.f32.mrf.mxu3 }
 0x356   : > { %v2235_v1 = vadd.f32 %v2234_v62, %v2190_v30  ;;  %v2210_v30 = vpop.f32.mrf.mxu1 }
 0x358   : > { %v2266_v4 = vpack.c.bf16 %v2235_v1, %v2235_v1 }
 0x35a   : > { %5283 = vst.msk [vmem:[%s6879_s25 + $0x78] sm:$0xf] %vm864_vm1, %v2266_v4 }
 0x35d   : > { %v2236_v9 = vpop.f32.mrf.mxu3 }
 0x35e   : > { %v2237_v10 = vadd.f32 %v2236_v9, %v2192_v35  ;;  %v2212_v35 = vpop.f32.mrf.mxu1 }
 0x360   : > { %v2267_v11 = vpack.c.bf16 %v2237_v10, %v2237_v10 }
 0x362   : > { %5284 = vst.msk [vmem:[%s6879_s25 + $0x7c] sm:$0xf] %vm864_vm1, %v2267_v11  ;;  %5501 = vmatmul.msk.bf16.gmra.mxu3 %vm417_vm0, %v5354_v39 }
 0x365   : > { %v2239_v14 = vpop.f32.mrf.mxu3 }
 0x366   : > { %v2240_v17 = vadd.f32 %v2239_v14, %v7341_v40  ;;  %v2215_v42 = vpop.f32.mrf.mxu1  ;;  %v6410_v14 = vld [vmem:[%s6546_s17 + $0x3f4] sm:$0xf] }
 0x368   : > { %v2268_v19 = vpack.c.bf16 %v2240_v17, %v2240_v17  ;;  %v5726_v17 = vld [vmem:[%s6546_s17 + $0x3f8] sm:$0xf0] }
 0x36a   : > { %5285 = vst.msk [vmem:[%s6879_s25 + $0x80] sm:$0xf] %vm864_vm1, %v2268_v19  ;;  %v5729_v19 = vor.u32 %v6410_v14, %v5726_v17  ;;  %v6419_v14 = vld [vmem:[%s6546_s17 + $0x434] sm:$0xf0]  ;;  %v5702_v17 = vld [vmem:[%s6546_s17 + $0x3c8] sm:$0xf0] }
 0x36c   : > { %3355 = vmatpush.bf16.msra.mxu0 %v5729_v19 }
 0x36d   : > { %v2241_v26 = vpop.f32.mrf.mxu3 }
 0x36e   : > { %v2242_v27 = vadd.f32 %v2241_v26, %v7354_v45  ;;  %v2613_v45 = vpop.f32.mrf.mxu2  ;;  %v2217_v51 = vpop.f32.mrf.mxu1 }
 0x370   : > { %v2269_v23 = vpack.c.bf16 %v2242_v27, %v2242_v27  ;;  %v5724_v27 = vld [vmem:[%s6546_s17 + $0x3f0] sm:$0xf] }
 0x371   : > { %v2569_v43 = vpop.f32.mrf.mxu0 }
 0x372   : > { %5286 = vst.msk [vmem:[%s6879_s25 + $0x84] sm:$0xf] %vm864_vm1, %v2269_v23  ;;  %5502 = vmatmul.msk.bf16.gmra.mxu3 %vm417_vm0, %v7362_v50  ;;  %v2614_v52 = vadd.f32 %v2613_v45, %v2569_v43  ;;  %v6411_v23 = vld [vmem:[%s6546_s17 + $0x3f4] sm:$0xf0]  ;;  %v6409_v45 = vld [vmem:[%s6546_s17 + $0x3e4] sm:$0xf0] }
 0x373   : > { %v5725_v28 = vor.u32 %v6411_v23, %v5724_v27  ;;  %v6416_v27 = vld [vmem:[%s6546_s17 + $0x424] sm:$0xf] }
 0x375   : > { %v2244_v29 = vpop.f32.mrf.mxu3  ;;  %3267 = vmatpush.bf16.msra.mxu1 %v5725_v28 }
 0x376   : > { %v2245_v31 = vadd.f32 %v2244_v29, %v2200_v58  ;;  %v2615_v54 = vpop.f32.mrf.mxu2  ;;  %v7464_v61 = vpop.f32.mrf.mxu1 }
 0x378   : > { %v2270_v32 = vpack.c.bf16 %v2245_v31, %v2245_v31 }
 0x379   : > { %v2571_v50 = vpop.f32.mrf.mxu0 }
 0x37a   : > { %5287 = vst.msk [vmem:[%s6879_s25 + $0x88] sm:$0xf] %vm864_vm1, %v2270_v32  ;;  %v2616_v56 = vadd.f32 %v2615_v54, %v2571_v50  ;;  %v6406_v54 = vld [vmem:[%s6546_s17 + $0x3d4] sm:$0xf] }
 0x37c   : > { %v2736_v58 = vpack.c.bf16 %v2616_v56, %v2614_v52 }
 0x37d   : > { %v2246_v33 = vpop.f32.mrf.mxu3 }
 0x37e   : > { %v2247_v34 = vadd.f32 %v2246_v33, %v2202_v3  ;;  %2891 = vmatmul.bf16.vlgmr.msrb.gmra.mxu0 %v2736_v58  ;;  %v2618_v62 = vpop.f32.mrf.mxu2  ;;  %v5774_v3 = vld [vmem:[%s6546_s17 + $0x458] sm:$0xf0]  ;;  %v2659_v9 = vpop.f32.mrf.mxu1 }
 0x380   : > { %v2271_v36 = vpack.c.bf16 %v2247_v34, %v2247_v34  ;;  %v6420_v34 = vld [vmem:[%s6546_s17 + $0x444] sm:$0xf] }
 0x381   : > { %v2574_v60 = vpop.f32.mrf.mxu0 }
 0x382   : > { %5288 = vst.msk [vmem:[%s6879_s25 + $0x8c] sm:$0xf] %vm864_vm1, %v2271_v36  ;;  %5503 = vmatmul.msk.bf16.gmra.mxu3 %vm417_vm0, %v5370_v2  ;;  %v6422_v2 = vld [vmem:[%s6546_s17 + $0x454] sm:$0xf]  ;;  %v2619_v5 = vadd.f32 %v2618_v62, %v2574_v60  ;;  %v6408_v36 = vld [vmem:[%s6546_s17 + $0x3e4] sm:$0xf] }
 0x383   : > { %v5777_v6 = vor.u32 %v6422_v2, %v5774_v3 }
 0x385   : > { %v2249_v39 = vpop.f32.mrf.mxu3  ;;  %3401 = vmatpush.bf16.msra.mxu2 %v5777_v6 }
 0x386   : > { %v2250_v40 = vadd.f32 %v2249_v39, %v2205_v12  ;;  %v2620_v7 = vpop.f32.mrf.mxu2  ;;  %v5772_v12 = vld [vmem:[%s6546_s17 + $0x450] sm:$0xf]  ;;  %v2662_v25 = vpop.f32.mrf.mxu1  ;;  %v5718_v39 = vld [vmem:[%s6546_s17 + $0x3e8] sm:$0xf0] }
 0x387   : > { %v5773_v16 = vor.u32 %v6423_v13, %v5772_v12  ;;  %v5756_v13 = vld [vmem:[%s6546_s17 + $0x430] sm:$0xf] }
 0x388   : > { %v2272_v41 = vpack.c.bf16 %v2250_v40, %v2250_v40  ;;  %v5764_v40 = vld [vmem:[%s6546_s17 + $0x440] sm:$0xf] }
 0x389   : > { %v2576_v4 = vpop.f32.mrf.mxu0  ;;  %3313 = vmatpush.bf16.msra.mxu3 %v5773_v16  ;;  %v6404_v16 = vld [vmem:[%s6546_s17 + $0x3c4] sm:$0xf] }
 0x38a   : > { %5289 = vst.msk [vmem:[%s6879_s25 + $0x90] sm:$0xf] %vm864_vm1, %v2272_v41  ;;  %v2621_v10 = vadd.f32 %v2620_v7, %v2576_v4  ;;  %v6421_v41 = vld [vmem:[%s6546_s17 + $0x444] sm:$0xf0]  ;;  %v6407_v4 = vld [vmem:[%s6546_s17 + $0x3d4] sm:$0xf0]  ;;  %v5705_v19 = vor.u32 %v6404_v16, %v5702_v17 }
 0x38b   : > { %v5765_v43 = vor.u32 %v6421_v41, %v5764_v40  ;;  %v6402_v40 = vld [vmem:[%s6546_s17 + $0x3b4] sm:$0xf]  ;;  %v5678_v16 = vld [vmem:[%s6546_s17 + $0x398] sm:$0xf0] }
 0x38c   : > { %v2738_v15 = vpack.c.bf16 %v2621_v10, %v2619_v5 }
 0x38d   : > { %v2251_v46 = vpop.f32.mrf.mxu3  ;;  %3314 = vmatpush.bf16.msra.mxu3 %v5765_v43  ;;  %v5694_v43 = vld [vmem:[%s6546_s17 + $0x3b8] sm:$0xf0] }
 0x38e   : > { %v2252_v47 = vadd.f32 %v2251_v46, %v2207_v21  ;;  %2896 = vmatmul.bf16.gmra.mxu0 %v2738_v15  ;;  %v2623_v21 = vpop.f32.mrf.mxu2  ;;  %v2664_v46 = vpop.f32.mrf.mxu1  ;;  %v5757_v15 = vor.u32 %v6419_v14, %v5756_v13 }
 0x390   : > { %v2273_v48 = vpack.c.bf16 %v2252_v47, %v2252_v47  ;;  %v5717_v47 = vor.u32 %v6409_v45, %v5716_v44  ;;  %v5697_v44 = vor.u32 %v6402_v40, %v5694_v43  ;;  %v6383_v43 = vld [vmem:[%s7997_s1 + $0x4] sm:$0xf0] }
 0x391   : > { %v2579_v20 = vpop.f32.mrf.mxu0  ;;  %3315 = vmatpush.bf16.msra.mxu3 %v5757_v15  ;;  %v6398_v15 = vld [vmem:[%s6546_s17 + $0x394] sm:$0xf] }
 0x392   : > { %5290 = vst.msk [vmem:[%s6879_s25 + $0x94] sm:$0xf] %vm864_vm1, %v2273_v48  ;;  %5504 = vmatmul.msk.bf16.gmra.mxu3 %vm417_vm0, %v5378_v18  ;;  %v2624_v29 = vadd.f32 %v2623_v21, %v2579_v20  ;;  %3268 = vmatpush.bf16.msra.mxu1 %v5717_v47 }
 0x395   : > { %v2254_v55 = vpop.f32.mrf.mxu3 }
 0x396   : > { %v2255_v57 = vadd.f32 %v2254_v55, %v2210_v30  ;;  %v2625_v31 = vpop.f32.mrf.mxu2  ;;  %v5710_v55 = vld [vmem:[%s6546_s17 + $0x3d8] sm:$0xf0]  ;;  %v2667_v56 = vpop.f32.mrf.mxu1 }
 0x398   : > { %v2274_v59 = vpack.c.bf16 %v2255_v57, %v2255_v57 }
 0x399   : > { %v2581_v30 = vpop.f32.mrf.mxu0 }
 0x39a   : > { %5291 = vst.msk [vmem:[%s6879_s25 + $0x98] sm:$0xf] %vm864_vm1, %v2274_v59  ;;  %v2626_v33 = vadd.f32 %v2625_v31, %v2581_v30  ;;  %v5713_v59 = vor.u32 %v6406_v54, %v5710_v55  ;;  %v5750_v30 = vld [vmem:[%s6546_s17 + $0x428] sm:$0xf0] }
 0x39b   : > { %v5753_v31 = vor.u32 %v6416_v27, %v5750_v30 }
 0x39c   : > { %v2740_v37 = vpack.c.bf16 %v2626_v33, %v2624_v29 }
 0x39d   : > { %v2256_v63 = vpop.f32.mrf.mxu3 }
 0x39e   : > { %v2257_v0 = vadd.f32 %v2256_v63, %v2212_v35  ;;  %v5766_v35 = vld [vmem:[%s6546_s17 + $0x448] sm:$0xf0]  ;;  %2901 = vmatmul.bf16.gmra.mxu0 %v2740_v37  ;;  %v2628_v49 = vpop.f32.mrf.mxu2 }
 0x39f   : > { %v5769_v38 = vor.u32 %v6420_v34, %v5766_v35 }
 0x3a0   : > { %v2275_v1 = vpack.c.bf16 %v2257_v0, %v2257_v0  ;;  %v6418_v0 = vld [vmem:[%s6546_s17 + $0x434] sm:$0xf] }
 0x3a1   : > { %3402 = vmatpush.bf16.msra.mxu2 %v5769_v38  ;;  %v2584_v48 = vpop.f32.mrf.mxu0  ;;  %v5748_v38 = vld [vmem:[%s6546_s17 + $0x420] sm:$0xf] }
 0x3a2   : > { %5292 = vst.msk [vmem:[%s6879_s25 + $0x9c] sm:$0xf] %vm864_vm1, %v2275_v1  ;;  %v2629_v57 = vadd.f32 %v2628_v49, %v2584_v48  ;;  %v5758_v1 = vld [vmem:[%s6546_s17 + $0x438] sm:$0xf0] }
 0x3a3   : > { %v5761_v3 = vor.u32 %v6418_v0, %v5758_v1  ;;  %v6400_v0 = vld [vmem:[%s6546_s17 + $0x3a4] sm:$0xf] }
 0x3a5   : > { %v2259_v8 = vpop.f32.mrf.mxu3  ;;  %3403 = vmatpush.bf16.msra.mxu2 %v5761_v3  ;;  %v5740_v3 = vld [vmem:[%s6546_s17 + $0x410] sm:$0xf] }
 0x3a6   : > { %v2260_v11 = vadd.f32 %v2259_v8, %v2215_v42  ;;  %v5721_v42 = vor.u32 %v6408_v36, %v5718_v39  ;;  %v2630_v60 = vpop.f32.mrf.mxu2  ;;  %v6417_v39 = vld [vmem:[%s6546_s17 + $0x424] sm:$0xf0] }
 0x3a8   : > { %v2276_v18 = vpack.c.bf16 %v2260_v11, %v2260_v11  ;;  %3356 = vmatpush.bf16.msra.mxu0 %v5721_v42  ;;  %v5749_v42 = vor.u32 %v6417_v39, %v5748_v38 }
 0x3a9   : > { %v2586_v58 = vpop.f32.mrf.mxu0  ;;  %3404 = vmatpush.bf16.msra.mxu2 %v5753_v31  ;;  %v6413_v31 = vld [vmem:[%s6546_s17 + $0x404] sm:$0xf0] }
 0x3aa   : > { %5293 = vst.msk [vmem:[%s6879_s25 + $0xa0] sm:$0xf] %vm864_vm1, %v2276_v18  ;;  %v2631_v63 = vadd.f32 %v2630_v60, %v2586_v58  ;;  %3316 = vmatpush.bf16.msra.mxu3 %v5749_v42  ;;  %v5612_v42 = vld [vmem:[%s7997_s1] sm:$0xf] }
 0x3ac   : > { %3357 = vmatpush.bf16.msra.mxu0 %v5713_v59  ;;  %v2742_v2 = vpack.c.bf16 %v2631_v63, %v2629_v57  ;;  %v5742_v63 = vld [vmem:[%s6546_s17 + $0x418] sm:$0xf0] }
 0x3ad   : > { %v2261_v22 = vpop.f32.mrf.mxu3 }
 0x3ae   : > { %v2262_v24 = vadd.f32 %v2261_v22, %v2217_v51  ;;  %2906 = vmatmul.bf16.gmra.mxu0 %v2742_v2  ;;  %v2633_v7 = vpop.f32.mrf.mxu2 }
 0x3b0   : > { %v2277_v26 = vpack.c.bf16 %v2262_v24, %v2262_v24  ;;  %3358 = vmatpush.bf16.msra.mxu0 %v5705_v19 }
 0x3b1   : > { %v2589_v6 = vpop.f32.mrf.mxu0 }
 0x3b2   : > { %5294 = vst.msk [vmem:[%s6879_s25 + $0xa4] sm:$0xf] %vm864_vm1, %v2277_v26  ;;  %v2634_v18 = vadd.f32 %v2633_v7, %v2589_v6  ;;  %v6405_v26 = vld [vmem:[%s6546_s17 + $0x3c4] sm:$0xf0] }
 0x3b4   : > { %3359 = vmatpush.bf16.msra.mxu0 %v5697_v44 }
 0x3b5   : > { %v2701_v32 = vpop.f32.mrf.mxu3 }
 0x3b6   : > { %v2702_v51 = vadd.f32 %v2701_v32, %v7464_v61  ;;  %v5708_v61 = vld [vmem:[%s6546_s17 + $0x3d0] sm:$0xf]  ;;  %v2635_v21 = vpop.f32.mrf.mxu2 }
 0x3b7   : > { %v5709_v5 = vor.u32 %v6407_v4, %v5708_v61  ;;  %v5686_v61 = vld [vmem:[%s6546_s17 + $0x3a8] sm:$0xf0]  ;;  %v6415_v4 = vld [vmem:[%s6546_s17 + $0x414] sm:$0xf0] }
 0x3b8   : > { %v5689_v2 = vor.u32 %v6400_v0, %v5686_v61 }
 0x3b9   : > { %3269 = vmatpush.bf16.msra.mxu1 %v5709_v5  ;;  %v2591_v20 = vpop.f32.mrf.mxu0  ;;  %v5684_v5 = vld [vmem:[%s6546_s17 + $0x3a0] sm:$0xf] }
 0x3ba   : > { %v2636_v24 = vadd.f32 %v2635_v21, %v2591_v20  ;;  %3360 = vmatpush.bf16.msra.mxu0 %v5689_v2  ;;  %v6386_v2 = vld [vmem:[%s7997_s1 + $0x24] sm:$0xf] }
 0x3bc   : > { %v2744_v28 = vpack.c.bf16 %v2636_v24, %v2634_v18  ;;  %v5681_v18 = vor.u32 %v6398_v15, %v5678_v16  ;;  %v6431_v15 = vld [vmem:[%s7998_s2 + $0x38] sm:$0xff]  ;;  %v5636_v16 = vld [vmem:[%s7997_s1 + $0x30] sm:$0xf] }
 0x3bd   : > { %v2703_v50 = vpop.f32.mrf.mxu3 }
 0x3be   : > { %v2704_v52 = vadd.f32 %v2703_v50, %v2659_v9  ;;  %v2669_v9 = vpop.f32.mrf.mxu1  ;;  %2911 = vmatmul.bf16.gmra.mxu0 %v2744_v28  ;;  %v2638_v33 = vpop.f32.mrf.mxu2  ;;  %v5692_v50 = vld [vmem:[%s6546_s17 + $0x3b0] sm:$0xf]  ;;  %v6399_v28 = vld [vmem:[%s6546_s17 + $0x394] sm:$0xf0] }
 0x3bf   : > { %3361 = vmatpush.bf16.msra.mxu0 %v5681_v18 }
 0x3c0   : > { %v2737_v53 = vpack.c.bf16 %v2704_v52, %v2702_v51  ;;  %v6403_v51 = vld [vmem:[%s6546_s17 + $0x3b4] sm:$0xf0] }
 0x3c1   : > { %v2594_v32 = vpop.f32.mrf.mxu0 }
 0x3c2   : > { %5561 = vmatmul.msk.bf16.vlgmr.msrb.gmra.mxu2 %vm417_vm0, %v2737_v53  ;;  %v2639_v45 = vadd.f32 %v2638_v33, %v2594_v32  ;;  %v5693_v53 = vor.u32 %v6403_v51, %v5692_v50  ;;  %v6382_v32 = vld [vmem:[%s7997_s1 + $0x4] sm:$0xf]  ;;  %v5614_v33 = vld [vmem:[%s7997_s1 + $0x8] sm:$0xf0]  ;;  %v6384_v51 = vld [vmem:[%s7997_s1 + $0x14] sm:$0xf] }
 0x3c3   : > { %v5617_v39 = vor.u32 %v6382_v32, %v5614_v33 }
 0x3c5   : > { %v2706_v62 = vpop.f32.mrf.mxu3 }
 0x3c6   : > { %v2707_v10 = vadd.f32 %v2706_v62, %v2662_v25  ;;  %v5700_v25 = vld [vmem:[%s6546_s17 + $0x3c0] sm:$0xf]  ;;  %v2672_v23 = vpop.f32.mrf.mxu1  ;;  %v2640_v47 = vpop.f32.mrf.mxu2  ;;  %v6414_v62 = vld [vmem:[%s6546_s17 + $0x414] sm:$0xf] }
 0x3c7   : > { %v5701_v29 = vor.u32 %v6405_v26, %v5700_v25  ;;  %v5745_v1 = vor.u32 %v6414_v62, %v5742_v63  ;;  %v6412_v25 = vld [vmem:[%s6546_s17 + $0x404] sm:$0xf]  ;;  %v5734_v26 = vld [vmem:[%s6546_s17 + $0x408] sm:$0xf0] }
 0x3c8   : > { %v5737_v27 = vor.u32 %v6412_v25, %v5734_v26 }
 0x3c9   : > { %3270 = vmatpush.bf16.msra.mxu1 %v5701_v29  ;;  %3405 = vmatpush.bf16.msra.mxu2 %v5745_v1  ;;  %v5732_v29 = vld [vmem:[%s6546_s17 + $0x400] sm:$0xf] }
 0x3cd   : > { %v2708_v8 = vpop.f32.mrf.mxu3  ;;  %3271 = vmatpush.bf16.msra.mxu1 %v5693_v53  ;;  %3406 = vmatpush.bf16.msra.mxu2 %v5737_v27  ;;  %v6436_v27 = vld [vmem:[%s7998_s2 + $0x60] sm:$0xff] }
 0x3ce   : > { %v2709_v11 = vadd.f32 %v2708_v8, %v2664_v46  ;;  %v2674_v41 = vpop.f32.mrf.mxu1  ;;  %v2596_v46 = vpop.f32.mrf.mxu0  ;;  %v5741_v8 = vor.u32 %v6415_v4, %v5740_v3  ;;  %v5630_v3 = vld [vmem:[%s7997_s1 + $0x28] sm:$0xf0] }
 0x3cf   : > { %v2641_v49 = vadd.f32 %v2640_v47, %v2596_v46 }
 0x3d0   : > { %v2739_v12 = vpack.c.bf16 %v2709_v11, %v2707_v10  ;;  %3317 = vmatpush.bf16.msra.mxu3 %v5741_v8 }
 0x3d1   : > { %v2746_v52 = vpack.c.bf16 %v2641_v49, %v2639_v45  ;;  %v5613_v45 = vor.u32 %v6383_v43, %v5612_v42  ;;  %v6435_v43 = vld [vmem:[%s7998_s2 + $0x58] sm:$0xff] }
 0x3d2   : > { %5562 = vmatmul.msk.bf16.gmra.mxu2 %vm417_vm0, %v2739_v12 }
 0x3d3   : > { %2916 = vmatmul.bf16.gmra.mxu0 %v2746_v52  ;;  %v5622_v52 = vld [vmem:[%s7997_s1 + $0x18] sm:$0xf0] }
 0x3d5   : > { %v2711_v22 = vpop.f32.mrf.mxu3 }
 0x3d6   : > { %v2712_v35 = vadd.f32 %v2711_v22, %v2667_v56  ;;  %v2677_v54 = vpop.f32.mrf.mxu1  ;;  %v2599_v55 = vpop.f32.mrf.mxu0 }
 0x3d7   : > { %v2643_v56 = vpop.f32.mrf.mxu2 }
 0x3d8   : > { %v2644_v6 = vadd.f32 %v2643_v56, %v2599_v55  ;;  %v5625_v55 = vor.u32 %v6384_v51, %v5622_v52  ;;  %v5620_v56 = vld [vmem:[%s7997_s1 + $0x10] sm:$0xf]  ;;  %v6428_v51 = vld [vmem:[%s7998_s2 + $0x20] sm:$0xff] }
 0x3dd   : > { %v2713_v34 = vpop.f32.mrf.mxu3 }
 0x3de   : > { %v2714_v36 = vadd.f32 %v2713_v34, %v2669_v9  ;;  %v2601_v7 = vpop.f32.mrf.mxu0  ;;  %v6401_v9 = vld [vmem:[%s6546_s17 + $0x3a4] sm:$0xf0]  ;;  %v2679_v12 = vpop.f32.mrf.mxu1  ;;  %v5733_v34 = vor.u32 %v6413_v31, %v5732_v29 }
 0x3df   : > { %v2645_v10 = vpop.f32.mrf.mxu2  ;;  %v5685_v11 = vor.u32 %v6401_v9, %v5684_v5  ;;  %v5633_v5 = vor.u32 %v6386_v2, %v5630_v3  ;;  %v6391_v29 = vld [vmem:[%s7997_s1 + $0x44] sm:$0xf0]  ;;  %v6427_v2 = vld [vmem:[%s7998_s2 + $0x18] sm:$0xff] }
 0x3e0   : > { %v2741_v37 = vpack.c.bf16 %v2714_v36, %v2712_v35  ;;  %v2646_v14 = vadd.f32 %v2645_v10, %v2601_v7  ;;  %v6396_v35 = vld [vmem:[%s6546_s17 + $0x384] sm:$0xf]  ;;  %v5670_v36 = vld [vmem:[%s6546_s17 + $0x388] sm:$0xf0]  ;;  %3318 = vmatpush.bf16.msra.mxu3 %v5733_v34  ;;  %v6387_v7 = vld [vmem:[%s7997_s1 + $0x24] sm:$0xf0] }
 0x3e1   : > { %3272 = vmatpush.bf16.msra.mxu1 %v5685_v11  ;;  %v5673_v40 = vor.u32 %v6396_v35, %v5670_v36  ;;  %v6437_v10 = vld [vmem:[%s7998_s2 + $0x68] sm:$0xff]  ;;  %v6388_v11 = vld [vmem:[%s7997_s1 + $0x34] sm:$0xf] }
 0x3e2   : > { %5563 = vmatmul.msk.bf16.gmra.mxu2 %vm417_vm0, %v2741_v37  ;;  %v2748_v17 = vpack.c.bf16 %v2646_v14, %v2644_v6  ;;  %v5668_v37 = vld [vmem:[%s6546_s17 + $0x380] sm:$0xf]  ;;  %v6429_v35 = vld [vmem:[%s7998_s2 + $0x28] sm:$0xff] }
 0x3e3   : > { %3362 = vmatpush.bf16.msra.mxu0 %v5673_v40  ;;  %5778 = vmatmul.msk.bf16.vlgmr.msra.gmra.mxu3 %vm417_vm0, %v5617_v39  ;;  %v5628_v6 = vld [vmem:[%s7997_s1 + $0x20] sm:$0xf] }
 0x3e4   : > { %2921 = vmatmul.bf16.gmra.mxu0 %v2748_v17  ;;  %v5629_v8 = vor.u32 %v6387_v7, %v5628_v6  ;;  %3636 = vmatpush.bf16.msrb.mxu3 %v6437_v10  ;;  %v6389_v17 = vld [vmem:[%s7997_s1 + $0x34] sm:$0xf0] }
 0x3e5   : > { %v2716_v48 = vpop.f32.mrf.mxu3  ;;  %v5637_v18 = vor.u32 %v6389_v17, %v5636_v16 }
 0x3e6   : > { %v2717_v58 = vadd.f32 %v2716_v48, %v2672_v23  ;;  %v2682_v22 = vpop.f32.mrf.mxu1  ;;  %v5676_v23 = vld [vmem:[%s6546_s17 + $0x390] sm:$0xf] }
 0x3e7   : > { %v5677_v30 = vor.u32 %v6399_v28, %v5676_v23  ;;  %v6430_v23 = vld [vmem:[%s7998_s2 + $0x30] sm:$0xff]  ;;  %v5644_v28 = vld [vmem:[%s7997_s1 + $0x40] sm:$0xf] }
 0x3e8   : > { %3637 = vmatpush.bf16.msrb.mxu3 %v6436_v27 }
 0x3e9   : > { %3273 = vmatpush.bf16.msra.mxu1 %v5677_v30  ;;  %v5645_v30 = vor.u32 %v6391_v29, %v5644_v28 }
 0x3ec   : > { %3638 = vmatpush.bf16.msrb.mxu3 %v6435_v43 }
 0x3ed   : > { %v2718_v57 = vpop.f32.mrf.mxu3 }
 0x3ee   : > { %v2719_v59 = vadd.f32 %v2718_v57, %v2674_v41  ;;  %v6397_v41 = vld [vmem:[%s6546_s17 + $0x384] sm:$0xf0]  ;;  %v2684_v46 = vpop.f32.mrf.mxu1  ;;  %v6385_v57 = vld [vmem:[%s7997_s1 + $0x14] sm:$0xf0] }
 0x3ef   : > { %v5669_v44 = vor.u32 %v6397_v41, %v5668_v37  ;;  %v6392_v37 = vld [vmem:[%s7997_s1 + $0x54] sm:$0xf] }
 0x3f0   : > { %v2743_v60 = vpack.c.bf16 %v2719_v59, %v2717_v58  ;;  %v5621_v59 = vor.u32 %v6385_v57, %v5620_v56 }
 0x3f1   : > { %3274 = vmatpush.bf16.msra.mxu1 %v5669_v44  ;;  %v5652_v44 = vld [vmem:[%s7997_s1 + $0x50] sm:$0xf] }
 0x3f2   : > { %5564 = vmatmul.msk.bf16.gmra.mxu2 %vm417_vm0, %v2743_v60 }
 0x3f3   : > { %5779 = vmatmul.msk.bf16.gmra.mxu3 %vm417_vm0, %v5625_v55 }
 0x3f4   : > { %3363 = vmatmul.bf16.vlgmr.msra.gmra.mxu0 %v5613_v45  ;;  %3275 = vmatmul.bf16.vlgmr.msra.gmra.mxu1 %v5613_v45  ;;  %v6393_v45 = vld [vmem:[%s7997_s1 + $0x54] sm:$0xf0] }
 0x3f5   : > { %v2721_v13 = vpop.f32.mrf.mxu3  ;;  %3590 = vmatpush.bf16.msrb.mxu1 %v6431_v15 }
 0x3f6   : > { %v2722_v20 = vadd.f32 %v2721_v13, %v2677_v54  ;;  %v2687_v53 = vpop.f32.mrf.mxu1 }
 0x3f9   : > { %3591 = vmatpush.bf16.msrb.mxu1 %v6430_v23  ;;  %v6424_v23 = vld [vmem:[%s7998_s2] sm:$0xff] }
 0x3fb   : > { %v2892_v58 = vpop.f32.mrf.mxu0 }
 0x3fd   : > { %v2723_v19 = vpop.f32.mrf.mxu3  ;;  %3592 = vmatpush.bf16.msrb.mxu1 %v6429_v35 }
 0x3fe   : > { %v2724_v21 = vadd.f32 %v2723_v19, %v2679_v12  ;;  %v2689_v60 = vpop.f32.mrf.mxu1  ;;  %v5638_v12 = vld [vmem:[%s7997_s1 + $0x38] sm:$0xf0] }
 0x3ff   : > { %v5641_v13 = vor.u32 %v6388_v11, %v5638_v12  ;;  %v6433_v11 = vld [vmem:[%s7998_s2 + $0x48] sm:$0xff]  ;;  %v6426_v12 = vld [vmem:[%s7998_s2 + $0x10] sm:$0xff] }
 0x400   : > { %v2745_v24 = vpack.c.bf16 %v2724_v21, %v2722_v20  ;;  %v6390_v21 = vld [vmem:[%s7997_s1 + $0x44] sm:$0xf] }
 0x401   : > { %3593 = vmatpush.bf16.msrb.mxu1 %v6428_v51  ;;  %v6479_v51 = vld [vmem:[%s6546_s17 + $0x534] sm:$0xf0] }
 0x402   : > { %5565 = vmatmul.msk.bf16.gmra.mxu2 %vm417_vm0, %v2745_v24 }
 0x403   : > { %v2894_v1 = vpop.f32.mrf.mxu0  ;;  %5780 = vmatmul.msk.bf16.gmra.mxu3 %vm417_vm0, %v5633_v5 }
 0x404   : > { %3368 = vmatmul.bf16.gmra.mxu0 %v5621_v59  ;;  %3280 = vmatmul.bf16.gmra.mxu1 %v5621_v59 }
 0x405   : > { %v2726_v38 = vpop.f32.mrf.mxu3  ;;  %3594 = vmatpush.bf16.msrb.mxu1 %v6427_v2 }
 0x406   : > { %v2727_v48 = vadd.f32 %v2726_v38, %v2682_v22  ;;  %v5646_v22 = vld [vmem:[%s7997_s1 + $0x48] sm:$0xf0]  ;;  %v5654_v38 = vld [vmem:[%s7997_s1 + $0x58] sm:$0xf0] }
 0x407   : > { %v7606_v25 = vor.u32 %v6390_v21, %v5646_v22  ;;  %v5657_v40 = vor.u32 %v6392_v37, %v5654_v38 }
 0x409   : > { %3595 = vmatpush.bf16.msrb.mxu1 %v6426_v12 }
 0x40b   : > { %v2897_v4 = vpop.f32.mrf.mxu0 }
 0x40d   : > { %v2728_v47 = vpop.f32.mrf.mxu3 }
 0x40e   : > { %v2729_v49 = vadd.f32 %v2728_v47, %v2684_v46  ;;  %v5653_v46 = vor.u32 %v6393_v45, %v5652_v44 }
 0x410   : > { %v2747_v50 = vpack.c.bf16 %v2729_v49, %v2727_v48 }
 0x412   : > { %5566 = vmatmul.msk.bf16.gmra.mxu2 %vm417_vm0, %v2747_v50 }
 0x413   : > { %v2899_v9 = vpop.f32.mrf.mxu0  ;;  %5781 = vmatmul.msk.bf16.gmra.mxu3 %vm417_vm0, %v5641_v13 }
 0x414   : > { %3285 = vmatmul.bf16.gmra.mxu1 %v5629_v8  ;;  %3373 = vmatmul.bf16.gmra.mxu0 %v5629_v8 }
 0x415   : > { %v2731_v54 = vpop.f32.mrf.mxu3 }
 0x416   : > { %v2732_v63 = vadd.f32 %v2731_v54, %v2687_v53  ;;  %v6394_v53 = vld [vmem:[%s7997_s1 + $0x64] sm:$0xf]  ;;  %v5662_v54 = vld [vmem:[%s7997_s1 + $0x68] sm:$0xf0] }
 0x417   : > { %v5665_v56 = vor.u32 %v6394_v53, %v5662_v54 }
 0x41b   : > { %v7585_v14 = vpop.f32.mrf.mxu0 }
 0x41d   : > { %v2733_v62 = vpop.f32.mrf.mxu3 }
 0x41e   : > { %v2734_v0 = vadd.f32 %v2733_v62, %v2689_v60  ;;  %v5660_v60 = vld [vmem:[%s7997_s1 + $0x60] sm:$0xf]  ;;  %v6395_v62 = vld [vmem:[%s7997_s1 + $0x64] sm:$0xf0] }
 0x420   : > { %v2749_v61 = vpack.c.bf16 %v2734_v0, %v2732_v63  ;;  %v5661_v63 = vor.u32 %v6395_v62, %v5660_v60 }
 0x422   : > { %5567 = vmatmul.msk.bf16.gmra.mxu2 %vm417_vm0, %v2749_v61 }
 0x423   : > { %v7598_v19 = vpop.f32.mrf.mxu0  ;;  %5782 = vmatmul.msk.bf16.gmra.mxu3 %vm417_vm0, %v7606_v25 }
 0x424   : > { %3290 = vmatmul.bf16.gmra.mxu1 %v5637_v18  ;;  %3378 = vmatmul.bf16.gmra.mxu0 %v5637_v18  ;;  %v6425_v18 = vld [vmem:[%s7998_s2 + $0x8] sm:$0xff] }
 0x425   : > { %3596 = vmatpush.bf16.msrb.mxu1 %v6425_v18  ;;  %v6003_v18 = vld [vmem:[%s6546_s17 + $0x4c0] sm:$0xf] }
 0x429   : > { %3597 = vmatpush.bf16.msrb.mxu1 %v6424_v23 }
 0x42b   : > { %v2907_v32 = vpop.f32.mrf.mxu0 }
 0x432   : > { %5785 = vmatmul.msk.bf16.vlgmr.msra.gmra.mxu2 %vm417_vm0, %v5617_v39 }
 0x433   : > { %v2909_v41 = vpop.f32.mrf.mxu0  ;;  %5783 = vmatmul.msk.bf16.gmra.mxu3 %vm417_vm0, %v5657_v40 }
 0x434   : > { %3295 = vmatmul.bf16.gmra.mxu1 %v5645_v30  ;;  %3383 = vmatmul.bf16.gmra.mxu0 %v5645_v30 }
 0x43b   : > { %v2912_v50 = vpop.f32.mrf.mxu0 }
 0x442   : > { %5786 = vmatmul.msk.bf16.gmra.mxu2 %vm417_vm0, %v5625_v55 }
 0x443   : > { %5784 = vmatmul.msk.bf16.gmra.mxu3 %vm417_vm0, %v5665_v56  ;;  %v2914_v59 = vpop.f32.mrf.mxu0 }
 0x444   : > { %3300 = vmatmul.bf16.gmra.mxu1 %v5653_v46  ;;  %3388 = vmatmul.bf16.gmra.mxu0 %v5653_v46 }
 0x445   : > { %v2936_v20 = vpop.f32.mrf.mxu2 }
 0x446   : > { %v2937_v24 = vadd.f32 %v2936_v20, %v2892_v58  ;;  %v6434_v58 = vld [vmem:[%s7998_s2 + $0x50] sm:$0xff] }
 0x447   : > { %3639 = vmatpush.bf16.msrb.mxu3 %v6434_v58 }
 0x448   : > { %v2971_v26 = vpack.c.bf16 %v2937_v24, %v2937_v24  ;;  %v6432_v24 = vld [vmem:[%s7998_s2 + $0x40] sm:$0xff] }
 0x44a   : > { %5568 = vst.msk [vmem:[%s6879_s25 + $0xa8] sm:$0xf] %vm864_vm1, %v2971_v26 }
 0x44b   : > { %3640 = vmatpush.bf16.msrb.mxu3 %v6433_v11 }
 0x44d   : > { %v2938_v31 = vpop.f32.mrf.mxu2 }
 0x44e   : > { %v2939_v33 = vadd.f32 %v2938_v31, %v2894_v1 }
 0x44f   : > { %3641 = vmatpush.bf16.msrb.mxu3 %v6432_v24 }
 0x450   : > { %v2972_v34 = vpack.c.bf16 %v2939_v33, %v2939_v33 }
 0x452   : > { %5569 = vst.msk [vmem:[%s6879_s25 + $0xac] sm:$0xf] %vm864_vm1, %v2972_v34  ;;  %5787 = vmatmul.msk.bf16.gmra.mxu2 %vm417_vm0, %v5633_v5 }
 0x454   : > { %3305 = vmatmul.bf16.gmra.mxu1 %v5661_v63  ;;  %3393 = vmatmul.bf16.gmra.mxu0 %v5661_v63 }
 0x455   : > { %v2941_v36 = vpop.f32.mrf.mxu2 }
 0x456   : > { %v2942_v39 = vadd.f32 %v2941_v36, %v2897_v4  ;;  %v2917_v4 = vpop.f32.mrf.mxu0 }
 0x458   : > { %v2973_v42 = vpack.c.bf16 %v2942_v39, %v2942_v39 }
 0x45a   : > { %5570 = vst.msk [vmem:[%s6879_s25 + $0xb0] sm:$0xf] %vm864_vm1, %v2973_v42 }
 0x45d   : > { %v2943_v47 = vpop.f32.mrf.mxu2 }
 0x45e   : > { %v2944_v48 = vadd.f32 %v2943_v47, %v2899_v9  ;;  %v2919_v9 = vpop.f32.mrf.mxu0 }
 0x460   : > { %v2974_v49 = vpack.c.bf16 %v2944_v48, %v2944_v48 }
 0x462   : > { %5571 = vst.msk [vmem:[%s6879_s25 + $0xb4] sm:$0xf] %vm864_vm1, %v2974_v49  ;;  %5788 = vmatmul.msk.bf16.gmra.mxu2 %vm417_vm0, %v5641_v13 }
 0x465   : > { %v2946_v52 = vpop.f32.mrf.mxu2 }
 0x466   : > { %v2947_v55 = vadd.f32 %v2946_v52, %v7585_v14  ;;  %v2922_v16 = vpop.f32.mrf.mxu0  ;;  %v6466_v52 = vld [vmem:[%s6546_s17 + $0x4d4] sm:$0xf] }
 0x468   : > { %v2975_v57 = vpack.c.bf16 %v2947_v55, %v2947_v55  ;;  %v6013_v55 = vld [vmem:[%s6546_s17 + $0x4d8] sm:$0xf0] }
 0x46a   : > { %5572 = vst.msk [vmem:[%s6879_s25 + $0xb8] sm:$0xf] %vm864_vm1, %v2975_v57  ;;  %v6016_v57 = vor.u32 %v6466_v52, %v6013_v55  ;;  %v6475_v52 = vld [vmem:[%s6546_s17 + $0x514] sm:$0xf0]  ;;  %v5989_v55 = vld [vmem:[%s6546_s17 + $0x4a8] sm:$0xf0] }
 0x46c   : > { %4062 = vmatpush.bf16.msra.mxu1 %v6016_v57 }
 0x46d   : > { %v2948_v0 = vpop.f32.mrf.mxu2 }
 0x46e   : > { %v2949_v1 = vadd.f32 %v2948_v0, %v7598_v19  ;;  %v3320_v19 = vpop.f32.mrf.mxu3  ;;  %v2924_v26 = vpop.f32.mrf.mxu0 }
 0x470   : > { %v2976_v61 = vpack.c.bf16 %v2949_v1, %v2949_v1  ;;  %v6011_v1 = vld [vmem:[%s6546_s17 + $0x4d0] sm:$0xf] }
 0x471   : > { %v3276_v17 = vpop.f32.mrf.mxu1 }
 0x472   : > { %5573 = vst.msk [vmem:[%s6879_s25 + $0xbc] sm:$0xf] %vm864_vm1, %v2976_v61  ;;  %5789 = vmatmul.msk.bf16.gmra.mxu2 %vm417_vm0, %v7606_v25  ;;  %v3321_v27 = vadd.f32 %v3320_v19, %v3276_v17  ;;  %v6467_v61 = vld [vmem:[%s6546_s17 + $0x4d4] sm:$0xf0]  ;;  %v6465_v19 = vld [vmem:[%s6546_s17 + $0x4c4] sm:$0xf0] }
 0x473   : > { %v6012_v2 = vor.u32 %v6467_v61, %v6011_v1  ;;  %v6472_v1 = vld [vmem:[%s6546_s17 + $0x504] sm:$0xf] }
 0x475   : > { %v2951_v3 = vpop.f32.mrf.mxu2  ;;  %3974 = vmatpush.bf16.msrb.mxu0 %v6012_v2 }
 0x476   : > { %v2952_v5 = vadd.f32 %v2951_v3, %v2907_v32  ;;  %v3322_v28 = vpop.f32.mrf.mxu3  ;;  %v7708_v35 = vpop.f32.mrf.mxu0 }
 0x478   : > { %v2977_v6 = vpack.c.bf16 %v2952_v5, %v2952_v5 }
 0x479   : > { %v3278_v25 = vpop.f32.mrf.mxu1 }
 0x47a   : > { %5574 = vst.msk [vmem:[%s6879_s25 + $0xc0] sm:$0xf] %vm864_vm1, %v2977_v6  ;;  %v3323_v30 = vadd.f32 %v3322_v28, %v3278_v25  ;;  %v6462_v28 = vld [vmem:[%s6546_s17 + $0x4b4] sm:$0xf] }
 0x47c   : > { %v3443_v32 = vpack.c.bf16 %v3323_v30, %v3321_v27 }
 0x47d   : > { %v2953_v7 = vpop.f32.mrf.mxu2 }
 0x47e   : > { %v2954_v8 = vadd.f32 %v2953_v7, %v2909_v41  ;;  %3598 = vmatmul.bf16.vlgmr.msrb.gmra.mxu1 %v3443_v32  ;;  %v3325_v36 = vpop.f32.mrf.mxu3  ;;  %v6061_v41 = vld [vmem:[%s6546_s17 + $0x538] sm:$0xf0]  ;;  %v3366_v47 = vpop.f32.mrf.mxu0 }
 0x480   : > { %v2978_v10 = vpack.c.bf16 %v2954_v8, %v2954_v8  ;;  %v6476_v8 = vld [vmem:[%s6546_s17 + $0x524] sm:$0xf] }
 0x481   : > { %v3281_v34 = vpop.f32.mrf.mxu1 }
 0x482   : > { %5575 = vst.msk [vmem:[%s6879_s25 + $0xc4] sm:$0xf] %vm864_vm1, %v2978_v10  ;;  %5790 = vmatmul.msk.bf16.gmra.mxu2 %vm417_vm0, %v5657_v40  ;;  %v6478_v40 = vld [vmem:[%s6546_s17 + $0x534] sm:$0xf]  ;;  %v3326_v43 = vadd.f32 %v3325_v36, %v3281_v34  ;;  %v6464_v10 = vld [vmem:[%s6546_s17 + $0x4c4] sm:$0xf] }
 0x483   : > { %v6064_v44 = vor.u32 %v6478_v40, %v6061_v41 }
 0x485   : > { %v2956_v13 = vpop.f32.mrf.mxu2  ;;  %4108 = vmatpush.bf16.msra.mxu3 %v6064_v44 }
 0x486   : > { %v2957_v14 = vadd.f32 %v2956_v13, %v2912_v50  ;;  %v3327_v45 = vpop.f32.mrf.mxu3  ;;  %v6059_v50 = vld [vmem:[%s6546_s17 + $0x530] sm:$0xf]  ;;  %v3369_v63 = vpop.f32.mrf.mxu0  ;;  %v6005_v13 = vld [vmem:[%s6546_s17 + $0x4c8] sm:$0xf0] }
 0x487   : > { %v6060_v54 = vor.u32 %v6479_v51, %v6059_v50  ;;  %v6043_v51 = vld [vmem:[%s6546_s17 + $0x510] sm:$0xf] }
 0x488   : > { %v2979_v15 = vpack.c.bf16 %v2957_v14, %v2957_v14  ;;  %v6051_v14 = vld [vmem:[%s6546_s17 + $0x520] sm:$0xf] }
 0x489   : > { %v3283_v42 = vpop.f32.mrf.mxu1  ;;  %4020 = vmatpush.bf16.msrb.mxu2 %v6060_v54  ;;  %v6460_v54 = vld [vmem:[%s6546_s17 + $0x4a4] sm:$0xf] }
 0x48a   : > { %5576 = vst.msk [vmem:[%s6879_s25 + $0xc8] sm:$0xf] %vm864_vm1, %v2979_v15  ;;  %v3328_v48 = vadd.f32 %v3327_v45, %v3283_v42  ;;  %v6477_v15 = vld [vmem:[%s6546_s17 + $0x524] sm:$0xf0]  ;;  %v6463_v42 = vld [vmem:[%s6546_s17 + $0x4b4] sm:$0xf0]  ;;  %v5992_v57 = vor.u32 %v6460_v54, %v5989_v55 }
 0x48b   : > { %v6052_v17 = vor.u32 %v6477_v15, %v6051_v14  ;;  %v6458_v14 = vld [vmem:[%s6546_s17 + $0x494] sm:$0xf]  ;;  %v5965_v54 = vld [vmem:[%s6546_s17 + $0x478] sm:$0xf0] }
 0x48c   : > { %v3445_v53 = vpack.c.bf16 %v3328_v48, %v3326_v43 }
 0x48d   : > { %v2958_v20 = vpop.f32.mrf.mxu2  ;;  %4021 = vmatpush.bf16.msrb.mxu2 %v6052_v17  ;;  %v5981_v17 = vld [vmem:[%s6546_s17 + $0x498] sm:$0xf0] }
 0x48e   : > { %v2959_v21 = vadd.f32 %v2958_v20, %v2914_v59  ;;  %3603 = vmatmul.bf16.gmra.mxu1 %v3445_v53  ;;  %v3330_v59 = vpop.f32.mrf.mxu3  ;;  %v3371_v20 = vpop.f32.mrf.mxu0  ;;  %v6044_v53 = vor.u32 %v6475_v52, %v6043_v51 }
 0x490   : > { %v2980_v22 = vpack.c.bf16 %v2959_v21, %v2959_v21  ;;  %v6004_v21 = vor.u32 %v6465_v19, %v6003_v18  ;;  %v5984_v18 = vor.u32 %v6458_v14, %v5981_v17  ;;  %v6439_v17 = vld [vmem:[%s7997_s1 + $0x4] sm:$0xf0] }
 0x491   : > { %v3286_v58 = vpop.f32.mrf.mxu1  ;;  %4022 = vmatpush.bf16.msrb.mxu2 %v6044_v53  ;;  %v6454_v53 = vld [vmem:[%s6546_s17 + $0x474] sm:$0xf] }
 0x492   : > { %5577 = vst.msk [vmem:[%s6879_s25 + $0xcc] sm:$0xf] %vm864_vm1, %v2980_v22  ;;  %5791 = vmatmul.msk.bf16.gmra.mxu2 %vm417_vm0, %v5665_v56  ;;  %v3331_v3 = vadd.f32 %v3330_v59, %v3286_v58  ;;  %3975 = vmatpush.bf16.msrb.mxu0 %v6004_v21 }
 0x495   : > { %v2961_v29 = vpop.f32.mrf.mxu2 }
 0x496   : > { %v2962_v31 = vadd.f32 %v2961_v29, %v2917_v4  ;;  %v3332_v5 = vpop.f32.mrf.mxu3  ;;  %v5997_v29 = vld [vmem:[%s6546_s17 + $0x4b8] sm:$0xf0]  ;;  %v3374_v30 = vpop.f32.mrf.mxu0 }
 0x498   : > { %v2981_v33 = vpack.c.bf16 %v2962_v31, %v2962_v31 }
 0x499   : > { %v3288_v4 = vpop.f32.mrf.mxu1 }
 0x49a   : > { %5578 = vst.msk [vmem:[%s6879_s25 + $0xd0] sm:$0xf] %vm864_vm1, %v2981_v33  ;;  %v3333_v7 = vadd.f32 %v3332_v5, %v3288_v4  ;;  %v6000_v33 = vor.u32 %v6462_v28, %v5997_v29  ;;  %v6037_v4 = vld [vmem:[%s6546_s17 + $0x508] sm:$0xf0] }
 0x49b   : > { %v6040_v5 = vor.u32 %v6472_v1, %v6037_v4 }
 0x49c   : > { %v3447_v11 = vpack.c.bf16 %v3333_v7, %v3331_v3 }
 0x49d   : > { %v2963_v37 = vpop.f32.mrf.mxu2 }
 0x49e   : > { %v2964_v38 = vadd.f32 %v2963_v37, %v2919_v9  ;;  %v6053_v9 = vld [vmem:[%s6546_s17 + $0x528] sm:$0xf0]  ;;  %3608 = vmatmul.bf16.gmra.mxu1 %v3447_v11  ;;  %v3335_v24 = vpop.f32.mrf.mxu3 }
 0x49f   : > { %v6056_v12 = vor.u32 %v6476_v8, %v6053_v9 }
 0x4a0   : > { %v2982_v39 = vpack.c.bf16 %v2964_v38, %v2964_v38  ;;  %v6474_v38 = vld [vmem:[%s6546_s17 + $0x514] sm:$0xf] }
 0x4a1   : > { %4109 = vmatpush.bf16.msra.mxu3 %v6056_v12  ;;  %v3291_v22 = vpop.f32.mrf.mxu1  ;;  %v6035_v12 = vld [vmem:[%s6546_s17 + $0x500] sm:$0xf] }
 0x4a2   : > { %5579 = vst.msk [vmem:[%s6879_s25 + $0xd4] sm:$0xf] %vm864_vm1, %v2982_v39  ;;  %v3336_v31 = vadd.f32 %v3335_v24, %v3291_v22  ;;  %v6045_v39 = vld [vmem:[%s6546_s17 + $0x518] sm:$0xf0] }
 0x4a3   : > { %v6048_v41 = vor.u32 %v6474_v38, %v6045_v39  ;;  %v6456_v38 = vld [vmem:[%s6546_s17 + $0x484] sm:$0xf] }
 0x4a5   : > { %v2966_v46 = vpop.f32.mrf.mxu2  ;;  %4110 = vmatpush.bf16.msra.mxu3 %v6048_v41  ;;  %v6027_v41 = vld [vmem:[%s6546_s17 + $0x4f0] sm:$0xf] }
 0x4a6   : > { %v2967_v49 = vadd.f32 %v2966_v46, %v2922_v16  ;;  %v6008_v16 = vor.u32 %v6464_v10, %v6005_v13  ;;  %v3337_v34 = vpop.f32.mrf.mxu3  ;;  %v6473_v13 = vld [vmem:[%s6546_s17 + $0x504] sm:$0xf0] }
 0x4a8   : > { %v2983_v56 = vpack.c.bf16 %v2967_v49, %v2967_v49  ;;  %4063 = vmatpush.bf16.msra.mxu1 %v6008_v16  ;;  %v6036_v16 = vor.u32 %v6473_v13, %v6035_v12 }
 0x4a9   : > { %v3293_v32 = vpop.f32.mrf.mxu1  ;;  %4111 = vmatpush.bf16.msra.mxu3 %v6040_v5  ;;  %v6469_v5 = vld [vmem:[%s6546_s17 + $0x4e4] sm:$0xf0] }
 0x4aa   : > { %5580 = vst.msk [vmem:[%s6879_s25 + $0xd8] sm:$0xf] %vm864_vm1, %v2983_v56  ;;  %v3338_v37 = vadd.f32 %v3337_v34, %v3293_v32  ;;  %4023 = vmatpush.bf16.msrb.mxu2 %v6036_v16  ;;  %v5899_v16 = vld [vmem:[%s7997_s1] sm:$0xf] }
 0x4ac   : > { %4064 = vmatpush.bf16.msra.mxu1 %v6000_v33  ;;  %v3449_v40 = vpack.c.bf16 %v3338_v37, %v3336_v31  ;;  %v6029_v37 = vld [vmem:[%s6546_s17 + $0x4f8] sm:$0xf0] }
 0x4ad   : > { %v2968_v60 = vpop.f32.mrf.mxu2 }
 0x4ae   : > { %v2969_v62 = vadd.f32 %v2968_v60, %v2924_v26  ;;  %3613 = vmatmul.bf16.gmra.mxu1 %v3449_v40  ;;  %v3340_v45 = vpop.f32.mrf.mxu3 }
 0x4b0   : > { %v2984_v0 = vpack.c.bf16 %v2969_v62, %v2969_v62  ;;  %4065 = vmatpush.bf16.msra.mxu1 %v5992_v57 }
 0x4b1   : > { %v3296_v44 = vpop.f32.mrf.mxu1 }
 0x4b2   : > { %5581 = vst.msk [vmem:[%s6879_s25 + $0xdc] sm:$0xf] %vm864_vm1, %v2984_v0  ;;  %v3341_v56 = vadd.f32 %v3340_v45, %v3296_v44  ;;  %v6461_v0 = vld [vmem:[%s6546_s17 + $0x4a4] sm:$0xf0] }
 0x4b4   : > { %4066 = vmatpush.bf16.msra.mxu1 %v5984_v18 }
 0x4b5   : > { %v3408_v6 = vpop.f32.mrf.mxu2 }
 0x4b6   : > { %v3409_v26 = vadd.f32 %v3408_v6, %v7708_v35  ;;  %v5995_v35 = vld [vmem:[%s6546_s17 + $0x4b0] sm:$0xf]  ;;  %v3342_v59 = vpop.f32.mrf.mxu3 }
 0x4b7   : > { %v5996_v43 = vor.u32 %v6463_v42, %v5995_v35  ;;  %v5973_v35 = vld [vmem:[%s6546_s17 + $0x488] sm:$0xf0]  ;;  %v6471_v42 = vld [vmem:[%s6546_s17 + $0x4f4] sm:$0xf0] }
 0x4b8   : > { %v5976_v40 = vor.u32 %v6456_v38, %v5973_v35 }
 0x4b9   : > { %3976 = vmatpush.bf16.msrb.mxu0 %v5996_v43  ;;  %v3298_v58 = vpop.f32.mrf.mxu1  ;;  %v5971_v43 = vld [vmem:[%s6546_s17 + $0x480] sm:$0xf] }
 0x4ba   : > { %v3343_v62 = vadd.f32 %v3342_v59, %v3298_v58  ;;  %4067 = vmatpush.bf16.msra.mxu1 %v5976_v40  ;;  %v6442_v40 = vld [vmem:[%s7997_s1 + $0x24] sm:$0xf] }
 0x4bc   : > { %v3451_v2 = vpack.c.bf16 %v3343_v62, %v3341_v56  ;;  %v5968_v56 = vor.u32 %v6454_v53, %v5965_v54  ;;  %v6487_v53 = vld [vmem:[%s7998_s2 + $0x38] sm:$0xff]  ;;  %v5923_v54 = vld [vmem:[%s7997_s1 + $0x30] sm:$0xf] }
 0x4bd   : > { %v3410_v25 = vpop.f32.mrf.mxu2 }
 0x4be   : > { %v3411_v27 = vadd.f32 %v3410_v25, %v3366_v47  ;;  %v3376_v47 = vpop.f32.mrf.mxu0  ;;  %3618 = vmatmul.bf16.gmra.mxu1 %v3451_v2  ;;  %v3345_v7 = vpop.f32.mrf.mxu3  ;;  %v5979_v25 = vld [vmem:[%s6546_s17 + $0x490] sm:$0xf]  ;;  %v6455_v2 = vld [vmem:[%s6546_s17 + $0x474] sm:$0xf0] }
 0x4bf   : > { %4068 = vmatpush.bf16.msra.mxu1 %v5968_v56 }
 0x4c0   : > { %v3444_v23 = vpack.c.bf16 %v3411_v27, %v3409_v26  ;;  %v6459_v26 = vld [vmem:[%s6546_s17 + $0x494] sm:$0xf0] }
 0x4c1   : > { %v3301_v6 = vpop.f32.mrf.mxu1 }
 0x4c2   : > { %5848 = vmatmul.msk.bf16.vlgmr.msrb.gmra.mxu3 %vm417_vm0, %v3444_v23  ;;  %v3346_v19 = vadd.f32 %v3345_v7, %v3301_v6  ;;  %v5980_v23 = vor.u32 %v6459_v26, %v5979_v25  ;;  %v6438_v6 = vld [vmem:[%s7997_s1 + $0x4] sm:$0xf]  ;;  %v5901_v7 = vld [vmem:[%s7997_s1 + $0x8] sm:$0xf0]  ;;  %v6440_v26 = vld [vmem:[%s7997_s1 + $0x14] sm:$0xf] }
 0x4c3   : > { %v5904_v13 = vor.u32 %v6438_v6, %v5901_v7 }
 0x4c5   : > { %v3413_v36 = vpop.f32.mrf.mxu2 }
 0x4c6   : > { %v3414_v48 = vadd.f32 %v3413_v36, %v3369_v63  ;;  %v5987_v63 = vld [vmem:[%s6546_s17 + $0x4a0] sm:$0xf]  ;;  %v3379_v61 = vpop.f32.mrf.mxu0  ;;  %v3347_v21 = vpop.f32.mrf.mxu3  ;;  %v6470_v36 = vld [vmem:[%s6546_s17 + $0x4f4] sm:$0xf] }
 0x4c7   : > { %v5988_v3 = vor.u32 %v6461_v0, %v5987_v63  ;;  %v6032_v39 = vor.u32 %v6470_v36, %v6029_v37  ;;  %v6468_v63 = vld [vmem:[%s6546_s17 + $0x4e4] sm:$0xf]  ;;  %v6021_v0 = vld [vmem:[%s6546_s17 + $0x4e8] sm:$0xf0] }
 0x4c8   : > { %v6024_v1 = vor.u32 %v6468_v63, %v6021_v0 }
 0x4c9   : > { %3977 = vmatpush.bf16.msrb.mxu0 %v5988_v3  ;;  %4112 = vmatpush.bf16.msra.mxu3 %v6032_v39  ;;  %v6019_v3 = vld [vmem:[%s6546_s17 + $0x4e0] sm:$0xf] }
 0x4cd   : > { %v3415_v46 = vpop.f32.mrf.mxu2  ;;  %3978 = vmatpush.bf16.msrb.mxu0 %v5980_v23  ;;  %4113 = vmatpush.bf16.msra.mxu3 %v6024_v1  ;;  %v6492_v1 = vld [vmem:[%s7998_s2 + $0x60] sm:$0xff] }
 0x4ce   : > { %v3416_v49 = vadd.f32 %v3415_v46, %v3371_v20  ;;  %v3381_v15 = vpop.f32.mrf.mxu0  ;;  %v3303_v20 = vpop.f32.mrf.mxu1  ;;  %v6028_v46 = vor.u32 %v6471_v42, %v6027_v41  ;;  %v5917_v41 = vld [vmem:[%s7997_s1 + $0x28] sm:$0xf0] }
 0x4cf   : > { %v3348_v24 = vadd.f32 %v3347_v21, %v3303_v20 }
 0x4d0   : > { %v3446_v50 = vpack.c.bf16 %v3416_v49, %v3414_v48  ;;  %4024 = vmatpush.bf16.msrb.mxu2 %v6028_v46 }
 0x4d1   : > { %v3453_v27 = vpack.c.bf16 %v3348_v24, %v3346_v19  ;;  %v5900_v19 = vor.u32 %v6439_v17, %v5899_v16  ;;  %v6491_v17 = vld [vmem:[%s7998_s2 + $0x58] sm:$0xff] }
 0x4d2   : > { %5849 = vmatmul.msk.bf16.gmra.mxu3 %vm417_vm0, %v3446_v50 }
 0x4d3   : > { %3623 = vmatmul.bf16.gmra.mxu1 %v3453_v27  ;;  %v5909_v27 = vld [vmem:[%s7997_s1 + $0x18] sm:$0xf0] }
 0x4d5   : > { %v3418_v60 = vpop.f32.mrf.mxu2 }
 0x4d6   : > { %v3419_v9 = vadd.f32 %v3418_v60, %v3374_v30  ;;  %v3384_v28 = vpop.f32.mrf.mxu0  ;;  %v3306_v29 = vpop.f32.mrf.mxu1 }
 0x4d7   : > { %v3350_v30 = vpop.f32.mrf.mxu3 }
 0x4d8   : > { %v3351_v44 = vadd.f32 %v3350_v30, %v3306_v29  ;;  %v5912_v29 = vor.u32 %v6440_v26, %v5909_v27  ;;  %v5907_v30 = vld [vmem:[%s7997_s1 + $0x10] sm:$0xf]  ;;  %v6484_v26 = vld [vmem:[%s7998_s2 + $0x20] sm:$0xff] }
 0x4dd   : > { %v3420_v8 = vpop.f32.mrf.mxu2 }
 0x4de   : > { %v3421_v10 = vadd.f32 %v3420_v8, %v3376_v47  ;;  %v3308_v45 = vpop.f32.mrf.mxu1  ;;  %v6457_v47 = vld [vmem:[%s6546_s17 + $0x484] sm:$0xf0]  ;;  %v3386_v50 = vpop.f32.mrf.mxu0  ;;  %v6020_v8 = vor.u32 %v6469_v5, %v6019_v3 }
 0x4df   : > { %v3352_v48 = vpop.f32.mrf.mxu3  ;;  %v5972_v49 = vor.u32 %v6457_v47, %v5971_v43  ;;  %v5920_v43 = vor.u32 %v6442_v40, %v5917_v41  ;;  %v6447_v3 = vld [vmem:[%s7997_s1 + $0x44] sm:$0xf0]  ;;  %v6483_v40 = vld [vmem:[%s7998_s2 + $0x18] sm:$0xff] }
 0x4e0   : > { %v3448_v11 = vpack.c.bf16 %v3421_v10, %v3419_v9  ;;  %v3353_v52 = vadd.f32 %v3352_v48, %v3308_v45  ;;  %v6452_v9 = vld [vmem:[%s6546_s17 + $0x464] sm:$0xf]  ;;  %v5957_v10 = vld [vmem:[%s6546_s17 + $0x468] sm:$0xf0]  ;;  %4025 = vmatpush.bf16.msrb.mxu2 %v6020_v8  ;;  %v6443_v45 = vld [vmem:[%s7997_s1 + $0x24] sm:$0xf0] }
 0x4e1   : > { %3979 = vmatpush.bf16.msrb.mxu0 %v5972_v49  ;;  %v5960_v14 = vor.u32 %v6452_v9, %v5957_v10  ;;  %v6493_v48 = vld [vmem:[%s7998_s2 + $0x68] sm:$0xff]  ;;  %v6444_v49 = vld [vmem:[%s7997_s1 + $0x34] sm:$0xf] }
 0x4e2   : > { %5850 = vmatmul.msk.bf16.gmra.mxu3 %vm417_vm0, %v3448_v11  ;;  %v3455_v55 = vpack.c.bf16 %v3353_v52, %v3351_v44  ;;  %v5955_v11 = vld [vmem:[%s6546_s17 + $0x460] sm:$0xf]  ;;  %v6485_v9 = vld [vmem:[%s7998_s2 + $0x28] sm:$0xff] }
 0x4e3   : > { %4069 = vmatpush.bf16.msra.mxu1 %v5960_v14  ;;  %6065 = vmatmul.msk.bf16.vlgmr.msrb.gmra.mxu2 %vm417_vm0, %v5904_v13  ;;  %v5915_v44 = vld [vmem:[%s7997_s1 + $0x20] sm:$0xf] }
 0x4e4   : > { %3628 = vmatmul.bf16.gmra.mxu1 %v3455_v55  ;;  %v5916_v46 = vor.u32 %v6443_v45, %v5915_v44  ;;  %4343 = vmatpush.bf16.msra.mxu2 %v6493_v48  ;;  %v6445_v55 = vld [vmem:[%s7997_s1 + $0x34] sm:$0xf0] }
 0x4e5   : > { %v3423_v22 = vpop.f32.mrf.mxu2  ;;  %v5924_v56 = vor.u32 %v6445_v55, %v5923_v54 }
 0x4e6   : > { %v3424_v32 = vadd.f32 %v3423_v22, %v3379_v61  ;;  %v3389_v60 = vpop.f32.mrf.mxu0  ;;  %v5963_v61 = vld [vmem:[%s6546_s17 + $0x470] sm:$0xf] }
 0x4e7   : > { %v5964_v4 = vor.u32 %v6455_v2, %v5963_v61  ;;  %v6486_v61 = vld [vmem:[%s7998_s2 + $0x30] sm:$0xff]  ;;  %v5931_v2 = vld [vmem:[%s7997_s1 + $0x40] sm:$0xf] }
 0x4e8   : > { %4344 = vmatpush.bf16.msra.mxu2 %v6492_v1 }
 0x4e9   : > { %3980 = vmatpush.bf16.msrb.mxu0 %v5964_v4  ;;  %v5932_v4 = vor.u32 %v6447_v3, %v5931_v2 }
 0x4ec   : > { %4345 = vmatpush.bf16.msra.mxu2 %v6491_v17 }
 0x4ed   : > { %v3425_v31 = vpop.f32.mrf.mxu2 }
 0x4ee   : > { %v3426_v33 = vadd.f32 %v3425_v31, %v3381_v15  ;;  %v6453_v15 = vld [vmem:[%s6546_s17 + $0x464] sm:$0xf0]  ;;  %v3391_v20 = vpop.f32.mrf.mxu0  ;;  %v6441_v31 = vld [vmem:[%s7997_s1 + $0x14] sm:$0xf0] }
 0x4ef   : > { %v5956_v18 = vor.u32 %v6453_v15, %v5955_v11  ;;  %v6448_v11 = vld [vmem:[%s7997_s1 + $0x54] sm:$0xf] }
 0x4f0   : > { %v3450_v34 = vpack.c.bf16 %v3426_v33, %v3424_v32  ;;  %v5908_v33 = vor.u32 %v6441_v31, %v5907_v30 }
 0x4f1   : > { %3981 = vmatpush.bf16.msrb.mxu0 %v5956_v18  ;;  %v5939_v18 = vld [vmem:[%s7997_s1 + $0x50] sm:$0xf] }
 0x4f2   : > { %5851 = vmatmul.msk.bf16.gmra.mxu3 %vm417_vm0, %v3450_v34 }
 0x4f3   : > { %6066 = vmatmul.msk.bf16.gmra.mxu2 %vm417_vm0, %v5912_v29 }
 0x4f4   : > { %4070 = vmatmul.bf16.vlgmr.msra.gmra.mxu1 %v5900_v19  ;;  %3982 = vmatmul.bf16.vlgmr.msrb.gmra.mxu0 %v5900_v19  ;;  %v6449_v19 = vld [vmem:[%s7997_s1 + $0x54] sm:$0xf0] }
 0x4f5   : > { %v3428_v51 = vpop.f32.mrf.mxu2  ;;  %4297 = vmatpush.bf16.msra.mxu0 %v6487_v53 }
 0x4f6   : > { %v3429_v58 = vadd.f32 %v3428_v51, %v3384_v28  ;;  %v3394_v23 = vpop.f32.mrf.mxu0 }
 0x4f9   : > { %4298 = vmatpush.bf16.msra.mxu0 %v6486_v61  ;;  %v6480_v61 = vld [vmem:[%s7998_s2] sm:$0xff] }
 0x4fb   : > { %v3599_v32 = vpop.f32.mrf.mxu1 }
 0x4fd   : > { %v3430_v57 = vpop.f32.mrf.mxu2  ;;  %4299 = vmatpush.bf16.msra.mxu0 %v6485_v9 }
 0x4fe   : > { %v3431_v59 = vadd.f32 %v3430_v57, %v3386_v50  ;;  %v3396_v34 = vpop.f32.mrf.mxu0  ;;  %v5925_v50 = vld [vmem:[%s7997_s1 + $0x38] sm:$0xf0] }
 0x4ff   : > { %v5928_v51 = vor.u32 %v6444_v49, %v5925_v50  ;;  %v6489_v49 = vld [vmem:[%s7998_s2 + $0x48] sm:$0xff]  ;;  %v6482_v50 = vld [vmem:[%s7998_s2 + $0x10] sm:$0xff] }
 0x500   : > { %v3452_v62 = vpack.c.bf16 %v3431_v59, %v3429_v58  ;;  %v6446_v59 = vld [vmem:[%s7997_s1 + $0x44] sm:$0xf] }
 0x501   : > { %4300 = vmatpush.bf16.msra.mxu0 %v6484_v26 }
 0x502   : > { %5852 = vmatmul.msk.bf16.gmra.mxu3 %vm417_vm0, %v3452_v62 }
 0x503   : > { %v3601_v39 = vpop.f32.mrf.mxu1  ;;  %6067 = vmatmul.msk.bf16.gmra.mxu2 %vm417_vm0, %v5920_v43 }
 0x504   : > { %4075 = vmatmul.bf16.gmra.mxu1 %v5908_v33  ;;  %3987 = vmatmul.bf16.gmra.mxu0 %v5908_v33 }
 0x505   : > { %v3433_v12 = vpop.f32.mrf.mxu2  ;;  %4301 = vmatpush.bf16.msra.mxu0 %v6483_v40 }
 0x506   : > { %v3434_v22 = vadd.f32 %v3433_v12, %v3389_v60  ;;  %v5933_v60 = vld [vmem:[%s7997_s1 + $0x48] sm:$0xf0]  ;;  %v5941_v12 = vld [vmem:[%s7997_s1 + $0x58] sm:$0xf0] }
 0x507   : > { %v7850_v63 = vor.u32 %v6446_v59, %v5933_v60  ;;  %v5944_v14 = vor.u32 %v6448_v11, %v5941_v12 }
 0x509   : > { %4302 = vmatpush.bf16.msra.mxu0 %v6482_v50 }
 0x50b   : > { %v3604_v42 = vpop.f32.mrf.mxu1 }
 0x50d   : > { %v3435_v21 = vpop.f32.mrf.mxu2 }
 0x50e   : > { %v3436_v24 = vadd.f32 %v3435_v21, %v3391_v20  ;;  %v5940_v20 = vor.u32 %v6449_v19, %v5939_v18 }
 0x510   : > { %v3454_v25 = vpack.c.bf16 %v3436_v24, %v3434_v22 }
 0x512   : > { %5853 = vmatmul.msk.bf16.gmra.mxu3 %vm417_vm0, %v3454_v25 }
 0x513   : > { %v3606_v47 = vpop.f32.mrf.mxu1  ;;  %6068 = vmatmul.msk.bf16.gmra.mxu2 %vm417_vm0, %v5928_v51 }
 0x514   : > { %3992 = vmatmul.bf16.gmra.mxu0 %v5916_v46  ;;  %4080 = vmatmul.bf16.gmra.mxu1 %v5916_v46 }
 0x515   : > { %v3438_v28 = vpop.f32.mrf.mxu2 }
 0x516   : > { %v3439_v37 = vadd.f32 %v3438_v28, %v3394_v23  ;;  %v6450_v23 = vld [vmem:[%s7997_s1 + $0x64] sm:$0xf]  ;;  %v5949_v28 = vld [vmem:[%s7997_s1 + $0x68] sm:$0xf0] }
 0x517   : > { %v5952_v30 = vor.u32 %v6450_v23, %v5949_v28 }
 0x51b   : > { %v7829_v52 = vpop.f32.mrf.mxu1 }
 0x51d   : > { %v3440_v36 = vpop.f32.mrf.mxu2 }
 0x51e   : > { %v3441_v38 = vadd.f32 %v3440_v36, %v3396_v34  ;;  %v5947_v34 = vld [vmem:[%s7997_s1 + $0x60] sm:$0xf]  ;;  %v6451_v36 = vld [vmem:[%s7997_s1 + $0x64] sm:$0xf0] }
 0x520   : > { %v3456_v35 = vpack.c.bf16 %v3441_v38, %v3439_v37  ;;  %v5948_v37 = vor.u32 %v6451_v36, %v5947_v34 }
 0x522   : > { %5854 = vmatmul.msk.bf16.gmra.mxu3 %vm417_vm0, %v3456_v35 }
 0x523   : > { %v7842_v57 = vpop.f32.mrf.mxu1  ;;  %6069 = vmatmul.msk.bf16.gmra.mxu2 %vm417_vm0, %v7850_v63 }
 0x524   : > { %3997 = vmatmul.bf16.gmra.mxu0 %v5924_v56  ;;  %4085 = vmatmul.bf16.gmra.mxu1 %v5924_v56  ;;  %v6481_v56 = vld [vmem:[%s7998_s2 + $0x8] sm:$0xff] }
 0x525   : > { %4303 = vmatpush.bf16.msra.mxu0 %v6481_v56 }
 0x529   : > { %4304 = vmatpush.bf16.msra.mxu0 %v6480_v61 }
 0x52b   : > { %v3614_v6 = vpop.f32.mrf.mxu1 }
 0x532   : > { %6072 = vmatmul.msk.bf16.vlgmr.msra.gmra.mxu3 %vm417_vm0, %v5904_v13 }
 0x533   : > { %v3616_v15 = vpop.f32.mrf.mxu1  ;;  %6070 = vmatmul.msk.bf16.gmra.mxu2 %vm417_vm0, %v5944_v14 }
 0x534   : > { %4002 = vmatmul.bf16.gmra.mxu0 %v5932_v4  ;;  %4090 = vmatmul.bf16.gmra.mxu1 %v5932_v4 }
 0x53b   : > { %v3619_v25 = vpop.f32.mrf.mxu1 }
 0x542   : > { %6073 = vmatmul.msk.bf16.gmra.mxu3 %vm417_vm0, %v5912_v29 }
 0x543   : > { %6071 = vmatmul.msk.bf16.gmra.mxu2 %vm417_vm0, %v5952_v30  ;;  %v3621_v33 = vpop.f32.mrf.mxu1 }
 0x544   : > { %4007 = vmatmul.bf16.gmra.mxu0 %v5940_v20  ;;  %4095 = vmatmul.bf16.gmra.mxu1 %v5940_v20 }
 0x545   : > { %v3643_v58 = vpop.f32.mrf.mxu3 }
 0x546   : > { %v3644_v62 = vadd.f32 %v3643_v58, %v3599_v32  ;;  %v6490_v32 = vld [vmem:[%s7998_s2 + $0x50] sm:$0xff] }
 0x547   : > { %4346 = vmatpush.bf16.msra.mxu2 %v6490_v32 }
 0x548   : > { %v3678_v0 = vpack.c.bf16 %v3644_v62, %v3644_v62  ;;  %v6488_v62 = vld [vmem:[%s7998_s2 + $0x40] sm:$0xff] }
 0x54a   : > { %5855 = vst.msk [vmem:[%s6879_s25 + $0xe0] sm:$0xf] %vm864_vm1, %v3678_v0 }
 0x54b   : > { %4347 = vmatpush.bf16.msra.mxu2 %v6489_v49 }
 0x54d   : > { %v3645_v5 = vpop.f32.mrf.mxu3 }
 0x54e   : > { %v3646_v7 = vadd.f32 %v3645_v5, %v3601_v39 }
 0x54f   : > { %4348 = vmatpush.bf16.msra.mxu2 %v6488_v62 }
 0x550   : > { %v3679_v8 = vpack.c.bf16 %v3646_v7, %v3646_v7 }
 0x552   : > { %5856 = vst.msk [vmem:[%s6879_s25 + $0xe4] sm:$0xf] %vm864_vm1, %v3679_v8  ;;  %6074 = vmatmul.msk.bf16.gmra.mxu3 %vm417_vm0, %v5920_v43 }
 0x554   : > { %4012 = vmatmul.bf16.gmra.mxu0 %v5948_v37  ;;  %4100 = vmatmul.bf16.gmra.mxu1 %v5948_v37 }
 0x555   : > { %v3648_v10 = vpop.f32.mrf.mxu3 }
 0x556   : > { %v3649_v13 = vadd.f32 %v3648_v10, %v3604_v42  ;;  %v3624_v42 = vpop.f32.mrf.mxu1 }
 0x558   : > { %v3680_v16 = vpack.c.bf16 %v3649_v13, %v3649_v13 }
 0x55a   : > { %5857 = vst.msk [vmem:[%s6879_s25 + $0xe8] sm:$0xf] %vm864_vm1, %v3680_v16 }
 0x55d   : > { %v3650_v21 = vpop.f32.mrf.mxu3 }
 0x55e   : > { %v3651_v22 = vadd.f32 %v3650_v21, %v3606_v47  ;;  %v3626_v47 = vpop.f32.mrf.mxu1 }
 0x560   : > { %v3681_v24 = vpack.c.bf16 %v3651_v22, %v3651_v22 }
 0x562   : > { %5858 = vst.msk [vmem:[%s6879_s25 + $0xec] sm:$0xf] %vm864_vm1, %v3681_v24  ;;  %6075 = vmatmul.msk.bf16.gmra.mxu3 %vm417_vm0, %v5928_v51 }
 0x565   : > { %v3653_v27 = vpop.f32.mrf.mxu3 }
 0x566   : > { %v3654_v29 = vadd.f32 %v3653_v27, %v7829_v52  ;;  %v3629_v54 = vpop.f32.mrf.mxu1 }
 0x568   : > { %v3682_v31 = vpack.c.bf16 %v3654_v29, %v3654_v29 }
 0x56a   : > { %5859 = vst.msk [vmem:[%s6879_s25 + $0xf0] sm:$0xf] %vm864_vm1, %v3682_v31 }
 0x56d   : > { %v3655_v38 = vpop.f32.mrf.mxu3 }
 0x56e   : > { %v3656_v39 = vadd.f32 %v3655_v38, %v7842_v57  ;;  %v4027_v57 = vpop.f32.mrf.mxu2  ;;  %v3631_v0 = vpop.f32.mrf.mxu1 }
 0x570   : > { %v3683_v35 = vpack.c.bf16 %v3656_v39, %v3656_v39 }
 0x571   : > { %v3983_v55 = vpop.f32.mrf.mxu0 }
 0x572   : > { %5860 = vst.msk [vmem:[%s6879_s25 + $0xf4] sm:$0xf] %vm864_vm1, %v3683_v35  ;;  %6076 = vmatmul.msk.bf16.gmra.mxu3 %vm417_vm0, %v7850_v63  ;;  %v4028_v1 = vadd.f32 %v4027_v57, %v3983_v55 }
 0x575   : > { %v3658_v41 = vpop.f32.mrf.mxu3 }
 0x576   : > { %v3659_v43 = vadd.f32 %v3658_v41, %v3614_v6  ;;  %v4029_v2 = vpop.f32.mrf.mxu2  ;;  %v4071_v9 = vpop.f32.mrf.mxu1 }
 0x578   : > { %v3684_v44 = vpack.c.bf16 %v3659_v43, %v3659_v43 }
 0x579   : > { %v3985_v63 = vpop.f32.mrf.mxu0 }
 0x57a   : > { %5861 = vst.msk [vmem:[%s6879_s25 + $0xf8] sm:$0xf] %vm864_vm1, %v3684_v44  ;;  %v4030_v4 = vadd.f32 %v4029_v2, %v3985_v63 }
 0x57c   : > { %v4150_v6 = vpack.c.bf16 %v4030_v4, %v4028_v1 }
 0x57d   : > { %v3660_v45 = vpop.f32.mrf.mxu3 }
 0x57e   : > { %v3661_v46 = vadd.f32 %v3660_v45, %v3616_v15  ;;  %4305 = vmatmul.bf16.vlgmr.msra.gmra.mxu0 %v4150_v6  ;;  %v4032_v10 = vpop.f32.mrf.mxu2  ;;  %v4073_v18 = vpop.f32.mrf.mxu1 }
 0x580   : > { %v3685_v48 = vpack.c.bf16 %v3661_v46, %v3661_v46 }
 0x581   : > { %v3988_v8 = vpop.f32.mrf.mxu0 }
 0x582   : > { %5862 = vst.msk [vmem:[%s6879_s25 + $0xfc] sm:$0xf] %vm864_vm1, %v3685_v48  ;;  %6077 = vmatmul.msk.bf16.gmra.mxu3 %vm417_vm0, %v5944_v14  ;;  %v4033_v15 = vadd.f32 %v4032_v10, %v3988_v8 }
 0x585   : > { %v3663_v51 = vpop.f32.mrf.mxu3 }
 0x586   : > { %v3664_v52 = vadd.f32 %v3663_v51, %v3619_v25  ;;  %v4034_v16 = vpop.f32.mrf.mxu2  ;;  %v4076_v23 = vpop.f32.mrf.mxu1 }
 0x588   : > { %v3686_v53 = vpack.c.bf16 %v3664_v52, %v3664_v52 }
 0x589   : > { %v3990_v14 = vpop.f32.mrf.mxu0 }
 0x58a   : > { %5863 = vst.msk [vmem:[%s6879_s25 + $0x100] sm:$0xf] %vm864_vm1, %v3686_v53  ;;  %v4035_v19 = vadd.f32 %v4034_v16, %v3990_v14 }
 0x58c   : > { %v4152_v21 = vpack.c.bf16 %v4035_v19, %v4033_v15 }
 0x58d   : > { %v3665_v58 = vpop.f32.mrf.mxu3 }
 0x58e   : > { %v3666_v59 = vadd.f32 %v3665_v58, %v3621_v33  ;;  %4310 = vmatmul.bf16.gmra.mxu0 %v4152_v21  ;;  %v4037_v25 = vpop.f32.mrf.mxu2  ;;  %v4078_v36 = vpop.f32.mrf.mxu1 }
 0x590   : > { %v3687_v60 = vpack.c.bf16 %v3666_v59, %v3666_v59 }
 0x591   : > { %v3993_v24 = vpop.f32.mrf.mxu0 }
 0x592   : > { %5864 = vst.msk [vmem:[%s6879_s25 + $0x104] sm:$0xf] %vm864_vm1, %v3687_v60  ;;  %6078 = vmatmul.msk.bf16.gmra.mxu3 %vm417_vm0, %v5952_v30  ;;  %v4038_v29 = vadd.f32 %v4037_v25, %v3993_v24 }
 0x595   : > { %v3668_v3 = vpop.f32.mrf.mxu3 }
 0x596   : > { %v3669_v5 = vadd.f32 %v3668_v3, %v3624_v42  ;;  %v4039_v31 = vpop.f32.mrf.mxu2  ;;  %v4081_v42 = vpop.f32.mrf.mxu1 }
 0x598   : > { %v3688_v7 = vpack.c.bf16 %v3669_v5, %v3669_v5 }
 0x599   : > { %v3995_v30 = vpop.f32.mrf.mxu0 }
 0x59a   : > { %5865 = vst.msk [vmem:[%s6879_s25 + $0x108] sm:$0xf] %vm864_vm1, %v3688_v7  ;;  %v4040_v33 = vadd.f32 %v4039_v31, %v3995_v30 }
 0x59c   : > { %v4154_v34 = vpack.c.bf16 %v4040_v33, %v4038_v29 }
 0x59d   : > { %v3670_v11 = vpop.f32.mrf.mxu3 }
 0x59e   : > { %v3671_v12 = vadd.f32 %v3670_v11, %v3626_v47  ;;  %4315 = vmatmul.bf16.gmra.mxu0 %v4154_v34  ;;  %v4042_v38 = vpop.f32.mrf.mxu2  ;;  %v4083_v52 = vpop.f32.mrf.mxu1 }
 0x5a0   : > { %v3689_v13 = vpack.c.bf16 %v3671_v12, %v3671_v12 }
 0x5a1   : > { %v3998_v37 = vpop.f32.mrf.mxu0 }
 0x5a2   : > { %5866 = vst.msk [vmem:[%s6879_s25 + $0x10c] sm:$0xf] %vm864_vm1, %v3689_v13  ;;  %v4043_v43 = vadd.f32 %v4042_v38, %v3998_v37 }
 0x5a5   : > { %v3673_v17 = vpop.f32.mrf.mxu3 }
 0x5a6   : > { %v3674_v20 = vadd.f32 %v3673_v17, %v3629_v54  ;;  %v4044_v45 = vpop.f32.mrf.mxu2  ;;  %v4086_v62 = vpop.f32.mrf.mxu1 }
 0x5a8   : > { %v3690_v22 = vpack.c.bf16 %v3674_v20, %v3674_v20 }
 0x5a9   : > { %v4000_v44 = vpop.f32.mrf.mxu0 }
 0x5aa   : > { %5867 = vst.msk [vmem:[%s6879_s25 + $0x110] sm:$0xf] %vm864_vm1, %v3690_v22  ;;  %v4045_v47 = vadd.f32 %v4044_v45, %v4000_v44 }
 0x5ac   : > { %v4156_v48 = vpack.c.bf16 %v4045_v47, %v4043_v43 }
 0x5ad   : > { %v3675_v26 = vpop.f32.mrf.mxu3 }
 0x5ae   : > { %v3676_v27 = vadd.f32 %v3675_v26, %v3631_v0  ;;  %4320 = vmatmul.bf16.gmra.mxu0 %v4156_v48  ;;  %v4047_v50 = vpop.f32.mrf.mxu2  ;;  %v4088_v5 = vpop.f32.mrf.mxu1 }
 0x5b0   : > { %v3691_v28 = vpack.c.bf16 %v3676_v27, %v3676_v27 }
 0x5b1   : > { %v4003_v49 = vpop.f32.mrf.mxu0 }
 0x5b2   : > { %5868 = vst.msk [vmem:[%s6879_s25 + $0x114] sm:$0xf] %vm864_vm1, %v3691_v28  ;;  %v4048_v56 = vadd.f32 %v4047_v50, %v4003_v49 }
 0x5b5   : > { %v4115_v32 = vpop.f32.mrf.mxu3 }
 0x5b6   : > { %v4116_v35 = vadd.f32 %v4115_v32, %v4071_v9  ;;  %v4049_v58 = vpop.f32.mrf.mxu2  ;;  %v4091_v12 = vpop.f32.mrf.mxu1 }
 0x5b9   : > { %v4005_v57 = vpop.f32.mrf.mxu0 }
 0x5ba   : > { %v4050_v60 = vadd.f32 %v4049_v58, %v4005_v57 }
 0x5bc   : > { %v4158_v63 = vpack.c.bf16 %v4050_v60, %v4048_v56 }
 0x5bd   : > { %v4117_v39 = vpop.f32.mrf.mxu3 }
 0x5be   : > { %v4118_v40 = vadd.f32 %v4117_v39, %v4073_v18  ;;  %4325 = vmatmul.bf16.gmra.mxu0 %v4158_v63  ;;  %v4052_v1 = vpop.f32.mrf.mxu2  ;;  %v4093_v22 = vpop.f32.mrf.mxu1 }
 0x5c0   : > { %v4151_v41 = vpack.c.bf16 %v4118_v40, %v4116_v35 }
 0x5c1   : > { %v4008_v0 = vpop.f32.mrf.mxu0 }
 0x5c2   : > { %6135 = vmatmul.msk.bf16.vlgmr.msra.gmra.mxu2 %vm417_vm0, %v4151_v41  ;;  %v4053_v6 = vadd.f32 %v4052_v1, %v4008_v0 }
 0x5c5   : > { %v4120_v46 = vpop.f32.mrf.mxu3 }
 0x5c6   : > { %v4121_v53 = vadd.f32 %v4120_v46, %v4076_v23  ;;  %v4054_v8 = vpop.f32.mrf.mxu2  ;;  %v4096_v29 = vpop.f32.mrf.mxu1 }
 0x5c9   : > { %v4010_v7 = vpop.f32.mrf.mxu0 }
 0x5ca   : > { %v4055_v10 = vadd.f32 %v4054_v8, %v4010_v7 }
 0x5cc   : > { %v4160_v11 = vpack.c.bf16 %v4055_v10, %v4053_v6 }
 0x5cd   : > { %v4122_v51 = vpop.f32.mrf.mxu3 }
 0x5ce   : > { %v4123_v54 = vadd.f32 %v4122_v51, %v4078_v36  ;;  %4330 = vmatmul.bf16.gmra.mxu0 %v4160_v11  ;;  %v4057_v14 = vpop.f32.mrf.mxu2  ;;  %v4098_v32 = vpop.f32.mrf.mxu1 }
 0x5d0   : > { %v4153_v55 = vpack.c.bf16 %v4123_v54, %v4121_v53 }
 0x5d1   : > { %v4013_v13 = vpop.f32.mrf.mxu0 }
 0x5d2   : > { %6136 = vmatmul.msk.bf16.gmra.mxu2 %vm417_vm0, %v4153_v55  ;;  %v4058_v19 = vadd.f32 %v4057_v14, %v4013_v13 }
 0x5d5   : > { %v4125_v59 = vpop.f32.mrf.mxu3 }
 0x5d6   : > { %v4126_v2 = vadd.f32 %v4125_v59, %v4081_v42  ;;  %v4059_v21 = vpop.f32.mrf.mxu2  ;;  %v4101_v38 = vpop.f32.mrf.mxu1 }
 0x5d9   : > { %v4015_v20 = vpop.f32.mrf.mxu0 }
 0x5da   : > { %v4060_v25 = vadd.f32 %v4059_v21, %v4015_v20 }
 0x5dc   : > { %v4162_v26 = vpack.c.bf16 %v4060_v25, %v4058_v19 }
 0x5dd   : > { %v4127_v61 = vpop.f32.mrf.mxu3 }
 0x5de   : > { %v4128_v3 = vadd.f32 %v4127_v61, %v4083_v52  ;;  %4335 = vmatmul.bf16.gmra.mxu0 %v4162_v26  ;;  %v4103_v35 = vpop.f32.mrf.mxu1 }
 0x5e0   : > { %v4155_v4 = vpack.c.bf16 %v4128_v3, %v4126_v2 }
 0x5e2   : > { %6137 = vmatmul.msk.bf16.gmra.mxu2 %vm417_vm0, %v4155_v4 }
 0x5e5   : > { %v4130_v9 = vpop.f32.mrf.mxu3 }
 0x5e6   : > { %v4131_v16 = vadd.f32 %v4130_v9, %v4086_v62 }
 0x5ed   : > { %v4132_v15 = vpop.f32.mrf.mxu3 }
 0x5ee   : > { %v4133_v17 = vadd.f32 %v4132_v15, %v4088_v5 }
 0x5f0   : > { %v4157_v18 = vpack.c.bf16 %v4133_v17, %v4131_v16 }
 0x5f2   : > { %6138 = vmatmul.msk.bf16.gmra.mxu2 %vm417_vm0, %v4157_v18 }
 0x5f5   : > { %v4135_v24 = vpop.f32.mrf.mxu3 }
 0x5f6   : > { %v4136_v23 = vadd.f32 %v4135_v24, %v4091_v12 }
 0x5fb   : > { %v4306_v44 = vpop.f32.mrf.mxu0 }
 0x5fd   : > { %v4137_v27 = vpop.f32.mrf.mxu3 }
 0x5fe   : > { %v4138_v28 = vadd.f32 %v4137_v27, %v4093_v22 }
 0x600   : > { %v4159_v30 = vpack.c.bf16 %v4138_v28, %v4136_v23 }
 0x602   : > { %6139 = vmatmul.msk.bf16.gmra.mxu2 %vm417_vm0, %v4159_v30 }
 0x603   : > { %v4308_v45 = vpop.f32.mrf.mxu0 }
 0x605   : > { %v4140_v31 = vpop.f32.mrf.mxu3 }
 0x606   : > { %v4141_v34 = vadd.f32 %v4140_v31, %v4096_v29 }
 0x60b   : > { %v4311_v46 = vpop.f32.mrf.mxu0 }
 0x60d   : > { %v4142_v33 = vpop.f32.mrf.mxu3 }
 0x60e   : > { %v4143_v36 = vadd.f32 %v4142_v33, %v4098_v32 }
 0x610   : > { %v4161_v37 = vpack.c.bf16 %v4143_v36, %v4141_v34 }
 0x612   : > { %6140 = vmatmul.msk.bf16.gmra.mxu2 %vm417_vm0, %v4161_v37 }
 0x613   : > { %v4313_v50 = vpop.f32.mrf.mxu0 }
 0x615   : > { %v4145_v39 = vpop.f32.mrf.mxu3 }
 0x616   : > { %v4146_v41 = vadd.f32 %v4145_v39, %v4101_v38 }
 0x61b   : > { %v4316_v54 = vpop.f32.mrf.mxu0 }
 0x61d   : > { %v4147_v40 = vpop.f32.mrf.mxu3 }
 0x61e   : > { %v4148_v42 = vadd.f32 %v4147_v40, %v4103_v35 }
 0x620   : > { %v4163_v43 = vpack.c.bf16 %v4148_v42, %v4146_v41 }
 0x622   : > { %6141 = vmatmul.msk.bf16.gmra.mxu2 %vm417_vm0, %v4163_v43 }
 0x623   : > { %v4318_v58 = vpop.f32.mrf.mxu0 }
 0x62b   : > { %v4321_v1 = vpop.f32.mrf.mxu0 }
 0x633   : > { %v4323_v5 = vpop.f32.mrf.mxu0 }
 0x63b   : > { %v4326_v9 = vpop.f32.mrf.mxu0 }
 0x643   : > { %v4328_v13 = vpop.f32.mrf.mxu0 }
 0x645   : > { %v4350_v47 = vpop.f32.mrf.mxu2 }
 0x646   : > { %v4351_v48 = vadd.f32 %v4350_v47, %v4306_v44 }
 0x648   : > { %v4385_v49 = vpack.c.bf16 %v4351_v48, %v4351_v48 }
 0x64a   : > { %6142 = vst.msk [vmem:[%s6879_s25 + $0x118] sm:$0xf] %vm864_vm1, %v4385_v49 }
 0x64b   : > { %v4331_v19 = vpop.f32.mrf.mxu0 }
 0x64d   : > { %v4352_v51 = vpop.f32.mrf.mxu2 }
 0x64e   : > { %v4353_v52 = vadd.f32 %v4352_v51, %v4308_v45 }
 0x650   : > { %v4386_v53 = vpack.c.bf16 %v4353_v52, %v4353_v52 }
 0x652   : > { %6143 = vst.msk [vmem:[%s6879_s25 + $0x11c] sm:$0xf] %vm864_vm1, %v4386_v53 }
 0x653   : > { %v4333_v25 = vpop.f32.mrf.mxu0 }
 0x655   : > { %v4355_v55 = vpop.f32.mrf.mxu2 }
 0x656   : > { %v4356_v56 = vadd.f32 %v4355_v55, %v4311_v46 }
 0x658   : > { %v4387_v57 = vpack.c.bf16 %v4356_v56, %v4356_v56 }
 0x65a   : > { %6144 = vst.msk [vmem:[%s6879_s25 + $0x120] sm:$0xf] %vm864_vm1, %v4387_v57 }
 0x65b   : > { %v4336_v28 = vpop.f32.mrf.mxu0 }
 0x65d   : > { %v4357_v59 = vpop.f32.mrf.mxu2 }
 0x65e   : > { %v4358_v60 = vadd.f32 %v4357_v59, %v4313_v50 }
 0x660   : > { %v4388_v62 = vpack.c.bf16 %v4358_v60, %v4358_v60 }
 0x662   : > { %6145 = vst.msk [vmem:[%s6879_s25 + $0x124] sm:$0xf] %vm864_vm1, %v4388_v62 }
 0x663   : > { %v4338_v32 = vpop.f32.mrf.mxu0 }
 0x665   : > { %v4360_v63 = vpop.f32.mrf.mxu2 }
 0x666   : > { %v4361_v0 = vadd.f32 %v4360_v63, %v4316_v54 }
 0x668   : > { %v4389_v61 = vpack.c.bf16 %v4361_v0, %v4361_v0 }
 0x66a   : > { %6146 = vst.msk [vmem:[%s6879_s25 + $0x128] sm:$0xf] %vm864_vm1, %v4389_v61 }
 0x66d   : > { %v4362_v2 = vpop.f32.mrf.mxu2 }
 0x66e   : > { %v4363_v3 = vadd.f32 %v4362_v2, %v4318_v58 }
 0x670   : > { %v4390_v4 = vpack.c.bf16 %v4363_v3, %v4363_v3 }
 0x672   : > { %6147 = vst.msk [vmem:[%s6879_s25 + $0x12c] sm:$0xf] %vm864_vm1, %v4390_v4 }
 0x675   : > { %v4365_v6 = vpop.f32.mrf.mxu2 }
 0x676   : > { %v4366_v7 = vadd.f32 %v4365_v6, %v4321_v1 }
 0x678   : > { %v4391_v8 = vpack.c.bf16 %v4366_v7, %v4366_v7 }
 0x67a   : > { %6148 = vst.msk [vmem:[%s6879_s25 + $0x130] sm:$0xf] %vm864_vm1, %v4391_v8 }
 0x67d   : > { %v4367_v10 = vpop.f32.mrf.mxu2 }
 0x67e   : > { %v4368_v11 = vadd.f32 %v4367_v10, %v4323_v5 }
 0x680   : > { %v4392_v12 = vpack.c.bf16 %v4368_v11, %v4368_v11 }
 0x682   : > { %6149 = vst.msk [vmem:[%s6879_s25 + $0x134] sm:$0xf] %vm864_vm1, %v4392_v12 }
 0x685   : > { %v4370_v14 = vpop.f32.mrf.mxu2 }
 0x686   : > { %v4371_v15 = vadd.f32 %v4370_v14, %v4326_v9 }
 0x688   : > { %v4393_v16 = vpack.c.bf16 %v4371_v15, %v4371_v15 }
 0x68a   : > { %6150 = vst.msk [vmem:[%s6879_s25 + $0x138] sm:$0xf] %vm864_vm1, %v4393_v16 }
 0x68d   : > { %v4372_v17 = vpop.f32.mrf.mxu2 }
 0x68e   : > { %v4373_v18 = vadd.f32 %v4372_v17, %v4328_v13 }
 0x690   : > { %v4394_v20 = vpack.c.bf16 %v4373_v18, %v4373_v18 }
 0x692   : > { %6151 = vst.msk [vmem:[%s6879_s25 + $0x13c] sm:$0xf] %vm864_vm1, %v4394_v20 }
 0x695   : > { %v4375_v21 = vpop.f32.mrf.mxu2 }
 0x696   : > { %v4376_v22 = vadd.f32 %v4375_v21, %v4331_v19 }
 0x698   : > { %v4395_v24 = vpack.c.bf16 %v4376_v22, %v4376_v22 }
 0x69a   : > { %6152 = vst.msk [vmem:[%s6879_s25 + $0x140] sm:$0xf] %vm864_vm1, %v4395_v24 }
 0x69d   : > { %v4377_v26 = vpop.f32.mrf.mxu2 }
 0x69e   : > { %v4378_v27 = vadd.f32 %v4377_v26, %v4333_v25 }
 0x6a0   : > { %v4396_v23 = vpack.c.bf16 %v4378_v27, %v4378_v27 }
 0x6a2   : > { %6153 = vst.msk [vmem:[%s6879_s25 + $0x144] sm:$0xf] %vm864_vm1, %v4396_v23 }
 0x6a5   : > { %v4380_v29 = vpop.f32.mrf.mxu2 }
 0x6a6   : > { %v4381_v30 = vadd.f32 %v4380_v29, %v4336_v28 }
 0x6a8   : > { %v4397_v31 = vpack.c.bf16 %v4381_v30, %v4381_v30 }
 0x6aa   : > { %6154 = vst.msk [vmem:[%s6879_s25 + $0x148] sm:$0xf] %vm864_vm1, %v4397_v31 }
 0x6ad   : > { %v4382_v33 = vpop.f32.mrf.mxu2 }
 0x6ae   : > { %v4383_v34 = vadd.f32 %v4382_v33, %v4338_v32 }
 0x6b0   : > { %v4398_v36 = vpack.c.bf16 %v4383_v34, %v4383_v34 }
 0x6b2   : > { %6155 = vst.msk [vmem:[%s6879_s25 + $0x14c] sm:$0xf] %vm864_vm1, %v4398_v36 }
 0x6b3 PF: > { %s13_s12 = sadd.s32 1, %s6510_s12  }
 0x6b4   : > { %p10_p4 = scmp.ge.s32.totalorder %s13_s12, 4  }
 0x6b6   :  { %12 = sbr.rel (!%p10_p4) target bundleno = 1 (0x1), region = 72 }

// kernel: lenet_forward.7
= control target key start
LH: loop header
LB: loop body
LE: loop exit
PB: predicated region body
PF: predicated region fallthrough
CT: control target
= control target key end

     0   :  { %s3032_s12 = smov 0   ;;  %s3034_s13 = smov 0   ;;  %s3882_s0 = inlined_call_operand.vmem [shape: bf16[16,160], index: 0, kind: input, shape index: {}]   ;;  %s3883_s1 = inlined_call_operand.vmem [shape: bf16[160,24576], index: 1, kind: input, shape index: {}]   ;;  %s3884_s2 = inlined_call_operand.vmem [shape: f32[16,1], index: 2, kind: input, shape index: {}]   ;;  %s3885_s3 = inlined_call_operand.vmem [shape: bf16[16,24576], index: 3, kind: output, shape index: {}]  }
   0x1   :  { %s3036_s14 = smov 0  }
   0x2 LB: > { %s2118_s15 = sadd.s32 4294967295, %s3009_s14   ;;  %s3049_s16 = sadd.s32 1, %s3009_s14   ;;  %s3009_s14 = sphi %s3036_s14, %s3889_s14   ;;  %s3005_s13 = sphi %s3034_s13, %s3888_s13   ;;  %s3001_s12 = sphi %s3032_s12, %s3887_s12  }
   0x3   : > { %s38_s17 = ssub.s32 %s3009_s14, %s3049_s16  ;;  %s41_s18 = sadd.s32 1, %s3005_s13 }
   0x4   : > { %p39_p0 = scmp.eq.s32.totalorder %s38_s17, 0  ;;  %p48_p1 = scmp.ne.s32.totalorder %s3005_s13, %s3001_s12 }
   0x5   : > { %p49_p2 = scmp.eq.s32.totalorder %s3009_s14, 0  ;;  %p99_p3 = scmp.eq.s32.totalorder %s2118_s15, 11 }
   0x6   : > { %s3060_s19 = scalar_select %p39_p0, %s3005_s13, %s41_s18  }
   0x7   : > { %p50_p4 = por %p49_p2, %p48_p1  ;;  %p3062_p5 = por %p99_p3, %p48_p1 }
   0x8   : > { %p2121_p6 = scmp.ge.s32.totalorder %s3009_s14, 12 }
   0xa   : > { %127 = sbr.rel (%p2121_p6) target bundleno = 179 (0xb3), region = 24 }
   0xf   : > { %130 = sbr.rel (!%p50_p4) target bundleno = 179 (0xb3), region = 28  ;;  %s132_s21 = sand.u32 (%p50_p4), 1, %s3005_s13  }
  0x10   : > { %s2795_s22 = sshll.u32 (%p50_p4), %s3009_s14, 6  ;;  %s2959_s23 = smul.u32 (%p50_p4), 1280, %s132_s21 }
  0x11   : > { %s3072_s26 = scalar_lea.vmem (%p50_p4), %s3883_s1, %s2795_s22 }
  0x12   : > { %v150_v0 = vld [vmem:[%s3072_s26] sm:$0xff] (%p50_p4)  ;;  %v152_v1 = vld [vmem:[%s3072_s26 + $0x8] sm:$0xff] (%p50_p4)  ;;  %v154_v2 = vld [vmem:[%s3072_s26 + $0x10] sm:$0xff] (%p50_p4)  ;;  %s3077_s27 = scalar_lea.vmem (%p50_p4), [#allocation2], %s2959_s23 }
  0x13   : > { %151 = vst [vmem:[%s3077_s27] sm:$0xff] (%p50_p4), %v150_v0  ;;  %v156_v3 = vld [vmem:[%s3072_s26 + $0x18] sm:$0xff] (%p50_p4)  ;;  %v158_v4 = vld [vmem:[%s3072_s26 + $0x20] sm:$0xff] (%p50_p4)  ;;  %v160_v5 = vld [vmem:[%s3072_s26 + $0x28] sm:$0xff] (%p50_p4) }
  0x14   : > { %153 = vst [vmem:[%s3077_s27 + $0x8] sm:$0xff] %v152_v1  ;;  %v162_v6 = vld [vmem:[%s3072_s26 + $0x30] sm:$0xff]  ;;  %v164_v7 = vld [vmem:[%s3072_s26 + $0x38] sm:$0xff]  ;;  %v166_v8 = vld [vmem:[%s3072_s26 + $0x300] sm:$0xff] }
  0x15   : > { %155 = vst [vmem:[%s3077_s27 + $0x10] sm:$0xff] %v154_v2  ;;  %v168_v9 = vld [vmem:[%s3072_s26 + $0x308] sm:$0xff]  ;;  %v170_v10 = vld [vmem:[%s3072_s26 + $0x310] sm:$0xff]  ;;  %v172_v11 = vld [vmem:[%s3072_s26 + $0x318] sm:$0xff] }
  0x16   : > { %157 = vst [vmem:[%s3077_s27 + $0x18] sm:$0xff] %v156_v3  ;;  %v174_v12 = vld [vmem:[%s3072_s26 + $0x320] sm:$0xff]  ;;  %v176_v13 = vld [vmem:[%s3072_s26 + $0x328] sm:$0xff]  ;;  %v178_v14 = vld [vmem:[%s3072_s26 + $0x330] sm:$0xff] }
  0x17   : > { %159 = vst [vmem:[%s3077_s27 + $0x20] sm:$0xff] %v158_v4  ;;  %v180_v15 = vld [vmem:[%s3072_s26 + $0x338] sm:$0xff]  ;;  %v182_v16 = vld [vmem:[%s3072_s26 + $0x600] sm:$0xff]  ;;  %v184_v17 = vld [vmem:[%s3072_s26 + $0x608] sm:$0xff] }
  0x18   : > { %161 = vst [vmem:[%s3077_s27 + $0x28] sm:$0xff] %v160_v5  ;;  %v186_v18 = vld [vmem:[%s3072_s26 + $0x610] sm:$0xff]  ;;  %v188_v19 = vld [vmem:[%s3072_s26 + $0x618] sm:$0xff]  ;;  %v190_v20 = vld [vmem:[%s3072_s26 + $0x620] sm:$0xff] }
  0x19   : > { %163 = vst [vmem:[%s3077_s27 + $0x30] sm:$0xff] %v162_v6  ;;  %v192_v21 = vld [vmem:[%s3072_s26 + $0x628] sm:$0xff]  ;;  %v194_v22 = vld [vmem:[%s3072_s26 + $0x630] sm:$0xff]  ;;  %v196_v23 = vld [vmem:[%s3072_s26 + $0x638] sm:$0xff] }
  0x1a   : > { %165 = vst [vmem:[%s3077_s27 + $0x38] sm:$0xff] %v164_v7  ;;  %v198_v24 = vld [vmem:[%s3072_s26 + $0x900] sm:$0xff]  ;;  %v200_v25 = vld [vmem:[%s3072_s26 + $0x908] sm:$0xff]  ;;  %v202_v26 = vld [vmem:[%s3072_s26 + $0x910] sm:$0xff] }
  0x1b   : > { %167 = vst [vmem:[%s3077_s27 + $0x40] sm:$0xff] %v166_v8  ;;  %v204_v27 = vld [vmem:[%s3072_s26 + $0x918] sm:$0xff]  ;;  %v206_v28 = vld [vmem:[%s3072_s26 + $0x920] sm:$0xff]  ;;  %v208_v29 = vld [vmem:[%s3072_s26 + $0x928] sm:$0xff] }
  0x1c   : > { %169 = vst [vmem:[%s3077_s27 + $0x48] sm:$0xff] %v168_v9  ;;  %v210_v30 = vld [vmem:[%s3072_s26 + $0x930] sm:$0xff]  ;;  %v212_v31 = vld [vmem:[%s3072_s26 + $0x938] sm:$0xff]  ;;  %v214_v32 = vld [vmem:[%s3072_s26 + $0xc00] sm:$0xff] }
  0x1d   : > { %171 = vst [vmem:[%s3077_s27 + $0x50] sm:$0xff] %v170_v10  ;;  %v216_v33 = vld [vmem:[%s3072_s26 + $0xc08] sm:$0xff]  ;;  %v218_v34 = vld [vmem:[%s3072_s26 + $0xc10] sm:$0xff]  ;;  %v220_v35 = vld [vmem:[%s3072_s26 + $0xc18] sm:$0xff] }
  0x1e   : > { %173 = vst [vmem:[%s3077_s27 + $0x58] sm:$0xff] %v172_v11  ;;  %v222_v36 = vld [vmem:[%s3072_s26 + $0xc20] sm:$0xff]  ;;  %v224_v37 = vld [vmem:[%s3072_s26 + $0xc28] sm:$0xff]  ;;  %v226_v38 = vld [vmem:[%s3072_s26 + $0xc30] sm:$0xff] }
  0x1f   : > { %175 = vst [vmem:[%s3077_s27 + $0x60] sm:$0xff] %v174_v12  ;;  %v228_v39 = vld [vmem:[%s3072_s26 + $0xc38] sm:$0xff]  ;;  %v230_v40 = vld [vmem:[%s3072_s26 + $0xf00] sm:$0xff]  ;;  %v232_v41 = vld [vmem:[%s3072_s26 + $0xf08] sm:$0xff] }
  0x20   : > { %177 = vst [vmem:[%s3077_s27 + $0x68] sm:$0xff] %v176_v13  ;;  %v234_v42 = vld [vmem:[%s3072_s26 + $0xf10] sm:$0xff]  ;;  %v236_v43 = vld [vmem:[%s3072_s26 + $0xf18] sm:$0xff]  ;;  %v238_v44 = vld [vmem:[%s3072_s26 + $0xf20] sm:$0xff] }
  0x21   : > { %179 = vst [vmem:[%s3077_s27 + $0x70] sm:$0xff] %v178_v14  ;;  %v240_v45 = vld [vmem:[%s3072_s26 + $0xf28] sm:$0xff]  ;;  %v242_v46 = vld [vmem:[%s3072_s26 + $0xf30] sm:$0xff]  ;;  %v244_v47 = vld [vmem:[%s3072_s26 + $0xf38] sm:$0xff] }
  0x22   : > { %181 = vst [vmem:[%s3077_s27 + $0x78] sm:$0xff] %v180_v15  ;;  %v246_v48 = vld [vmem:[%s3072_s26 + $0x1200] sm:$0xff]  ;;  %v248_v49 = vld [vmem:[%s3072_s26 + $0x1208] sm:$0xff]  ;;  %v250_v50 = vld [vmem:[%s3072_s26 + $0x1210] sm:$0xff] }
  0x23   : > { %183 = vst [vmem:[%s3077_s27 + $0x80] sm:$0xff] %v182_v16  ;;  %v252_v51 = vld [vmem:[%s3072_s26 + $0x1218] sm:$0xff]  ;;  %v254_v52 = vld [vmem:[%s3072_s26 + $0x1220] sm:$0xff]  ;;  %v256_v53 = vld [vmem:[%s3072_s26 + $0x1228] sm:$0xff] }
  0x24   : > { %185 = vst [vmem:[%s3077_s27 + $0x88] sm:$0xff] %v184_v17  ;;  %v258_v54 = vld [vmem:[%s3072_s26 + $0x1230] sm:$0xff]  ;;  %v260_v55 = vld [vmem:[%s3072_s26 + $0x1238] sm:$0xff]  ;;  %v262_v56 = vld [vmem:[%s3072_s26 + $0x1500] sm:$0xff] }
  0x25   : > { %187 = vst [vmem:[%s3077_s27 + $0x90] sm:$0xff] %v186_v18  ;;  %v264_v57 = vld [vmem:[%s3072_s26 + $0x1508] sm:$0xff]  ;;  %v266_v58 = vld [vmem:[%s3072_s26 + $0x1510] sm:$0xff]  ;;  %v268_v59 = vld [vmem:[%s3072_s26 + $0x1518] sm:$0xff] }
  0x26   : > { %189 = vst [vmem:[%s3077_s27 + $0x98] sm:$0xff] %v188_v19  ;;  %v270_v60 = vld [vmem:[%s3072_s26 + $0x1520] sm:$0xff]  ;;  %v272_v61 = vld [vmem:[%s3072_s26 + $0x1528] sm:$0xff]  ;;  %v274_v62 = vld [vmem:[%s3072_s26 + $0x1530] sm:$0xff] }
  0x27   : > { %191 = vst [vmem:[%s3077_s27 + $0xa0] sm:$0xff] %v190_v20  ;;  %v276_v63 = vld [vmem:[%s3072_s26 + $0x1538] sm:$0xff]  ;;  %v278_v0 = vld [vmem:[%s3072_s26 + $0x1800] sm:$0xff]  ;;  %v280_v1 = vld [vmem:[%s3072_s26 + $0x1808] sm:$0xff] }
  0x28   : > { %193 = vst [vmem:[%s3077_s27 + $0xa8] sm:$0xff] %v192_v21  ;;  %v282_v2 = vld [vmem:[%s3072_s26 + $0x1810] sm:$0xff]  ;;  %v284_v3 = vld [vmem:[%s3072_s26 + $0x1818] sm:$0xff]  ;;  %v286_v4 = vld [vmem:[%s3072_s26 + $0x1820] sm:$0xff] }
  0x29   : > { %195 = vst [vmem:[%s3077_s27 + $0xb0] sm:$0xff] %v194_v22  ;;  %v288_v5 = vld [vmem:[%s3072_s26 + $0x1828] sm:$0xff]  ;;  %v290_v6 = vld [vmem:[%s3072_s26 + $0x1830] sm:$0xff]  ;;  %v292_v7 = vld [vmem:[%s3072_s26 + $0x1838] sm:$0xff] }
  0x2a   : > { %197 = vst [vmem:[%s3077_s27 + $0xb8] sm:$0xff] %v196_v23  ;;  %v294_v8 = vld [vmem:[%s3072_s26 + $0x1b00] sm:$0xff]  ;;  %v296_v9 = vld [vmem:[%s3072_s26 + $0x1b08] sm:$0xff]  ;;  %v298_v10 = vld [vmem:[%s3072_s26 + $0x1b10] sm:$0xff] }
  0x2b   : > { %199 = vst [vmem:[%s3077_s27 + $0xc0] sm:$0xff] %v198_v24  ;;  %v300_v11 = vld [vmem:[%s3072_s26 + $0x1b18] sm:$0xff]  ;;  %v302_v12 = vld [vmem:[%s3072_s26 + $0x1b20] sm:$0xff]  ;;  %v304_v13 = vld [vmem:[%s3072_s26 + $0x1b28] sm:$0xff] }
  0x2c   : > { %201 = vst [vmem:[%s3077_s27 + $0xc8] sm:$0xff] %v200_v25  ;;  %v306_v14 = vld [vmem:[%s3072_s26 + $0x1b30] sm:$0xff]  ;;  %v308_v15 = vld [vmem:[%s3072_s26 + $0x1b38] sm:$0xff]  ;;  %v310_v16 = vld [vmem:[%s3072_s26 + $0x1e00] sm:$0xff] }
  0x2d   : > { %203 = vst [vmem:[%s3077_s27 + $0xd0] sm:$0xff] %v202_v26  ;;  %v312_v17 = vld [vmem:[%s3072_s26 + $0x1e08] sm:$0xff]  ;;  %v314_v18 = vld [vmem:[%s3072_s26 + $0x1e10] sm:$0xff]  ;;  %v316_v19 = vld [vmem:[%s3072_s26 + $0x1e18] sm:$0xff] }
  0x2e   : > { %205 = vst [vmem:[%s3077_s27 + $0xd8] sm:$0xff] %v204_v27  ;;  %v318_v20 = vld [vmem:[%s3072_s26 + $0x1e20] sm:$0xff]  ;;  %v320_v21 = vld [vmem:[%s3072_s26 + $0x1e28] sm:$0xff]  ;;  %v322_v22 = vld [vmem:[%s3072_s26 + $0x1e30] sm:$0xff] }
  0x2f   : > { %207 = vst [vmem:[%s3077_s27 + $0xe0] sm:$0xff] %v206_v28  ;;  %v324_v23 = vld [vmem:[%s3072_s26 + $0x1e38] sm:$0xff]  ;;  %v326_v24 = vld [vmem:[%s3072_s26 + $0x2100] sm:$0xff]  ;;  %v328_v25 = vld [vmem:[%s3072_s26 + $0x2108] sm:$0xff] }
  0x30   : > { %209 = vst [vmem:[%s3077_s27 + $0xe8] sm:$0xff] %v208_v29  ;;  %v330_v26 = vld [vmem:[%s3072_s26 + $0x2110] sm:$0xff]  ;;  %v332_v27 = vld [vmem:[%s3072_s26 + $0x2118] sm:$0xff]  ;;  %v334_v28 = vld [vmem:[%s3072_s26 + $0x2120] sm:$0xff] }
  0x31   : > { %211 = vst [vmem:[%s3077_s27 + $0xf0] sm:$0xff] %v210_v30  ;;  %v336_v29 = vld [vmem:[%s3072_s26 + $0x2128] sm:$0xff]  ;;  %v338_v30 = vld [vmem:[%s3072_s26 + $0x2130] sm:$0xff] }
  0x32   : > { %213 = vst [vmem:[%s3077_s27 + $0xf8] sm:$0xff] %v212_v31  ;;  %v340_v31 = vld [vmem:[%s3072_s26 + $0x2138] sm:$0xff] }
  0x33   : > { %215 = vst [vmem:[%s3077_s27 + $0x100] sm:$0xff] %v214_v32  ;;  %v342_v32 = vld [vmem:[%s3072_s26 + $0x2400] sm:$0xff] }
  0x34   : > { %217 = vst [vmem:[%s3077_s27 + $0x108] sm:$0xff] %v216_v33  ;;  %v344_v33 = vld [vmem:[%s3072_s26 + $0x2408] sm:$0xff] }
  0x35   : > { %219 = vst [vmem:[%s3077_s27 + $0x110] sm:$0xff] %v218_v34  ;;  %v346_v34 = vld [vmem:[%s3072_s26 + $0x2410] sm:$0xff] }
  0x36   : > { %221 = vst [vmem:[%s3077_s27 + $0x118] sm:$0xff] %v220_v35  ;;  %v348_v35 = vld [vmem:[%s3072_s26 + $0x2418] sm:$0xff] }
  0x37   : > { %223 = vst [vmem:[%s3077_s27 + $0x120] sm:$0xff] %v222_v36  ;;  %v350_v36 = vld [vmem:[%s3072_s26 + $0x2420] sm:$0xff] }
  0x38   : > { %225 = vst [vmem:[%s3077_s27 + $0x128] sm:$0xff] %v224_v37  ;;  %v352_v37 = vld [vmem:[%s3072_s26 + $0x2428] sm:$0xff] }
  0x39   : > { %227 = vst [vmem:[%s3077_s27 + $0x130] sm:$0xff] %v226_v38  ;;  %v354_v38 = vld [vmem:[%s3072_s26 + $0x2430] sm:$0xff] }
  0x3a   : > { %229 = vst [vmem:[%s3077_s27 + $0x138] sm:$0xff] %v228_v39  ;;  %v356_v39 = vld [vmem:[%s3072_s26 + $0x2438] sm:$0xff] }
  0x3b   : > { %231 = vst [vmem:[%s3077_s27 + $0x140] sm:$0xff] %v230_v40  ;;  %v358_v40 = vld [vmem:[%s3072_s26 + $0x2700] sm:$0xff] }
  0x3c   : > { %233 = vst [vmem:[%s3077_s27 + $0x148] sm:$0xff] %v232_v41  ;;  %v360_v41 = vld [vmem:[%s3072_s26 + $0x2708] sm:$0xff] }
  0x3d   : > { %235 = vst [vmem:[%s3077_s27 + $0x150] sm:$0xff] %v234_v42  ;;  %v362_v42 = vld [vmem:[%s3072_s26 + $0x2710] sm:$0xff] }
  0x3e   : > { %237 = vst [vmem:[%s3077_s27 + $0x158] sm:$0xff] %v236_v43  ;;  %v364_v43 = vld [vmem:[%s3072_s26 + $0x2718] sm:$0xff] }
  0x3f   : > { %239 = vst [vmem:[%s3077_s27 + $0x160] sm:$0xff] %v238_v44  ;;  %v366_v44 = vld [vmem:[%s3072_s26 + $0x2720] sm:$0xff] }
  0x40   : > { %241 = vst [vmem:[%s3077_s27 + $0x168] sm:$0xff] %v240_v45  ;;  %v368_v45 = vld [vmem:[%s3072_s26 + $0x2728] sm:$0xff] }
  0x41   : > { %243 = vst [vmem:[%s3077_s27 + $0x170] sm:$0xff] %v242_v46  ;;  %v370_v46 = vld [vmem:[%s3072_s26 + $0x2730] sm:$0xff] }
  0x42   : > { %245 = vst [vmem:[%s3077_s27 + $0x178] sm:$0xff] %v244_v47  ;;  %v372_v47 = vld [vmem:[%s3072_s26 + $0x2738] sm:$0xff] }
  0x43   : > { %247 = vst [vmem:[%s3077_s27 + $0x180] sm:$0xff] %v246_v48  ;;  %v374_v48 = vld [vmem:[%s3072_s26 + $0x2a00] sm:$0xff] }
  0x44   : > { %249 = vst [vmem:[%s3077_s27 + $0x188] sm:$0xff] %v248_v49  ;;  %v376_v49 = vld [vmem:[%s3072_s26 + $0x2a08] sm:$0xff] }
  0x45   : > { %251 = vst [vmem:[%s3077_s27 + $0x190] sm:$0xff] %v250_v50  ;;  %v378_v50 = vld [vmem:[%s3072_s26 + $0x2a10] sm:$0xff] }
  0x46   : > { %253 = vst [vmem:[%s3077_s27 + $0x198] sm:$0xff] %v252_v51  ;;  %v380_v51 = vld [vmem:[%s3072_s26 + $0x2a18] sm:$0xff] }
  0x47   : > { %255 = vst [vmem:[%s3077_s27 + $0x1a0] sm:$0xff] %v254_v52  ;;  %v382_v52 = vld [vmem:[%s3072_s26 + $0x2a20] sm:$0xff] }
  0x48   : > { %257 = vst [vmem:[%s3077_s27 + $0x1a8] sm:$0xff] %v256_v53  ;;  %v384_v53 = vld [vmem:[%s3072_s26 + $0x2a28] sm:$0xff] }
  0x49   : > { %259 = vst [vmem:[%s3077_s27 + $0x1b0] sm:$0xff] %v258_v54  ;;  %v386_v54 = vld [vmem:[%s3072_s26 + $0x2a30] sm:$0xff] }
  0x4a   : > { %261 = vst [vmem:[%s3077_s27 + $0x1b8] sm:$0xff] %v260_v55  ;;  %v388_v55 = vld [vmem:[%s3072_s26 + $0x2a38] sm:$0xff] }
  0x4b   : > { %263 = vst [vmem:[%s3077_s27 + $0x1c0] sm:$0xff] %v262_v56  ;;  %v390_v56 = vld [vmem:[%s3072_s26 + $0x2d00] sm:$0xff] }
  0x4c   : > { %265 = vst [vmem:[%s3077_s27 + $0x1c8] sm:$0xff] %v264_v57  ;;  %v392_v57 = vld [vmem:[%s3072_s26 + $0x2d08] sm:$0xff] }
  0x4d   : > { %267 = vst [vmem:[%s3077_s27 + $0x1d0] sm:$0xff] %v266_v58  ;;  %v394_v58 = vld [vmem:[%s3072_s26 + $0x2d10] sm:$0xff] }
  0x4e   : > { %269 = vst [vmem:[%s3077_s27 + $0x1d8] sm:$0xff] %v268_v59  ;;  %v396_v59 = vld [vmem:[%s3072_s26 + $0x2d18] sm:$0xff] }
  0x4f   : > { %271 = vst [vmem:[%s3077_s27 + $0x1e0] sm:$0xff] %v270_v60  ;;  %v398_v60 = vld [vmem:[%s3072_s26 + $0x2d20] sm:$0xff] }
  0x50   : > { %273 = vst [vmem:[%s3077_s27 + $0x1e8] sm:$0xff] %v272_v61  ;;  %v400_v61 = vld [vmem:[%s3072_s26 + $0x2d28] sm:$0xff] }
  0x51   : > { %275 = vst [vmem:[%s3077_s27 + $0x1f0] sm:$0xff] %v274_v62  ;;  %v402_v62 = vld [vmem:[%s3072_s26 + $0x2d30] sm:$0xff] }
  0x52   : > { %277 = vst [vmem:[%s3077_s27 + $0x1f8] sm:$0xff] %v276_v63  ;;  %v404_v63 = vld [vmem:[%s3072_s26 + $0x2d38] sm:$0xff] }
  0x53   : > { %279 = vst [vmem:[%s3077_s27 + $0x200] sm:$0xff] %v278_v0  ;;  %v406_v0 = vld [vmem:[%s3072_s26 + $0x3000] sm:$0xff] }
  0x54   : > { %281 = vst [vmem:[%s3077_s27 + $0x208] sm:$0xff] %v280_v1  ;;  %v408_v1 = vld [vmem:[%s3072_s26 + $0x3008] sm:$0xff] }
  0x55   : > { %283 = vst [vmem:[%s3077_s27 + $0x210] sm:$0xff] %v282_v2  ;;  %v410_v2 = vld [vmem:[%s3072_s26 + $0x3010] sm:$0xff] }
  0x56   : > { %285 = vst [vmem:[%s3077_s27 + $0x218] sm:$0xff] %v284_v3  ;;  %v412_v3 = vld [vmem:[%s3072_s26 + $0x3018] sm:$0xff] }
  0x57   : > { %287 = vst [vmem:[%s3077_s27 + $0x220] sm:$0xff] %v286_v4  ;;  %v414_v4 = vld [vmem:[%s3072_s26 + $0x3020] sm:$0xff] }
  0x58   : > { %289 = vst [vmem:[%s3077_s27 + $0x228] sm:$0xff] %v288_v5  ;;  %v416_v5 = vld [vmem:[%s3072_s26 + $0x3028] sm:$0xff] }
  0x59   : > { %291 = vst [vmem:[%s3077_s27 + $0x230] sm:$0xff] %v290_v6  ;;  %v418_v6 = vld [vmem:[%s3072_s26 + $0x3030] sm:$0xff] }
  0x5a   : > { %293 = vst [vmem:[%s3077_s27 + $0x238] sm:$0xff] %v292_v7  ;;  %v420_v7 = vld [vmem:[%s3072_s26 + $0x3038] sm:$0xff] }
  0x5b   : > { %295 = vst [vmem:[%s3077_s27 + $0x240] sm:$0xff] %v294_v8  ;;  %v422_v8 = vld [vmem:[%s3072_s26 + $0x3300] sm:$0xff] }
  0x5c   : > { %297 = vst [vmem:[%s3077_s27 + $0x248] sm:$0xff] %v296_v9  ;;  %v424_v9 = vld [vmem:[%s3072_s26 + $0x3308] sm:$0xff] }
  0x5d   : > { %299 = vst [vmem:[%s3077_s27 + $0x250] sm:$0xff] %v298_v10  ;;  %v426_v10 = vld [vmem:[%s3072_s26 + $0x3310] sm:$0xff] }
  0x5e   : > { %301 = vst [vmem:[%s3077_s27 + $0x258] sm:$0xff] %v300_v11  ;;  %v428_v11 = vld [vmem:[%s3072_s26 + $0x3318] sm:$0xff] }
  0x5f   : > { %303 = vst [vmem:[%s3077_s27 + $0x260] sm:$0xff] %v302_v12  ;;  %v430_v12 = vld [vmem:[%s3072_s26 + $0x3320] sm:$0xff] }
  0x60   : > { %305 = vst [vmem:[%s3077_s27 + $0x268] sm:$0xff] %v304_v13  ;;  %v432_v13 = vld [vmem:[%s3072_s26 + $0x3328] sm:$0xff] }
  0x61   : > { %307 = vst [vmem:[%s3077_s27 + $0x270] sm:$0xff] %v306_v14  ;;  %v434_v14 = vld [vmem:[%s3072_s26 + $0x3330] sm:$0xff] }
  0x62   : > { %309 = vst [vmem:[%s3077_s27 + $0x278] sm:$0xff] %v308_v15  ;;  %v436_v15 = vld [vmem:[%s3072_s26 + $0x3338] sm:$0xff] }
  0x63   : > { %311 = vst [vmem:[%s3077_s27 + $0x280] sm:$0xff] %v310_v16  ;;  %v438_v16 = vld [vmem:[%s3072_s26 + $0x3600] sm:$0xff] }
  0x64   : > { %313 = vst [vmem:[%s3077_s27 + $0x288] sm:$0xff] %v312_v17  ;;  %v440_v17 = vld [vmem:[%s3072_s26 + $0x3608] sm:$0xff] }
  0x65   : > { %315 = vst [vmem:[%s3077_s27 + $0x290] sm:$0xff] %v314_v18  ;;  %v442_v18 = vld [vmem:[%s3072_s26 + $0x3610] sm:$0xff] }
  0x66   : > { %317 = vst [vmem:[%s3077_s27 + $0x298] sm:$0xff] %v316_v19  ;;  %v444_v19 = vld [vmem:[%s3072_s26 + $0x3618] sm:$0xff] }
  0x67   : > { %319 = vst [vmem:[%s3077_s27 + $0x2a0] sm:$0xff] %v318_v20  ;;  %v446_v20 = vld [vmem:[%s3072_s26 + $0x3620] sm:$0xff] }
  0x68   : > { %321 = vst [vmem:[%s3077_s27 + $0x2a8] sm:$0xff] %v320_v21  ;;  %v448_v21 = vld [vmem:[%s3072_s26 + $0x3628] sm:$0xff] }
  0x69   : > { %323 = vst [vmem:[%s3077_s27 + $0x2b0] sm:$0xff] %v322_v22  ;;  %v450_v22 = vld [vmem:[%s3072_s26 + $0x3630] sm:$0xff] }
  0x6a   : > { %325 = vst [vmem:[%s3077_s27 + $0x2b8] sm:$0xff] %v324_v23  ;;  %v452_v23 = vld [vmem:[%s3072_s26 + $0x3638] sm:$0xff] }
  0x6b   : > { %327 = vst [vmem:[%s3077_s27 + $0x2c0] sm:$0xff] %v326_v24  ;;  %v454_v24 = vld [vmem:[%s3072_s26 + $0x3900] sm:$0xff] }
  0x6c   : > { %329 = vst [vmem:[%s3077_s27 + $0x2c8] sm:$0xff] %v328_v25  ;;  %v456_v25 = vld [vmem:[%s3072_s26 + $0x3908] sm:$0xff] }
  0x6d   : > { %331 = vst [vmem:[%s3077_s27 + $0x2d0] sm:$0xff] %v330_v26  ;;  %v458_v26 = vld [vmem:[%s3072_s26 + $0x3910] sm:$0xff] }
  0x6e   : > { %333 = vst [vmem:[%s3077_s27 + $0x2d8] sm:$0xff] %v332_v27  ;;  %v460_v27 = vld [vmem:[%s3072_s26 + $0x3918] sm:$0xff] }
  0x6f   : > { %335 = vst [vmem:[%s3077_s27 + $0x2e0] sm:$0xff] %v334_v28  ;;  %v462_v28 = vld [vmem:[%s3072_s26 + $0x3920] sm:$0xff] }
  0x70   : > { %337 = vst [vmem:[%s3077_s27 + $0x2e8] sm:$0xff] %v336_v29  ;;  %v464_v29 = vld [vmem:[%s3072_s26 + $0x3928] sm:$0xff] }
  0x71   : > { %339 = vst [vmem:[%s3077_s27 + $0x2f0] sm:$0xff] %v338_v30  ;;  %v466_v30 = vld [vmem:[%s3072_s26 + $0x3930] sm:$0xff] }
  0x72   : > { %341 = vst [vmem:[%s3077_s27 + $0x2f8] sm:$0xff] %v340_v31  ;;  %v468_v31 = vld [vmem:[%s3072_s26 + $0x3938] sm:$0xff] }
  0x73   : > { %343 = vst [vmem:[%s3077_s27 + $0x300] sm:$0xff] %v342_v32 }
  0x74   : > { %345 = vst [vmem:[%s3077_s27 + $0x308] sm:$0xff] %v344_v33 }
  0x75   : > { %347 = vst [vmem:[%s3077_s27 + $0x310] sm:$0xff] %v346_v34 }
  0x76   : > { %349 = vst [vmem:[%s3077_s27 + $0x318] sm:$0xff] %v348_v35 }
  0x77   : > { %351 = vst [vmem:[%s3077_s27 + $0x320] sm:$0xff] %v350_v36 }
  0x78   : > { %353 = vst [vmem:[%s3077_s27 + $0x328] sm:$0xff] %v352_v37 }
  0x79   : > { %355 = vst [vmem:[%s3077_s27 + $0x330] sm:$0xff] %v354_v38 }
  0x7a   : > { %357 = vst [vmem:[%s3077_s27 + $0x338] sm:$0xff] %v356_v39 }
  0x7b   : > { %359 = vst [vmem:[%s3077_s27 + $0x340] sm:$0xff] %v358_v40 }
  0x7c   : > { %361 = vst [vmem:[%s3077_s27 + $0x348] sm:$0xff] %v360_v41 }
  0x7d   : > { %363 = vst [vmem:[%s3077_s27 + $0x350] sm:$0xff] %v362_v42 }
  0x7e   : > { %365 = vst [vmem:[%s3077_s27 + $0x358] sm:$0xff] %v364_v43 }
  0x7f   : > { %367 = vst [vmem:[%s3077_s27 + $0x360] sm:$0xff] %v366_v44 }
  0x80   : > { %369 = vst [vmem:[%s3077_s27 + $0x368] sm:$0xff] %v368_v45 }
  0x81   : > { %371 = vst [vmem:[%s3077_s27 + $0x370] sm:$0xff] %v370_v46 }
  0x82   : > { %373 = vst [vmem:[%s3077_s27 + $0x378] sm:$0xff] %v372_v47 }
  0x83   : > { %375 = vst [vmem:[%s3077_s27 + $0x380] sm:$0xff] %v374_v48 }
  0x84   : > { %377 = vst [vmem:[%s3077_s27 + $0x388] sm:$0xff] %v376_v49 }
  0x85   : > { %379 = vst [vmem:[%s3077_s27 + $0x390] sm:$0xff] %v378_v50 }
  0x86   : > { %381 = vst [vmem:[%s3077_s27 + $0x398] sm:$0xff] %v380_v51 }
  0x87   : > { %383 = vst [vmem:[%s3077_s27 + $0x3a0] sm:$0xff] %v382_v52 }
  0x88   : > { %385 = vst [vmem:[%s3077_s27 + $0x3a8] sm:$0xff] %v384_v53 }
  0x89   : > { %387 = vst [vmem:[%s3077_s27 + $0x3b0] sm:$0xff] %v386_v54 }
  0x8a   : > { %389 = vst [vmem:[%s3077_s27 + $0x3b8] sm:$0xff] %v388_v55 }
  0x8b   : > { %391 = vst [vmem:[%s3077_s27 + $0x3c0] sm:$0xff] %v390_v56 }
  0x8c   : > { %393 = vst [vmem:[%s3077_s27 + $0x3c8] sm:$0xff] %v392_v57 }
  0x8d   : > { %395 = vst [vmem:[%s3077_s27 + $0x3d0] sm:$0xff] %v394_v58 }
  0x8e   : > { %397 = vst [vmem:[%s3077_s27 + $0x3d8] sm:$0xff] %v396_v59 }
  0x8f   : > { %399 = vst [vmem:[%s3077_s27 + $0x3e0] sm:$0xff] %v398_v60 }
  0x90   : > { %401 = vst [vmem:[%s3077_s27 + $0x3e8] sm:$0xff] %v400_v61 }
  0x91   : > { %403 = vst [vmem:[%s3077_s27 + $0x3f0] sm:$0xff] %v402_v62 }
  0x92   : > { %405 = vst [vmem:[%s3077_s27 + $0x3f8] sm:$0xff] %v404_v63 }
  0x93   : > { %407 = vst [vmem:[%s3077_s27 + $0x400] sm:$0xff] %v406_v0 }
  0x94   : > { %409 = vst [vmem:[%s3077_s27 + $0x408] sm:$0xff] %v408_v1 }
  0x95   : > { %411 = vst [vmem:[%s3077_s27 + $0x410] sm:$0xff] %v410_v2 }
  0x96   : > { %413 = vst [vmem:[%s3077_s27 + $0x418] sm:$0xff] %v412_v3 }
  0x97   : > { %415 = vst [vmem:[%s3077_s27 + $0x420] sm:$0xff] %v414_v4 }
  0x98   : > { %417 = vst [vmem:[%s3077_s27 + $0x428] sm:$0xff] %v416_v5 }
  0x99   : > { %419 = vst [vmem:[%s3077_s27 + $0x430] sm:$0xff] %v418_v6 }
  0x9a   : > { %421 = vst [vmem:[%s3077_s27 + $0x438] sm:$0xff] %v420_v7 }
  0x9b   : > { %423 = vst [vmem:[%s3077_s27 + $0x440] sm:$0xff] %v422_v8 }
  0x9c   : > { %425 = vst [vmem:[%s3077_s27 + $0x448] sm:$0xff] %v424_v9 }
  0x9d   : > { %427 = vst [vmem:[%s3077_s27 + $0x450] sm:$0xff] %v426_v10 }
  0x9e   : > { %429 = vst [vmem:[%s3077_s27 + $0x458] sm:$0xff] %v428_v11 }
  0x9f   : > { %431 = vst [vmem:[%s3077_s27 + $0x460] sm:$0xff] %v430_v12 }
  0xa0   : > { %433 = vst [vmem:[%s3077_s27 + $0x468] sm:$0xff] %v432_v13 }
  0xa1   : > { %435 = vst [vmem:[%s3077_s27 + $0x470] sm:$0xff] %v434_v14 }
  0xa2   : > { %437 = vst [vmem:[%s3077_s27 + $0x478] sm:$0xff] %v436_v15 }
  0xa3   : > { %439 = vst [vmem:[%s3077_s27 + $0x480] sm:$0xff] %v438_v16 }
  0xa4   : > { %441 = vst [vmem:[%s3077_s27 + $0x488] sm:$0xff] %v440_v17 }
  0xa5   : > { %443 = vst [vmem:[%s3077_s27 + $0x490] sm:$0xff] %v442_v18 }
  0xa6   : > { %445 = vst [vmem:[%s3077_s27 + $0x498] sm:$0xff] %v444_v19 }
  0xa7   : > { %447 = vst [vmem:[%s3077_s27 + $0x4a0] sm:$0xff] %v446_v20 }
  0xa8   : > { %449 = vst [vmem:[%s3077_s27 + $0x4a8] sm:$0xff] %v448_v21 }
  0xa9   : > { %451 = vst [vmem:[%s3077_s27 + $0x4b0] sm:$0xff] %v450_v22 }
  0xaa   : > { %453 = vst [vmem:[%s3077_s27 + $0x4b8] sm:$0xff] %v452_v23 }
  0xab   : > { %455 = vst [vmem:[%s3077_s27 + $0x4c0] sm:$0xff] %v454_v24 }
  0xac   : > { %457 = vst [vmem:[%s3077_s27 + $0x4c8] sm:$0xff] %v456_v25 }
  0xad   : > { %459 = vst [vmem:[%s3077_s27 + $0x4d0] sm:$0xff] %v458_v26 }
  0xae   : > { %461 = vst [vmem:[%s3077_s27 + $0x4d8] sm:$0xff] %v460_v27 }
  0xaf   : > { %463 = vst [vmem:[%s3077_s27 + $0x4e0] sm:$0xff] %v462_v28 }
  0xb0   : > { %465 = vst [vmem:[%s3077_s27 + $0x4e8] sm:$0xff] %v464_v29 }
  0xb1   : > { %467 = vst [vmem:[%s3077_s27 + $0x4f0] sm:$0xff] %v466_v30 }
  0xb2   : > { %469 = vst [vmem:[%s3077_s27 + $0x4f8] sm:$0xff] %v468_v31 }
  0xb3 PF: > { %p2124_p7 = scmp.ge.s32.totalorder %s3009_s14, 1  ;;  %p474_p8 = scmp.lt.s32.totalorder %s3009_s14, 13 }
  0xb5   : > { %p475_p9 = pnand %p2124_p7, %p474_p8 }
  0xb6   : > { %s481_s28 = sand.u32 (!%p475_p9), 1, %s3001_s12  }
  0xb7   : > { %478 = sbr.rel (%p475_p9) target bundleno = 516 (0x204), region = 51  ;;  %s2125_s23 = sshll.u32 (!%p475_p9), %s481_s28, 7 }
  0xb8   : > { %s2960_s29 = smul.u32 (!%p475_p9), 1280, %s481_s28  ;;  %s3804_s24 = scalar_lea.vmem (!%p475_p9), [#allocation3], %s2125_s23 }
  0xba   : > { %s3401_s30 = scalar_lea.vmem (!%p475_p9), [#allocation2], %s2960_s29 }
  0xbc   : > { %v2584_v32 = vld [vmem:[%s3401_s30 + $0x380] sm:$0xf]  ;;  %vm1489_vm0 = vcmask 261120   ;;  %v2942_v37 = vld [vmem:[%s3401_s30 + $0x484] sm:$0xf]  ;;  %s2958_s12 = sshll.u32 (%p3062_p5), %s2118_s15, 6 }
  0xbd   : > { %v2918_v33 = vld [vmem:[%s3401_s30 + $0x3bc] sm:$0xf0]  ;;  %v2714_v38 = vld [vmem:[%s3401_s30 + $0x4c0] sm:$0xf0]  ;;  %v2592_v41 = vld [vmem:[%s3401_s30 + $0x388] sm:$0xf]  ;;  %s2014_s20 = scalar_lea.vmem (%p3062_p5), %s3885_s3, %s2958_s12 }
  0xbe   : > { %v2712_v34 = vld [vmem:[%s3401_s30 + $0x480] sm:$0xf]  ;;  %v2585_v35 = vor.u32 %v2918_v33, %v2584_v32  ;;  %v2717_v40 = vor.u32 %v2942_v37, %v2714_v38  ;;  %v2919_v42 = vld [vmem:[%s3401_s30 + $0x3c4] sm:$0xf0]  ;;  %v2796_v44 = vld [vmem:[%s3882_s0 + $0x4] sm:$0xf] }
  0xbf   : > { %v2950_v36 = vld [vmem:[%s3401_s30 + $0x4bc] sm:$0xf0]  ;;  %v2130_v45 = vld [vmem:[%s3882_s0 + $0x8] sm:$0xf0]  ;;  %v2593_v46 = vor.u32 %v2919_v42, %v2592_v41  ;;  %v2926_v52 = vld [vmem:[%s3401_s30 + $0x404] sm:$0xf] }
  0xc0   : > { %v2713_v39 = vor.u32 %v2950_v36, %v2712_v34  ;;  %v2520_v43 = vld [vmem:[%s3401_s30 + $0x300] sm:$0xf]  ;;  %1493 = vmatpush.bf16.msra.mxu0 %v2585_v35  ;;  %1541 = vmatpush.bf16.msra.mxu3 %v2717_v40  ;;  %v2650_v53 = vld [vmem:[%s3401_s30 + $0x440] sm:$0xf0]  ;;  %v2528_v54 = vld [vmem:[%s3401_s30 + $0x308] sm:$0xf]  ;;  %v3433_v4 = vor.u32 %v2796_v44, %v2130_v45 }
  0xc1   : > { %v2902_v47 = vld [vmem:[%s3401_s30 + $0x33c] sm:$0xf0]  ;;  %1549 = vmatpush.bf16.msra.mxu1 %v2593_v46  ;;  %v2653_v55 = vor.u32 %v2926_v52, %v2650_v53  ;;  %v2903_v56 = vld [vmem:[%s3401_s30 + $0x344] sm:$0xf0]  ;;  %v2910_v57 = vld [vmem:[%s3401_s30 + $0x384] sm:$0xf] }
  0xc2   : > { %v2648_v48 = vld [vmem:[%s3401_s30 + $0x400] sm:$0xf]  ;;  %1513 = vmatpush.bf16.msra.mxu2 %v2713_v39  ;;  %v2521_v50 = vor.u32 %v2902_v47, %v2520_v43  ;;  %v2586_v58 = vld [vmem:[%s3401_s30 + $0x3c0] sm:$0xf0]  ;;  %v2529_v59 = vor.u32 %v2903_v56, %v2528_v54  ;;  %v2720_v61 = vld [vmem:[%s3401_s30 + $0x488] sm:$0xf] }
  0xc3   : > { %v2934_v49 = vld [vmem:[%s3401_s30 + $0x43c] sm:$0xf0]  ;;  %v2589_v60 = vor.u32 %v2910_v57, %v2586_v58  ;;  %v2951_v62 = vld [vmem:[%s3401_s30 + $0x4c4] sm:$0xf0]  ;;  %v2894_v6 = vld [vmem:[%s3401_s30 + $0x304] sm:$0xf] }
  0xc4   : > { %v2649_v51 = vor.u32 %v2934_v49, %v2648_v48  ;;  %v2456_v63 = vld [vmem:[%s3401_s30 + $0x280] sm:$0xf]  ;;  %1494 = vmatpush.bf16.msra.mxu0 %v2521_v50  ;;  %v2721_v0 = vor.u32 %v2951_v62, %v2720_v61  ;;  %v2464_v2 = vld [vmem:[%s3401_s30 + $0x288] sm:$0xf]  ;;  %1542 = vmatpush.bf16.msra.mxu3 %v2653_v55  ;;  %v2522_v7 = vld [vmem:[%s3401_s30 + $0x340] sm:$0xf0] }
  0xc5   : > { %v2886_v1 = vld [vmem:[%s3401_s30 + $0x2bc] sm:$0xf0]  ;;  %v2887_v3 = vld [vmem:[%s3401_s30 + $0x2c4] sm:$0xf0]  ;;  %1550 = vmatpush.bf16.msra.mxu1 %v2529_v59  ;;  %v2525_v10 = vor.u32 %v2894_v6, %v2522_v7  ;;  %v2911_v12 = vld [vmem:[%s3401_s30 + $0x38c] sm:$0xf] }
  0xc6   : > { %1514 = vmatpush.bf16.msra.mxu2 %v2649_v51  ;;  %v2457_v5 = vor.u32 %v2886_v1, %v2456_v63  ;;  %v2656_v8 = vld [vmem:[%s3401_s30 + $0x408] sm:$0xf]  ;;  %v2465_v9 = vor.u32 %v2887_v3, %v2464_v2  ;;  %v2594_v13 = vld [vmem:[%s3401_s30 + $0x3c8] sm:$0xf0]  ;;  %v2392_v15 = vld [vmem:[%s3401_s30 + $0x200] sm:$0xf] }
  0xc7   : > { %v2935_v11 = vld [vmem:[%s3401_s30 + $0x444] sm:$0xf0]  ;;  %v2870_v16 = vld [vmem:[%s3401_s30 + $0x23c] sm:$0xf0]  ;;  %2775 = vmatmul.msk.bf16.vlgmr.msra.gmra.mxu3 %vm1489_vm0, %v3433_v4  ;;  %v2597_v18 = vor.u32 %v2911_v12, %v2594_v13  ;;  %v2878_v21 = vld [vmem:[%s3401_s30 + $0x284] sm:$0xf] }
  0xc8   : > { %1569 = vmatpush.bf16.msrb.mxu3 %v2721_v0  ;;  %v2657_v14 = vor.u32 %v2935_v11, %v2656_v8  ;;  %v2400_v17 = vld [vmem:[%s3401_s30 + $0x208] sm:$0xf]  ;;  %1495 = vmatpush.bf16.msra.mxu0 %v2457_v5  ;;  %v2393_v19 = vor.u32 %v2870_v16, %v2392_v15  ;;  %v2458_v22 = vld [vmem:[%s3401_s30 + $0x2c0] sm:$0xf0]  ;;  %v2895_v23 = vld [vmem:[%s3401_s30 + $0x30c] sm:$0xf] }
  0xc9   : > { %v2871_v20 = vld [vmem:[%s3401_s30 + $0x244] sm:$0xf0]  ;;  %v2530_v24 = vld [vmem:[%s3401_s30 + $0x348] sm:$0xf0]  ;;  %v2328_v25 = vld [vmem:[%s3401_s30 + $0x180] sm:$0xf]  ;;  %2774 = vmatmul.msk.bf16.vlgmr.msra.gmra.mxu2 %vm1489_vm0, %v3433_v4  ;;  %1551 = vmatpush.bf16.msra.mxu1 %v2465_v9  ;;  %v2461_v27 = vor.u32 %v2878_v21, %v2458_v22 }
  0xca   : > { %1521 = vmatpush.bf16.msrb.mxu2 %v2589_v60  ;;  %v2401_v26 = vor.u32 %v2871_v20, %v2400_v17  ;;  %v2854_v28 = vld [vmem:[%s3401_s30 + $0x1bc] sm:$0xf0]  ;;  %v2336_v29 = vld [vmem:[%s3401_s30 + $0x188] sm:$0xf]  ;;  %v2862_v31 = vld [vmem:[%s3401_s30 + $0x204] sm:$0xf]  ;;  %v2533_v33 = vor.u32 %v2895_v23, %v2530_v24 }
  0xcb   : > { %v2855_v30 = vld [vmem:[%s3401_s30 + $0x1c4] sm:$0xf0]  ;;  %v2394_v32 = vld [vmem:[%s3401_s30 + $0x240] sm:$0xf0]  ;;  %v2329_v34 = vor.u32 %v2854_v28, %v2328_v25  ;;  %v2879_v35 = vld [vmem:[%s3401_s30 + $0x28c] sm:$0xf] }
  0xcc   : > { %1570 = vmatpush.bf16.msrb.mxu3 %v2657_v14  ;;  %1496 = vmatpush.bf16.msra.mxu0 %v2393_v19  ;;  %v2466_v36 = vld [vmem:[%s3401_s30 + $0x2c8] sm:$0xf0]  ;;  %v2264_v37 = vld [vmem:[%s3401_s30 + $0x100] sm:$0xf]  ;;  %v2337_v39 = vor.u32 %v2855_v30, %v2336_v29  ;;  %v2397_v40 = vor.u32 %v2862_v31, %v2394_v32  ;;  %v2272_v41 = vld [vmem:[%s3401_s30 + $0x108] sm:$0xf] }
  0xcd   : > { %v2838_v38 = vld [vmem:[%s3401_s30 + $0x13c] sm:$0xf0]  ;;  %1552 = vmatpush.bf16.msra.mxu1 %v2401_v26  ;;  %v2839_v42 = vld [vmem:[%s3401_s30 + $0x144] sm:$0xf0]  ;;  %v2846_v43 = vld [vmem:[%s3401_s30 + $0x184] sm:$0xf]  ;;  %v2469_v45 = vor.u32 %v2879_v35, %v2466_v36 }
  0xce   : > { %1522 = vmatpush.bf16.msrb.mxu2 %v2525_v10  ;;  %v2330_v44 = vld [vmem:[%s3401_s30 + $0x1c0] sm:$0xf0]  ;;  %v2265_v46 = vor.u32 %v2838_v38, %v2264_v37  ;;  %v2863_v47 = vld [vmem:[%s3401_s30 + $0x20c] sm:$0xf]  ;;  %v2200_v49 = vld [vmem:[%s3401_s30 + $0x80] sm:$0xf]  ;;  %v2273_v51 = vor.u32 %v2839_v42, %v2272_v41 }
  0xcf   : > { %v2402_v48 = vld [vmem:[%s3401_s30 + $0x248] sm:$0xf0]  ;;  %v2822_v50 = vld [vmem:[%s3401_s30 + $0xbc] sm:$0xf0]  ;;  %v2333_v52 = vor.u32 %v2846_v43, %v2330_v44  ;;  %v2208_v53 = vld [vmem:[%s3401_s30 + $0x88] sm:$0xf] }
  0xd0   : > { %1577 = vmatpush.bf16.msra.mxu3 %v2597_v18  ;;  %1497 = vmatpush.bf16.msra.mxu0 %v2329_v34  ;;  %v2823_v54 = vld [vmem:[%s3401_s30 + $0xc4] sm:$0xf0]  ;;  %v2830_v55 = vld [vmem:[%s3401_s30 + $0x104] sm:$0xf]  ;;  %v2405_v57 = vor.u32 %v2863_v47, %v2402_v48  ;;  %v2201_v58 = vor.u32 %v2822_v50, %v2200_v49  ;;  %v2847_v59 = vld [vmem:[%s3401_s30 + $0x18c] sm:$0xf] }
  0xd1   : > { %1553 = vmatpush.bf16.msra.mxu1 %v2337_v39  ;;  %v2266_v56 = vld [vmem:[%s3401_s30 + $0x140] sm:$0xf0]  ;;  %v2338_v60 = vld [vmem:[%s3401_s30 + $0x1c8] sm:$0xf0]  ;;  %v2136_v61 = vld [vmem:[%s3401_s30] sm:$0xf]  ;;  %v2209_v0 = vor.u32 %v2823_v54, %v2208_v53 }
  0xd2   : > { %1523 = vmatpush.bf16.msrb.mxu2 %v2461_v27  ;;  %v2806_v62 = vld [vmem:[%s3401_s30 + $0x3c] sm:$0xf0]  ;;  %v2144_v63 = vld [vmem:[%s3401_s30 + $0x8] sm:$0xf]  ;;  %v2269_v1 = vor.u32 %v2830_v55, %v2266_v56  ;;  %v2943_v3 = vld [vmem:[%s3401_s30 + $0x48c] sm:$0xf]  ;;  %v2341_v9 = vor.u32 %v2847_v59, %v2338_v60 }
  0xd3   : > { %v2807_v2 = vld [vmem:[%s3401_s30 + $0x44] sm:$0xf0]  ;;  %v2722_v5 = vld [vmem:[%s3401_s30 + $0x4c8] sm:$0xf0]  ;;  %v2814_v6 = vld [vmem:[%s3401_s30 + $0x84] sm:$0xf]  ;;  %v2137_v10 = vor.u32 %v2806_v62, %v2136_v61 }
  0xd4   : > { %1578 = vmatpush.bf16.msra.mxu3 %v2533_v33  ;;  %1498 = vmatpush.bf16.msra.mxu0 %v2265_v46  ;;  %v2202_v7 = vld [vmem:[%s3401_s30 + $0xc0] sm:$0xf0]  ;;  %v2831_v8 = vld [vmem:[%s3401_s30 + $0x10c] sm:$0xf]  ;;  %v2128_v12 = vld [vmem:[%s3882_s0] sm:$0xf]  ;;  %v2725_v14 = vor.u32 %v2943_v3, %v2722_v5  ;;  %v2145_v18 = vor.u32 %v2807_v2, %v2144_v63 }
  0xd5   : > { %1554 = vmatpush.bf16.msra.mxu1 %v2273_v51  ;;  %v2274_v11 = vld [vmem:[%s3401_s30 + $0x148] sm:$0xf0]  ;;  %v2797_v13 = vld [vmem:[%s3882_s0 + $0x4] sm:$0xf0]  ;;  %v2798_v15 = vld [vmem:[%s3401_s30 + $0x4] sm:$0xf]  ;;  %v2205_v19 = vor.u32 %v2814_v6, %v2202_v7 }
  0xd6   : > { %1524 = vmatpush.bf16.msrb.mxu2 %v2397_v40  ;;  %v2728_v16 = vld [vmem:[%s3401_s30 + $0x490] sm:$0xf]  ;;  %v2138_v20 = vld [vmem:[%s3401_s30 + $0x40] sm:$0xf0]  ;;  %v2927_v21 = vld [vmem:[%s3401_s30 + $0x40c] sm:$0xf]  ;;  %v3501_v23 = vor.u32 %v2797_v13, %v2128_v12  ;;  %v2277_v29 = vor.u32 %v2831_v8, %v2274_v11 }
  0xd7   : > { %2776 = vmatmul.msk.bf16.vlgmr.msrb.gmra.mxu3 %vm1489_vm0, %v3433_v4  ;;  %v2952_v17 = vld [vmem:[%s3401_s30 + $0x4cc] sm:$0xf0]  ;;  %v2658_v22 = vld [vmem:[%s3401_s30 + $0x448] sm:$0xf0]  ;;  %v2912_v26 = vld [vmem:[%s3401_s30 + $0x394] sm:$0xf]  ;;  %v2141_v37 = vor.u32 %v2798_v15, %v2138_v20 }
  0xd8   : > { %1579 = vmatpush.bf16.msra.mxu3 %v2469_v45  ;;  %1499 = vmatpush.bf16.msra.mxu0 %v2201_v58  ;;  %v2815_v24 = vld [vmem:[%s3401_s30 + $0x8c] sm:$0xf]  ;;  %v2600_v25 = vld [vmem:[%s3401_s30 + $0x390] sm:$0xf]  ;;  %v2602_v27 = vld [vmem:[%s3401_s30 + $0x3d0] sm:$0xf0]  ;;  %v2729_v28 = vor.u32 %v2952_v17, %v2728_v16  ;;  %v2661_v32 = vor.u32 %v2927_v21, %v2658_v22 }
  0xd9   : > { %1555 = vmatpush.bf16.msra.mxu1 %v2209_v0  ;;  %v2920_v30 = vld [vmem:[%s3401_s30 + $0x3cc] sm:$0xf0]  ;;  %v2210_v33 = vld [vmem:[%s3401_s30 + $0xc8] sm:$0xf0]  ;;  %v3011_v34 = vmov 0   ;;  %v668_v36 = vld [vmem:[%s3884_s2] sm:$0xff]  ;;  %v2605_v38 = vor.u32 %v2912_v26, %v2602_v27 }
  0xda   : > { %1525 = vmatpush.bf16.msrb.mxu2 %v2333_v52  ;;  %v2664_v31 = vld [vmem:[%s3401_s30 + $0x410] sm:$0xf]  ;;  %2986 = vset.pattern.permute.xlu0 %v3011_v34  ;;  %v2944_v39 = vld [vmem:[%s3401_s30 + $0x494] sm:$0xf]  ;;  %v2601_v40 = vor.u32 %v2920_v30, %v2600_v25  ;;  %v2213_v45 = vor.u32 %v2815_v24, %v2210_v33  ;;  %v2799_v46 = vld [vmem:[%s3401_s30 + $0xc] sm:$0xf] }
  0xdb   : > { %v2936_v35 = vld [vmem:[%s3401_s30 + $0x44c] sm:$0xf0]  ;;  %v2896_v41 = vld [vmem:[%s3401_s30 + $0x314] sm:$0xf]  ;;  %672 = vperm.xlu0 %2986, %v668_v36   ;;  %v2146_v50 = vld [vmem:[%s3401_s30 + $0x48] sm:$0xf0] }
  0xdc   : > { %1580 = vmatpush.bf16.msra.mxu3 %v2405_v57  ;;  %1500 = vmatpush.bf16.msra.mxu0 %v2137_v10  ;;  %v2538_v42 = vld [vmem:[%s3401_s30 + $0x350] sm:$0xf0]  ;;  %v2665_v43 = vor.u32 %v2936_v35, %v2664_v31  ;;  %v2536_v47 = vld [vmem:[%s3401_s30 + $0x310] sm:$0xf]  ;;  %v2608_v54 = vld [vmem:[%s3401_s30 + $0x398] sm:$0xf]  ;;  %v2149_v59 = vor.u32 %v2799_v46, %v2146_v50 }
  0xdd   : > { %1556 = vmatpush.bf16.msra.mxu1 %v2145_v18  ;;  %v2730_v44 = vld [vmem:[%s3401_s30 + $0x4d0] sm:$0xf0]  ;;  %v2904_v48 = vld [vmem:[%s3401_s30 + $0x34c] sm:$0xf0]  ;;  %v2541_v53 = vor.u32 %v2896_v41, %v2538_v42  ;;  %v2921_v55 = vld [vmem:[%s3401_s30 + $0x3d4] sm:$0xf0] }
  0xde   : > { %1526 = vmatpush.bf16.msrb.mxu2 %v2269_v1  ;;  %v2733_v49 = vor.u32 %v2944_v39, %v2730_v44  ;;  %v2928_v51 = vld [vmem:[%s3401_s30 + $0x414] sm:$0xf]  ;;  %v2537_v56 = vor.u32 %v2904_v48, %v2536_v47  ;;  %v2472_v60 = vld [vmem:[%s3401_s30 + $0x290] sm:$0xf]  ;;  %v2609_v63 = vor.u32 %v2921_v55, %v2608_v54  ;;  %v2544_v1 = vld [vmem:[%s3401_s30 + $0x318] sm:$0xf] }
  0xdf   : > { %1501 = vmatmul.bf16.vlgmr.msra.gmra.mxu0 %v3501_v23  ;;  %v2666_v52 = vld [vmem:[%s3401_s30 + $0x450] sm:$0xf0]  ;;  %v2888_v61 = vld [vmem:[%s3401_s30 + $0x2cc] sm:$0xf0]  ;;  %v2905_v2 = vld [vmem:[%s3401_s30 + $0x354] sm:$0xf0] }
  0xe0   : > { %1581 = vmatpush.bf16.msra.mxu3 %v2341_v9  ;;  %1597 = vmatpush.bf16.msrb.mxu0 %v2725_v14  ;;  %v2880_v57 = vld [vmem:[%s3401_s30 + $0x294] sm:$0xf]  ;;  %v2669_v62 = vor.u32 %v2928_v51, %v2666_v52  ;;  %v669_v3 = vld [vmem:[%s3884_s2 + $0x8] sm:$0xff]  ;;  %v2473_v5 = vor.u32 %v2888_v61, %v2472_v60  ;;  %v2408_v8 = vld [vmem:[%s3401_s30 + $0x210] sm:$0xf]  ;;  %v2545_v10 = vor.u32 %v2905_v2, %v2544_v1 }
  0xe1   : > { %1625 = vmatpush.bf16.msrb.mxu1 %v2729_v28  ;;  %v2474_v58 = vld [vmem:[%s3401_s30 + $0x2d0] sm:$0xf0]  ;;  %v2872_v9 = vld [vmem:[%s3401_s30 + $0x24c] sm:$0xf0]  ;;  %v2913_v12 = vld [vmem:[%s3401_s30 + $0x39c] sm:$0xf] }
  0xe2   : > { %1527 = vmatpush.bf16.msrb.mxu2 %v2205_v19  ;;  %1557 = vmatmul.bf16.vlgmr.msra.gmra.mxu1 %v3501_v23  ;;  %v2477_v0 = vor.u32 %v2880_v57, %v2474_v58  ;;  %v2864_v6 = vld [vmem:[%s3401_s30 + $0x214] sm:$0xf]  ;;  %v2480_v13 = vld [vmem:[%s3401_s30 + $0x298] sm:$0xf]  ;;  %v2409_v15 = vor.u32 %v2872_v9, %v2408_v8  ;;  %v2610_v16 = vld [vmem:[%s3401_s30 + $0x3d8] sm:$0xf0] }
  0xe3   : > { %v2410_v7 = vld [vmem:[%s3401_s30 + $0x250] sm:$0xf0]  ;;  %677 = vperm.xlu0 %2986, %v669_v3   ;;  %v2889_v14 = vld [vmem:[%s3401_s30 + $0x2d4] sm:$0xf0]  ;;  %v2344_v19 = vld [vmem:[%s3401_s30 + $0x190] sm:$0xf]  ;;  %v2613_v22 = vor.u32 %v2913_v12, %v2610_v16 }
  0xe4   : > { %1582 = vmatpush.bf16.msra.mxu3 %v2277_v29  ;;  %1598 = vmatpush.bf16.msrb.mxu0 %v2661_v32  ;;  %v2413_v11 = vor.u32 %v2864_v6, %v2410_v7  ;;  %v2848_v17 = vld [vmem:[%s3401_s30 + $0x194] sm:$0xf]  ;;  %v2856_v20 = vld [vmem:[%s3401_s30 + $0x1cc] sm:$0xf0]  ;;  %v2481_v21 = vor.u32 %v2889_v14, %v2480_v13  ;;  %v2897_v25 = vld [vmem:[%s3401_s30 + $0x31c] sm:$0xf] }
  0xe5   : > { %1626 = vmatpush.bf16.msrb.mxu1 %v2665_v43  ;;  %v2346_v18 = vld [vmem:[%s3401_s30 + $0x1d0] sm:$0xf0]  ;;  %v2416_v26 = vld [vmem:[%s3401_s30 + $0x218] sm:$0xf]  ;;  %v2345_v28 = vor.u32 %v2856_v20, %v2344_v19  ;;  %v2546_v29 = vld [vmem:[%s3401_s30 + $0x358] sm:$0xf0] }
  0xe6   : > { %1528 = vmatpush.bf16.msrb.mxu2 %v2141_v37  ;;  %v2349_v24 = vor.u32 %v2848_v17, %v2346_v18  ;;  %v2873_v27 = vld [vmem:[%s3401_s30 + $0x254] sm:$0xf0]  ;;  %v2832_v30 = vld [vmem:[%s3401_s30 + $0x114] sm:$0xf]  ;;  %v2280_v32 = vld [vmem:[%s3401_s30 + $0x110] sm:$0xf]  ;;  %v2549_v35 = vor.u32 %v2897_v25, %v2546_v29 }
  0xe7   : > { %v2282_v31 = vld [vmem:[%s3401_s30 + $0x150] sm:$0xf0]  ;;  %v2840_v33 = vld [vmem:[%s3401_s30 + $0x14c] sm:$0xf0]  ;;  %v2417_v34 = vor.u32 %v2873_v27, %v2416_v26  ;;  %v2881_v37 = vld [vmem:[%s3401_s30 + $0x29c] sm:$0xf] }
  0xe8   : > { %1633 = vmatpush.bf16.msra.mxu0 %v2605_v38  ;;  %1583 = vmatpush.bf16.msra.mxu3 %v2213_v45  ;;  %v2285_v36 = vor.u32 %v2832_v30, %v2282_v31  ;;  %v2352_v38 = vld [vmem:[%s3401_s30 + $0x198] sm:$0xf]  ;;  %v2482_v41 = vld [vmem:[%s3401_s30 + $0x2d8] sm:$0xf0]  ;;  %v2816_v42 = vld [vmem:[%s3401_s30 + $0x94] sm:$0xf] }
  0xe9   : > { %1653 = vmatpush.bf16.msra.mxu1 %v2733_v49  ;;  %1529 = vmatmul.bf16.vlgmr.msrb.gmra.mxu2 %v3501_v23  ;;  %v2857_v39 = vld [vmem:[%s3401_s30 + $0x1d4] sm:$0xf0]  ;;  %v2218_v43 = vld [vmem:[%s3401_s30 + $0xd0] sm:$0xf0]  ;;  %v2216_v44 = vld [vmem:[%s3401_s30 + $0x90] sm:$0xf]  ;;  %v2485_v48 = vor.u32 %v2881_v37, %v2482_v41 }
  0xea   : > { %1605 = vmatpush.bf16.msra.mxu2 %v2601_v40  ;;  %v2281_v40 = vor.u32 %v2840_v33, %v2280_v32  ;;  %v2824_v45 = vld [vmem:[%s3401_s30 + $0xcc] sm:$0xf0]  ;;  %v2353_v46 = vor.u32 %v2857_v39, %v2352_v38  ;;  %v2865_v47 = vld [vmem:[%s3401_s30 + $0x21c] sm:$0xf]  ;;  %v2221_v49 = vor.u32 %v2816_v42, %v2218_v43  ;;  %v2288_v51 = vld [vmem:[%s3401_s30 + $0x118] sm:$0xf] }
  0xeb   : > { %v2418_v50 = vld [vmem:[%s3401_s30 + $0x258] sm:$0xf0]  ;;  %v2841_v52 = vld [vmem:[%s3401_s30 + $0x154] sm:$0xf0]  ;;  %v2152_v54 = vld [vmem:[%s3401_s30 + $0x10] sm:$0xf] }
  0xec   : > { %1634 = vmatpush.bf16.msra.mxu0 %v2541_v53  ;;  %1584 = vmatpush.bf16.msra.mxu3 %v2149_v59  ;;  %v2217_v53 = vor.u32 %v2824_v45, %v2216_v44  ;;  %v2800_v55 = vld [vmem:[%s3401_s30 + $0x14] sm:$0xf]  ;;  %v2808_v57 = vld [vmem:[%s3401_s30 + $0x4c] sm:$0xf0]  ;;  %v2945_v58 = vld [vmem:[%s3401_s30 + $0x49c] sm:$0xf]  ;;  %v2289_v60 = vor.u32 %v2841_v52, %v2288_v51 }
  0xed   : > { %1654 = vmatpush.bf16.msra.mxu1 %v2669_v62  ;;  %v2738_v59 = vld [vmem:[%s3401_s30 + $0x4d8] sm:$0xf0]  ;;  %v2736_v61 = vld [vmem:[%s3401_s30 + $0x498] sm:$0xf]  ;;  %v2153_v3 = vor.u32 %v2808_v57, %v2152_v54  ;;  %v2616_v18 = vld [vmem:[%s3401_s30 + $0x3a0] sm:$0xf] }
  0xee   : > { %1606 = vmatpush.bf16.msra.mxu2 %v2537_v56  ;;  %v2154_v56 = vld [vmem:[%s3401_s30 + $0x50] sm:$0xf0]  ;;  %v2953_v62 = vld [vmem:[%s3401_s30 + $0x4d4] sm:$0xf0]  ;;  %v2354_v6 = vld [vmem:[%s3401_s30 + $0x1d8] sm:$0xf0]  ;;  %v2741_v7 = vor.u32 %v2945_v58, %v2738_v59 }
  0xef   : > { %1585 = vmatmul.bf16.vlgmr.msra.gmra.mxu3 %v3501_v23  ;;  %2777 = vmatmul.msk.bf16.vlgmr.msrb.gmra.mxu0 %vm1489_vm0, %v3433_v4  ;;  %v2224_v1 = vld [vmem:[%s3401_s30 + $0x98] sm:$0xf]  ;;  %v2737_v8 = vor.u32 %v2953_v62, %v2736_v61  ;;  %v2833_v12 = vld [vmem:[%s3401_s30 + $0x11c] sm:$0xf]  ;;  %v2922_v19 = vld [vmem:[%s3401_s30 + $0x3dc] sm:$0xf0] }
  0xf0   : > { %1661 = vmatpush.bf16.msrb.mxu3 %v2609_v63  ;;  %1635 = vmatpush.bf16.msra.mxu0 %v2477_v0  ;;  %v2421_v63 = vor.u32 %v2865_v47, %v2418_v50  ;;  %v2157_v0 = vor.u32 %v2800_v55, %v2154_v56  ;;  %v2825_v2 = vld [vmem:[%s3401_s30 + $0xd4] sm:$0xf0]  ;;  %v2929_v13 = vld [vmem:[%s3401_s30 + $0x41c] sm:$0xf]  ;;  %v2744_v26 = vld [vmem:[%s3401_s30 + $0x4a0] sm:$0xf]  ;;  %v2617_v29 = vor.u32 %v2922_v19, %v2616_v18 }
  0xf1   : > { %v2672_v9 = vld [vmem:[%s3401_s30 + $0x418] sm:$0xf]  ;;  %v2674_v14 = vld [vmem:[%s3401_s30 + $0x458] sm:$0xf0]  ;;  %v2954_v27 = vld [vmem:[%s3401_s30 + $0x4dc] sm:$0xf0] }
  0xf2   : > { %1607 = vmatpush.bf16.msra.mxu2 %v2473_v5  ;;  %2778 = vmatmul.msk.bf16.vlgmr.msrb.gmra.mxu1 %vm1489_vm0, %v3433_v4  ;;  %v2849_v5 = vld [vmem:[%s3401_s30 + $0x19c] sm:$0xf]  ;;  %v2809_v17 = vld [vmem:[%s3401_s30 + $0x54] sm:$0xf0]  ;;  %v2677_v25 = vor.u32 %v2929_v13, %v2674_v14  ;;  %v2552_v33 = vld [vmem:[%s3401_s30 + $0x320] sm:$0xf] }
  0xf3   : > { %1689 = vmatpush.bf16.msrb.mxu1 %v2613_v22  ;;  %v2357_v16 = vor.u32 %v2849_v5, %v2354_v6  ;;  %v2290_v20 = vld [vmem:[%s3401_s30 + $0x158] sm:$0xf0]  ;;  %v2618_v22 = vld [vmem:[%s3401_s30 + $0x3e0] sm:$0xf0]  ;;  %v2680_v39 = vld [vmem:[%s3401_s30 + $0x420] sm:$0xf] }
  0xf4   : > { %1662 = vmatpush.bf16.msrb.mxu3 %v2545_v10  ;;  %1636 = vmatpush.bf16.msra.mxu0 %v2413_v11  ;;  %v2937_v10 = vld [vmem:[%s3401_s30 + $0x454] sm:$0xf0]  ;;  %v2225_v11 = vor.u32 %v2825_v2, %v2224_v1  ;;  %v2293_v30 = vor.u32 %v2833_v12, %v2290_v20  ;;  %v2817_v32 = vld [vmem:[%s3401_s30 + $0x9c] sm:$0xf]  ;;  %v2898_v37 = vld [vmem:[%s3401_s30 + $0x324] sm:$0xf] }
  0xf5   : > { %v2554_v38 = vld [vmem:[%s3401_s30 + $0x360] sm:$0xf0]  ;;  %v2624_v42 = vld [vmem:[%s3401_s30 + $0x3a8] sm:$0xf]  ;;  %v2488_v47 = vld [vmem:[%s3401_s30 + $0x2a0] sm:$0xf] }
  0xf6   : > { %1608 = vmatpush.bf16.msra.mxu2 %v2409_v15  ;;  %v2160_v15 = vld [vmem:[%s3401_s30 + $0x18] sm:$0xf]  ;;  %v2923_v43 = vld [vmem:[%s3401_s30 + $0x3e4] sm:$0xf0]  ;;  %v2557_v45 = vor.u32 %v2898_v37, %v2554_v38  ;;  %v2162_v50 = vld [vmem:[%s3401_s30 + $0x58] sm:$0xf0] }
  0xf7   : > { %1690 = vmatpush.bf16.msrb.mxu1 %v2549_v35  ;;  %v2745_v35 = vor.u32 %v2954_v27, %v2744_v26  ;;  %v2882_v51 = vld [vmem:[%s3401_s30 + $0x2a4] sm:$0xf]  ;;  %v2560_v57 = vld [vmem:[%s3401_s30 + $0x328] sm:$0xf]  ;;  %v2424_v61 = vld [vmem:[%s3401_s30 + $0x220] sm:$0xf] }
  0xf8   : > { %1663 = vmatpush.bf16.msrb.mxu3 %v2481_v21  ;;  %1637 = vmatpush.bf16.msra.mxu0 %v2349_v24  ;;  %v2914_v21 = vld [vmem:[%s3401_s30 + $0x3a4] sm:$0xf]  ;;  %v2673_v24 = vor.u32 %v2937_v10, %v2672_v9  ;;  %v2907_v58 = vld [vmem:[%s3401_s30 + $0x364] sm:$0xf0]  ;;  %v2874_v62 = vld [vmem:[%s3401_s30 + $0x25c] sm:$0xf0] }
  0xf9   : > { %v2621_v31 = vor.u32 %v2914_v21, %v2618_v22  ;;  %v2490_v52 = vld [vmem:[%s3401_s30 + $0x2e0] sm:$0xf0]  ;;  %v2561_v2 = vor.u32 %v2907_v58, %v2560_v57  ;;  %v2915_v6 = vld [vmem:[%s3401_s30 + $0x3ac] sm:$0xf]  ;;  %v2496_v9 = vld [vmem:[%s3401_s30 + $0x2a8] sm:$0xf] }
  0xfa   : > { %1609 = vmatpush.bf16.msra.mxu2 %v2345_v28  ;;  %v2161_v28 = vor.u32 %v2809_v17, %v2160_v15  ;;  %v2946_v54 = vld [vmem:[%s3401_s30 + $0x4a4] sm:$0xf]  ;;  %v2891_v10 = vld [vmem:[%s3401_s30 + $0x2e4] sm:$0xf0]  ;;  %v2360_v12 = vld [vmem:[%s3401_s30 + $0x1a0] sm:$0xf] }
  0xfb   : > { %1691 = vmatpush.bf16.msrb.mxu1 %v2485_v48  ;;  %v2890_v48 = vld [vmem:[%s3401_s30 + $0x2dc] sm:$0xf0]  ;;  %v2746_v55 = vld [vmem:[%s3401_s30 + $0x4e0] sm:$0xf0]  ;;  %v2497_v18 = vor.u32 %v2891_v10, %v2496_v9  ;;  %v2899_v19 = vld [vmem:[%s3401_s30 + $0x32c] sm:$0xf] }
  0xfc   : > { %1664 = vmatpush.bf16.msrb.mxu3 %v2417_v34  ;;  %1638 = vmatpush.bf16.msra.mxu0 %v2285_v36  ;;  %v2906_v34 = vld [vmem:[%s3401_s30 + $0x35c] sm:$0xf0]  ;;  %v2226_v36 = vld [vmem:[%s3401_s30 + $0xd8] sm:$0xf0]  ;;  %v2489_v56 = vor.u32 %v2890_v48, %v2488_v47  ;;  %v2426_v1 = vld [vmem:[%s3401_s30 + $0x260] sm:$0xf0] }
  0xfd   : > { %v2553_v41 = vor.u32 %v2906_v34, %v2552_v33  ;;  %v2229_v44 = vor.u32 %v2817_v32, %v2226_v36  ;;  %v2682_v5 = vld [vmem:[%s3401_s30 + $0x460] sm:$0xf0]  ;;  %v2858_v13 = vld [vmem:[%s3401_s30 + $0x1dc] sm:$0xf0]  ;;  %v2562_v21 = vld [vmem:[%s3401_s30 + $0x368] sm:$0xf0] }
  0xfe   : > { %1610 = vmatpush.bf16.msra.mxu2 %v2281_v40  ;;  %v2938_v40 = vld [vmem:[%s3401_s30 + $0x45c] sm:$0xf0]  ;;  %v2850_v15 = vld [vmem:[%s3401_s30 + $0x1a4] sm:$0xf]  ;;  %v2361_v20 = vor.u32 %v2858_v13, %v2360_v12  ;;  %v2432_v22 = vld [vmem:[%s3401_s30 + $0x228] sm:$0xf] }
  0xff   : > { %1692 = vmatpush.bf16.msrb.mxu1 %v2421_v63  ;;  %v2749_v63 = vor.u32 %v2946_v54, %v2746_v55  ;;  %v2296_v26 = vld [vmem:[%s3401_s30 + $0x120] sm:$0xf]  ;;  %v2883_v32 = vld [vmem:[%s3401_s30 + $0x2ac] sm:$0xf]  ;;  %v2859_v36 = vld [vmem:[%s3401_s30 + $0x1e4] sm:$0xf0] }
 0x100   : > { %1665 = vmatpush.bf16.msrb.mxu3 %v2353_v46  ;;  %1639 = vmatpush.bf16.msra.mxu0 %v2221_v49  ;;  %v2801_v46 = vld [vmem:[%s3401_s30 + $0x1c] sm:$0xf]  ;;  %v2681_v49 = vor.u32 %v2938_v40, %v2680_v39  ;;  %v2842_v27 = vld [vmem:[%s3401_s30 + $0x15c] sm:$0xf0]  ;;  %v2498_v34 = vld [vmem:[%s3401_s30 + $0x2e8] sm:$0xf0] }
 0x101   : > { %v2165_v59 = vor.u32 %v2801_v46, %v2162_v50  ;;  %v2297_v33 = vor.u32 %v2842_v27, %v2296_v26  ;;  %v2232_v38 = vld [vmem:[%s3401_s30 + $0xa0] sm:$0xf]  ;;  %v2818_v40 = vld [vmem:[%s3401_s30 + $0xa4] sm:$0xf]  ;;  %v2434_v46 = vld [vmem:[%s3401_s30 + $0x268] sm:$0xf0] }
 0x102   : > { %1611 = vmatpush.bf16.msra.mxu2 %v2217_v53  ;;  %2779 = vmatmul.msk.bf16.vlgmr.msra.gmra.mxu1 %vm1489_vm0, %v3433_v4  ;;  %v2625_v53 = vor.u32 %v2923_v43, %v2624_v42  ;;  %v2826_v39 = vld [vmem:[%s3401_s30 + $0xdc] sm:$0xf0]  ;;  %v2501_v42 = vor.u32 %v2883_v32, %v2498_v34  ;;  %v2304_v47 = vld [vmem:[%s3401_s30 + $0x128] sm:$0xf]  ;;  %v2851_v58 = vld [vmem:[%s3401_s30 + $0x1ac] sm:$0xf] }
 0x103   : > { %1693 = vmatpush.bf16.msrb.mxu1 %v2357_v16  ;;  %v2362_v16 = vld [vmem:[%s3401_s30 + $0x1e0] sm:$0xf0]  ;;  %v2843_v48 = vld [vmem:[%s3401_s30 + $0x164] sm:$0xf0]  ;;  %v2168_v50 = vld [vmem:[%s3401_s30 + $0x20] sm:$0xf] }
 0x104   : > { %1666 = vmatpush.bf16.msrb.mxu3 %v2289_v60  ;;  %1640 = vmatpush.bf16.msra.mxu0 %v2157_v0  ;;  %v2493_v60 = vor.u32 %v2882_v51, %v2490_v52  ;;  %v2866_v0 = vld [vmem:[%s3401_s30 + $0x224] sm:$0xf]  ;;  %v2810_v51 = vld [vmem:[%s3401_s30 + $0x5c] sm:$0xf0]  ;;  %v2752_v54 = vld [vmem:[%s3401_s30 + $0x4a8] sm:$0xf]  ;;  %v2305_v57 = vor.u32 %v2843_v48, %v2304_v47 }
 0x105   : > { %v2802_v52 = vld [vmem:[%s3401_s30 + $0x24] sm:$0xf]  ;;  %v2955_v55 = vld [vmem:[%s3401_s30 + $0x4e4] sm:$0xf0]  ;;  %v2931_v9 = vld [vmem:[%s3401_s30 + $0x42c] sm:$0xf] }
 0x106   : > { %1612 = vmatpush.bf16.msra.mxu2 %v2153_v3  ;;  %v2930_v3 = vld [vmem:[%s3401_s30 + $0x424] sm:$0xf]  ;;  %v2690_v12 = vld [vmem:[%s3401_s30 + $0x468] sm:$0xf0]  ;;  %v2632_v13 = vld [vmem:[%s3401_s30 + $0x3b0] sm:$0xf] }
 0x107   : > { %1641 = vmatmul.bf16.vlgmr.msra.gmra.mxu0 %v3501_v23  ;;  %1694 = vmatpush.bf16.msrb.mxu1 %v2293_v30  ;;  %v2685_v14 = vor.u32 %v2930_v3, %v2682_v5  ;;  %v2565_v30 = vor.u32 %v2899_v19, %v2562_v21  ;;  %v2688_v3 = vld [vmem:[%s3401_s30 + $0x428] sm:$0xf]  ;;  %v2634_v19 = vld [vmem:[%s3401_s30 + $0x3f0] sm:$0xf0]  ;;  %v2956_v21 = vld [vmem:[%s3401_s30 + $0x4ec] sm:$0xf0] }
 0x108   : > { %1709 = vmatpush.bf16.msrb.mxu0 %v2741_v7  ;;  %1667 = vmatpush.bf16.msrb.mxu3 %v2225_v11  ;;  %v2425_v7 = vor.u32 %v2874_v62, %v2424_v61  ;;  %v2429_v11 = vor.u32 %v2866_v0, %v2426_v1  ;;  %v2169_v61 = vor.u32 %v2810_v51, %v2168_v50  ;;  %v2370_v62 = vld [vmem:[%s3401_s30 + $0x1e8] sm:$0xf0]  ;;  %v2827_v0 = vld [vmem:[%s3401_s30 + $0xe4] sm:$0xf0]  ;;  %v2568_v27 = vld [vmem:[%s3401_s30 + $0x330] sm:$0xf] }
 0x109   : > { %1613 = vmatmul.bf16.vlgmr.msra.gmra.mxu2 %v3501_v23  ;;  %v2939_v5 = vld [vmem:[%s3401_s30 + $0x464] sm:$0xf0]  ;;  %v2373_v10 = vor.u32 %v2851_v58, %v2370_v62  ;;  %v2242_v32 = vld [vmem:[%s3401_s30 + $0xe8] sm:$0xf0]  ;;  %v2570_v34 = vld [vmem:[%s3401_s30 + $0x370] sm:$0xf0] }
 0x10a   : > { %1681 = vmatpush.bf16.msrb.mxu2 %v2737_v8  ;;  %v2626_v8 = vld [vmem:[%s3401_s30 + $0x3e8] sm:$0xf0]  ;;  %v2884_v47 = vld [vmem:[%s3401_s30 + $0x2b4] sm:$0xf] }
 0x10b   : > { %1695 = vmatpush.bf16.msrb.mxu1 %v2229_v44  ;;  %v2629_v17 = vor.u32 %v2915_v6, %v2626_v8  ;;  %v2867_v44 = vld [vmem:[%s3401_s30 + $0x22c] sm:$0xf]  ;;  %v2948_v50 = vld [vmem:[%s3401_s30 + $0x4b4] sm:$0xf] }
 0x10c   : > { %1710 = vmatpush.bf16.msrb.mxu0 %v2677_v25  ;;  %1668 = vmatpush.bf16.msrb.mxu3 %v2161_v28  ;;  %v2365_v25 = vor.u32 %v2850_v15, %v2362_v16  ;;  %v2834_v28 = vld [vmem:[%s3401_s30 + $0x124] sm:$0xf]  ;;  %v2306_v8 = vld [vmem:[%s3401_s30 + $0x168] sm:$0xf0]  ;;  %v2176_v15 = vld [vmem:[%s3401_s30 + $0x28] sm:$0xf] }
 0x10d   : > { %v2811_v16 = vld [vmem:[%s3401_s30 + $0x64] sm:$0xf0]  ;;  %v2762_v51 = vld [vmem:[%s3401_s30 + $0x4f0] sm:$0xf0] }
 0x10e   : > { %1682 = vmatpush.bf16.msrb.mxu2 %v2673_v24  ;;  %v2875_v24 = vld [vmem:[%s3401_s30 + $0x264] sm:$0xf0]  ;;  %v2177_v26 = vor.u32 %v2811_v16, %v2176_v15  ;;  %v2442_v62 = vld [vmem:[%s3401_s30 + $0x270] sm:$0xf0]  ;;  %v2901_v15 = vld [vmem:[%s3401_s30 + $0x33c] sm:$0xf] }
 0x10f   : > { %1669 = vmatmul.bf16.vlgmr.msrb.gmra.mxu3 %v3501_v23  ;;  %1696 = vmatpush.bf16.msrb.mxu1 %v2165_v59  ;;  %v2947_v59 = vld [vmem:[%s3401_s30 + $0x4ac] sm:$0xf] }
 0x110   : > { %1745 = vmatpush.bf16.msra.mxu0 %v2621_v31  ;;  %1737 = vmatpush.bf16.msra.mxu3 %v2745_v35  ;;  %v2433_v31 = vor.u32 %v2875_v24, %v2432_v22  ;;  %v2368_v35 = vld [vmem:[%s3401_s30 + $0x1a8] sm:$0xf]  ;;  %v2693_v22 = vor.u32 %v2931_v9, %v2690_v12  ;;  %v2376_v9 = vld [vmem:[%s3401_s30 + $0x1b0] sm:$0xf]  ;;  %v2378_v12 = vld [vmem:[%s3401_s30 + $0x1f0] sm:$0xf0] }
 0x111   : > { %v2369_v43 = vor.u32 %v2859_v36, %v2368_v35  ;;  %v2696_v35 = vld [vmem:[%s3401_s30 + $0x430] sm:$0xf] }
 0x112   : > { %1717 = vmatpush.bf16.msra.mxu2 %v2617_v29  ;;  %1697 = vmatmul.bf16.vlgmr.msrb.gmra.mxu1 %v3501_v23  ;;  %v2298_v29 = vld [vmem:[%s3401_s30 + $0x160] sm:$0xf0]  ;;  %v2940_v36 = vld [vmem:[%s3401_s30 + $0x46c] sm:$0xf0] }
 0x113   : > { %1765 = vmatpush.bf16.msra.mxu1 %v2749_v63  ;;  %v2301_v37 = vor.u32 %v2834_v28, %v2298_v29  ;;  %v2240_v63 = vld [vmem:[%s3401_s30 + $0xa8] sm:$0xf]  ;;  %v2908_v28 = vld [vmem:[%s3401_s30 + $0x36c] sm:$0xf0] }
 0x114   : > { %1746 = vmatpush.bf16.msra.mxu0 %v2557_v45  ;;  %1738 = vmatpush.bf16.msra.mxu3 %v2681_v49  ;;  %v2233_v45 = vor.u32 %v2826_v39, %v2232_v38  ;;  %v2640_v38 = vld [vmem:[%s3401_s30 + $0x3b8] sm:$0xf] }
 0x115   : > { %v2925_v39 = vld [vmem:[%s3401_s30 + $0x3f4] sm:$0xf0] }
 0x116   : > { %1718 = vmatpush.bf16.msra.mxu2 %v2553_v41  ;;  %v2234_v41 = vld [vmem:[%s3401_s30 + $0xe0] sm:$0xf0]  ;;  %v2641_v48 = vor.u32 %v2925_v39, %v2640_v38 }
 0x117   : > { %1766 = vmatpush.bf16.msra.mxu1 %v2685_v14  ;;  %2781 = vmatmul.msk.bf16.vlgmr.msrb.gmra.mxu0 %vm1489_vm0, %v3433_v4  ;;  %v2237_v49 = vor.u32 %v2818_v40, %v2234_v41  ;;  %v2924_v14 = vld [vmem:[%s3401_s30 + $0x3ec] sm:$0xf0] }
 0x118   : > { %1773 = vmatpush.bf16.msrb.mxu3 %v2625_v53  ;;  %1747 = vmatpush.bf16.msra.mxu0 %v2493_v60  ;;  %v2170_v53 = vld [vmem:[%s3401_s30 + $0x60] sm:$0xf0]  ;;  %v2754_v60 = vld [vmem:[%s3401_s30 + $0x4e8] sm:$0xf0]  ;;  %v2633_v24 = vor.u32 %v2924_v14, %v2632_v13  ;;  %v2504_v41 = vld [vmem:[%s3401_s30 + $0x2b0] sm:$0xf] }
 0x119   : > { %2780 = vmatmul.msk.bf16.vlgmr.msrb.gmra.mxu2 %vm1489_vm0, %v3433_v4  ;;  %v2173_v1 = vor.u32 %v2802_v52, %v2170_v53  ;;  %v2757_v6 = vor.u32 %v2947_v59, %v2754_v60  ;;  %v2576_v53 = vld [vmem:[%s3401_s30 + $0x338] sm:$0xf]  ;;  %v2765_v59 = vor.u32 %v2948_v50, %v2762_v51  ;;  %v2868_v60 = vld [vmem:[%s3401_s30 + $0x234] sm:$0xf] }
 0x11a   : > { %1719 = vmatpush.bf16.msra.mxu2 %v2489_v56  ;;  %v2437_v56 = vor.u32 %v2867_v44, %v2434_v46  ;;  %v2697_v44 = vor.u32 %v2940_v36, %v2696_v35  ;;  %v2178_v46 = vld [vmem:[%s3401_s30 + $0x68] sm:$0xf0]  ;;  %v2828_v35 = vld [vmem:[%s3401_s30 + $0xec] sm:$0xf0]  ;;  %v2820_v36 = vld [vmem:[%s3401_s30 + $0xb4] sm:$0xf] }
 0x11b   : > { %1801 = vmatpush.bf16.msrb.mxu1 %v2629_v17  ;;  %v2916_v17 = vld [vmem:[%s3401_s30 + $0x3b4] sm:$0xf]  ;;  %v2768_v50 = vld [vmem:[%s3401_s30 + $0x4b8] sm:$0xf] }
 0x11c   : > { %1774 = vmatpush.bf16.msrb.mxu3 %v2561_v2  ;;  %1748 = vmatpush.bf16.msra.mxu0 %v2429_v11  ;;  %v2753_v2 = vor.u32 %v2955_v55, %v2752_v54  ;;  %v2241_v11 = vor.u32 %v2827_v0, %v2240_v63  ;;  %v2637_v29 = vor.u32 %v2916_v17, %v2634_v19  ;;  %v2909_v54 = vld [vmem:[%s3401_s30 + $0x374] sm:$0xf0]  ;;  %v2932_v63 = vld [vmem:[%s3401_s30 + $0x434] sm:$0xf]  ;;  %v2578_v17 = vld [vmem:[%s3401_s30 + $0x378] sm:$0xf0] }
 0x11d   : > { %v2698_v0 = vld [vmem:[%s3401_s30 + $0x470] sm:$0xf0]  ;;  %v2877_v19 = vld [vmem:[%s3401_s30 + $0x274] sm:$0xf0] }
 0x11e   : > { %1720 = vmatpush.bf16.msra.mxu2 %v2425_v7  ;;  %v2835_v7 = vld [vmem:[%s3401_s30 + $0x12c] sm:$0xf]  ;;  %v2957_v51 = vld [vmem:[%s3401_s30 + $0x4f4] sm:$0xf0] }
 0x11f   : > { %1802 = vmatpush.bf16.msrb.mxu1 %v2565_v30  ;;  %2782 = vmatmul.msk.bf16.vlgmr.msra.gmra.mxu3 %vm1489_vm0, %v3433_v4 }
 0x120   : > { %1775 = vmatpush.bf16.msrb.mxu3 %v2497_v18  ;;  %1749 = vmatpush.bf16.msra.mxu0 %v2365_v25  ;;  %v2689_v18 = vor.u32 %v2939_v5, %v2688_v3  ;;  %v2309_v25 = vor.u32 %v2835_v7, %v2306_v8  ;;  %v2642_v3 = vld [vmem:[%s3401_s30 + $0x3f8] sm:$0xf0]  ;;  %v2512_v5 = vld [vmem:[%s3401_s30 + $0x2b8] sm:$0xf]  ;;  %v2445_v7 = vor.u32 %v2868_v60, %v2442_v62 }
 0x121   : > { %v2701_v8 = vor.u32 %v2932_v63, %v2698_v0  ;;  %v2829_v60 = vld [vmem:[%s3401_s30 + $0xf4] sm:$0xf0]  ;;  %v2769_v62 = vor.u32 %v2957_v51, %v2768_v50 }
 0x122   : > { %1721 = vmatpush.bf16.msra.mxu2 %v2361_v20  ;;  %2783 = vmatmul.msk.bf16.vlgmr.msra.gmra.mxu1 %vm1489_vm0, %v3433_v4  ;;  %v2760_v20 = vld [vmem:[%s3401_s30 + $0x4b0] sm:$0xf]  ;;  %v2704_v0 = vld [vmem:[%s3401_s30 + $0x438] sm:$0xf] }
 0x123   : > { %1803 = vmatpush.bf16.msrb.mxu1 %v2501_v42  ;;  %v2761_v30 = vor.u32 %v2956_v21, %v2760_v20  ;;  %v2892_v42 = vld [vmem:[%s3401_s30 + $0x2ec] sm:$0xf0] }
 0x124   : > { %1776 = vmatpush.bf16.msrb.mxu3 %v2433_v31  ;;  %1750 = vmatpush.bf16.msra.mxu0 %v2301_v37  ;;  %v2819_v31 = vld [vmem:[%s3401_s30 + $0xac] sm:$0xf]  ;;  %v2569_v37 = vor.u32 %v2908_v28, %v2568_v27  ;;  %v2505_v52 = vor.u32 %v2892_v42, %v2504_v41  ;;  %v2312_v21 = vld [vmem:[%s3401_s30 + $0x130] sm:$0xf]  ;;  %v2885_v28 = vld [vmem:[%s3401_s30 + $0x2bc] sm:$0xf] }
 0x125   : > { %v2245_v40 = vor.u32 %v2819_v31, %v2242_v32  ;;  %v2384_v31 = vld [vmem:[%s3401_s30 + $0x1b8] sm:$0xf]  ;;  %v2450_v42 = vld [vmem:[%s3401_s30 + $0x278] sm:$0xf0] }
 0x126   : > { %1722 = vmatpush.bf16.msra.mxu2 %v2297_v33  ;;  %v2900_v33 = vld [vmem:[%s3401_s30 + $0x334] sm:$0xf]  ;;  %v2861_v32 = vld [vmem:[%s3401_s30 + $0x1f4] sm:$0xf0] }
 0x127   : > { %1804 = vmatpush.bf16.msrb.mxu1 %v2437_v56  ;;  %v2440_v56 = vld [vmem:[%s3401_s30 + $0x230] sm:$0xf]  ;;  %v2385_v39 = vor.u32 %v2861_v32, %v2384_v31 }
 0x128   : > { %1777 = vmatpush.bf16.msrb.mxu3 %v2369_v43  ;;  %1751 = vmatpush.bf16.msra.mxu0 %v2237_v49  ;;  %v2573_v43 = vor.u32 %v2900_v33, %v2570_v34  ;;  %v2506_v49 = vld [vmem:[%s3401_s30 + $0x2f0] sm:$0xf0]  ;;  %v2248_v34 = vld [vmem:[%s3401_s30 + $0xb0] sm:$0xf] }
 0x129   : > { %v2509_v58 = vor.u32 %v2884_v47, %v2506_v49  ;;  %v2249_v41 = vor.u32 %v2828_v35, %v2248_v34  ;;  %v2812_v47 = vld [vmem:[%s3401_s30 + $0x6c] sm:$0xf0]  ;;  %v2186_v49 = vld [vmem:[%s3401_s30 + $0x70] sm:$0xf0] }
 0x12a   : > { %1723 = vmatpush.bf16.msra.mxu2 %v2233_v45  ;;  %v2803_v45 = vld [vmem:[%s3401_s30 + $0x2c] sm:$0xf] }
 0x12b   : > { %1805 = vmatpush.bf16.msrb.mxu1 %v2373_v10  ;;  %v2181_v55 = vor.u32 %v2803_v45, %v2178_v46  ;;  %v2860_v10 = vld [vmem:[%s3401_s30 + $0x1ec] sm:$0xf0] }
 0x12c   : > { %1778 = vmatpush.bf16.msrb.mxu3 %v2305_v57  ;;  %1752 = vmatpush.bf16.msra.mxu0 %v2173_v1  ;;  %v2876_v57 = vld [vmem:[%s3401_s30 + $0x26c] sm:$0xf0]  ;;  %v2377_v16 = vor.u32 %v2860_v10, %v2376_v9  ;;  %v2192_v9 = vld [vmem:[%s3401_s30 + $0x38] sm:$0xf] }
 0x12d   : > { %v2441_v1 = vor.u32 %v2876_v57, %v2440_v56  ;;  %v2184_v46 = vld [vmem:[%s3401_s30 + $0x30] sm:$0xf]  ;;  %v2770_v56 = vld [vmem:[%s3401_s30 + $0x4f8] sm:$0xf0]  ;;  %v2813_v10 = vld [vmem:[%s3401_s30 + $0x74] sm:$0xf0] }
 0x12e   : > { %1724 = vmatpush.bf16.msra.mxu2 %v2169_v61  ;;  %v2577_v61 = vor.u32 %v2909_v54, %v2576_v53  ;;  %v2853_v54 = vld [vmem:[%s3401_s30 + $0x1bc] sm:$0xf]  ;;  %v2185_v57 = vor.u32 %v2812_v47, %v2184_v46 }
 0x12f   : > { %1753 = vmatmul.bf16.vlgmr.msra.gmra.mxu0 %v3501_v23  ;;  %1806 = vmatpush.bf16.msrb.mxu1 %v2309_v25  ;;  %v2314_v25 = vld [vmem:[%s3401_s30 + $0x170] sm:$0xf0] }
 0x130   : > { %1821 = vmatpush.bf16.msrb.mxu0 %v2757_v6  ;;  %1779 = vmatpush.bf16.msrb.mxu3 %v2241_v11  ;;  %v2893_v6 = vld [vmem:[%s3401_s30 + $0x2f4] sm:$0xf0]  ;;  %v2852_v11 = vld [vmem:[%s3401_s30 + $0x1b4] sm:$0xf] }
 0x131   : > { %1725 = vmatmul.bf16.vlgmr.msra.gmra.mxu2 %v3501_v23  ;;  %v2513_v14 = vor.u32 %v2893_v6, %v2512_v5  ;;  %v2381_v20 = vor.u32 %v2852_v11, %v2378_v12  ;;  %v2837_v5 = vld [vmem:[%s3401_s30 + $0x13c] sm:$0xf] }
 0x132   : > { %1793 = vmatpush.bf16.msrb.mxu2 %v2753_v2  ;;  %v2917_v2 = vld [vmem:[%s3401_s30 + $0x3bc] sm:$0xf] }
 0x133   : > { %1807 = vmatpush.bf16.msrb.mxu1 %v2245_v40  ;;  %v2645_v13 = vor.u32 %v2917_v2, %v2642_v3  ;;  %v2869_v40 = vld [vmem:[%s3401_s30 + $0x23c] sm:$0xf] }
 0x134   : > { %1822 = vmatpush.bf16.msrb.mxu0 %v2693_v22  ;;  %1780 = vmatpush.bf16.msrb.mxu3 %v2177_v26  ;;  %v2844_v22 = vld [vmem:[%s3401_s30 + $0x16c] sm:$0xf0]  ;;  %v2581_v26 = vor.u32 %v2901_v15, %v2578_v17  ;;  %v2933_v6 = vld [vmem:[%s3401_s30 + $0x43c] sm:$0xf] }
 0x135   : > { %v2821_v15 = vld [vmem:[%s3401_s30 + $0xbc] sm:$0xf] }
 0x136   : > { %1794 = vmatpush.bf16.msrb.mxu2 %v2689_v18  ;;  %v2448_v18 = vld [vmem:[%s3401_s30 + $0x238] sm:$0xf] }
 0x137   : > { %1781 = vmatmul.bf16.vlgmr.msrb.gmra.mxu3 %v3501_v23  ;;  %1808 = vmatpush.bf16.msrb.mxu1 %v2181_v55  ;;  %v2449_v27 = vor.u32 %v2877_v19, %v2448_v18  ;;  %v2949_v55 = vld [vmem:[%s3401_s30 + $0x4bc] sm:$0xf] }
 0x138   : > { %1857 = vmatpush.bf16.msra.mxu0 %v2637_v29  ;;  %1849 = vmatpush.bf16.msra.mxu3 %v2761_v30  ;;  %v2313_v29 = vor.u32 %v2844_v22, %v2312_v21  ;;  %v2514_v30 = vld [vmem:[%s3401_s30 + $0x2f8] sm:$0xf0]  ;;  %v2773_v63 = vor.u32 %v2949_v55, %v2770_v56 }
 0x139   : > { %v2517_v38 = vor.u32 %v2885_v28, %v2514_v30  ;;  %v2805_v19 = vld [vmem:[%s3401_s30 + $0x3c] sm:$0xf] }
 0x13a   : > { %1829 = vmatpush.bf16.msra.mxu2 %v2633_v24  ;;  %1809 = vmatmul.bf16.vlgmr.msrb.gmra.mxu1 %v3501_v23  ;;  %v2836_v24 = vld [vmem:[%s3401_s30 + $0x134] sm:$0xf] }
 0x13b   : > { %1877 = vmatpush.bf16.msra.mxu1 %v2765_v59  ;;  %v2317_v33 = vor.u32 %v2836_v24, %v2314_v25  ;;  %v2256_v59 = vld [vmem:[%s3401_s30 + $0xb8] sm:$0xf] }
 0x13c   : > { %1858 = vmatpush.bf16.msra.mxu0 %v2573_v43  ;;  %1850 = vmatpush.bf16.msra.mxu3 %v2697_v44  ;;  %v2320_v43 = vld [vmem:[%s3401_s30 + $0x138] sm:$0xf]  ;;  %v2257_v3 = vor.u32 %v2829_v60, %v2256_v59 }
 0x13d   : > { %v2845_v44 = vld [vmem:[%s3401_s30 + $0x174] sm:$0xf0] }
 0x13e   : > { %1830 = vmatpush.bf16.msra.mxu2 %v2569_v37  ;;  %v2250_v37 = vld [vmem:[%s3401_s30 + $0xf0] sm:$0xf0]  ;;  %v2321_v53 = vor.u32 %v2845_v44, %v2320_v43 }
 0x13f   : > { %1878 = vmatpush.bf16.msra.mxu1 %v2701_v8  ;;  %2785 = vmatmul.msk.bf16.vlgmr.msrb.gmra.mxu0 %vm1489_vm0, %v3433_v4  ;;  %v2253_v45 = vor.u32 %v2820_v36, %v2250_v37  ;;  %v2322_v8 = vld [vmem:[%s3401_s30 + $0x178] sm:$0xf0] }
 0x140   : > { %1885 = vmatpush.bf16.msrb.mxu3 %v2641_v48  ;;  %1859 = vmatpush.bf16.msra.mxu0 %v2509_v58  ;;  %v2804_v48 = vld [vmem:[%s3401_s30 + $0x34] sm:$0xf]  ;;  %v2386_v58 = vld [vmem:[%s3401_s30 + $0x1f8] sm:$0xf0] }
 0x141   : > { %2784 = vmatmul.msk.bf16.vlgmr.msrb.gmra.mxu2 %vm1489_vm0, %v3433_v4  ;;  %v2389_v2 = vor.u32 %v2853_v54, %v2386_v58 }
 0x142   : > { %1831 = vmatpush.bf16.msra.mxu2 %v2505_v52  ;;  %v2453_v52 = vor.u32 %v2869_v40, %v2450_v42 }
 0x143   : > { %1913 = vmatpush.bf16.msrb.mxu1 %v2645_v13  ;;  %v2325_v13 = vor.u32 %v2837_v5, %v2322_v8 }
 0x144   : > { %1886 = vmatpush.bf16.msrb.mxu3 %v2577_v61  ;;  %1860 = vmatpush.bf16.msra.mxu0 %v2445_v7  ;;  %v2189_v61 = vor.u32 %v2804_v48, %v2186_v49  ;;  %v2706_v7 = vld [vmem:[%s3401_s30 + $0x478] sm:$0xf0] }
 0x145   : > { %v2709_v12 = vor.u32 %v2933_v6, %v2706_v7 }
 0x146   : > { %1832 = vmatpush.bf16.msra.mxu2 %v2441_v1  ;;  %v2941_v1 = vld [vmem:[%s3401_s30 + $0x474] sm:$0xf0] }
 0x147   : > { %1914 = vmatpush.bf16.msrb.mxu1 %v2581_v26  ;;  %2786 = vmatmul.msk.bf16.vlgmr.msra.gmra.mxu3 %vm1489_vm0, %v3433_v4  ;;  %v2705_v11 = vor.u32 %v2941_v1, %v2704_v0 }
 0x148   : > { %1887 = vmatpush.bf16.msrb.mxu3 %v2513_v14  ;;  %1861 = vmatpush.bf16.msra.mxu0 %v2381_v20  ;;  %v2193_v14 = vor.u32 %v2813_v10, %v2192_v9  ;;  %v2194_v20 = vld [vmem:[%s3401_s30 + $0x78] sm:$0xf0] }
 0x149   : > { %v2197_v21 = vor.u32 %v2805_v19, %v2194_v20 }
 0x14a   : > { %1833 = vmatpush.bf16.msra.mxu2 %v2377_v16  ;;  %2787 = vmatmul.msk.bf16.vlgmr.msra.gmra.mxu1 %vm1489_vm0, %v3433_v4  ;;  %v2258_v16 = vld [vmem:[%s3401_s30 + $0xf8] sm:$0xf0]  ;;  %v1544_v18 = vpop.f32.mrf.mxu3 }
 0x14b   : > { %1915 = vmatpush.bf16.msrb.mxu1 %v2517_v38  ;;  %v2261_v17 = vor.u32 %v2821_v15, %v2258_v16 }
 0x14c   : > { %1888 = vmatpush.bf16.msrb.mxu3 %v2449_v27  ;;  %1862 = vmatpush.bf16.msra.mxu0 %v2317_v33  ;;  %v1516_v24 = vpop.f32.mrf.mxu2 }
 0x14e   : > { %1834 = vmatpush.bf16.msra.mxu2 %v2313_v29  ;;  %v3793_v29 = vpop.permute.xlu0 %672 }
 0x14f   : > { %1916 = vmatpush.bf16.msrb.mxu1 %v2453_v52 }
 0x150   : > { %1889 = vmatpush.bf16.msrb.mxu3 %v2385_v39  ;;  %1863 = vmatpush.bf16.msra.mxu0 %v2253_v45 }
 0x152   : > { %1835 = vmatpush.bf16.msra.mxu2 %v2249_v41  ;;  %v1546_v22 = vpop.f32.mrf.mxu3 }
 0x153   : > { %1917 = vmatpush.bf16.msrb.mxu1 %v2389_v2 }
 0x154   : > { %1890 = vmatpush.bf16.msrb.mxu3 %v2321_v53  ;;  %1864 = vmatpush.bf16.msra.mxu0 %v2189_v61  ;;  %v1518_v28 = vpop.f32.mrf.mxu2 }
 0x156   : > { %1836 = vmatpush.bf16.msra.mxu2 %v2185_v57  ;;  %v3797_v36 = vpop.permute.xlu0 %677 }
 0x157   : > { %1865 = vmatmul.bf16.vlgmr.msra.gmra.mxu0 %v3501_v23  ;;  %1918 = vmatpush.bf16.msrb.mxu1 %v2325_v13 }
 0x158   : > { %1933 = vmatpush.bf16.msrb.mxu0 %v2773_v63  ;;  %1891 = vmatpush.bf16.msrb.mxu3 %v2257_v3 }
 0x159   : > { %1837 = vmatmul.bf16.vlgmr.msra.gmra.mxu2 %v3501_v23 }
 0x15a   : > { %1905 = vmatpush.bf16.msrb.mxu2 %v2769_v62  ;;  %v1572_v26 = vpop.f32.mrf.mxu3 }
 0x15b   : > { %1919 = vmatpush.bf16.msrb.mxu1 %v2261_v17 }
 0x15c   : > { %1934 = vmatpush.bf16.msrb.mxu0 %v2709_v12  ;;  %1892 = vmatpush.bf16.msrb.mxu3 %v2193_v14  ;;  %v1502_v25 = vpop.f32.mrf.mxu0 }
 0x15d   : > { %v1503_v32 = vadd.f32 %v1502_v25, %v3793_v29 }
 0x15e   : > { %1906 = vmatpush.bf16.msrb.mxu2 %v2705_v11 }
 0x15f   : > { %1893 = vmatmul.bf16.vlgmr.msrb.gmra.mxu3 %v3501_v23  ;;  %1920 = vmatpush.bf16.msrb.mxu1 %v2197_v21  ;;  %v1558_v27 = vpop.f32.mrf.mxu1 }
 0x160   : > { %v1559_v37 = vadd.f32 %v1558_v27, %v3793_v29 }
 0x162   : > { %1921 = vmatmul.bf16.vlgmr.msrb.gmra.mxu1 %v3501_v23  ;;  %v1574_v31 = vpop.f32.mrf.mxu3  ;;  %v1517_v23 = vadd.f32 %v1516_v24, %v1503_v32  ;;  %v1573_v44 = vadd.f32 %v1572_v26, %v1559_v37 }
 0x164   : > { %v1504_v30 = vpop.f32.mrf.mxu0  ;;  %v1941_v39 = vmax.f32 %v1517_v23, 0.0  ;;  %v1943_v51 = vmax.f32 %v1573_v44, 0.0 }
 0x165   : > { %v1505_v40 = vadd.f32 %v1504_v30, %v3797_v36 }
 0x167   : > { %2789 = vmatmul.msk.bf16.vlgmr.msrb.gmra.mxu0 %vm1489_vm0, %v3433_v4  ;;  %v1560_v33 = vpop.f32.mrf.mxu1  ;;  %v1519_v48 = vadd.f32 %v1518_v28, %v1505_v40 }
 0x168   : > { %v1561_v52 = vadd.f32 %v1560_v33, %v3797_v36 }
 0x169   : > { %2788 = vmatmul.msk.bf16.vlgmr.msrb.gmra.mxu2 %vm1489_vm0, %v3433_v4  ;;  %v1957_v55 = vmax.f32 %v1519_v48, 0.0 }
 0x16a   : > { %v1575_v61 = vadd.f32 %v1574_v31, %v1561_v52 }
 0x16c   : > { %v1530_v34 = vpop.f32.mrf.mxu2  ;;  %v1600_v38 = vpop.f32.mrf.mxu0  ;;  %v1959_v1 = vmax.f32 %v1575_v61, 0.0 }
 0x16d   : > { %v1531_v35 = vadd.f32 %v1530_v34, %v3793_v29 }
 0x16f   : > { %v1545_v4 = vadd.f32 %v1544_v18, %v1531_v35  ;;  %v1628_v43 = vpop.f32.mrf.mxu1 }
 0x171   : > { %v1942_v41 = vmax.f32 %v1545_v4, 0.0 }
 0x172   : > { %v1586_v42 = vpop.f32.mrf.mxu3 }
 0x173   : > { %v1973_v45 = vpack.c.bf16 %v1942_v41, %v1941_v39  ;;  %v1587_v46 = vadd.f32 %v1586_v42, %v3793_v29 }
 0x174   : > { %v1532_v47 = vpop.f32.mrf.mxu2  ;;  %v1602_v58 = vpop.f32.mrf.mxu0 }
 0x175   : > { %1989 = vst [vmem:[%s3804_s24] sm:$0xff] %v1973_v45  ;;  %v1601_v49 = vadd.f32 %v1600_v38, %v1587_v46  ;;  %v1533_v50 = vadd.f32 %v1532_v47, %v3797_v36 }
 0x177   : > { %v1944_v53 = vmax.f32 %v1601_v49, 0.0  ;;  %v1547_v54 = vadd.f32 %v1546_v22, %v1533_v50  ;;  %v1630_v60 = vpop.f32.mrf.mxu1 }
 0x179   : > { %v1974_v56 = vpack.c.bf16 %v1944_v53, %v1943_v51  ;;  %v1958_v57 = vmax.f32 %v1547_v54, 0.0 }
 0x17a   : > { %v1588_v59 = vpop.f32.mrf.mxu3 }
 0x17b   : > { %1990 = vst [vmem:[%s3804_s24 + $0x8] sm:$0xff] %v1974_v56  ;;  %v1981_v62 = vpack.c.bf16 %v1958_v57, %v1957_v55  ;;  %v1589_v63 = vadd.f32 %v1588_v59, %v3797_v36 }
 0x17d   : > { %1997 = vst [vmem:[%s3804_s24 + $0x40] sm:$0xff] %v1981_v62  ;;  %v1603_v0 = vadd.f32 %v1602_v58, %v1589_v63 }
 0x17f   : > { %v1960_v2 = vmax.f32 %v1603_v0, 0.0  ;;  %v1656_v5 = vpop.f32.mrf.mxu1 }
 0x181   : > { %v1982_v3 = vpack.c.bf16 %v1960_v2, %v1959_v1 }
 0x183   : > { %1998 = vst [vmem:[%s3804_s24 + $0x48] sm:$0xff] %v1982_v3 }
 0x184   : > { %v1642_v6 = vpop.f32.mrf.mxu0 }
 0x185   : > { %v1643_v7 = vadd.f32 %v1642_v6, %v3793_v29 }
 0x187   : > { %v1657_v8 = vadd.f32 %v1656_v5, %v1643_v7  ;;  %v1658_v11 = vpop.f32.mrf.mxu1 }
 0x189   : > { %v1946_v12 = vmax.f32 %v1657_v8, 0.0 }
 0x18c   : > { %v1614_v9 = vpop.f32.mrf.mxu2  ;;  %v1644_v14 = vpop.f32.mrf.mxu0 }
 0x18d   : > { %v1615_v10 = vadd.f32 %v1614_v9, %v3793_v29  ;;  %v1645_v16 = vadd.f32 %v1644_v14, %v3797_v36 }
 0x18f   : > { %v1629_v13 = vadd.f32 %v1628_v43, %v1615_v10  ;;  %v1659_v20 = vadd.f32 %v1658_v11, %v1645_v16  ;;  %v1698_v22 = vpop.f32.mrf.mxu1 }
 0x190   : > { %v1699_v24 = vadd.f32 %v1698_v22, %v3793_v29 }
 0x191   : > { %v1945_v15 = vmax.f32 %v1629_v13, 0.0  ;;  %v1962_v27 = vmax.f32 %v1659_v20, 0.0 }
 0x192   : > { %v1670_v17 = vpop.f32.mrf.mxu3 }
 0x193   : > { %v1975_v18 = vpack.c.bf16 %v1946_v12, %v1945_v15  ;;  %v1671_v30 = vadd.f32 %v1670_v17, %v3793_v29 }
 0x194   : > { %v1616_v19 = vpop.f32.mrf.mxu2  ;;  %v1712_v26 = vpop.f32.mrf.mxu0 }
 0x195   : > { %1991 = vst [vmem:[%s3804_s24 + $0x10] sm:$0xff] %v1975_v18  ;;  %v1617_v21 = vadd.f32 %v1616_v19, %v3797_v36  ;;  %v1713_v31 = vadd.f32 %v1712_v26, %v1699_v24 }
 0x197   : > { %v1631_v25 = vadd.f32 %v1630_v60, %v1617_v21  ;;  %v1948_v23 = vmax.f32 %v1713_v31, 0.0  ;;  %v1700_v37 = vpop.f32.mrf.mxu1 }
 0x198   : > { %v1701_v38 = vadd.f32 %v1700_v37, %v3797_v36 }
 0x199   : > { %v1961_v28 = vmax.f32 %v1631_v25, 0.0 }
 0x19a   : > { %v1672_v32 = vpop.f32.mrf.mxu3 }
 0x19b   : > { %v1983_v33 = vpack.c.bf16 %v1962_v27, %v1961_v28  ;;  %v1673_v41 = vadd.f32 %v1672_v32, %v3797_v36 }
 0x19c   : > { %v1684_v34 = vpop.f32.mrf.mxu2  ;;  %v1714_v39 = vpop.f32.mrf.mxu0 }
 0x19d   : > { %1999 = vst [vmem:[%s3804_s24 + $0x50] sm:$0xff] %v1983_v33  ;;  %v1685_v35 = vadd.f32 %v1684_v34, %v1671_v30  ;;  %v1715_v42 = vadd.f32 %v1714_v39, %v1701_v38 }
 0x19f   : > { %v1947_v4 = vmax.f32 %v1685_v35, 0.0  ;;  %v1768_v46 = vpop.f32.mrf.mxu1  ;;  %v1964_v47 = vmax.f32 %v1715_v42, 0.0 }
 0x1a1   : > { %v1976_v40 = vpack.c.bf16 %v1948_v23, %v1947_v4 }
 0x1a2   : > { %v1740_v43 = vpop.f32.mrf.mxu3 }
 0x1a3   : > { %1992 = vst [vmem:[%s3804_s24 + $0x18] sm:$0xff] %v1976_v40 }
 0x1a4   : > { %v1686_v44 = vpop.f32.mrf.mxu2 }
 0x1a5   : > { %v1687_v45 = vadd.f32 %v1686_v44, %v1673_v41 }
 0x1a7   : > { %v1963_v48 = vmax.f32 %v1687_v45, 0.0  ;;  %v1770_v53 = vpop.f32.mrf.mxu1 }
 0x1a9   : > { %v1984_v49 = vpack.c.bf16 %v1964_v47, %v1963_v48 }
 0x1aa   : > { %v1742_v51 = vpop.f32.mrf.mxu3 }
 0x1ab   : > { %2000 = vst [vmem:[%s3804_s24 + $0x58] sm:$0xff] %v1984_v49 }
 0x1ac   : > { %v1754_v50 = vpop.f32.mrf.mxu0 }
 0x1ad   : > { %v1755_v52 = vadd.f32 %v1754_v50, %v3793_v29 }
 0x1af   : > { %v1769_v55 = vadd.f32 %v1768_v46, %v1755_v52 }
 0x1b1   : > { %v1950_v59 = vmax.f32 %v1769_v55, 0.0 }
 0x1b4   : > { %v1726_v54 = vpop.f32.mrf.mxu2  ;;  %v1756_v57 = vpop.f32.mrf.mxu0 }
 0x1b5   : > { %v1727_v56 = vadd.f32 %v1726_v54, %v3793_v29  ;;  %v1757_v61 = vadd.f32 %v1756_v57, %v3797_v36 }
 0x1b7   : > { %v1741_v58 = vadd.f32 %v1740_v43, %v1727_v56  ;;  %v1810_v1 = vpop.f32.mrf.mxu1  ;;  %v1771_v2 = vadd.f32 %v1770_v53, %v1757_v61 }
 0x1b8   : > { %v1811_v5 = vadd.f32 %v1810_v1, %v3793_v29 }
 0x1b9   : > { %v1949_v60 = vmax.f32 %v1741_v58, 0.0  ;;  %v1966_v8 = vmax.f32 %v1771_v2, 0.0 }
 0x1ba   : > { %v1782_v62 = vpop.f32.mrf.mxu3 }
 0x1bb   : > { %v1977_v63 = vpack.c.bf16 %v1950_v59, %v1949_v60  ;;  %v1783_v10 = vadd.f32 %v1782_v62, %v3793_v29 }
 0x1bc   : > { %v1728_v0 = vpop.f32.mrf.mxu2  ;;  %v1824_v7 = vpop.f32.mrf.mxu0 }
 0x1bd   : > { %1993 = vst [vmem:[%s3804_s24 + $0x20] sm:$0xff] %v1977_v63  ;;  %v1729_v3 = vadd.f32 %v1728_v0, %v3797_v36  ;;  %v1825_v11 = vadd.f32 %v1824_v7, %v1811_v5 }
 0x1bf   : > { %v1743_v6 = vadd.f32 %v1742_v51, %v1729_v3  ;;  %v1812_v14 = vpop.f32.mrf.mxu1  ;;  %v1952_v16 = vmax.f32 %v1825_v11, 0.0  ;;  %v2031_v11 = vld [vmem:[%s3804_s24 + $0x10] sm:$0xff] (%p3062_p5) }
 0x1c0   : > { %v1813_v19 = vadd.f32 %v1812_v14, %v3797_v36  ;;  %2032 = vst [vmem:[%s2014_s20 + $0x10] sm:$0xff] (%p3062_p5), %v2031_v11 }
 0x1c1   : > { %v1965_v9 = vmax.f32 %v1743_v6, 0.0 }
 0x1c2   : > { %v1784_v12 = vpop.f32.mrf.mxu3 }
 0x1c3   : > { %v1985_v13 = vpack.c.bf16 %v1966_v8, %v1965_v9  ;;  %v1785_v22 = vadd.f32 %v1784_v12, %v3797_v36  ;;  %v2033_v12 = vld [vmem:[%s3804_s24 + $0x18] sm:$0xff] (%p3062_p5) }
 0x1c4   : > { %v1796_v15 = vpop.f32.mrf.mxu2  ;;  %v1826_v20 = vpop.f32.mrf.mxu0  ;;  %2034 = vst [vmem:[%s2014_s20 + $0x18] sm:$0xff] (%p3062_p5), %v2033_v12 }
 0x1c5   : > { %2001 = vst [vmem:[%s3804_s24 + $0x60] sm:$0xff] %v1985_v13  ;;  %v1797_v17 = vadd.f32 %v1796_v15, %v1783_v10  ;;  %v1827_v24 = vadd.f32 %v1826_v20, %v1813_v19  ;;  %v2029_v10 = vld [vmem:[%s3804_s24 + $0x8] sm:$0xff] (%p3062_p5)  ;;  %v2035_v13 = vld [vmem:[%s3804_s24 + $0x20] sm:$0xff] (%p3062_p5)  ;;  %v2047_v19 = vld [vmem:[%s3804_s24 + $0x50] sm:$0xff] (%p3062_p5) }
 0x1c6   : > { %2030 = vst [vmem:[%s2014_s20 + $0x8] sm:$0xff] (%p3062_p5), %v2029_v10  ;;  %v2049_v20 = vld [vmem:[%s3804_s24 + $0x58] sm:$0xff] (%p3062_p5) }
 0x1c7   : > { %v1951_v18 = vmax.f32 %v1797_v17, 0.0  ;;  %v1880_v27 = vpop.f32.mrf.mxu1  ;;  %v1968_v30 = vmax.f32 %v1827_v24, 0.0  ;;  %2036 = vst [vmem:[%s2014_s20 + $0x20] sm:$0xff] (%p3062_p5), %v2035_v13  ;;  %v2043_v17 = vld [vmem:[%s3804_s24 + $0x40] sm:$0xff] (%p3062_p5) }
 0x1c8   : > { %2044 = vst [vmem:[%s2014_s20 + $0x300] sm:$0xff] (%p3062_p5), %v2043_v17 }
 0x1c9   : > { %v1978_v21 = vpack.c.bf16 %v1952_v16, %v1951_v18  ;;  %v2045_v18 = vld [vmem:[%s3804_s24 + $0x48] sm:$0xff] (%p3062_p5)  ;;  %2048 = vst [vmem:[%s2014_s20 + $0x310] sm:$0xff] (%p3062_p5), %v2047_v19 }
 0x1ca   : > { %v1852_v25 = vpop.f32.mrf.mxu3  ;;  %2046 = vst [vmem:[%s2014_s20 + $0x308] sm:$0xff] (%p3062_p5), %v2045_v18 }
 0x1cb   : > { %1994 = vst [vmem:[%s3804_s24 + $0x28] sm:$0xff] %v1978_v21 }
 0x1cc   : > { %v1798_v26 = vpop.f32.mrf.mxu2  ;;  %v2051_v21 = vld [vmem:[%s3804_s24 + $0x60] sm:$0xff] (%p3062_p5)  ;;  %2050 = vst [vmem:[%s2014_s20 + $0x318] sm:$0xff] (%p3062_p5), %v2049_v20 }
 0x1cd   : > { %v1799_v28 = vadd.f32 %v1798_v26, %v1785_v22  ;;  %2052 = vst [vmem:[%s2014_s20 + $0x320] sm:$0xff] (%p3062_p5), %v2051_v21 }
 0x1cf   : > { %v1967_v31 = vmax.f32 %v1799_v28, 0.0  ;;  %v1882_v23 = vpop.f32.mrf.mxu1 }
 0x1d1   : > { %v1986_v33 = vpack.c.bf16 %v1968_v30, %v1967_v31 }
 0x1d2   : > { %v1854_v35 = vpop.f32.mrf.mxu3  ;;  %v2037_v14 = vld [vmem:[%s3804_s24 + $0x28] sm:$0xff] (%p3062_p5) }
 0x1d3   : > { %2002 = vst [vmem:[%s3804_s24 + $0x68] sm:$0xff] %v1986_v33 }
 0x1d4   : > { %v1866_v32 = vpop.f32.mrf.mxu0  ;;  %2038 = vst [vmem:[%s2014_s20 + $0x28] sm:$0xff] (%p3062_p5), %v2037_v14 }
 0x1d5   : > { %v1867_v34 = vadd.f32 %v1866_v32, %v3793_v29 }
 0x1d7   : > { %v1881_v4 = vadd.f32 %v1880_v27, %v1867_v34 }
 0x1d9   : > { %v1954_v41 = vmax.f32 %v1881_v4, 0.0 }
 0x1da   : > { %v2053_v22 = vld [vmem:[%s3804_s24 + $0x68] sm:$0xff] (%p3062_p5) }
 0x1db   : > { %2054 = vst [vmem:[%s2014_s20 + $0x328] sm:$0xff] (%p3062_p5), %v2053_v22 }
 0x1dc   : > { %v1838_v37 = vpop.f32.mrf.mxu2  ;;  %v1868_v39 = vpop.f32.mrf.mxu0 }
 0x1dd   : > { %v1839_v38 = vadd.f32 %v1838_v37, %v3793_v29  ;;  %v1869_v43 = vadd.f32 %v1868_v39, %v3797_v36 }
 0x1df   : > { %v1853_v40 = vadd.f32 %v1852_v25, %v1839_v38  ;;  %v1922_v45 = vpop.f32.mrf.mxu1  ;;  %v1883_v47 = vadd.f32 %v1882_v23, %v1869_v43 }
 0x1e0   : > { %v1923_v48 = vadd.f32 %v1922_v45, %v3793_v29 }
 0x1e1   : > { %v1953_v42 = vmax.f32 %v1853_v40, 0.0  ;;  %v1970_v53 = vmax.f32 %v1883_v47, 0.0 }
 0x1e2   : > { %v1894_v50 = vpop.f32.mrf.mxu3 }
 0x1e3   : > { %v1979_v44 = vpack.c.bf16 %v1954_v41, %v1953_v42  ;;  %v1895_v54 = vadd.f32 %v1894_v50, %v3793_v29 }
 0x1e4   : > { %v1840_v46 = vpop.f32.mrf.mxu2  ;;  %v1936_v51 = vpop.f32.mrf.mxu0 }
 0x1e5   : > { %1995 = vst [vmem:[%s3804_s24 + $0x30] sm:$0xff] %v1979_v44  ;;  %v1841_v49 = vadd.f32 %v1840_v46, %v3797_v36  ;;  %v1937_v56 = vadd.f32 %v1936_v51, %v1923_v48 }
 0x1e7   : > { %v1855_v52 = vadd.f32 %v1854_v35, %v1841_v49  ;;  %v1924_v58 = vpop.f32.mrf.mxu1  ;;  %v1956_v60 = vmax.f32 %v1937_v56, 0.0 }
 0x1e8   : > { %v1925_v62 = vadd.f32 %v1924_v58, %v3797_v36 }
 0x1e9   : > { %v1969_v55 = vmax.f32 %v1855_v52, 0.0 }
 0x1ea   : > { %v1896_v0 = vpop.f32.mrf.mxu3 }
 0x1eb   : > { %v1987_v57 = vpack.c.bf16 %v1970_v53, %v1969_v55  ;;  %v1897_v3 = vadd.f32 %v1896_v0, %v3797_v36  ;;  %v2027_v36 = vld [vmem:[%s3804_s24] sm:$0xff] (%p3062_p5) }
 0x1ec   : > { %v1908_v59 = vpop.f32.mrf.mxu2  ;;  %v1938_v1 = vpop.f32.mrf.mxu0  ;;  %2028 = vst [vmem:[%s2014_s20] sm:$0xff] (%p3062_p5), %v2027_v36  ;;  %v2039_v15 = vld [vmem:[%s3804_s24 + $0x30] sm:$0xff] (%p3062_p5) }
 0x1ed   : > { %2003 = vst [vmem:[%s3804_s24 + $0x70] sm:$0xff] %v1987_v57  ;;  %v1909_v61 = vadd.f32 %v1908_v59, %v1895_v54  ;;  %v1939_v5 = vadd.f32 %v1938_v1, %v1925_v62 }
 0x1ee   : > { %2040 = vst [vmem:[%s2014_s20 + $0x30] sm:$0xff] (%p3062_p5), %v2039_v15 }
 0x1ef   : > { %v1955_v63 = vmax.f32 %v1909_v61, 0.0  ;;  %v1972_v7 = vmax.f32 %v1939_v5, 0.0 }
 0x1f1   : > { %v1980_v2 = vpack.c.bf16 %v1956_v60, %v1955_v63 }
 0x1f3   : > { %1996 = vst [vmem:[%s3804_s24 + $0x38] sm:$0xff] %v1980_v2 }
 0x1f4   : > { %v1910_v29 = vpop.f32.mrf.mxu2  ;;  %v2055_v24 = vld [vmem:[%s3804_s24 + $0x70] sm:$0xff] (%p3062_p5) }
 0x1f5   : > { %v1911_v6 = vadd.f32 %v1910_v29, %v1897_v3  ;;  %2056 = vst [vmem:[%s2014_s20 + $0x330] sm:$0xff] (%p3062_p5), %v2055_v24 }
 0x1f7   : > { %v1971_v8 = vmax.f32 %v1911_v6, 0.0  ;;  %2011 = sbr.rel (!%p3062_p5) target bundleno = 516 (0x204), region = 59 }
 0x1f9   : > { %v1988_v9 = vpack.c.bf16 %v1972_v7, %v1971_v8 }
 0x1fa   : > { %v2041_v16 = vld [vmem:[%s3804_s24 + $0x38] sm:$0xff] (%p3062_p5) }
 0x1fb   : > { %2004 = vst [vmem:[%s3804_s24 + $0x78] sm:$0xff] %v1988_v9 }
 0x1fc   : > { %2042 = vst [vmem:[%s2014_s20 + $0x38] sm:$0xff] %v2041_v16 }
 0x202   : > { %v2057_v25 = vld [vmem:[%s3804_s24 + $0x78] sm:$0xff] }
 0x203   : > { %2058 = vst [vmem:[%s2014_s20 + $0x338] sm:$0xff] %v2057_v25 }
 0x204 PF: > { %p10_p10 = scmp.ge.s32.totalorder %s3049_s16, 14   ;;  %s3887_s12 = smov %s3005_s13 }
 0x205   : > { %s3888_s13 = smov %s3060_s19  ;;  %s3889_s14 = smov %s3049_s16 }
 0x206   :  { %12 = sbr.rel (!%p10_p10) target bundleno = 2 (0x2), region = 113 }

// kernel: lenet_forward.8
= control target key start
LH: loop header
LB: loop body
LE: loop exit
PB: predicated region body
PF: predicated region fallthrough
CT: control target
= control target key end

     0   :  { %s5935_s12 = smov 0   ;;  %s7048_s0 = inlined_call_operand.vmem [shape: bf16[2,16,108,108], index: 0, kind: input, shape index: {}]   ;;  %s7049_s1 = inlined_call_operand.vmem [shape: bf16[54,108], index: 1, kind: input, shape index: {}]   ;;  %s7050_s2 = inlined_call_operand.vmem [shape: bf16[108,54], index: 2, kind: input, shape index: {}]   ;;  %s7051_s3 = inlined_call_operand.vmem [shape: bf16[2,16,54,54], index: 3, kind: output, shape index: {}]  }
   0x1 LB: > { %s4085_s13 = sadd.s32 4294967295, %s5913_s12   ;;  %p4089_p0 = scmp.ge.s32.totalorder %s5913_s12, 1  ;;  %s5913_s12 = sphi %s5935_s12, %s13_s12  }
   0x2   : > { %p137_p1 = scmp.lt.s32.totalorder %s5913_s12, 3 }
   0x4   : > { %p138_p2 = pnand %p4089_p0, %p137_p1 }
   0x5   : > { %p161_p3 = scmp.lt.s32.totalorder (!%p138_p2), %s4085_s13, 1 }
   0x6   : > { %141 = sbr.rel (%p138_p2) target bundleno = 825 (0x339), region = 32 }
   0xb   : > { %s7053_s13 = smov (!%p161_p3, %s4085_s13), 1  ;;  %vm265_vm0 = vcmask 1045504   ;;  %v5625_v27 = vld [vmem:[%s7049_s1] sm:$0xff]  ;;  %vm252_vm1 = vcmask 883712   ;;  %v5626_v37 = vld [vmem:[%s7049_s1 + $0x8] sm:$0xff]  ;;  %v5627_v44 = vld [vmem:[%s7049_s1 + $0x10] sm:$0xff] }
   0xc   : > { %s5897_s14 = smul.u32 896, %s7053_s13  ;;  %v5642_v29 = vld [vmem:[%s7049_s1] sm:$0xff]  ;;  %v5643_v38 = vld [vmem:[%s7049_s1 + $0x8] sm:$0xff]  ;;  %v5644_v45 = vld [vmem:[%s7049_s1 + $0x10] sm:$0xff]  ;;  %vm406_vm2 = vcmask 437248   ;;  %vm413_vm3 = vcmask 436224  }
   0xd   : > { %v178_v53 = vld [vmem:[%s7049_s1 + $0x18] sm:$0x7]  ;;  %s5898_s26 = smul.u32 448, %s7053_s13 }
   0xe   : > { %s5949_s17 = scalar_lea.vmem %s7048_s0, %s5897_s14  ;;  %v421_v56 = vld [vmem:[%s7049_s1 + $0x18] sm:$0x7]  ;;  %v206_v57 = vunpack.c.l.b16 %v178_v53 }
   0xf   : > { %v4130_v0 = vld [vmem:[%s5949_s17 + $0x30] sm:$0xf]  ;;  %v5634_v1 = vld [vmem:[%s5949_s17 + $0x30] sm:$0x30]  ;;  %v4220_v2 = vld [vmem:[%s5949_s17 + $0x68] sm:$0xf]  ;;  %v450_v58 = vunpack.c.l.b16 %v421_v56  ;;  %s6378_s29 = scalar_lea.vmem %s7051_s3, %s5898_s26 }
  0x10   : > { %v4131_v3 = vor.u32 %v5634_v1, %v4130_v0  ;;  %v5651_v4 = vld [vmem:[%s5949_s17 + $0x68] sm:$0x30]  ;;  %v5650_v9 = vld [vmem:[%s5949_s17 + $0x60] sm:$0xff]  ;;  %v5649_v11 = vld [vmem:[%s5949_s17 + $0x58] sm:$0xff]  ;;  %v210_v59 = vpack.c.b16 %v206_v57, %v206_v57 }
  0x11   : > { %v4221_v5 = vor.u32 %v5651_v4, %v4220_v2  ;;  %v5633_v8 = vld [vmem:[%s5949_s17 + $0x28] sm:$0xff]  ;;  %v5632_v10 = vld [vmem:[%s5949_s17 + $0x20] sm:$0xff]  ;;  %v5631_v12 = vld [vmem:[%s5949_s17 + $0x18] sm:$0xff]  ;;  %v454_v60 = vpack.c.b16 %v450_v58, %v450_v58 }
  0x12   : > { %v267_v6 = vsel %vm265_vm0, %v4131_v3, 0  ;;  %v5648_v13 = vld [vmem:[%s5949_s17 + $0x50] sm:$0xff]  ;;  %v5647_v15 = vld [vmem:[%s5949_s17 + $0x48] sm:$0xff]  ;;  %v4317_v16 = vld [vmem:[%s5949_s17 + $0xa0] sm:$0xf] }
  0x13   : > { %270 = vmatpush.bf16.msra.mxu0 %v267_v6  ;;  %v509_v7 = vsel %vm265_vm0, %v4221_v5, 0  ;;  %v5630_v14 = vld [vmem:[%s5949_s17 + $0x10] sm:$0xff]  ;;  %v5668_v17 = vld [vmem:[%s5949_s17 + $0xa0] sm:$0x30]  ;;  %v5629_v18 = vld [vmem:[%s5949_s17 + $0x8] sm:$0xff] }
  0x14   : > { %512 = vmatpush.bf16.msra.mxu2 %v509_v7  ;;  %v4414_v19 = vld [vmem:[%s5949_s17 + $0xd8] sm:$0xf]  ;;  %v5685_v20 = vld [vmem:[%s5949_s17 + $0xd8] sm:$0x30]  ;;  %v5646_v21 = vld [vmem:[%s5949_s17 + $0x40] sm:$0xff]  ;;  %v4318_v22 = vor.u32 %v5668_v17, %v4317_v16 }
  0x15   : > { %v4415_v23 = vor.u32 %v5685_v20, %v4414_v19  ;;  %v5628_v24 = vld [vmem:[%s5949_s17] sm:$0xff]  ;;  %v5645_v25 = vld [vmem:[%s5949_s17 + $0x38] sm:$0xff]  ;;  %v5684_v31 = vld [vmem:[%s5949_s17 + $0xd0] sm:$0xff] }
  0x16   : > { %v750_v26 = vsel %vm265_vm0, %v4318_v22, 0  ;;  %v5667_v30 = vld [vmem:[%s5949_s17 + $0x98] sm:$0xff]  ;;  %v5666_v32 = vld [vmem:[%s5949_s17 + $0x90] sm:$0xff]  ;;  %v5683_v33 = vld [vmem:[%s5949_s17 + $0xc8] sm:$0xff] }
  0x17   : > { %271 = vmatpush.bf16.msra.mxu0 %v5633_v8  ;;  %v991_v28 = vsel %vm265_vm0, %v4415_v23, 0  ;;  %v5665_v34 = vld [vmem:[%s5949_s17 + $0x88] sm:$0xff]  ;;  %v5682_v35 = vld [vmem:[%s5949_s17 + $0xc0] sm:$0xff]  ;;  %v5681_v36 = vld [vmem:[%s5949_s17 + $0xb8] sm:$0xff] }
  0x18   : > { %513 = vmatpush.bf16.msra.mxu2 %v5650_v9  ;;  %v5680_v39 = vld [vmem:[%s5949_s17 + $0xb0] sm:$0xff]  ;;  %v5664_v40 = vld [vmem:[%s5949_s17 + $0x80] sm:$0xff]  ;;  %v5679_v41 = vld [vmem:[%s5949_s17 + $0xa8] sm:$0xff] }
  0x19   : > { %v5663_v42 = vld [vmem:[%s5949_s17 + $0x78] sm:$0xff]  ;;  %v5662_v43 = vld [vmem:[%s5949_s17 + $0x70] sm:$0xff]  ;;  %v4608_v46 = vld [vmem:[%s5949_s17 + $0x148] sm:$0xf] }
  0x1a   : > { %v5719_v47 = vld [vmem:[%s5949_s17 + $0x148] sm:$0x30]  ;;  %v4511_v49 = vld [vmem:[%s5949_s17 + $0x110] sm:$0xf]  ;;  %v5702_v50 = vld [vmem:[%s5949_s17 + $0x110] sm:$0x30] }
  0x1b   : > { %272 = vmatpush.bf16.msra.mxu0 %v5632_v10  ;;  %v4609_v48 = vor.u32 %v5719_v47, %v4608_v46  ;;  %v4512_v51 = vor.u32 %v5702_v50, %v4511_v49  ;;  %v5718_v54 = vld [vmem:[%s5949_s17 + $0x140] sm:$0xff]  ;;  %v5717_v61 = vld [vmem:[%s5949_s17 + $0x138] sm:$0xff]  ;;  %v5701_v62 = vld [vmem:[%s5949_s17 + $0x108] sm:$0xff] }
  0x1c   : > { %514 = vmatpush.bf16.msra.mxu2 %v5649_v11  ;;  %v5716_v63 = vld [vmem:[%s5949_s17 + $0x130] sm:$0xff]  ;;  %v5700_v0 = vld [vmem:[%s5949_s17 + $0x100] sm:$0xff]  ;;  %v5715_v3 = vld [vmem:[%s5949_s17 + $0x128] sm:$0xff] }
  0x1d   : > { %v1473_v52 = vsel %vm265_vm0, %v4609_v48, 0  ;;  %v1232_v55 = vsel %vm265_vm0, %v4512_v51, 0  ;;  %v5659_v1 = vld [vmem:[%s7049_s1] sm:$0xff]  ;;  %v5699_v4 = vld [vmem:[%s5949_s17 + $0xf8] sm:$0xff]  ;;  %v4162_v5 = vld [vmem:[%s7050_s2 + $0x30] sm:$0xf] }
  0x1e   : > { %v5676_v2 = vld [vmem:[%s7049_s1] sm:$0xff]  ;;  %v5641_v6 = vld [vmem:[%s7050_s2 + $0x30] sm:$0x30]  ;;  %v5660_v10 = vld [vmem:[%s7049_s1 + $0x8] sm:$0xff] }
  0x1f   : > { %273 = vmatpush.bf16.msra.mxu0 %v5631_v12  ;;  %v4163_v7 = vor.u32 %v5641_v6, %v4162_v5  ;;  %v5714_v8 = vld [vmem:[%s5949_s17 + $0x120] sm:$0xff]  ;;  %v5677_v11 = vld [vmem:[%s7049_s1 + $0x8] sm:$0xff]  ;;  %v5638_v22 = vld [vmem:[%s7050_s2 + $0x18] sm:$0xff] }
  0x20   : > { %515 = vmatpush.bf16.msra.mxu2 %v5648_v13  ;;  %v5640_v12 = vld [vmem:[%s7050_s2 + $0x28] sm:$0xff]  ;;  %v4252_v13 = vld [vmem:[%s7050_s2 + $0x30] sm:$0xf]  ;;  %v5639_v17 = vld [vmem:[%s7050_s2 + $0x20] sm:$0xff] }
  0x21   : > { %v369_v9 = vsel %vm265_vm0, %v4163_v7, 0  ;;  %v5697_v20 = vld [vmem:[%s5949_s17 + $0xe8] sm:$0xff]  ;;  %v5656_v23 = vld [vmem:[%s7050_s2 + $0x20] sm:$0xff]  ;;  %v4446_v48 = vld [vmem:[%s7050_s2 + $0x30] sm:$0xf] }
  0x22   : > { %372 = vmatpush.bf16.msra.mxu1 %v369_v9  ;;  %v5736_v46 = vld [vmem:[%s5949_s17 + $0x180] sm:$0x30]  ;;  %v5692_v49 = vld [vmem:[%s7050_s2 + $0x30] sm:$0x30]  ;;  %v5751_v53 = vld [vmem:[%s5949_s17 + $0x1a8] sm:$0xff] }
  0x23   : > { %274 = vmatpush.bf16.msra.mxu0 %v5630_v14  ;;  %v5658_v14 = vld [vmem:[%s7050_s2 + $0x30] sm:$0x30]  ;;  %v4447_v51 = vor.u32 %v5692_v49, %v4446_v48  ;;  %v5735_v57 = vld [vmem:[%s5949_s17 + $0x178] sm:$0xff]  ;;  %v5673_v7 = vld [vmem:[%s7050_s2 + $0x20] sm:$0xff] }
  0x24   : > { %516 = vmatpush.bf16.msra.mxu2 %v5647_v15  ;;  %v5698_v15 = vld [vmem:[%s5949_s17 + $0xf0] sm:$0xff]  ;;  %v4253_v16 = vor.u32 %v5658_v14, %v4252_v13  ;;  %v5749_v6 = vld [vmem:[%s5949_s17 + $0x198] sm:$0xff]  ;;  %v5711_v14 = vld [vmem:[%s7049_s1 + $0x8] sm:$0xff] }
  0x25   : > { %v5689_v9 = vld [vmem:[%s7050_s2 + $0x18] sm:$0xff] }
  0x26   : > { %373 = vmatpush.bf16.msra.mxu1 %v5640_v12  ;;  %v611_v19 = vsel %vm265_vm0, %v4253_v16, 0  ;;  %v5672_v16 = vld [vmem:[%s7050_s2 + $0x18] sm:$0xff] }
  0x27   : > { %275 = vmatpush.bf16.msra.mxu0 %v5629_v18  ;;  %v5713_v18 = vld [vmem:[%s5949_s17 + $0x118] sm:$0xff]  ;;  %614 = vmatpush.bf16.msra.mxu3 %v611_v19 }
  0x28   : > { %517 = vmatpush.bf16.msra.mxu2 %v5646_v21  ;;  %v5657_v21 = vld [vmem:[%s7050_s2 + $0x28] sm:$0xff] }
  0x2a   : > { %374 = vmatpush.bf16.msra.mxu1 %v5639_v17  ;;  %v5732_v17 = vld [vmem:[%s5949_s17 + $0x160] sm:$0xff] }
  0x2b   : > { %276 = vmatpush.bf16.msra.mxu0 %v5628_v24  ;;  %615 = vmatpush.bf16.msra.mxu3 %v5657_v21  ;;  %v5661_v24 = vld [vmem:[%s7049_s1 + $0x10] sm:$0xff]  ;;  %v5747_v21 = vld [vmem:[%s5949_s17 + $0x188] sm:$0xff] }
  0x2c   : > { %518 = vmatpush.bf16.msra.mxu2 %v5645_v25  ;;  %v5637_v25 = vld [vmem:[%s7050_s2 + $0x10] sm:$0xff] }
  0x2e   : > { %4132 = vmatmul.msk.bf16.vlgmr.msra.gmra.mxu0 %vm252_vm1, %v5625_v27  ;;  %375 = vmatpush.bf16.msra.mxu1 %v5638_v22  ;;  %v5678_v27 = vld [vmem:[%s7049_s1 + $0x10] sm:$0xff] }
  0x2f   : > { %753 = vmatpush.bf16.msrb.mxu0 %v750_v26  ;;  %4222 = vmatmul.msk.bf16.vlgmr.msra.gmra.mxu2 %vm252_vm1, %v5642_v29  ;;  %v5696_v26 = vld [vmem:[%s5949_s17 + $0xe0] sm:$0xff]  ;;  %v5636_v29 = vld [vmem:[%s7050_s2 + $0x8] sm:$0xff] }
  0x30   : > { %994 = vmatpush.bf16.msrb.mxu2 %v991_v28  ;;  %616 = vmatpush.bf16.msra.mxu3 %v5656_v23  ;;  %v5655_v28 = vld [vmem:[%s7050_s2 + $0x18] sm:$0xff]  ;;  %v5671_v23 = vld [vmem:[%s7050_s2 + $0x10] sm:$0xff] }
  0x32   : > { %376 = vmatpush.bf16.msra.mxu1 %v5637_v25 }
  0x33   : > { %754 = vmatpush.bf16.msrb.mxu0 %v5667_v30  ;;  %v4802_v30 = vld [vmem:[%s5949_s17 + $0x1b8] sm:$0xf] }
  0x34   : > { %995 = vmatpush.bf16.msrb.mxu2 %v5684_v31  ;;  %617 = vmatpush.bf16.msra.mxu3 %v5655_v28  ;;  %v5753_v31 = vld [vmem:[%s5949_s17 + $0x1b8] sm:$0x30]  ;;  %v5730_v28 = vld [vmem:[%s5949_s17 + $0x150] sm:$0xff] }
  0x36   : > { %377 = vmatpush.bf16.msra.mxu1 %v5636_v29 }
  0x37   : > { %755 = vmatpush.bf16.msrb.mxu0 %v5666_v32  ;;  %v4803_v32 = vor.u32 %v5753_v31, %v4802_v30  ;;  %v5712_v31 = vld [vmem:[%s7049_s1 + $0x10] sm:$0xff] }
  0x38   : > { %996 = vmatpush.bf16.msrb.mxu2 %v5683_v33  ;;  %v5654_v33 = vld [vmem:[%s7050_s2 + $0x10] sm:$0xff] }
  0x39   : > { %618 = vmatpush.bf16.msra.mxu3 %v5654_v33  ;;  %v4996_v33 = vld [vmem:[%s5949_s17 + $0x228] sm:$0xf] }
  0x3b   : > { %756 = vmatpush.bf16.msrb.mxu0 %v5665_v34  ;;  %v1955_v34 = vsel %vm265_vm0, %v4803_v32, 0  ;;  %v5670_v32 = vld [vmem:[%s7050_s2 + $0x8] sm:$0xff] }
  0x3c   : > { %997 = vmatpush.bf16.msrb.mxu2 %v5682_v35  ;;  %v5635_v35 = vld [vmem:[%s7050_s2] sm:$0xff] }
  0x3d   : > { %378 = vmatpush.bf16.msra.mxu1 %v5635_v35 }
  0x3e   : > { %4133 = vmatmul.msk.bf16.gmra.mxu0 %vm252_vm1, %v5626_v37  ;;  %v903_v37 = vld [vmem:[%s7049_s1 + $0x18] sm:$0x7] }
  0x3f   : > { %4223 = vmatmul.msk.bf16.gmra.mxu2 %vm252_vm1, %v5643_v38  ;;  %757 = vmatpush.bf16.msrb.mxu0 %v5664_v40  ;;  %v5653_v38 = vld [vmem:[%s7050_s2 + $0x8] sm:$0xff]  ;;  %v5752_v40 = vld [vmem:[%s5949_s17 + $0x1b0] sm:$0xff] }
  0x40   : > { %998 = vmatpush.bf16.msrb.mxu2 %v5681_v36  ;;  %v662_v36 = vld [vmem:[%s7049_s1 + $0x18] sm:$0x7]  ;;  %619 = vmatpush.bf16.msra.mxu3 %v5653_v38  ;;  %v5669_v38 = vld [vmem:[%s7050_s2] sm:$0xff] }
  0x43   : > { %758 = vmatpush.bf16.msrb.mxu0 %v5663_v42  ;;  %v5652_v42 = vld [vmem:[%s7050_s2] sm:$0xff] }
  0x44   : > { %999 = vmatpush.bf16.msrb.mxu2 %v5680_v39  ;;  %v691_v39 = vunpack.c.l.b16 %v662_v36  ;;  %620 = vmatpush.bf16.msra.mxu3 %v5652_v42  ;;  %v1385_v42 = vld [vmem:[%s7049_s1 + $0x18] sm:$0x7] }
  0x47   : > { %759 = vmatpush.bf16.msrb.mxu0 %v5662_v43  ;;  %v695_v43 = vpack.c.b16 %v691_v39, %v691_v39 }
  0x48   : > { %1000 = vmatpush.bf16.msrb.mxu2 %v5679_v41  ;;  %v932_v41 = vunpack.c.l.b16 %v903_v37 }
  0x4b   : > { %1235 = vmatpush.bf16.msra.mxu0 %v1232_v55  ;;  %v5675_v55 = vld [vmem:[%s7050_s2 + $0x30] sm:$0x30] }
  0x4c   : > { %1476 = vmatpush.bf16.msra.mxu2 %v1473_v52  ;;  %v1093_v52 = vsel %vm265_vm0, %v4447_v51, 0 }
  0x4d   : > { %1096 = vmatpush.bf16.msrb.mxu3 %v1093_v52  ;;  %v4899_v52 = vld [vmem:[%s5949_s17 + $0x1f0] sm:$0xf] }
  0x4e   : > { %4134 = vmatmul.msk.bf16.gmra.mxu0 %vm252_vm1, %v5627_v44  ;;  %v936_v44 = vpack.c.b16 %v932_v41, %v932_v41 }
  0x4f   : > { %4224 = vmatmul.msk.bf16.gmra.mxu2 %vm252_vm1, %v5644_v45  ;;  %1236 = vmatpush.bf16.msra.mxu0 %v5701_v62  ;;  %v4705_v45 = vld [vmem:[%s5949_s17 + $0x180] sm:$0xf] }
  0x50   : > { %1477 = vmatpush.bf16.msra.mxu2 %v5718_v54  ;;  %v4706_v47 = vor.u32 %v5736_v46, %v4705_v45  ;;  %v4349_v54 = vld [vmem:[%s7050_s2 + $0x30] sm:$0xf]  ;;  %v5710_v62 = vld [vmem:[%s7049_s1] sm:$0xff]  ;;  %v1414_v46 = vunpack.c.l.b16 %v1385_v42 }
  0x51   : > { %v4350_v56 = vor.u32 %v5675_v55, %v4349_v54  ;;  %v5786_v45 = vld [vmem:[%s5949_s17 + $0x220] sm:$0xff]  ;;  %v4640_v55 = vld [vmem:[%s7050_s2 + $0x30] sm:$0xf] }
  0x52   : > { %v1714_v50 = vsel %vm265_vm0, %v4706_v47, 0  ;;  %v1418_v51 = vpack.c.b16 %v1414_v46, %v1414_v46  ;;  %v5821_v46 = vld [vmem:[%s5949_s17 + $0x298] sm:$0x30] }
  0x53   : > { %1237 = vmatpush.bf16.msra.mxu0 %v5700_v0  ;;  %v852_v58 = vsel %vm265_vm0, %v4350_v56, 0  ;;  %v5674_v0 = vld [vmem:[%s7050_s2 + $0x28] sm:$0xff]  ;;  %v5726_v56 = vld [vmem:[%s7050_s2 + $0x30] sm:$0x30] }
  0x54   : > { %1478 = vmatpush.bf16.msra.mxu2 %v5717_v61  ;;  %855 = vmatpush.bf16.msrb.mxu1 %v852_v58  ;;  %v4641_v58 = vor.u32 %v5726_v56, %v4640_v55  ;;  %v5720_v56 = vld [vmem:[%s7050_s2] sm:$0xff] }
  0x57   : > { %1238 = vmatpush.bf16.msra.mxu0 %v5699_v4 }
  0x58   : > { %1479 = vmatpush.bf16.msra.mxu2 %v5716_v63  ;;  %v5750_v63 = vld [vmem:[%s5949_s17 + $0x1a0] sm:$0xff]  ;;  %856 = vmatpush.bf16.msrb.mxu1 %v5674_v0  ;;  %v5709_v0 = vld [vmem:[%s7050_s2 + $0x30] sm:$0x30] }
  0x5b   : > { %1239 = vmatpush.bf16.msra.mxu0 %v5698_v15  ;;  %v5748_v15 = vld [vmem:[%s5949_s17 + $0x190] sm:$0xff] }
  0x5c   : > { %1480 = vmatpush.bf16.msra.mxu2 %v5715_v3  ;;  %857 = vmatpush.bf16.msrb.mxu1 %v5673_v7  ;;  %v5727_v7 = vld [vmem:[%s7049_s1] sm:$0xff] }
  0x5e   : > { %4135 = vmatmul.msk.bf16.gmra.mxu0 %vm252_vm1, %v210_v59  ;;  %v5691_v59 = vld [vmem:[%s7050_s2 + $0x28] sm:$0xff] }
  0x5f   : > { %4225 = vmatmul.msk.bf16.gmra.mxu2 %vm252_vm1, %v454_v60  ;;  %1240 = vmatpush.bf16.msra.mxu0 %v5697_v20  ;;  %v5693_v60 = vld [vmem:[%s7049_s1] sm:$0xff]  ;;  %v5688_v20 = vld [vmem:[%s7050_s2 + $0x10] sm:$0xff] }
  0x60   : > { %1481 = vmatpush.bf16.msra.mxu2 %v5714_v8  ;;  %1097 = vmatpush.bf16.msrb.mxu3 %v5691_v59  ;;  %v5733_v8 = vld [vmem:[%s5949_s17 + $0x168] sm:$0xff]  ;;  %v1575_v59 = vsel %vm265_vm0, %v4641_v58, 0 }
  0x61   : > { %858 = vmatpush.bf16.msrb.mxu1 %v5672_v16 }
  0x63   : > { %1241 = vmatpush.bf16.msra.mxu0 %v5696_v26  ;;  %v5695_v26 = vld [vmem:[%s7049_s1 + $0x10] sm:$0xff] }
  0x64   : > { %1482 = vmatpush.bf16.msra.mxu2 %v5713_v18 }
  0x65   : > { %859 = vmatpush.bf16.msrb.mxu1 %v5671_v23  ;;  %v5728_v23 = vld [vmem:[%s7049_s1 + $0x8] sm:$0xff] }
  0x69   : > { %860 = vmatpush.bf16.msrb.mxu1 %v5670_v32  ;;  %v5722_v32 = vld [vmem:[%s7050_s2 + $0x10] sm:$0xff] }
  0x6d   : > { %861 = vmatpush.bf16.msrb.mxu1 %v5669_v38  ;;  %v5729_v38 = vld [vmem:[%s7049_s1 + $0x10] sm:$0xff] }
  0x6e   : > { %4319 = vmatmul.msk.bf16.vlgmr.msrb.gmra.mxu0 %vm252_vm1, %v5659_v1  ;;  %v5734_v1 = vld [vmem:[%s5949_s17 + $0x170] sm:$0xff] }
  0x6f   : > { %4416 = vmatmul.msk.bf16.vlgmr.msrb.gmra.mxu2 %vm252_vm1, %v5676_v2  ;;  %1717 = vmatpush.bf16.msrb.mxu0 %v1714_v50  ;;  %v5690_v2 = vld [vmem:[%s7050_s2 + $0x20] sm:$0xff] }
  0x70   : > { %1958 = vmatpush.bf16.msrb.mxu2 %v1955_v34  ;;  %1098 = vmatpush.bf16.msrb.mxu3 %v5690_v2  ;;  %v5787_v34 = vld [vmem:[%s5949_s17 + $0x228] sm:$0x30] }
  0x71   : > { %v4997_v35 = vor.u32 %v5787_v34, %v4996_v33  ;;  %v5781_v33 = vld [vmem:[%s5949_s17 + $0x1f8] sm:$0xff] }
  0x73   : > { %1718 = vmatpush.bf16.msrb.mxu0 %v5735_v57  ;;  %v2437_v37 = vsel %vm265_vm0, %v4997_v35, 0  ;;  %v5705_v35 = vld [vmem:[%s7050_s2 + $0x10] sm:$0xff] }
  0x74   : > { %1959 = vmatpush.bf16.msrb.mxu2 %v5752_v40  ;;  %1099 = vmatpush.bf16.msrb.mxu3 %v5689_v9  ;;  %v1144_v40 = vld [vmem:[%s7049_s1 + $0x18] sm:$0x7] }
  0x77   : > { %1719 = vmatpush.bf16.msrb.mxu0 %v5734_v1 }
  0x78   : > { %1960 = vmatpush.bf16.msrb.mxu2 %v5751_v53  ;;  %1100 = vmatpush.bf16.msrb.mxu3 %v5688_v20  ;;  %v5770_v53 = vld [vmem:[%s5949_s17 + $0x1f0] sm:$0x30]  ;;  %v5767_v20 = vld [vmem:[%s5949_s17 + $0x1d8] sm:$0xff] }
  0x79   : > { %v4900_v54 = vor.u32 %v5770_v53, %v4899_v52  ;;  %v1626_v52 = vld [vmem:[%s7049_s1 + $0x18] sm:$0x7] }
  0x7a   : > { %v1655_v55 = vunpack.c.l.b16 %v1626_v52 }
  0x7b   : > { %1720 = vmatpush.bf16.msrb.mxu0 %v5733_v8  ;;  %v2196_v57 = vsel %vm265_vm0, %v4900_v54, 0  ;;  %v1867_v54 = vld [vmem:[%s7049_s1 + $0x18] sm:$0x7] }
  0x7c   : > { %1961 = vmatpush.bf16.msrb.mxu2 %v5750_v63  ;;  %v4543_v63 = vld [vmem:[%s7050_s2 + $0x30] sm:$0xf]  ;;  %v1896_v58 = vunpack.c.l.b16 %v1867_v54  ;;  %v5815_v54 = vld [vmem:[%s5949_s17 + $0x268] sm:$0xff] }
  0x7d   : > { %v4544_v2 = vor.u32 %v5709_v0, %v4543_v63  ;;  %v5093_v0 = vld [vmem:[%s5949_s17 + $0x260] sm:$0xf] }
  0x7e   : > { %4320 = vmatmul.msk.bf16.gmra.mxu0 %vm252_vm1, %v5660_v10  ;;  %v1900_v63 = vpack.c.b16 %v1896_v58, %v1896_v58 }
  0x7f   : > { %4417 = vmatmul.msk.bf16.gmra.mxu2 %vm252_vm1, %v5677_v11  ;;  %v5694_v11 = vld [vmem:[%s7049_s1 + $0x8] sm:$0xff]  ;;  %1721 = vmatpush.bf16.msrb.mxu0 %v5732_v17 }
  0x80   : > { %1962 = vmatpush.bf16.msrb.mxu2 %v5749_v6 }
  0x84   : > { %1963 = vmatpush.bf16.msrb.mxu2 %v5748_v15 }
  0x88   : > { %1964 = vmatpush.bf16.msrb.mxu2 %v5747_v21  ;;  %v5723_v21 = vld [vmem:[%s7050_s2 + $0x18] sm:$0xff] }
  0x8e   : > { %4321 = vmatmul.msk.bf16.gmra.mxu0 %vm252_vm1, %v5661_v24  ;;  %v5731_v24 = vld [vmem:[%s5949_s17 + $0x158] sm:$0xff] }
  0x8f   : > { %4418 = vmatmul.msk.bf16.gmra.mxu2 %vm252_vm1, %v5678_v27  ;;  %1722 = vmatpush.bf16.msrb.mxu0 %v5731_v24  ;;  %v5687_v27 = vld [vmem:[%s7050_s2 + $0x8] sm:$0xff] }
  0x90   : > { %1101 = vmatpush.bf16.msrb.mxu3 %v5687_v27  ;;  %v5782_v27 = vld [vmem:[%s5949_s17 + $0x200] sm:$0xff] }
  0x93   : > { %1723 = vmatpush.bf16.msrb.mxu0 %v5730_v28  ;;  %v5706_v28 = vld [vmem:[%s7050_s2 + $0x18] sm:$0xff] }
  0x9e   : > { %4322 = vmatmul.msk.bf16.gmra.mxu0 %vm252_vm1, %v695_v43  ;;  %v5686_v43 = vld [vmem:[%s7050_s2] sm:$0xff] }
  0x9f   : > { %4419 = vmatmul.msk.bf16.gmra.mxu2 %vm252_vm1, %v936_v44  ;;  %v1173_v44 = vunpack.c.l.b16 %v1144_v40  ;;  %1102 = vmatpush.bf16.msrb.mxu3 %v5686_v43  ;;  %v5764_v40 = vld [vmem:[%s5949_s17 + $0x1c0] sm:$0xff]  ;;  %v5746_v43 = vld [vmem:[%s7049_s1 + $0x10] sm:$0xff] }
  0xa1   : > { %v1177_v48 = vpack.c.b16 %v1173_v44, %v1173_v44  ;;  %v5704_v44 = vld [vmem:[%s7050_s2 + $0x8] sm:$0xff] }
  0xab   : > { %v278_v61 = vpop.f32.mrf.mxu0 }
  0xae   : > { %4513 = vmatmul.msk.bf16.vlgmr.msra.gmra.mxu0 %vm252_vm1, %v5693_v60 }
  0xaf   : > { %4610 = vmatmul.msk.bf16.vlgmr.msra.gmra.mxu2 %vm252_vm1, %v5710_v62  ;;  %2199 = vmatpush.bf16.msra.mxu0 %v2196_v57  ;;  %v5785_v62 = vld [vmem:[%s5949_s17 + $0x218] sm:$0xff]  ;;  %v5820_v57 = vld [vmem:[%s5949_s17 + $0x290] sm:$0xff] }
  0xb0   : > { %2440 = vmatpush.bf16.msra.mxu2 %v2437_v37 }
  0xb2   : > { %v520_v3 = vpop.f32.mrf.mxu2 }
  0xb3   : > { %v280_v4 = vpop.f32.mrf.mxu0 }
  0xb4   : > { %v297_v5 = vpack.c.bf16 %v280_v4, %v278_v61  ;;  %2441 = vmatpush.bf16.msra.mxu2 %v5786_v45  ;;  %v1334_v4 = vsel %vm265_vm0, %v4544_v2, 0  ;;  %v5190_v45 = vld [vmem:[%s5949_s17 + $0x298] sm:$0xf] }
  0xb6   : > { %4164 = vmatmul.msk.bf16.vlgmr.msra.gmra.mxu1 %vm252_vm1, %v297_v5  ;;  %v5725_v5 = vld [vmem:[%s7050_s2 + $0x28] sm:$0xff] }
  0xb7   : > { %1337 = vmatpush.bf16.msra.mxu1 %v1334_v4  ;;  %v4834_v4 = vld [vmem:[%s7050_s2 + $0x30] sm:$0xf] }
  0xb8   : > { %2442 = vmatpush.bf16.msra.mxu2 %v5785_v62 }
  0xba   : > { %v522_v10 = vpop.f32.mrf.mxu2 }
  0xbb   : > { %v539_v12 = vpack.c.bf16 %v522_v10, %v520_v3  ;;  %v283_v13 = vpop.f32.mrf.mxu0  ;;  %v5769_v3 = vld [vmem:[%s5949_s17 + $0x1e8] sm:$0xff]  ;;  %v5744_v10 = vld [vmem:[%s7049_s1] sm:$0xff] }
  0xbc   : > { %2200 = vmatpush.bf16.msra.mxu0 %v5769_v3 }
  0xbd   : > { %4254 = vmatmul.msk.bf16.vlgmr.msra.gmra.mxu3 %vm252_vm1, %v539_v12  ;;  %v5708_v12 = vld [vmem:[%s7050_s2 + $0x28] sm:$0xff] }
  0xbe   : > { %4514 = vmatmul.msk.bf16.gmra.mxu0 %vm252_vm1, %v5694_v11  ;;  %1578 = vmatpush.bf16.msra.mxu3 %v1575_v59  ;;  %v5784_v11 = vld [vmem:[%s5949_s17 + $0x210] sm:$0xff] }
  0xbf   : > { %4611 = vmatmul.msk.bf16.gmra.mxu2 %vm252_vm1, %v5711_v14  ;;  %1338 = vmatpush.bf16.msra.mxu1 %v5708_v12  ;;  %v5724_v14 = vld [vmem:[%s7050_s2 + $0x20] sm:$0xff]  ;;  %v4737_v12 = vld [vmem:[%s7050_s2 + $0x30] sm:$0xf] }
  0xc0   : > { %2443 = vmatpush.bf16.msra.mxu2 %v5784_v11  ;;  %v5819_v11 = vld [vmem:[%s5949_s17 + $0x288] sm:$0xff] }
  0xc2   : > { %v525_v18 = vpop.f32.mrf.mxu2  ;;  %1579 = vmatpush.bf16.msra.mxu3 %v5725_v5  ;;  %v5760_v5 = vld [vmem:[%s7050_s2 + $0x30] sm:$0x30] }
  0xc3   : > { %v285_v19 = vpop.f32.mrf.mxu0 }
  0xc4   : > { %v298_v22 = vpack.c.bf16 %v285_v19, %v283_v13  ;;  %v5768_v13 = vld [vmem:[%s5949_s17 + $0x1e0] sm:$0xff] }
  0xc5   : > { %2201 = vmatpush.bf16.msra.mxu0 %v5768_v13  ;;  %v5707_v19 = vld [vmem:[%s7050_s2 + $0x20] sm:$0xff]  ;;  %v5743_v13 = vld [vmem:[%s7050_s2 + $0x30] sm:$0x30] }
  0xc6   : > { %4165 = vmatmul.msk.bf16.gmra.mxu1 %vm252_vm1, %v298_v22  ;;  %1580 = vmatpush.bf16.msra.mxu3 %v5724_v14  ;;  %v4738_v14 = vor.u32 %v5743_v13, %v4737_v12  ;;  %v5737_v12 = vld [vmem:[%s7050_s2] sm:$0xff] }
  0xc7   : > { %1339 = vmatpush.bf16.msra.mxu1 %v5707_v19  ;;  %v5761_v19 = vld [vmem:[%s7049_s1] sm:$0xff] }
  0xc9   : > { %2202 = vmatpush.bf16.msra.mxu0 %v5767_v20 }
  0xca   : > { %v527_v25 = vpop.f32.mrf.mxu2  ;;  %1581 = vmatpush.bf16.msra.mxu3 %v5723_v21 }
  0xcb   : > { %v540_v29 = vpack.c.bf16 %v527_v25, %v525_v18  ;;  %v288_v30 = vpop.f32.mrf.mxu0  ;;  %v5783_v18 = vld [vmem:[%s5949_s17 + $0x208] sm:$0xff]  ;;  %1340 = vmatpush.bf16.msra.mxu1 %v5706_v28 }
  0xcc   : > { %2444 = vmatpush.bf16.msra.mxu2 %v5783_v18 }
  0xcd   : > { %4255 = vmatmul.msk.bf16.gmra.mxu3 %vm252_vm1, %v540_v29  ;;  %v5766_v29 = vld [vmem:[%s5949_s17 + $0x1d0] sm:$0xff] }
  0xce   : > { %4515 = vmatmul.msk.bf16.gmra.mxu0 %vm252_vm1, %v5695_v26  ;;  %v5745_v26 = vld [vmem:[%s7049_s1 + $0x8] sm:$0xff]  ;;  %1582 = vmatpush.bf16.msra.mxu3 %v5722_v32  ;;  %v5817_v32 = vld [vmem:[%s5949_s17 + $0x278] sm:$0xff] }
  0xcf   : > { %4612 = vmatmul.msk.bf16.gmra.mxu2 %vm252_vm1, %v5712_v31  ;;  %2203 = vmatpush.bf16.msra.mxu0 %v5766_v29  ;;  %v5758_v29 = vld [vmem:[%s7050_s2 + $0x20] sm:$0xff] }
  0xd0   : > { %2445 = vmatpush.bf16.msra.mxu2 %v5782_v27  ;;  %1341 = vmatpush.bf16.msra.mxu1 %v5705_v35 }
  0xd2   : > { %v530_v36 = vpop.f32.mrf.mxu2 }
  0xd3   : > { %v290_v39 = vpop.f32.mrf.mxu0 }
  0xd4   : > { %v299_v41 = vpack.c.bf16 %v290_v39, %v288_v30  ;;  %2446 = vmatpush.bf16.msra.mxu2 %v5781_v33  ;;  %v5721_v39 = vld [vmem:[%s7050_s2 + $0x8] sm:$0xff]  ;;  %1342 = vmatpush.bf16.msra.mxu1 %v5704_v44  ;;  %v5741_v33 = vld [vmem:[%s7050_s2 + $0x20] sm:$0xff]  ;;  %v5740_v44 = vld [vmem:[%s7050_s2 + $0x18] sm:$0xff] }
  0xd5   : > { %1583 = vmatpush.bf16.msra.mxu3 %v5721_v39 }
  0xd6   : > { %4166 = vmatmul.msk.bf16.gmra.mxu1 %vm252_vm1, %v299_v41 }
  0xd9   : > { %1584 = vmatpush.bf16.msra.mxu3 %v5720_v56 }
  0xda   : > { %v532_v47 = vpop.f32.mrf.mxu2 }
  0xdb   : > { %v541_v49 = vpack.c.bf16 %v532_v47, %v530_v36  ;;  %v293_v50 = vpop.f32.mrf.mxu0  ;;  %v5765_v36 = vld [vmem:[%s5949_s17 + $0x1c8] sm:$0xff]  ;;  %v5191_v47 = vor.u32 %v5821_v46, %v5190_v45 }
  0xdc   : > { %v300_v60 = vpack.c.bf16 %v293_v50, %v293_v50  ;;  %2204 = vmatpush.bf16.msra.mxu0 %v5765_v36  ;;  %v5703_v50 = vld [vmem:[%s7050_s2] sm:$0xff]  ;;  %v5762_v36 = vld [vmem:[%s7049_s1 + $0x8] sm:$0xff] }
  0xdd   : > { %4256 = vmatmul.msk.bf16.gmra.mxu3 %vm252_vm1, %v541_v49  ;;  %v2919_v49 = vsel %vm265_vm0, %v5191_v47, 0  ;;  %1343 = vmatpush.bf16.msra.mxu1 %v5703_v50 }
  0xde   : > { %4516 = vmatmul.msk.bf16.gmra.mxu0 %vm252_vm1, %v1177_v48 }
  0xdf   : > { %4613 = vmatmul.msk.bf16.gmra.mxu2 %vm252_vm1, %v1418_v51 }
  0xe0   : > { %2205 = vmatpush.bf16.msra.mxu0 %v5764_v40  ;;  %v5779_v40 = vld [vmem:[%s7049_s1 + $0x8] sm:$0xff] }
  0xe2   : > { %v535_v61 = vpop.f32.mrf.mxu2 }
  0xe3   : > { %v295_v1 = vpop.f32.mrf.mxu0  ;;  %v542_v8 = vpack.c.bf16 %v535_v61, %v535_v61 }
  0xe4   : > { %v5804_v1 = vld [vmem:[%s5949_s17 + $0x260] sm:$0x30] }
  0xe5   : > { %v5094_v2 = vor.u32 %v5804_v1, %v5093_v0  ;;  %v5780_v1 = vld [vmem:[%s7049_s1 + $0x10] sm:$0xff] }
  0xe6   : > { %4167 = vmatmul.msk.bf16.gmra.mxu1 %vm252_vm1, %v300_v60  ;;  %v1659_v60 = vpack.c.b16 %v1655_v55, %v1655_v55  ;;  %v5799_v55 = vld [vmem:[%s5949_s17 + $0x238] sm:$0xff] }
  0xe7   : > { %v2678_v3 = vsel %vm265_vm0, %v5094_v2, 0  ;;  %v5755_v2 = vld [vmem:[%s7050_s2 + $0x8] sm:$0xff] }
  0xea   : > { %v537_v6 = vpop.f32.mrf.mxu2 }
  0xeb   : > { %v761_v9 = vpop.f32.mrf.mxu0  ;;  %v4835_v6 = vor.u32 %v5760_v5, %v4834_v4  ;;  %v5738_v4 = vld [vmem:[%s7050_s2 + $0x8] sm:$0xff] }
  0xec   : > { %v5384_v5 = vld [vmem:[%s5949_s17 + $0x308] sm:$0xf] }
  0xed   : > { %4257 = vmatmul.msk.bf16.gmra.mxu3 %vm252_vm1, %v542_v8 }
  0xee   : > { %4707 = vmatmul.msk.bf16.vlgmr.msrb.gmra.mxu0 %vm252_vm1, %v5727_v7  ;;  %v2057_v7 = vsel %vm265_vm0, %v4835_v6, 0  ;;  %v5855_v6 = vld [vmem:[%s5949_s17 + $0x308] sm:$0x30] }
  0xef   : > { %4804 = vmatmul.msk.bf16.vlgmr.msrb.gmra.mxu2 %vm252_vm1, %v5744_v10  ;;  %2681 = vmatpush.bf16.msrb.mxu0 %v2678_v3 }
  0xf0   : > { %2922 = vmatpush.bf16.msrb.mxu2 %v2919_v49 }
  0xf2   : > { %v1002_v15 = vpop.f32.mrf.mxu2 }
  0xf3   : > { %v763_v16 = vpop.f32.mrf.mxu0 }
  0xf4   : > { %v780_v17 = vpack.c.bf16 %v763_v16, %v761_v9  ;;  %2923 = vmatpush.bf16.msrb.mxu2 %v5820_v57  ;;  %v5803_v16 = vld [vmem:[%s5949_s17 + $0x258] sm:$0xff] }
  0xf5   : > { %2682 = vmatpush.bf16.msrb.mxu0 %v5803_v16 }
  0xf6   : > { %4351 = vmatmul.msk.bf16.vlgmr.msrb.gmra.mxu1 %vm252_vm1, %v780_v17  ;;  %v5759_v17 = vld [vmem:[%s7050_s2 + $0x28] sm:$0xff] }
  0xf8   : > { %2924 = vmatpush.bf16.msrb.mxu2 %v5819_v11 }
  0xfa   : > { %v1004_v22 = vpop.f32.mrf.mxu2 }
  0xfb   : > { %v1021_v24 = vpack.c.bf16 %v1004_v22, %v1002_v15  ;;  %v766_v25 = vpop.f32.mrf.mxu0  ;;  %v1816_v15 = vsel %vm265_vm0, %v4738_v14, 0  ;;  %v5778_v22 = vld [vmem:[%s7049_s1] sm:$0xff] }
  0xfc   : > { %1819 = vmatpush.bf16.msrb.mxu1 %v1816_v15  ;;  %v2108_v15 = vld [vmem:[%s7049_s1 + $0x18] sm:$0x7] }
  0xfd   : > { %4448 = vmatmul.msk.bf16.vlgmr.msrb.gmra.mxu3 %vm252_vm1, %v1021_v24  ;;  %v5742_v24 = vld [vmem:[%s7050_s2 + $0x28] sm:$0xff] }
  0xfe   : > { %4708 = vmatmul.msk.bf16.gmra.mxu0 %vm252_vm1, %v5728_v23  ;;  %2060 = vmatpush.bf16.msrb.mxu3 %v2057_v7  ;;  %v5818_v23 = vld [vmem:[%s5949_s17 + $0x280] sm:$0xff] }
  0xff   : > { %4805 = vmatmul.msk.bf16.gmra.mxu2 %vm252_vm1, %v5745_v26 }
 0x100   : > { %2925 = vmatpush.bf16.msrb.mxu2 %v5818_v23  ;;  %1820 = vmatpush.bf16.msrb.mxu1 %v5742_v24  ;;  %v5854_v23 = vld [vmem:[%s5949_s17 + $0x300] sm:$0xff] }
 0x102   : > { %v1007_v30 = vpop.f32.mrf.mxu2  ;;  %2061 = vmatpush.bf16.msrb.mxu3 %v5759_v17 }
 0x103   : > { %v768_v31 = vpop.f32.mrf.mxu0 }
 0x104   : > { %v781_v34 = vpack.c.bf16 %v768_v31, %v766_v25  ;;  %v5802_v25 = vld [vmem:[%s5949_s17 + $0x250] sm:$0xff]  ;;  %2926 = vmatpush.bf16.msrb.mxu2 %v5817_v32  ;;  %1821 = vmatpush.bf16.msrb.mxu1 %v5741_v33 }
 0x105   : > { %2683 = vmatpush.bf16.msrb.mxu0 %v5802_v25  ;;  %v5838_v32 = vld [vmem:[%s5949_s17 + $0x2d0] sm:$0x30] }
 0x106   : > { %4352 = vmatmul.msk.bf16.gmra.mxu1 %vm252_vm1, %v781_v34  ;;  %2062 = vmatpush.bf16.msrb.mxu3 %v5758_v29  ;;  %v5801_v34 = vld [vmem:[%s5949_s17 + $0x248] sm:$0xff] }
 0x108   : > { %1822 = vmatpush.bf16.msrb.mxu1 %v5740_v44 }
 0x109   : > { %2684 = vmatpush.bf16.msrb.mxu0 %v5801_v34 }
 0x10a   : > { %v1009_v37 = vpop.f32.mrf.mxu2 }
 0x10b   : > { %v1022_v41 = vpack.c.bf16 %v1009_v37, %v1007_v30  ;;  %v771_v42 = vpop.f32.mrf.mxu0 }
 0x10d   : > { %4449 = vmatmul.msk.bf16.gmra.mxu3 %vm252_vm1, %v1022_v41  ;;  %v5757_v41 = vld [vmem:[%s7050_s2 + $0x18] sm:$0xff] }
 0x10e   : > { %4709 = vmatmul.msk.bf16.gmra.mxu0 %vm252_vm1, %v5729_v38  ;;  %2063 = vmatpush.bf16.msrb.mxu3 %v5757_v41 }
 0x10f   : > { %4806 = vmatmul.msk.bf16.gmra.mxu2 %vm252_vm1, %v5746_v43  ;;  %v5816_v43 = vld [vmem:[%s5949_s17 + $0x270] sm:$0xff] }
 0x110   : > { %2927 = vmatpush.bf16.msrb.mxu2 %v5816_v43 }
 0x112   : > { %v1012_v48 = vpop.f32.mrf.mxu2 }
 0x113   : > { %v773_v51 = vpop.f32.mrf.mxu0 }
 0x114   : > { %v782_v53 = vpack.c.bf16 %v773_v51, %v771_v42  ;;  %v5756_v51 = vld [vmem:[%s7050_s2 + $0x10] sm:$0xff]  ;;  %2928 = vmatpush.bf16.msrb.mxu2 %v5815_v54 }
 0x115   : > { %2064 = vmatpush.bf16.msrb.mxu3 %v5756_v51  ;;  %v5837_v51 = vld [vmem:[%s5949_s17 + $0x2c8] sm:$0xff] }
 0x116   : > { %4353 = vmatmul.msk.bf16.gmra.mxu1 %vm252_vm1, %v782_v53 }
 0x119   : > { %2065 = vmatpush.bf16.msrb.mxu3 %v5755_v2 }
 0x11a   : > { %v1014_v59 = vpop.f32.mrf.mxu2 }
 0x11b   : > { %v1023_v61 = vpack.c.bf16 %v1014_v59, %v1012_v48  ;;  %v776_v62 = vpop.f32.mrf.mxu0  ;;  %v5800_v48 = vld [vmem:[%s5949_s17 + $0x240] sm:$0xff]  ;;  %v5763_v59 = vld [vmem:[%s7049_s1 + $0x10] sm:$0xff] }
 0x11c   : > { %v783_v8 = vpack.c.bf16 %v776_v62, %v776_v62  ;;  %2685 = vmatpush.bf16.msrb.mxu0 %v5800_v48 }
 0x11d   : > { %4450 = vmatmul.msk.bf16.gmra.mxu3 %vm252_vm1, %v1023_v61  ;;  %v5798_v61 = vld [vmem:[%s5949_s17 + $0x230] sm:$0xff] }
 0x11e   : > { %4710 = vmatmul.msk.bf16.gmra.mxu0 %vm252_vm1, %v1659_v60  ;;  %v5739_v60 = vld [vmem:[%s7050_s2 + $0x10] sm:$0xff] }
 0x11f   : > { %4807 = vmatmul.msk.bf16.gmra.mxu2 %vm252_vm1, %v1900_v63  ;;  %1823 = vmatpush.bf16.msrb.mxu1 %v5739_v60 }
 0x120   : > { %2686 = vmatpush.bf16.msrb.mxu0 %v5799_v55 }
 0x122   : > { %v1017_v9 = vpop.f32.mrf.mxu2 }
 0x123   : > { %v778_v10 = vpop.f32.mrf.mxu0  ;;  %v1024_v20 = vpack.c.bf16 %v1017_v9, %v1017_v9  ;;  %1824 = vmatpush.bf16.msrb.mxu1 %v5738_v4 }
 0x124   : > { %2687 = vmatpush.bf16.msrb.mxu0 %v5798_v61  ;;  %v5812_v61 = vld [vmem:[%s7049_s1] sm:$0xff] }
 0x126   : > { %4354 = vmatmul.msk.bf16.gmra.mxu1 %vm252_vm1, %v783_v8  ;;  %v5385_v8 = vor.u32 %v5855_v6, %v5384_v5  ;;  %v5792_v6 = vld [vmem:[%s7050_s2 + $0x20] sm:$0xff] }
 0x127   : > { %1825 = vmatpush.bf16.msrb.mxu1 %v5737_v12 }
 0x128   : > { %v3401_v11 = vsel %vm265_vm0, %v5385_v8, 0 }
 0x12a   : > { %v1019_v18 = vpop.f32.mrf.mxu2 }
 0x12b   : > { %v1243_v21 = vpop.f32.mrf.mxu0  ;;  %v2349_v18 = vld [vmem:[%s7049_s1 + $0x18] sm:$0x7] }
 0x12d   : > { %4451 = vmatmul.msk.bf16.gmra.mxu3 %vm252_vm1, %v1024_v20  ;;  %v5754_v20 = vld [vmem:[%s7050_s2] sm:$0xff] }
 0x12e   : > { %4901 = vmatmul.msk.bf16.vlgmr.msra.gmra.mxu0 %vm252_vm1, %v5761_v19  ;;  %v2137_v19 = vunpack.c.l.b16 %v2108_v15  ;;  %2066 = vmatpush.bf16.msrb.mxu3 %v5754_v20 }
 0x12f   : > { %4998 = vmatmul.msk.bf16.vlgmr.msra.gmra.mxu2 %vm252_vm1, %v5778_v22 }
 0x130   : > { %3404 = vmatpush.bf16.msra.mxu2 %v3401_v11  ;;  %v5835_v11 = vld [vmem:[%s5949_s17 + $0x2b8] sm:$0xff] }
 0x132   : > { %v1484_v26 = vpop.f32.mrf.mxu2 }
 0x133   : > { %v380_v27 = vpop.f32.mrf.mxu1  ;;  %v1245_v28 = vpop.f32.mrf.mxu0 }
 0x134   : > { %v399_v30 = vpack.c.bf16 %v380_v27, %v380_v27  ;;  %v1262_v31 = vpack.c.bf16 %v1245_v28, %v1243_v21  ;;  %v2378_v21 = vunpack.c.l.b16 %v2349_v18  ;;  %3405 = vmatpush.bf16.msra.mxu2 %v5854_v23  ;;  %v5813_v18 = vld [vmem:[%s7049_s1 + $0x8] sm:$0xff] }
 0x136   : > { %407 = vst.msk [vmem:[%s6378_s29] sm:$0xf] %vm406_vm2, %v399_v30  ;;  %4545 = vmatmul.msk.bf16.vlgmr.msra.gmra.mxu1 %vm252_vm1, %v1262_v31  ;;  %v2382_v30 = vpack.c.b16 %v2378_v21, %v2378_v21  ;;  %v5287_v31 = vld [vmem:[%s5949_s17 + $0x2d0] sm:$0xf]  ;;  %v5850_v21 = vld [vmem:[%s5949_s17 + $0x2e0] sm:$0xff] }
 0x137   : > { %v5288_v34 = vor.u32 %v5838_v32, %v5287_v31  ;;  %v5849_v32 = vld [vmem:[%s5949_s17 + $0x2d8] sm:$0xff] }
 0x13a   : > { %v1486_v35 = vpop.f32.mrf.mxu2 }
 0x13b   : > { %v1503_v37 = vpack.c.bf16 %v1486_v35, %v1484_v26  ;;  %v382_v38 = vpop.f32.mrf.mxu1  ;;  %v1248_v39 = vpop.f32.mrf.mxu0  ;;  %v2141_v26 = vpack.c.b16 %v2137_v19, %v2137_v19  ;;  %v3160_v35 = vsel %vm265_vm0, %v5288_v34, 0  ;;  %v5791_v19 = vld [vmem:[%s7050_s2 + $0x18] sm:$0xff] }
 0x13c   : > { %v400_v42 = vpack.c.bf16 %v382_v38, %v382_v38  ;;  %3163 = vmatpush.bf16.msra.mxu0 %v3160_v35 }
 0x13d   : > { %4642 = vmatmul.msk.bf16.vlgmr.msra.gmra.mxu3 %vm252_vm1, %v1503_v37  ;;  %v5794_v37 = vld [vmem:[%s7050_s2 + $0x30] sm:$0x30] }
 0x13e   : > { %408 = vst.msk [vmem:[%s6378_s29 + $0x4] sm:$0xf] %vm406_vm2, %v400_v42  ;;  %4902 = vmatmul.msk.bf16.gmra.mxu0 %vm252_vm1, %v5762_v36  ;;  %v5028_v36 = vld [vmem:[%s7050_s2 + $0x30] sm:$0xf] }
 0x13f   : > { %4999 = vmatmul.msk.bf16.gmra.mxu2 %vm252_vm1, %v5779_v40 }
 0x140   : > { %v622_v45 = vpop.f32.mrf.mxu3  ;;  %3164 = vmatpush.bf16.msra.mxu0 %v5837_v51 }
 0x141   : > { %v641_v46 = vpack.c.bf16 %v622_v45, %v622_v45 }
 0x142   : > { %v1489_v47 = vpop.f32.mrf.mxu2 }
 0x143   : > { %4258 = vst.msk [vmem:[%s6378_s29 + $0x1c] sm:$0xf] %vm406_vm2, %v641_v46  ;;  %v385_v49 = vpop.f32.mrf.mxu1  ;;  %v1250_v50 = vpop.f32.mrf.mxu0  ;;  %v5853_v46 = vld [vmem:[%s5949_s17 + $0x2f8] sm:$0xff] }
 0x144   : > { %v401_v52 = vpack.c.bf16 %v385_v49, %v385_v49  ;;  %v1263_v53 = vpack.c.bf16 %v1250_v50, %v1248_v39  ;;  %v5029_v39 = vor.u32 %v5794_v37, %v5028_v36  ;;  %v5777_v49 = vld [vmem:[%s7050_s2 + $0x30] sm:$0x30]  ;;  %3406 = vmatpush.bf16.msra.mxu2 %v5853_v46  ;;  %v5772_v46 = vld [vmem:[%s7050_s2 + $0x8] sm:$0xff] }
 0x145   : > { %v5797_v37 = vld [vmem:[%s7049_s1 + $0x10] sm:$0xff] }
 0x146   : > { %409 = vst.msk [vmem:[%s6378_s29 + $0x8] sm:$0xf] %vm406_vm2, %v401_v52  ;;  %4546 = vmatmul.msk.bf16.gmra.mxu1 %vm252_vm1, %v1263_v53  ;;  %v2539_v43 = vsel %vm265_vm0, %v5029_v39, 0  ;;  %v5793_v52 = vld [vmem:[%s7050_s2 + $0x28] sm:$0xff]  ;;  %v5832_v39 = vld [vmem:[%s5949_s17 + $0x2a0] sm:$0xff] }
 0x147   : > { %2542 = vmatpush.bf16.msra.mxu3 %v2539_v43  ;;  %v5814_v43 = vld [vmem:[%s7049_s1 + $0x10] sm:$0xff] }
 0x148   : > { %v624_v56 = vpop.f32.mrf.mxu3 }
 0x149   : > { %v642_v57 = vpack.c.bf16 %v624_v56, %v624_v56 }
 0x14a   : > { %v1491_v58 = vpop.f32.mrf.mxu2 }
 0x14b   : > { %4259 = vst.msk [vmem:[%s6378_s29 + $0x20] sm:$0xf] %vm406_vm2, %v642_v57  ;;  %v1504_v62 = vpack.c.bf16 %v1491_v58, %v1489_v47  ;;  %v387_v63 = vpop.f32.mrf.mxu1  ;;  %v1253_v0 = vpop.f32.mrf.mxu0  ;;  %v4931_v47 = vld [vmem:[%s7050_s2 + $0x30] sm:$0xf]  ;;  %2543 = vmatpush.bf16.msra.mxu3 %v5793_v52  ;;  %v5795_v57 = vld [vmem:[%s7049_s1] sm:$0xff] }
 0x14c   : > { %v402_v3 = vpack.c.bf16 %v387_v63, %v387_v63  ;;  %v4932_v50 = vor.u32 %v5777_v49, %v4931_v47  ;;  %v5776_v63 = vld [vmem:[%s7050_s2 + $0x28] sm:$0xff]  ;;  %v5578_v47 = vld [vmem:[%s5949_s17 + $0x378] sm:$0xf] }
 0x14d   : > { %4643 = vmatmul.msk.bf16.gmra.mxu3 %vm252_vm1, %v1504_v62  ;;  %v5852_v62 = vld [vmem:[%s5949_s17 + $0x2f0] sm:$0xff] }
 0x14e   : > { %410 = vst.msk [vmem:[%s6378_s29 + $0xc] sm:$0xf] %vm406_vm2, %v402_v3  ;;  %4903 = vmatmul.msk.bf16.gmra.mxu0 %vm252_vm1, %v5763_v59  ;;  %v2298_v53 = vsel %vm265_vm0, %v4932_v50, 0  ;;  %3407 = vmatpush.bf16.msra.mxu2 %v5852_v62  ;;  %v5788_v62 = vld [vmem:[%s7050_s2] sm:$0xff] }
 0x14f   : > { %5000 = vmatmul.msk.bf16.gmra.mxu2 %vm252_vm1, %v5780_v1  ;;  %2301 = vmatpush.bf16.msra.mxu1 %v2298_v53 }
 0x150   : > { %v627_v7 = vpop.f32.mrf.mxu3  ;;  %2544 = vmatpush.bf16.msra.mxu3 %v5792_v6 }
 0x151   : > { %v643_v9 = vpack.c.bf16 %v627_v7, %v627_v7 }
 0x152   : > { %v1494_v10 = vpop.f32.mrf.mxu2 }
 0x153   : > { %4260 = vst.msk [vmem:[%s6378_s29 + $0x24] sm:$0xf] %vm406_vm2, %v643_v9  ;;  %v390_v13 = vpop.f32.mrf.mxu1  ;;  %v1255_v14 = vpop.f32.mrf.mxu0  ;;  %2302 = vmatpush.bf16.msra.mxu1 %v5776_v63  ;;  %v5851_v9 = vld [vmem:[%s5949_s17 + $0x2e8] sm:$0xff] }
 0x154   : > { %v403_v16 = vpack.c.bf16 %v390_v13, %v390_v13  ;;  %v1264_v17 = vpack.c.bf16 %v1255_v14, %v1253_v0  ;;  %v5836_v0 = vld [vmem:[%s5949_s17 + $0x2c0] sm:$0xff]  ;;  %3408 = vmatpush.bf16.msra.mxu2 %v5851_v9  ;;  %v5796_v14 = vld [vmem:[%s7049_s1 + $0x8] sm:$0xff]  ;;  %2545 = vmatpush.bf16.msra.mxu3 %v5791_v19 }
 0x155   : > { %3165 = vmatpush.bf16.msra.mxu0 %v5836_v0  ;;  %v5481_v9 = vld [vmem:[%s5949_s17 + $0x340] sm:$0xf] }
 0x156   : > { %411 = vst.msk [vmem:[%s6378_s29 + $0x10] sm:$0xf] %vm406_vm2, %v403_v16  ;;  %4547 = vmatmul.msk.bf16.gmra.mxu1 %vm252_vm1, %v1264_v17 }
 0x158   : > { %v629_v22 = vpop.f32.mrf.mxu3  ;;  %3409 = vmatpush.bf16.msra.mxu2 %v5850_v21 }
 0x159   : > { %v644_v24 = vpack.c.bf16 %v629_v22, %v629_v22  ;;  %3166 = vmatpush.bf16.msra.mxu0 %v5835_v11  ;;  %v5774_v22 = vld [vmem:[%s7050_s2 + $0x18] sm:$0xff] }
 0x15a   : > { %v1496_v25 = vpop.f32.mrf.mxu2 }
 0x15b   : > { %4261 = vst.msk [vmem:[%s6378_s29 + $0x28] sm:$0xf] %vm406_vm2, %v644_v24  ;;  %v1505_v27 = vpack.c.bf16 %v1496_v25, %v1494_v10  ;;  %v392_v28 = vpop.f32.mrf.mxu1  ;;  %v1258_v29 = vpop.f32.mrf.mxu0  ;;  %v5775_v10 = vld [vmem:[%s7050_s2 + $0x20] sm:$0xff] }
 0x15c   : > { %v404_v33 = vpack.c.bf16 %v392_v28, %v392_v28  ;;  %v1265_v41 = vpack.c.bf16 %v1258_v29, %v1258_v29  ;;  %2303 = vmatpush.bf16.msra.mxu1 %v5775_v10  ;;  %v5790_v29 = vld [vmem:[%s7050_s2 + $0x10] sm:$0xff]  ;;  %3410 = vmatpush.bf16.msra.mxu2 %v5849_v32  ;;  %v5872_v10 = vld [vmem:[%s5949_s17 + $0x340] sm:$0x30] }
 0x15d   : > { %4644 = vmatmul.msk.bf16.gmra.mxu3 %vm252_vm1, %v1505_v27 }
 0x15e   : > { %412 = vst.msk [vmem:[%s6378_s29 + $0x14] sm:$0xf] %vm406_vm2, %v404_v33  ;;  %4904 = vmatmul.msk.bf16.gmra.mxu0 %vm252_vm1, %v2141_v26  ;;  %v5834_v26 = vld [vmem:[%s5949_s17 + $0x2b0] sm:$0xff]  ;;  %2546 = vmatpush.bf16.msra.mxu3 %v5790_v29  ;;  %v5833_v33 = vld [vmem:[%s5949_s17 + $0x2a8] sm:$0xff]  ;;  %v5871_v29 = vld [vmem:[%s5949_s17 + $0x338] sm:$0xff] }
 0x15f   : > { %5001 = vmatmul.msk.bf16.gmra.mxu2 %vm252_vm1, %v2382_v30  ;;  %3167 = vmatpush.bf16.msra.mxu0 %v5834_v26 }
 0x160   : > { %v632_v38 = vpop.f32.mrf.mxu3  ;;  %2304 = vmatpush.bf16.msra.mxu1 %v5774_v22 }
 0x161   : > { %v645_v40 = vpack.c.bf16 %v632_v38, %v632_v38  ;;  %v5773_v38 = vld [vmem:[%s7050_s2 + $0x10] sm:$0xff] }
 0x162   : > { %v1499_v42 = vpop.f32.mrf.mxu2 }
 0x163   : > { %4262 = vst.msk [vmem:[%s6378_s29 + $0x2c] sm:$0xf] %vm406_vm2, %v645_v40  ;;  %v395_v44 = vpop.f32.mrf.mxu1  ;;  %v1260_v45 = vpop.f32.mrf.mxu0  ;;  %v1506_v58 = vpack.c.bf16 %v1499_v42, %v1499_v42  ;;  %3168 = vmatpush.bf16.msra.mxu0 %v5833_v33 }
 0x164   : > { %v405_v48 = vpack.c.bf16 %v395_v44, %v395_v44  ;;  %v5789_v44 = vld [vmem:[%s7050_s2 + $0x8] sm:$0xff]  ;;  %2305 = vmatpush.bf16.msra.mxu1 %v5773_v38 }
 0x165   : > { %2547 = vmatpush.bf16.msra.mxu3 %v5789_v44 }
 0x166   : > { %414 = vst.msk [vmem:[%s6378_s29 + $0x18] sm:$0x7] %vm413_vm3, %v405_v48  ;;  %4548 = vmatmul.msk.bf16.gmra.mxu1 %vm252_vm1, %v1265_v41  ;;  %v5889_v48 = vld [vmem:[%s5949_s17 + $0x378] sm:$0x30] }
 0x167   : > { %3169 = vmatpush.bf16.msra.mxu0 %v5832_v39  ;;  %v5579_v50 = vor.u32 %v5889_v48, %v5578_v47  ;;  %v5846_v39 = vld [vmem:[%s7049_s1] sm:$0xff] }
 0x168   : > { %v634_v54 = vpop.f32.mrf.mxu3  ;;  %2306 = vmatpush.bf16.msra.mxu1 %v5772_v46  ;;  %v5826_v48 = vld [vmem:[%s7050_s2 + $0x20] sm:$0xff] }
 0x169   : > { %v646_v55 = vpack.c.bf16 %v634_v54, %v634_v54  ;;  %v3883_v53 = vsel %vm265_vm0, %v5579_v50, 0  ;;  %v5771_v54 = vld [vmem:[%s7050_s2] sm:$0xff]  ;;  %2548 = vmatpush.bf16.msra.mxu3 %v5788_v62 }
 0x16a   : > { %v1501_v56 = vpop.f32.mrf.mxu2 }
 0x16b   : > { %4263 = vst.msk [vmem:[%s6378_s29 + $0x30] sm:$0xf] %vm406_vm2, %v646_v55  ;;  %v397_v59 = vpop.f32.mrf.mxu1  ;;  %v1725_v60 = vpop.f32.mrf.mxu0 }
 0x16c   : > { %2307 = vmatpush.bf16.msra.mxu1 %v5771_v54 }
 0x16d   : > { %4645 = vmatmul.msk.bf16.gmra.mxu3 %vm252_vm1, %v1506_v58 }
 0x16e   : > { %5095 = vmatmul.msk.bf16.vlgmr.msrb.gmra.mxu0 %vm252_vm1, %v5795_v57  ;;  %v2590_v57 = vld [vmem:[%s7049_s1 + $0x18] sm:$0x7] }
 0x16f   : > { %5192 = vmatmul.msk.bf16.vlgmr.msrb.gmra.mxu2 %vm252_vm1, %v5812_v61  ;;  %v2619_v61 = vunpack.c.l.b16 %v2590_v57 }
 0x170   : > { %v637_v1 = vpop.f32.mrf.mxu3  ;;  %3886 = vmatpush.bf16.msrb.mxu2 %v3883_v53  ;;  %v5869_v53 = vld [vmem:[%s5949_s17 + $0x328] sm:$0xff] }
 0x171   : > { %v647_v2 = vpack.c.bf16 %v637_v1, %v637_v1  ;;  %v5888_v1 = vld [vmem:[%s5949_s17 + $0x370] sm:$0xff] }
 0x172   : > { %v1966_v3 = vpop.f32.mrf.mxu2 }
 0x173   : > { %4264 = vst.msk [vmem:[%s6378_s29 + $0x34] sm:$0x7] %vm413_vm3, %v647_v2  ;;  %v863_v4 = vpop.f32.mrf.mxu1  ;;  %v1727_v5 = vpop.f32.mrf.mxu0 }
 0x174   : > { %v882_v7 = vpack.c.bf16 %v863_v4, %v863_v4  ;;  %v1744_v8 = vpack.c.bf16 %v1727_v5, %v1725_v60  ;;  %v2831_v60 = vld [vmem:[%s7049_s1 + $0x18] sm:$0x7]  ;;  %v2623_v4 = vpack.c.b16 %v2619_v61, %v2619_v61  ;;  %3887 = vmatpush.bf16.msrb.mxu2 %v5888_v1 }
 0x175   : > { %v2860_v63 = vunpack.c.l.b16 %v2831_v60  ;;  %v5847_v60 = vld [vmem:[%s7049_s1 + $0x8] sm:$0xff]  ;;  %v5825_v61 = vld [vmem:[%s7050_s2 + $0x18] sm:$0xff] }
 0x176   : > { %4355 = vst.msk [vmem:[%s6378_s29 + $0x38] sm:$0xf] %vm406_vm2, %v882_v7  ;;  %4739 = vmatmul.msk.bf16.vlgmr.msrb.gmra.mxu1 %vm252_vm1, %v1744_v8 }
 0x177   : > { %v2864_v8 = vpack.c.b16 %v2860_v63, %v2860_v63  ;;  %v5884_v63 = vld [vmem:[%s5949_s17 + $0x350] sm:$0xff] }
 0x178   : > { %v639_v12 = vpop.f32.mrf.mxu3 }
 0x179   : > { %v5482_v12 = vor.u32 %v5872_v10, %v5481_v9  ;;  %v5883_v10 = vld [vmem:[%s5949_s17 + $0x348] sm:$0xff] }
 0x17a   : > { %v1968_v13 = vpop.f32.mrf.mxu2 }
 0x17b   : > { %v1985_v15 = vpack.c.bf16 %v1968_v13, %v1966_v3  ;;  %v865_v16 = vpop.f32.mrf.mxu1  ;;  %v1730_v17 = vpop.f32.mrf.mxu0  ;;  %v3642_v13 = vsel %vm265_vm0, %v5482_v12, 0 }
 0x17c   : > { %v883_v20 = vpack.c.bf16 %v865_v16, %v865_v16  ;;  %3645 = vmatpush.bf16.msrb.mxu0 %v3642_v13 }
 0x17d   : > { %4836 = vmatmul.msk.bf16.vlgmr.msrb.gmra.mxu3 %vm252_vm1, %v1985_v15  ;;  %v5828_v15 = vld [vmem:[%s7050_s2 + $0x30] sm:$0x30] }
 0x17e   : > { %4356 = vst.msk [vmem:[%s6378_s29 + $0x3c] sm:$0xf] %vm406_vm2, %v883_v20  ;;  %5096 = vmatmul.msk.bf16.gmra.mxu0 %vm252_vm1, %v5796_v14  ;;  %v5222_v14 = vld [vmem:[%s7050_s2 + $0x30] sm:$0xf] }
 0x17f   : > { %5193 = vmatmul.msk.bf16.gmra.mxu2 %vm252_vm1, %v5813_v18 }
 0x180   : > { %v1104_v23 = vpop.f32.mrf.mxu3  ;;  %3646 = vmatpush.bf16.msrb.mxu0 %v5871_v29 }
 0x181   : > { %v1123_v24 = vpack.c.bf16 %v1104_v23, %v1104_v23 }
 0x182   : > { %v1971_v25 = vpop.f32.mrf.mxu2 }
 0x183   : > { %4452 = vst.msk [vmem:[%s6378_s29 + $0x54] sm:$0xf] %vm406_vm2, %v1123_v24  ;;  %v868_v27 = vpop.f32.mrf.mxu1  ;;  %v1732_v28 = vpop.f32.mrf.mxu0  ;;  %v5887_v24 = vld [vmem:[%s5949_s17 + $0x368] sm:$0xff] }
 0x184   : > { %v884_v30 = vpack.c.bf16 %v868_v27, %v868_v27  ;;  %v1745_v31 = vpack.c.bf16 %v1732_v28, %v1730_v17  ;;  %v5223_v17 = vor.u32 %v5828_v15, %v5222_v14  ;;  %v5811_v27 = vld [vmem:[%s7050_s2 + $0x30] sm:$0x30]  ;;  %3888 = vmatpush.bf16.msrb.mxu2 %v5887_v24  ;;  %v5806_v24 = vld [vmem:[%s7050_s2 + $0x8] sm:$0xff] }
 0x185   : > { %v5831_v15 = vld [vmem:[%s7049_s1 + $0x10] sm:$0xff] }
 0x186   : > { %4357 = vst.msk [vmem:[%s6378_s29 + $0x40] sm:$0xf] %vm406_vm2, %v884_v30  ;;  %4740 = vmatmul.msk.bf16.gmra.mxu1 %vm252_vm1, %v1745_v31  ;;  %v3021_v21 = vsel %vm265_vm0, %v5223_v17, 0  ;;  %v5827_v30 = vld [vmem:[%s7050_s2 + $0x28] sm:$0xff]  ;;  %v5866_v17 = vld [vmem:[%s5949_s17 + $0x310] sm:$0xff] }
 0x187   : > { %3024 = vmatpush.bf16.msrb.mxu3 %v3021_v21  ;;  %v5848_v21 = vld [vmem:[%s7049_s1 + $0x10] sm:$0xff] }
 0x188   : > { %v1106_v34 = vpop.f32.mrf.mxu3 }
 0x189   : > { %v1124_v35 = vpack.c.bf16 %v1106_v34, %v1106_v34 }
 0x18a   : > { %v1973_v36 = vpop.f32.mrf.mxu2 }
 0x18b   : > { %4453 = vst.msk [vmem:[%s6378_s29 + $0x58] sm:$0xf] %vm406_vm2, %v1124_v35  ;;  %v1986_v40 = vpack.c.bf16 %v1973_v36, %v1971_v25  ;;  %v870_v41 = vpop.f32.mrf.mxu1  ;;  %v1735_v42 = vpop.f32.mrf.mxu0  ;;  %v5125_v25 = vld [vmem:[%s7050_s2 + $0x30] sm:$0xf]  ;;  %3025 = vmatpush.bf16.msrb.mxu3 %v5827_v30  ;;  %v5829_v35 = vld [vmem:[%s7049_s1] sm:$0xff] }
 0x18c   : > { %v885_v45 = vpack.c.bf16 %v870_v41, %v870_v41  ;;  %v5126_v28 = vor.u32 %v5811_v27, %v5125_v25  ;;  %v5810_v41 = vld [vmem:[%s7050_s2 + $0x28] sm:$0xff] }
 0x18d   : > { %4837 = vmatmul.msk.bf16.gmra.mxu3 %vm252_vm1, %v1986_v40  ;;  %v5886_v40 = vld [vmem:[%s5949_s17 + $0x360] sm:$0xff] }
 0x18e   : > { %4358 = vst.msk [vmem:[%s6378_s29 + $0x44] sm:$0xf] %vm406_vm2, %v885_v45  ;;  %5097 = vmatmul.msk.bf16.gmra.mxu0 %vm252_vm1, %v5797_v37  ;;  %v2780_v31 = vsel %vm265_vm0, %v5126_v28, 0  ;;  %3889 = vmatpush.bf16.msrb.mxu2 %v5886_v40  ;;  %v5805_v28 = vld [vmem:[%s7050_s2] sm:$0xff] }
 0x18f   : > { %5194 = vmatmul.msk.bf16.gmra.mxu2 %vm252_vm1, %v5814_v43  ;;  %2783 = vmatpush.bf16.msrb.mxu1 %v2780_v31  ;;  %v3072_v31 = vld [vmem:[%s7049_s1 + $0x18] sm:$0x7] }
 0x190   : > { %v1109_v49 = vpop.f32.mrf.mxu3  ;;  %3026 = vmatpush.bf16.msrb.mxu3 %v5826_v48  ;;  %v5862_v48 = vld [vmem:[%s7050_s2 + $0x30] sm:$0x30] }
 0x191   : > { %v1125_v51 = vpack.c.bf16 %v1109_v49, %v1109_v49 }
 0x192   : > { %v1976_v52 = vpop.f32.mrf.mxu2 }
 0x193   : > { %4454 = vst.msk [vmem:[%s6378_s29 + $0x5c] sm:$0xf] %vm406_vm2, %v1125_v51  ;;  %v873_v55 = vpop.f32.mrf.mxu1  ;;  %v1737_v56 = vpop.f32.mrf.mxu0  ;;  %2784 = vmatpush.bf16.msrb.mxu1 %v5810_v41  ;;  %v5885_v51 = vld [vmem:[%s5949_s17 + $0x358] sm:$0xff] }
 0x194   : > { %v886_v58 = vpack.c.bf16 %v873_v55, %v873_v55  ;;  %v1746_v59 = vpack.c.bf16 %v1737_v56, %v1735_v42  ;;  %v5870_v42 = vld [vmem:[%s5949_s17 + $0x330] sm:$0xff]  ;;  %3890 = vmatpush.bf16.msrb.mxu2 %v5885_v51  ;;  %v5830_v56 = vld [vmem:[%s7049_s1 + $0x8] sm:$0xff]  ;;  %3027 = vmatpush.bf16.msrb.mxu3 %v5825_v61 }
 0x195   : > { %3647 = vmatpush.bf16.msrb.mxu0 %v5870_v42 }
 0x196   : > { %4359 = vst.msk [vmem:[%s6378_s29 + $0x48] sm:$0xf] %vm406_vm2, %v886_v58  ;;  %4741 = vmatmul.msk.bf16.gmra.mxu1 %vm252_vm1, %v1746_v59 }
 0x198   : > { %v1111_v0 = vpop.f32.mrf.mxu3  ;;  %3891 = vmatpush.bf16.msrb.mxu2 %v5884_v63 }
 0x199   : > { %v1126_v2 = vpack.c.bf16 %v1111_v0, %v1111_v0  ;;  %3648 = vmatpush.bf16.msrb.mxu0 %v5869_v53  ;;  %v5808_v0 = vld [vmem:[%s7050_s2 + $0x18] sm:$0xff] }
 0x19a   : > { %v1978_v3 = vpop.f32.mrf.mxu2 }
 0x19b   : > { %4455 = vst.msk [vmem:[%s6378_s29 + $0x60] sm:$0xf] %vm406_vm2, %v1126_v2  ;;  %v1987_v5 = vpack.c.bf16 %v1978_v3, %v1976_v52  ;;  %v875_v6 = vpop.f32.mrf.mxu1  ;;  %v1740_v7 = vpop.f32.mrf.mxu0  ;;  %v5809_v52 = vld [vmem:[%s7050_s2 + $0x20] sm:$0xff] }
 0x19c   : > { %v887_v11 = vpack.c.bf16 %v875_v6, %v875_v6  ;;  %v1747_v19 = vpack.c.bf16 %v1740_v7, %v1740_v7  ;;  %2785 = vmatpush.bf16.msrb.mxu1 %v5809_v52  ;;  %v5824_v7 = vld [vmem:[%s7050_s2 + $0x10] sm:$0xff]  ;;  %3892 = vmatpush.bf16.msrb.mxu2 %v5883_v10 }
 0x19d   : > { %4838 = vmatmul.msk.bf16.gmra.mxu3 %vm252_vm1, %v1987_v5 }
 0x19e   : > { %4360 = vst.msk [vmem:[%s6378_s29 + $0x4c] sm:$0xf] %vm406_vm2, %v887_v11  ;;  %5098 = vmatmul.msk.bf16.gmra.mxu0 %vm252_vm1, %v2623_v4  ;;  %v5868_v4 = vld [vmem:[%s5949_s17 + $0x320] sm:$0xff]  ;;  %3028 = vmatpush.bf16.msrb.mxu3 %v5824_v7  ;;  %v5867_v11 = vld [vmem:[%s5949_s17 + $0x318] sm:$0xff]  ;;  %v5844_v7 = vld [vmem:[%s7050_s2 + $0x28] sm:$0xff] }
 0x19f   : > { %5195 = vmatmul.msk.bf16.gmra.mxu2 %vm252_vm1, %v2864_v8  ;;  %3649 = vmatpush.bf16.msrb.mxu0 %v5868_v4 }
 0x1a0   : > { %v1114_v16 = vpop.f32.mrf.mxu3  ;;  %2786 = vmatpush.bf16.msrb.mxu1 %v5808_v0 }
 0x1a1   : > { %v1127_v18 = vpack.c.bf16 %v1114_v16, %v1114_v16  ;;  %v5807_v16 = vld [vmem:[%s7050_s2 + $0x10] sm:$0xff] }
 0x1a2   : > { %v1981_v20 = vpop.f32.mrf.mxu2 }
 0x1a3   : > { %4456 = vst.msk [vmem:[%s6378_s29 + $0x64] sm:$0xf] %vm406_vm2, %v1127_v18  ;;  %v878_v22 = vpop.f32.mrf.mxu1  ;;  %v1742_v23 = vpop.f32.mrf.mxu0  ;;  %v1988_v36 = vpack.c.bf16 %v1981_v20, %v1981_v20  ;;  %3650 = vmatpush.bf16.msrb.mxu0 %v5867_v11 }
 0x1a4   : > { %v888_v26 = vpack.c.bf16 %v878_v22, %v878_v22  ;;  %v5823_v22 = vld [vmem:[%s7050_s2 + $0x8] sm:$0xff]  ;;  %2787 = vmatpush.bf16.msrb.mxu1 %v5807_v16  ;;  %v5843_v16 = vld [vmem:[%s7050_s2 + $0x20] sm:$0xff] }
 0x1a5   : > { %3029 = vmatpush.bf16.msrb.mxu3 %v5823_v22 }
 0x1a6   : > { %4361 = vst.msk [vmem:[%s6378_s29 + $0x50] sm:$0x7] %vm413_vm3, %v888_v26  ;;  %4742 = vmatmul.msk.bf16.gmra.mxu1 %vm252_vm1, %v1747_v19 }
 0x1a7   : > { %3651 = vmatpush.bf16.msrb.mxu0 %v5866_v17 }
 0x1a8   : > { %v1116_v32 = vpop.f32.mrf.mxu3  ;;  %2788 = vmatpush.bf16.msrb.mxu1 %v5806_v24  ;;  %v5859_v24 = vld [vmem:[%s7050_s2 + $0x18] sm:$0xff] }
 0x1a9   : > { %v1128_v33 = vpack.c.bf16 %v1116_v32, %v1116_v32 }
 0x1aa   : > { %v1983_v34 = vpop.f32.mrf.mxu2 }
 0x1ab   : > { %4457 = vst.msk [vmem:[%s6378_s29 + $0x68] sm:$0xf] %vm406_vm2, %v1128_v33  ;;  %v880_v37 = vpop.f32.mrf.mxu1  ;;  %v2207_v38 = vpop.f32.mrf.mxu0  ;;  %v3313_v34 = vld [vmem:[%s7049_s1 + $0x18] sm:$0x7] }
 0x1ac   : > { %2789 = vmatpush.bf16.msrb.mxu1 %v5805_v28  ;;  %v3342_v37 = vunpack.c.l.b16 %v3313_v34 }
 0x1ad   : > { %4839 = vmatmul.msk.bf16.gmra.mxu3 %vm252_vm1, %v1988_v36  ;;  %v5822_v36 = vld [vmem:[%s7050_s2] sm:$0xff] }
 0x1ae   : > { %5289 = vmatmul.msk.bf16.vlgmr.msra.gmra.mxu0 %vm252_vm1, %v5829_v35  ;;  %v3101_v35 = vunpack.c.l.b16 %v3072_v31  ;;  %3030 = vmatpush.bf16.msrb.mxu3 %v5822_v36 }
 0x1af   : > { %5386 = vmatmul.msk.bf16.vlgmr.msra.gmra.mxu2 %vm252_vm1, %v5846_v39 }
 0x1b0   : > { %v1119_v43 = vpop.f32.mrf.mxu3  ;;  %v3105_v41 = vpack.c.b16 %v3101_v35, %v3101_v35 }
 0x1b1   : > { %v1129_v44 = vpack.c.bf16 %v1119_v43, %v1119_v43 }
 0x1b2   : > { %v2448_v45 = vpop.f32.mrf.mxu2 }
 0x1b3   : > { %4458 = vst.msk [vmem:[%s6378_s29 + $0x6c] sm:$0x7] %vm413_vm3, %v1129_v44  ;;  %v1345_v46 = vpop.f32.mrf.mxu1  ;;  %v2209_v47 = vpop.f32.mrf.mxu0 }
 0x1b4   : > { %v1364_v49 = vpack.c.bf16 %v1345_v46, %v1345_v46  ;;  %v2226_v50 = vpack.c.bf16 %v2209_v47, %v2207_v38  ;;  %v5416_v47 = vld [vmem:[%s7050_s2 + $0x30] sm:$0xf] }
 0x1b6   : > { %4549 = vst.msk [vmem:[%s6378_s29 + $0x70] sm:$0xf] %vm406_vm2, %v1364_v49  ;;  %4933 = vmatmul.msk.bf16.vlgmr.msra.gmra.mxu1 %vm252_vm1, %v2226_v50  ;;  %v5417_v49 = vor.u32 %v5862_v48, %v5416_v47 }
 0x1b8   : > { %v1121_v54 = vpop.f32.mrf.mxu3  ;;  %v3503_v52 = vsel %vm265_vm0, %v5417_v49, 0 }
 0x1ba   : > { %v2450_v55 = vpop.f32.mrf.mxu2 }
 0x1bb   : > { %v2467_v57 = vpack.c.bf16 %v2450_v55, %v2448_v45  ;;  %v1347_v58 = vpop.f32.mrf.mxu1  ;;  %v2212_v59 = vpop.f32.mrf.mxu0  ;;  %v3346_v45 = vpack.c.b16 %v3342_v37, %v3342_v37 }
 0x1bc   : > { %v1365_v62 = vpack.c.bf16 %v1347_v58, %v1347_v58  ;;  %v5845_v58 = vld [vmem:[%s7050_s2 + $0x30] sm:$0x30] }
 0x1bd   : > { %5030 = vmatmul.msk.bf16.vlgmr.msra.gmra.mxu3 %vm252_vm1, %v2467_v57  ;;  %v5319_v57 = vld [vmem:[%s7050_s2 + $0x30] sm:$0xf] }
 0x1be   : > { %4550 = vst.msk [vmem:[%s6378_s29 + $0x74] sm:$0xf] %vm406_vm2, %v1365_v62  ;;  %5290 = vmatmul.msk.bf16.gmra.mxu0 %vm252_vm1, %v5830_v56  ;;  %3506 = vmatpush.bf16.msra.mxu3 %v3503_v52  ;;  %v5861_v62 = vld [vmem:[%s7050_s2 + $0x28] sm:$0xff] }
 0x1bf   : > { %5387 = vmatmul.msk.bf16.gmra.mxu2 %vm252_vm1, %v5847_v60  ;;  %v5320_v60 = vor.u32 %v5845_v58, %v5319_v57  ;;  %v5856_v58 = vld [vmem:[%s7050_s2] sm:$0xff] }
 0x1c0   : > { %v1586_v1 = vpop.f32.mrf.mxu3 }
 0x1c1   : > { %v1605_v2 = vpack.c.bf16 %v1586_v1, %v1586_v1  ;;  %v3262_v61 = vsel %vm265_vm0, %v5320_v60, 0 }
 0x1c2   : > { %v2453_v3 = vpop.f32.mrf.mxu2  ;;  %3265 = vmatpush.bf16.msra.mxu1 %v3262_v61  ;;  %3507 = vmatpush.bf16.msra.mxu3 %v5861_v62 }
 0x1c3   : > { %4646 = vst.msk [vmem:[%s6378_s29 + $0x8c] sm:$0xf] %vm406_vm2, %v1605_v2  ;;  %v1350_v5 = vpop.f32.mrf.mxu1  ;;  %v2214_v6 = vpop.f32.mrf.mxu0  ;;  %v5863_v2 = vld [vmem:[%s7049_s1] sm:$0xff] }
 0x1c4   : > { %v1366_v8 = vpack.c.bf16 %v1350_v5, %v1350_v5  ;;  %v2227_v9 = vpack.c.bf16 %v2214_v6, %v2212_v59  ;;  %v5880_v6 = vld [vmem:[%s7049_s1] sm:$0xff] }
 0x1c6   : > { %4551 = vst.msk [vmem:[%s6378_s29 + $0x78] sm:$0xf] %vm406_vm2, %v1366_v8  ;;  %4934 = vmatmul.msk.bf16.gmra.mxu1 %vm252_vm1, %v2227_v9 }
 0x1c7   : > { %3266 = vmatpush.bf16.msra.mxu1 %v5844_v7 }
 0x1c8   : > { %v1588_v12 = vpop.f32.mrf.mxu3 }
 0x1c9   : > { %v1606_v13 = vpack.c.bf16 %v1588_v12, %v1588_v12 }
 0x1ca   : > { %v2455_v14 = vpop.f32.mrf.mxu2 }
 0x1cb   : > { %4647 = vst.msk [vmem:[%s6378_s29 + $0x90] sm:$0xf] %vm406_vm2, %v1606_v13  ;;  %v2468_v18 = vpack.c.bf16 %v2455_v14, %v2453_v3  ;;  %v1352_v19 = vpop.f32.mrf.mxu1  ;;  %v2217_v20 = vpop.f32.mrf.mxu0  ;;  %v5860_v13 = vld [vmem:[%s7050_s2 + $0x20] sm:$0xff]  ;;  %3267 = vmatpush.bf16.msra.mxu1 %v5843_v16  ;;  %v5879_v16 = vld [vmem:[%s7050_s2 + $0x30] sm:$0x30] }
 0x1cc   : > { %v1367_v23 = vpack.c.bf16 %v1352_v19, %v1352_v19  ;;  %3508 = vmatpush.bf16.msra.mxu3 %v5860_v13  ;;  %v5864_v19 = vld [vmem:[%s7049_s1 + $0x8] sm:$0xff] }
 0x1cd   : > { %5031 = vmatmul.msk.bf16.gmra.mxu3 %vm252_vm1, %v2468_v18 }
 0x1ce   : > { %4552 = vst.msk [vmem:[%s6378_s29 + $0x7c] sm:$0xf] %vm406_vm2, %v1367_v23  ;;  %5291 = vmatmul.msk.bf16.gmra.mxu0 %vm252_vm1, %v5831_v15  ;;  %v5881_v23 = vld [vmem:[%s7049_s1 + $0x8] sm:$0xff] }
 0x1cf   : > { %5388 = vmatmul.msk.bf16.gmra.mxu2 %vm252_vm1, %v5848_v21 }
 0x1d0   : > { %v1591_v25 = vpop.f32.mrf.mxu3  ;;  %3509 = vmatpush.bf16.msra.mxu3 %v5859_v24 }
 0x1d1   : > { %v1607_v26 = vpack.c.bf16 %v1591_v25, %v1591_v25 }
 0x1d2   : > { %v2458_v27 = vpop.f32.mrf.mxu2 }
 0x1d3   : > { %4648 = vst.msk [vmem:[%s6378_s29 + $0x94] sm:$0xf] %vm406_vm2, %v1607_v26  ;;  %v1355_v29 = vpop.f32.mrf.mxu1  ;;  %v2219_v30 = vpop.f32.mrf.mxu0  ;;  %v5842_v26 = vld [vmem:[%s7050_s2 + $0x18] sm:$0xff] }
 0x1d4   : > { %v1368_v32 = vpack.c.bf16 %v1355_v29, %v1355_v29  ;;  %v2228_v33 = vpack.c.bf16 %v2219_v30, %v2217_v20  ;;  %3268 = vmatpush.bf16.msra.mxu1 %v5842_v26 }
 0x1d6   : > { %4553 = vst.msk [vmem:[%s6378_s29 + $0x80] sm:$0xf] %vm406_vm2, %v1368_v32  ;;  %4935 = vmatmul.msk.bf16.gmra.mxu1 %vm252_vm1, %v2228_v33  ;;  %v5858_v32 = vld [vmem:[%s7050_s2 + $0x10] sm:$0xff] }
 0x1d7   : > { %3510 = vmatpush.bf16.msra.mxu3 %v5858_v32 }
 0x1d8   : > { %v1593_v38 = vpop.f32.mrf.mxu3 }
 0x1d9   : > { %v1608_v39 = vpack.c.bf16 %v1593_v38, %v1593_v38  ;;  %v5865_v38 = vld [vmem:[%s7049_s1 + $0x10] sm:$0xff] }
 0x1da   : > { %v2460_v40 = vpop.f32.mrf.mxu2 }
 0x1db   : > { %4649 = vst.msk [vmem:[%s6378_s29 + $0x98] sm:$0xf] %vm406_vm2, %v1608_v39  ;;  %v2469_v42 = vpack.c.bf16 %v2460_v40, %v2458_v27  ;;  %v1357_v43 = vpop.f32.mrf.mxu1  ;;  %v2222_v44 = vpop.f32.mrf.mxu0  ;;  %v5841_v39 = vld [vmem:[%s7050_s2 + $0x10] sm:$0xff] }
 0x1dc   : > { %v1369_v46 = vpack.c.bf16 %v1357_v43, %v1357_v43  ;;  %v2229_v53 = vpack.c.bf16 %v2222_v44, %v2222_v44  ;;  %v5882_v43 = vld [vmem:[%s7049_s1 + $0x10] sm:$0xff]  ;;  %v5857_v44 = vld [vmem:[%s7050_s2 + $0x8] sm:$0xff]  ;;  %3269 = vmatpush.bf16.msra.mxu1 %v5841_v39 }
 0x1dd   : > { %5032 = vmatmul.msk.bf16.gmra.mxu3 %vm252_vm1, %v2469_v42 }
 0x1de   : > { %4554 = vst.msk [vmem:[%s6378_s29 + $0x84] sm:$0xf] %vm406_vm2, %v1369_v46  ;;  %5292 = vmatmul.msk.bf16.gmra.mxu0 %vm252_vm1, %v3105_v41  ;;  %3511 = vmatpush.bf16.msra.mxu3 %v5857_v44  ;;  %v5840_v46 = vld [vmem:[%s7050_s2 + $0x8] sm:$0xff]  ;;  %v5876_v44 = vld [vmem:[%s7050_s2 + $0x18] sm:$0xff] }
 0x1df   : > { %5389 = vmatmul.msk.bf16.gmra.mxu2 %vm252_vm1, %v3346_v45 }
 0x1e0   : > { %v1596_v50 = vpop.f32.mrf.mxu3  ;;  %3270 = vmatpush.bf16.msra.mxu1 %v5840_v46 }
 0x1e1   : > { %v1609_v51 = vpack.c.bf16 %v1596_v50, %v1596_v50  ;;  %v5839_v50 = vld [vmem:[%s7050_s2] sm:$0xff] }
 0x1e2   : > { %v2463_v54 = vpop.f32.mrf.mxu2  ;;  %3512 = vmatpush.bf16.msra.mxu3 %v5856_v58 }
 0x1e3   : > { %4650 = vst.msk [vmem:[%s6378_s29 + $0x9c] sm:$0xf] %vm406_vm2, %v1609_v51  ;;  %v1360_v55 = vpop.f32.mrf.mxu1  ;;  %v2224_v56 = vpop.f32.mrf.mxu0  ;;  %v2470_v3 = vpack.c.bf16 %v2463_v54, %v2463_v54 }
 0x1e4   : > { %v1370_v59 = vpack.c.bf16 %v1360_v55, %v1360_v55  ;;  %v3795_v56 = vld [vmem:[%s7049_s1 + $0x18] sm:$0x7]  ;;  %3271 = vmatpush.bf16.msra.mxu1 %v5839_v50  ;;  %v5892_v50 = vld [vmem:[%s7050_s2 + $0x10] sm:$0xff] }
 0x1e6   : > { %4555 = vst.msk [vmem:[%s6378_s29 + $0x88] sm:$0x7] %vm413_vm3, %v1370_v59  ;;  %4936 = vmatmul.msk.bf16.gmra.mxu1 %vm252_vm1, %v2229_v53  ;;  %v3554_v53 = vld [vmem:[%s7049_s1 + $0x18] sm:$0x7]  ;;  %v3824_v59 = vunpack.c.l.b16 %v3795_v56  ;;  %v5875_v56 = vld [vmem:[%s7050_s2 + $0x10] sm:$0xff] }
 0x1e7   : > { %v3583_v57 = vunpack.c.l.b16 %v3554_v53 }
 0x1e8   : > { %v1598_v63 = vpop.f32.mrf.mxu3 }
 0x1e9   : > { %v1610_v0 = vpack.c.bf16 %v1598_v63, %v1598_v63  ;;  %v3587_v63 = vpack.c.b16 %v3583_v57, %v3583_v57 }
 0x1ea   : > { %v2465_v1 = vpop.f32.mrf.mxu2 }
 0x1eb   : > { %4651 = vst.msk [vmem:[%s6378_s29 + $0xa0] sm:$0xf] %vm406_vm2, %v1610_v0  ;;  %v1362_v4 = vpop.f32.mrf.mxu1  ;;  %v2689_v5 = vpop.f32.mrf.mxu0 }
 0x1ed   : > { %5033 = vmatmul.msk.bf16.gmra.mxu3 %vm252_vm1, %v2470_v3  ;;  %v3828_v3 = vpack.c.b16 %v3824_v59, %v3824_v59 }
 0x1ee   : > { %5483 = vmatmul.msk.bf16.vlgmr.msrb.gmra.mxu0 %vm252_vm1, %v5863_v2 }
 0x1ef   : > { %5580 = vmatmul.msk.bf16.vlgmr.msrb.gmra.mxu2 %vm252_vm1, %v5880_v6  ;;  %v5896_v6 = vld [vmem:[%s7050_s2 + $0x30] sm:$0x30] }
 0x1f0   : > { %v1601_v8 = vpop.f32.mrf.mxu3 }
 0x1f1   : > { %v1611_v9 = vpack.c.bf16 %v1601_v8, %v1601_v8 }
 0x1f2   : > { %v2930_v10 = vpop.f32.mrf.mxu2 }
 0x1f3   : > { %4652 = vst.msk [vmem:[%s6378_s29 + $0xa4] sm:$0x7] %vm413_vm3, %v1611_v9  ;;  %v1827_v11 = vpop.f32.mrf.mxu1  ;;  %v2691_v12 = vpop.f32.mrf.mxu0 }
 0x1f4   : > { %v1846_v14 = vpack.c.bf16 %v1827_v11, %v1827_v11  ;;  %v2708_v15 = vpack.c.bf16 %v2691_v12, %v2689_v5  ;;  %v5610_v5 = vld [vmem:[%s7050_s2 + $0x30] sm:$0xf] }
 0x1f5   : > { %v5611_v7 = vor.u32 %v5896_v6, %v5610_v5 }
 0x1f6   : > { %4743 = vst.msk [vmem:[%s6378_s29 + $0xa8] sm:$0xf] %vm406_vm2, %v1846_v14  ;;  %5127 = vmatmul.msk.bf16.vlgmr.msrb.gmra.mxu1 %vm252_vm1, %v2708_v15  ;;  %v5513_v15 = vld [vmem:[%s7050_s2 + $0x30] sm:$0xf] }
 0x1f8   : > { %v1603_v17 = vpop.f32.mrf.mxu3 }
 0x1fa   : > { %v2932_v18 = vpop.f32.mrf.mxu2 }
 0x1fb   : > { %v2949_v20 = vpack.c.bf16 %v2932_v18, %v2930_v10  ;;  %v1829_v21 = vpop.f32.mrf.mxu1  ;;  %v2694_v22 = vpop.f32.mrf.mxu0  ;;  %v3985_v10 = vsel %vm265_vm0, %v5611_v7, 0  ;;  %v5514_v18 = vor.u32 %v5879_v16, %v5513_v15  ;;  %v5890_v7 = vld [vmem:[%s7050_s2] sm:$0xff] }
 0x1fc   : > { %v1847_v25 = vpack.c.bf16 %v1829_v21, %v1829_v21 }
 0x1fd   : > { %5224 = vmatmul.msk.bf16.vlgmr.msrb.gmra.mxu3 %vm252_vm1, %v2949_v20  ;;  %v5895_v20 = vld [vmem:[%s7050_s2 + $0x28] sm:$0xff] }
 0x1fe   : > { %4744 = vst.msk [vmem:[%s6378_s29 + $0xac] sm:$0xf] %vm406_vm2, %v1847_v25  ;;  %5484 = vmatmul.msk.bf16.gmra.mxu0 %vm252_vm1, %v5864_v19  ;;  %3988 = vmatpush.bf16.msrb.mxu3 %v3985_v10  ;;  %v3744_v19 = vsel %vm265_vm0, %v5514_v18, 0 }
 0x1ff   : > { %5581 = vmatmul.msk.bf16.gmra.mxu2 %vm252_vm1, %v5881_v23  ;;  %3747 = vmatpush.bf16.msrb.mxu1 %v3744_v19 }
 0x200   : > { %v2068_v27 = vpop.f32.mrf.mxu3 }
 0x201   : > { %v2087_v28 = vpack.c.bf16 %v2068_v27, %v2068_v27  ;;  %v5878_v27 = vld [vmem:[%s7050_s2 + $0x28] sm:$0xff] }
 0x202   : > { %v2935_v29 = vpop.f32.mrf.mxu2  ;;  %3989 = vmatpush.bf16.msrb.mxu3 %v5895_v20 }
 0x203   : > { %4840 = vst.msk [vmem:[%s6378_s29 + $0xc4] sm:$0xf] %vm406_vm2, %v2087_v28  ;;  %v1832_v30 = vpop.f32.mrf.mxu1  ;;  %v2696_v31 = vpop.f32.mrf.mxu0  ;;  %3748 = vmatpush.bf16.msrb.mxu1 %v5878_v27 }
 0x204   : > { %v1848_v33 = vpack.c.bf16 %v1832_v30, %v1832_v30  ;;  %v2709_v34 = vpack.c.bf16 %v2696_v31, %v2694_v22 }
 0x206   : > { %4745 = vst.msk [vmem:[%s6378_s29 + $0xb0] sm:$0xf] %vm406_vm2, %v1848_v33  ;;  %5128 = vmatmul.msk.bf16.gmra.mxu1 %vm252_vm1, %v2709_v34  ;;  %v5894_v33 = vld [vmem:[%s7050_s2 + $0x20] sm:$0xff] }
 0x207   : > { %3990 = vmatpush.bf16.msrb.mxu3 %v5894_v33 }
 0x208   : > { %v2070_v35 = vpop.f32.mrf.mxu3 }
 0x209   : > { %v2088_v36 = vpack.c.bf16 %v2070_v35, %v2070_v35 }
 0x20a   : > { %v2937_v37 = vpop.f32.mrf.mxu2 }
 0x20b   : > { %4841 = vst.msk [vmem:[%s6378_s29 + $0xc8] sm:$0xf] %vm406_vm2, %v2088_v36  ;;  %v2950_v40 = vpack.c.bf16 %v2937_v37, %v2935_v29  ;;  %v1834_v41 = vpop.f32.mrf.mxu1  ;;  %v2699_v42 = vpop.f32.mrf.mxu0  ;;  %v5877_v36 = vld [vmem:[%s7050_s2 + $0x20] sm:$0xff] }
 0x20c   : > { %v1849_v45 = vpack.c.bf16 %v1834_v41, %v1834_v41  ;;  %3749 = vmatpush.bf16.msrb.mxu1 %v5877_v36 }
 0x20d   : > { %5225 = vmatmul.msk.bf16.gmra.mxu3 %vm252_vm1, %v2950_v40 }
 0x20e   : > { %4746 = vst.msk [vmem:[%s6378_s29 + $0xb4] sm:$0xf] %vm406_vm2, %v1849_v45  ;;  %5485 = vmatmul.msk.bf16.gmra.mxu0 %vm252_vm1, %v5865_v38 }
 0x20f   : > { %5582 = vmatmul.msk.bf16.gmra.mxu2 %vm252_vm1, %v5882_v43 }
 0x210   : > { %v2073_v47 = vpop.f32.mrf.mxu3  ;;  %3750 = vmatpush.bf16.msrb.mxu1 %v5876_v44 }
 0x211   : > { %v2089_v48 = vpack.c.bf16 %v2073_v47, %v2073_v47 }
 0x212   : > { %v2940_v49 = vpop.f32.mrf.mxu2 }
 0x213   : > { %4842 = vst.msk [vmem:[%s6378_s29 + $0xcc] sm:$0xf] %vm406_vm2, %v2089_v48  ;;  %v1837_v51 = vpop.f32.mrf.mxu1  ;;  %v2701_v52 = vpop.f32.mrf.mxu0 }
 0x214   : > { %v1850_v54 = vpack.c.bf16 %v1837_v51, %v1837_v51  ;;  %v2710_v55 = vpack.c.bf16 %v2701_v52, %v2699_v42  ;;  %v5893_v42 = vld [vmem:[%s7050_s2 + $0x18] sm:$0xff]  ;;  %3751 = vmatpush.bf16.msrb.mxu1 %v5875_v56 }
 0x215   : > { %3991 = vmatpush.bf16.msrb.mxu3 %v5893_v42 }
 0x216   : > { %4747 = vst.msk [vmem:[%s6378_s29 + $0xb8] sm:$0xf] %vm406_vm2, %v1850_v54  ;;  %5129 = vmatmul.msk.bf16.gmra.mxu1 %vm252_vm1, %v2710_v55 }
 0x218   : > { %v2075_v60 = vpop.f32.mrf.mxu3 }
 0x219   : > { %v2090_v61 = vpack.c.bf16 %v2075_v60, %v2075_v60  ;;  %3992 = vmatpush.bf16.msrb.mxu3 %v5892_v50  ;;  %v5891_v60 = vld [vmem:[%s7050_s2 + $0x8] sm:$0xff] }
 0x21a   : > { %v2942_v62 = vpop.f32.mrf.mxu2 }
 0x21b   : > { %4843 = vst.msk [vmem:[%s6378_s29 + $0xd0] sm:$0xf] %vm406_vm2, %v2090_v61  ;;  %v2951_v0 = vpack.c.bf16 %v2942_v62, %v2940_v49  ;;  %v1839_v1 = vpop.f32.mrf.mxu1  ;;  %v2704_v2 = vpop.f32.mrf.mxu0  ;;  %v5874_v62 = vld [vmem:[%s7050_s2 + $0x8] sm:$0xff] }
 0x21c   : > { %v1851_v4 = vpack.c.bf16 %v1839_v1, %v1839_v1  ;;  %v2711_v11 = vpack.c.bf16 %v2704_v2, %v2704_v2  ;;  %3752 = vmatpush.bf16.msrb.mxu1 %v5874_v62  ;;  %v5873_v2 = vld [vmem:[%s7050_s2] sm:$0xff] }
 0x21d   : > { %5226 = vmatmul.msk.bf16.gmra.mxu3 %vm252_vm1, %v2951_v0 }
 0x21e   : > { %4748 = vst.msk [vmem:[%s6378_s29 + $0xbc] sm:$0xf] %vm406_vm2, %v1851_v4  ;;  %5486 = vmatmul.msk.bf16.gmra.mxu0 %vm252_vm1, %v3587_v63  ;;  %3993 = vmatpush.bf16.msrb.mxu3 %v5891_v60 }
 0x21f   : > { %5583 = vmatmul.msk.bf16.gmra.mxu2 %vm252_vm1, %v3828_v3 }
 0x220   : > { %v2078_v8 = vpop.f32.mrf.mxu3  ;;  %3753 = vmatpush.bf16.msrb.mxu1 %v5873_v2 }
 0x221   : > { %v2091_v9 = vpack.c.bf16 %v2078_v8, %v2078_v8 }
 0x222   : > { %v2945_v12 = vpop.f32.mrf.mxu2  ;;  %3994 = vmatpush.bf16.msrb.mxu3 %v5890_v7 }
 0x223   : > { %4844 = vst.msk [vmem:[%s6378_s29 + $0xd4] sm:$0xf] %vm406_vm2, %v2091_v9  ;;  %v1842_v13 = vpop.f32.mrf.mxu1  ;;  %v2706_v14 = vpop.f32.mrf.mxu0  ;;  %v2952_v24 = vpack.c.bf16 %v2945_v12, %v2945_v12 }
 0x224   : > { %v1852_v17 = vpack.c.bf16 %v1842_v13, %v1842_v13 }
 0x226   : > { %4749 = vst.msk [vmem:[%s6378_s29 + $0xc0] sm:$0x7] %vm413_vm3, %v1852_v17  ;;  %5130 = vmatmul.msk.bf16.gmra.mxu1 %vm252_vm1, %v2711_v11 }
 0x228   : > { %v2080_v21 = vpop.f32.mrf.mxu3 }
 0x229   : > { %v2092_v22 = vpack.c.bf16 %v2080_v21, %v2080_v21 }
 0x22a   : > { %v2947_v23 = vpop.f32.mrf.mxu2 }
 0x22b   : > { %4845 = vst.msk [vmem:[%s6378_s29 + $0xd8] sm:$0xf] %vm406_vm2, %v2092_v22  ;;  %v1844_v25 = vpop.f32.mrf.mxu1  ;;  %v3171_v26 = vpop.f32.mrf.mxu0 }
 0x22d   : > { %5227 = vmatmul.msk.bf16.gmra.mxu3 %vm252_vm1, %v2952_v24 }
 0x230   : > { %v2083_v28 = vpop.f32.mrf.mxu3 }
 0x231   : > { %v2093_v29 = vpack.c.bf16 %v2083_v28, %v2083_v28 }
 0x232   : > { %v3412_v30 = vpop.f32.mrf.mxu2 }
 0x233   : > { %4846 = vst.msk [vmem:[%s6378_s29 + $0xdc] sm:$0x7] %vm413_vm3, %v2093_v29  ;;  %v2309_v31 = vpop.f32.mrf.mxu1  ;;  %v3173_v32 = vpop.f32.mrf.mxu0 }
 0x234   : > { %v2328_v34 = vpack.c.bf16 %v2309_v31, %v2309_v31  ;;  %v3190_v35 = vpack.c.bf16 %v3173_v32, %v3171_v26 }
 0x236   : > { %4937 = vst.msk [vmem:[%s6378_s29 + $0xe0] sm:$0xf] %vm406_vm2, %v2328_v34  ;;  %5321 = vmatmul.msk.bf16.vlgmr.msra.gmra.mxu1 %vm252_vm1, %v3190_v35 }
 0x238   : > { %v2085_v37 = vpop.f32.mrf.mxu3 }
 0x23a   : > { %v3414_v38 = vpop.f32.mrf.mxu2 }
 0x23b   : > { %v3431_v39 = vpack.c.bf16 %v3414_v38, %v3412_v30  ;;  %v2311_v40 = vpop.f32.mrf.mxu1  ;;  %v3176_v41 = vpop.f32.mrf.mxu0 }
 0x23c   : > { %v2329_v43 = vpack.c.bf16 %v2311_v40, %v2311_v40 }
 0x23d   : > { %5418 = vmatmul.msk.bf16.vlgmr.msra.gmra.mxu3 %vm252_vm1, %v3431_v39 }
 0x23e   : > { %4938 = vst.msk [vmem:[%s6378_s29 + $0xe4] sm:$0xf] %vm406_vm2, %v2329_v43 }
 0x240   : > { %v2550_v45 = vpop.f32.mrf.mxu3 }
 0x241   : > { %v2569_v46 = vpack.c.bf16 %v2550_v45, %v2550_v45 }
 0x242   : > { %v3417_v47 = vpop.f32.mrf.mxu2 }
 0x243   : > { %5034 = vst.msk [vmem:[%s6378_s29 + $0xfc] sm:$0xf] %vm406_vm2, %v2569_v46  ;;  %v2314_v48 = vpop.f32.mrf.mxu1  ;;  %v3178_v49 = vpop.f32.mrf.mxu0 }
 0x244   : > { %v2330_v51 = vpack.c.bf16 %v2314_v48, %v2314_v48  ;;  %v3191_v52 = vpack.c.bf16 %v3178_v49, %v3176_v41 }
 0x246   : > { %4939 = vst.msk [vmem:[%s6378_s29 + $0xe8] sm:$0xf] %vm406_vm2, %v2330_v51  ;;  %5322 = vmatmul.msk.bf16.gmra.mxu1 %vm252_vm1, %v3191_v52 }
 0x248   : > { %v2552_v53 = vpop.f32.mrf.mxu3 }
 0x249   : > { %v2570_v54 = vpack.c.bf16 %v2552_v53, %v2552_v53 }
 0x24a   : > { %v3419_v55 = vpop.f32.mrf.mxu2 }
 0x24b   : > { %5035 = vst.msk [vmem:[%s6378_s29 + $0x100] sm:$0xf] %vm406_vm2, %v2570_v54  ;;  %v3432_v57 = vpack.c.bf16 %v3419_v55, %v3417_v47  ;;  %v2316_v58 = vpop.f32.mrf.mxu1  ;;  %v3181_v59 = vpop.f32.mrf.mxu0 }
 0x24c   : > { %v2331_v61 = vpack.c.bf16 %v2316_v58, %v2316_v58 }
 0x24d   : > { %5419 = vmatmul.msk.bf16.gmra.mxu3 %vm252_vm1, %v3432_v57 }
 0x24e   : > { %4940 = vst.msk [vmem:[%s6378_s29 + $0xec] sm:$0xf] %vm406_vm2, %v2331_v61 }
 0x250   : > { %v2555_v63 = vpop.f32.mrf.mxu3 }
 0x251   : > { %v2571_v0 = vpack.c.bf16 %v2555_v63, %v2555_v63 }
 0x252   : > { %v3422_v1 = vpop.f32.mrf.mxu2 }
 0x253   : > { %5036 = vst.msk [vmem:[%s6378_s29 + $0x104] sm:$0xf] %vm406_vm2, %v2571_v0  ;;  %v2319_v3 = vpop.f32.mrf.mxu1  ;;  %v3183_v4 = vpop.f32.mrf.mxu0 }
 0x254   : > { %v2332_v5 = vpack.c.bf16 %v2319_v3, %v2319_v3  ;;  %v3192_v6 = vpack.c.bf16 %v3183_v4, %v3181_v59 }
 0x256   : > { %4941 = vst.msk [vmem:[%s6378_s29 + $0xf0] sm:$0xf] %vm406_vm2, %v2332_v5  ;;  %5323 = vmatmul.msk.bf16.gmra.mxu1 %vm252_vm1, %v3192_v6 }
 0x258   : > { %v2557_v8 = vpop.f32.mrf.mxu3 }
 0x259   : > { %v2572_v9 = vpack.c.bf16 %v2557_v8, %v2557_v8 }
 0x25a   : > { %v3424_v10 = vpop.f32.mrf.mxu2 }
 0x25b   : > { %5037 = vst.msk [vmem:[%s6378_s29 + $0x108] sm:$0xf] %vm406_vm2, %v2572_v9  ;;  %v3433_v11 = vpack.c.bf16 %v3424_v10, %v3422_v1  ;;  %v2321_v12 = vpop.f32.mrf.mxu1  ;;  %v3186_v13 = vpop.f32.mrf.mxu0 }
 0x25c   : > { %v2333_v14 = vpack.c.bf16 %v2321_v12, %v2321_v12  ;;  %v3193_v17 = vpack.c.bf16 %v3186_v13, %v3186_v13 }
 0x25d   : > { %5420 = vmatmul.msk.bf16.gmra.mxu3 %vm252_vm1, %v3433_v11 }
 0x25e   : > { %4942 = vst.msk [vmem:[%s6378_s29 + $0xf4] sm:$0xf] %vm406_vm2, %v2333_v14 }
 0x260   : > { %v2560_v15 = vpop.f32.mrf.mxu3 }
 0x261   : > { %v2573_v16 = vpack.c.bf16 %v2560_v15, %v2560_v15 }
 0x262   : > { %v3427_v18 = vpop.f32.mrf.mxu2 }
 0x263   : > { %5038 = vst.msk [vmem:[%s6378_s29 + $0x10c] sm:$0xf] %vm406_vm2, %v2573_v16  ;;  %v2324_v19 = vpop.f32.mrf.mxu1  ;;  %v3188_v20 = vpop.f32.mrf.mxu0  ;;  %v3434_v25 = vpack.c.bf16 %v3427_v18, %v3427_v18 }
 0x264   : > { %v2334_v21 = vpack.c.bf16 %v2324_v19, %v2324_v19 }
 0x266   : > { %4943 = vst.msk [vmem:[%s6378_s29 + $0xf8] sm:$0x7] %vm413_vm3, %v2334_v21  ;;  %5324 = vmatmul.msk.bf16.gmra.mxu1 %vm252_vm1, %v3193_v17 }
 0x268   : > { %v2562_v22 = vpop.f32.mrf.mxu3 }
 0x269   : > { %v2574_v23 = vpack.c.bf16 %v2562_v22, %v2562_v22 }
 0x26a   : > { %v3429_v24 = vpop.f32.mrf.mxu2 }
 0x26b   : > { %5039 = vst.msk [vmem:[%s6378_s29 + $0x110] sm:$0xf] %vm406_vm2, %v2574_v23  ;;  %v2326_v26 = vpop.f32.mrf.mxu1  ;;  %v3653_v27 = vpop.f32.mrf.mxu0 }
 0x26d   : > { %5421 = vmatmul.msk.bf16.gmra.mxu3 %vm252_vm1, %v3434_v25 }
 0x270   : > { %v2565_v28 = vpop.f32.mrf.mxu3 }
 0x271   : > { %v2575_v29 = vpack.c.bf16 %v2565_v28, %v2565_v28 }
 0x272   : > { %v3894_v30 = vpop.f32.mrf.mxu2 }
 0x273   : > { %5040 = vst.msk [vmem:[%s6378_s29 + $0x114] sm:$0x7] %vm413_vm3, %v2575_v29  ;;  %v2791_v31 = vpop.f32.mrf.mxu1  ;;  %v3655_v32 = vpop.f32.mrf.mxu0 }
 0x274   : > { %v2810_v33 = vpack.c.bf16 %v2791_v31, %v2791_v31  ;;  %v3672_v34 = vpack.c.bf16 %v3655_v32, %v3653_v27 }
 0x276   : > { %5131 = vst.msk [vmem:[%s6378_s29 + $0x118] sm:$0xf] %vm406_vm2, %v2810_v33  ;;  %5515 = vmatmul.msk.bf16.vlgmr.msrb.gmra.mxu1 %vm252_vm1, %v3672_v34 }
 0x278   : > { %v2567_v35 = vpop.f32.mrf.mxu3 }
 0x27a   : > { %v3896_v36 = vpop.f32.mrf.mxu2 }
 0x27b   : > { %v3913_v37 = vpack.c.bf16 %v3896_v36, %v3894_v30  ;;  %v2793_v38 = vpop.f32.mrf.mxu1  ;;  %v3658_v39 = vpop.f32.mrf.mxu0 }
 0x27c   : > { %v2811_v40 = vpack.c.bf16 %v2793_v38, %v2793_v38 }
 0x27d   : > { %5612 = vmatmul.msk.bf16.vlgmr.msrb.gmra.mxu3 %vm252_vm1, %v3913_v37 }
 0x27e   : > { %5132 = vst.msk [vmem:[%s6378_s29 + $0x11c] sm:$0xf] %vm406_vm2, %v2811_v40 }
 0x280   : > { %v3032_v41 = vpop.f32.mrf.mxu3 }
 0x281   : > { %v3051_v42 = vpack.c.bf16 %v3032_v41, %v3032_v41 }
 0x282   : > { %v3899_v43 = vpop.f32.mrf.mxu2 }
 0x283   : > { %5228 = vst.msk [vmem:[%s6378_s29 + $0x134] sm:$0xf] %vm406_vm2, %v3051_v42  ;;  %v2796_v44 = vpop.f32.mrf.mxu1  ;;  %v3660_v45 = vpop.f32.mrf.mxu0 }
 0x284   : > { %v2812_v46 = vpack.c.bf16 %v2796_v44, %v2796_v44  ;;  %v3673_v47 = vpack.c.bf16 %v3660_v45, %v3658_v39 }
 0x286   : > { %5133 = vst.msk [vmem:[%s6378_s29 + $0x120] sm:$0xf] %vm406_vm2, %v2812_v46  ;;  %5516 = vmatmul.msk.bf16.gmra.mxu1 %vm252_vm1, %v3673_v47 }
 0x288   : > { %v3034_v48 = vpop.f32.mrf.mxu3 }
 0x289   : > { %v3052_v49 = vpack.c.bf16 %v3034_v48, %v3034_v48 }
 0x28a   : > { %v3901_v50 = vpop.f32.mrf.mxu2 }
 0x28b   : > { %5229 = vst.msk [vmem:[%s6378_s29 + $0x138] sm:$0xf] %vm406_vm2, %v3052_v49  ;;  %v3914_v51 = vpack.c.bf16 %v3901_v50, %v3899_v43  ;;  %v2798_v52 = vpop.f32.mrf.mxu1  ;;  %v3663_v53 = vpop.f32.mrf.mxu0 }
 0x28c   : > { %v2813_v54 = vpack.c.bf16 %v2798_v52, %v2798_v52 }
 0x28d   : > { %5613 = vmatmul.msk.bf16.gmra.mxu3 %vm252_vm1, %v3914_v51 }
 0x28e   : > { %5134 = vst.msk [vmem:[%s6378_s29 + $0x124] sm:$0xf] %vm406_vm2, %v2813_v54 }
 0x290   : > { %v3037_v55 = vpop.f32.mrf.mxu3 }
 0x291   : > { %v3053_v56 = vpack.c.bf16 %v3037_v55, %v3037_v55 }
 0x292   : > { %v3904_v57 = vpop.f32.mrf.mxu2 }
 0x293   : > { %5230 = vst.msk [vmem:[%s6378_s29 + $0x13c] sm:$0xf] %vm406_vm2, %v3053_v56  ;;  %v2801_v58 = vpop.f32.mrf.mxu1  ;;  %v3665_v59 = vpop.f32.mrf.mxu0 }
 0x294   : > { %v2814_v60 = vpack.c.bf16 %v2801_v58, %v2801_v58  ;;  %v3674_v61 = vpack.c.bf16 %v3665_v59, %v3663_v53 }
 0x296   : > { %5135 = vst.msk [vmem:[%s6378_s29 + $0x128] sm:$0xf] %vm406_vm2, %v2814_v60  ;;  %5517 = vmatmul.msk.bf16.gmra.mxu1 %vm252_vm1, %v3674_v61 }
 0x298   : > { %v3039_v62 = vpop.f32.mrf.mxu3 }
 0x299   : > { %v3054_v63 = vpack.c.bf16 %v3039_v62, %v3039_v62 }
 0x29a   : > { %v3906_v0 = vpop.f32.mrf.mxu2 }
 0x29b   : > { %5231 = vst.msk [vmem:[%s6378_s29 + $0x140] sm:$0xf] %vm406_vm2, %v3054_v63  ;;  %v3915_v1 = vpack.c.bf16 %v3906_v0, %v3904_v57  ;;  %v2803_v2 = vpop.f32.mrf.mxu1  ;;  %v3668_v3 = vpop.f32.mrf.mxu0 }
 0x29c   : > { %v2815_v4 = vpack.c.bf16 %v2803_v2, %v2803_v2  ;;  %v3675_v8 = vpack.c.bf16 %v3668_v3, %v3668_v3 }
 0x29d   : > { %5614 = vmatmul.msk.bf16.gmra.mxu3 %vm252_vm1, %v3915_v1 }
 0x29e   : > { %5136 = vst.msk [vmem:[%s6378_s29 + $0x12c] sm:$0xf] %vm406_vm2, %v2815_v4 }
 0x2a0   : > { %v3042_v5 = vpop.f32.mrf.mxu3 }
 0x2a1   : > { %v3055_v6 = vpack.c.bf16 %v3042_v5, %v3042_v5 }
 0x2a2   : > { %v3909_v7 = vpop.f32.mrf.mxu2 }
 0x2a3   : > { %5232 = vst.msk [vmem:[%s6378_s29 + $0x144] sm:$0xf] %vm406_vm2, %v3055_v6  ;;  %v2806_v9 = vpop.f32.mrf.mxu1  ;;  %v3670_v10 = vpop.f32.mrf.mxu0  ;;  %v3916_v13 = vpack.c.bf16 %v3909_v7, %v3909_v7 }
 0x2a4   : > { %v2816_v11 = vpack.c.bf16 %v2806_v9, %v2806_v9 }
 0x2a6   : > { %5137 = vst.msk [vmem:[%s6378_s29 + $0x130] sm:$0x7] %vm413_vm3, %v2816_v11  ;;  %5518 = vmatmul.msk.bf16.gmra.mxu1 %vm252_vm1, %v3675_v8 }
 0x2a8   : > { %v3044_v12 = vpop.f32.mrf.mxu3 }
 0x2a9   : > { %v3056_v14 = vpack.c.bf16 %v3044_v12, %v3044_v12 }
 0x2aa   : > { %v3911_v15 = vpop.f32.mrf.mxu2 }
 0x2ab   : > { %5233 = vst.msk [vmem:[%s6378_s29 + $0x148] sm:$0xf] %vm406_vm2, %v3056_v14  ;;  %v2808_v16 = vpop.f32.mrf.mxu1 }
 0x2ad   : > { %5615 = vmatmul.msk.bf16.gmra.mxu3 %vm252_vm1, %v3916_v13 }
 0x2b0   : > { %v3047_v17 = vpop.f32.mrf.mxu3 }
 0x2b1   : > { %v3057_v18 = vpack.c.bf16 %v3047_v17, %v3047_v17 }
 0x2b3   : > { %5234 = vst.msk [vmem:[%s6378_s29 + $0x14c] sm:$0x7] %vm413_vm3, %v3057_v18  ;;  %v3273_v19 = vpop.f32.mrf.mxu1 }
 0x2b4   : > { %v3292_v20 = vpack.c.bf16 %v3273_v19, %v3273_v19 }
 0x2b6   : > { %5325 = vst.msk [vmem:[%s6378_s29 + $0x150] sm:$0xf] %vm406_vm2, %v3292_v20 }
 0x2b8   : > { %v3049_v21 = vpop.f32.mrf.mxu3 }
 0x2bb   : > { %v3275_v22 = vpop.f32.mrf.mxu1 }
 0x2bc   : > { %v3293_v23 = vpack.c.bf16 %v3275_v22, %v3275_v22 }
 0x2be   : > { %5326 = vst.msk [vmem:[%s6378_s29 + $0x154] sm:$0xf] %vm406_vm2, %v3293_v23 }
 0x2c0   : > { %v3514_v24 = vpop.f32.mrf.mxu3 }
 0x2c1   : > { %v3533_v25 = vpack.c.bf16 %v3514_v24, %v3514_v24 }
 0x2c3   : > { %5422 = vst.msk [vmem:[%s6378_s29 + $0x16c] sm:$0xf] %vm406_vm2, %v3533_v25  ;;  %v3278_v26 = vpop.f32.mrf.mxu1 }
 0x2c4   : > { %v3294_v27 = vpack.c.bf16 %v3278_v26, %v3278_v26 }
 0x2c6   : > { %5327 = vst.msk [vmem:[%s6378_s29 + $0x158] sm:$0xf] %vm406_vm2, %v3294_v27 }
 0x2c8   : > { %v3516_v28 = vpop.f32.mrf.mxu3 }
 0x2c9   : > { %v3534_v29 = vpack.c.bf16 %v3516_v28, %v3516_v28 }
 0x2cb   : > { %5423 = vst.msk [vmem:[%s6378_s29 + $0x170] sm:$0xf] %vm406_vm2, %v3534_v29  ;;  %v3280_v30 = vpop.f32.mrf.mxu1 }
 0x2cc   : > { %v3295_v31 = vpack.c.bf16 %v3280_v30, %v3280_v30 }
 0x2ce   : > { %5328 = vst.msk [vmem:[%s6378_s29 + $0x15c] sm:$0xf] %vm406_vm2, %v3295_v31 }
 0x2d0   : > { %v3519_v32 = vpop.f32.mrf.mxu3 }
 0x2d1   : > { %v3535_v33 = vpack.c.bf16 %v3519_v32, %v3519_v32 }
 0x2d3   : > { %5424 = vst.msk [vmem:[%s6378_s29 + $0x174] sm:$0xf] %vm406_vm2, %v3535_v33  ;;  %v3283_v34 = vpop.f32.mrf.mxu1 }
 0x2d4   : > { %v3296_v35 = vpack.c.bf16 %v3283_v34, %v3283_v34 }
 0x2d6   : > { %5329 = vst.msk [vmem:[%s6378_s29 + $0x160] sm:$0xf] %vm406_vm2, %v3296_v35 }
 0x2d8   : > { %v3521_v36 = vpop.f32.mrf.mxu3 }
 0x2d9   : > { %v3536_v37 = vpack.c.bf16 %v3521_v36, %v3521_v36 }
 0x2db   : > { %5425 = vst.msk [vmem:[%s6378_s29 + $0x178] sm:$0xf] %vm406_vm2, %v3536_v37  ;;  %v3285_v38 = vpop.f32.mrf.mxu1 }
 0x2dc   : > { %v3297_v39 = vpack.c.bf16 %v3285_v38, %v3285_v38 }
 0x2de   : > { %5330 = vst.msk [vmem:[%s6378_s29 + $0x164] sm:$0xf] %vm406_vm2, %v3297_v39 }
 0x2e0   : > { %v3524_v40 = vpop.f32.mrf.mxu3 }
 0x2e1   : > { %v3537_v41 = vpack.c.bf16 %v3524_v40, %v3524_v40 }
 0x2e3   : > { %5426 = vst.msk [vmem:[%s6378_s29 + $0x17c] sm:$0xf] %vm406_vm2, %v3537_v41  ;;  %v3288_v42 = vpop.f32.mrf.mxu1 }
 0x2e4   : > { %v3298_v43 = vpack.c.bf16 %v3288_v42, %v3288_v42 }
 0x2e6   : > { %5331 = vst.msk [vmem:[%s6378_s29 + $0x168] sm:$0x7] %vm413_vm3, %v3298_v43 }
 0x2e8   : > { %v3526_v44 = vpop.f32.mrf.mxu3 }
 0x2e9   : > { %v3538_v45 = vpack.c.bf16 %v3526_v44, %v3526_v44 }
 0x2eb   : > { %5427 = vst.msk [vmem:[%s6378_s29 + $0x180] sm:$0xf] %vm406_vm2, %v3538_v45  ;;  %v3290_v46 = vpop.f32.mrf.mxu1 }
 0x2f0   : > { %v3529_v47 = vpop.f32.mrf.mxu3 }
 0x2f1   : > { %v3539_v48 = vpack.c.bf16 %v3529_v47, %v3529_v47 }
 0x2f3   : > { %5428 = vst.msk [vmem:[%s6378_s29 + $0x184] sm:$0x7] %vm413_vm3, %v3539_v48  ;;  %v3755_v49 = vpop.f32.mrf.mxu1 }
 0x2f4   : > { %v3774_v50 = vpack.c.bf16 %v3755_v49, %v3755_v49 }
 0x2f6   : > { %5519 = vst.msk [vmem:[%s6378_s29 + $0x188] sm:$0xf] %vm406_vm2, %v3774_v50 }
 0x2f8   : > { %v3531_v51 = vpop.f32.mrf.mxu3 }
 0x2fb   : > { %v3757_v52 = vpop.f32.mrf.mxu1 }
 0x2fc   : > { %v3775_v53 = vpack.c.bf16 %v3757_v52, %v3757_v52 }
 0x2fe   : > { %5520 = vst.msk [vmem:[%s6378_s29 + $0x18c] sm:$0xf] %vm406_vm2, %v3775_v53 }
 0x300   : > { %v3996_v54 = vpop.f32.mrf.mxu3 }
 0x301   : > { %v4015_v55 = vpack.c.bf16 %v3996_v54, %v3996_v54 }
 0x303   : > { %5616 = vst.msk [vmem:[%s6378_s29 + $0x1a4] sm:$0xf] %vm406_vm2, %v4015_v55  ;;  %v3760_v56 = vpop.f32.mrf.mxu1 }
 0x304   : > { %v3776_v57 = vpack.c.bf16 %v3760_v56, %v3760_v56 }
 0x306   : > { %5521 = vst.msk [vmem:[%s6378_s29 + $0x190] sm:$0xf] %vm406_vm2, %v3776_v57 }
 0x308   : > { %v3998_v58 = vpop.f32.mrf.mxu3 }
 0x309   : > { %v4016_v59 = vpack.c.bf16 %v3998_v58, %v3998_v58 }
 0x30b   : > { %5617 = vst.msk [vmem:[%s6378_s29 + $0x1a8] sm:$0xf] %vm406_vm2, %v4016_v59  ;;  %v3762_v60 = vpop.f32.mrf.mxu1 }
 0x30c   : > { %v3777_v61 = vpack.c.bf16 %v3762_v60, %v3762_v60 }
 0x30e   : > { %5522 = vst.msk [vmem:[%s6378_s29 + $0x194] sm:$0xf] %vm406_vm2, %v3777_v61 }
 0x310   : > { %v4001_v62 = vpop.f32.mrf.mxu3 }
 0x311   : > { %v4017_v63 = vpack.c.bf16 %v4001_v62, %v4001_v62 }
 0x313   : > { %5618 = vst.msk [vmem:[%s6378_s29 + $0x1ac] sm:$0xf] %vm406_vm2, %v4017_v63  ;;  %v3765_v0 = vpop.f32.mrf.mxu1 }
 0x314   : > { %v3778_v1 = vpack.c.bf16 %v3765_v0, %v3765_v0 }
 0x316   : > { %5523 = vst.msk [vmem:[%s6378_s29 + $0x198] sm:$0xf] %vm406_vm2, %v3778_v1 }
 0x318   : > { %v4003_v2 = vpop.f32.mrf.mxu3 }
 0x319   : > { %v4018_v3 = vpack.c.bf16 %v4003_v2, %v4003_v2 }
 0x31b   : > { %5619 = vst.msk [vmem:[%s6378_s29 + $0x1b0] sm:$0xf] %vm406_vm2, %v4018_v3  ;;  %v3767_v4 = vpop.f32.mrf.mxu1 }
 0x31c   : > { %v3779_v5 = vpack.c.bf16 %v3767_v4, %v3767_v4 }
 0x31e   : > { %5524 = vst.msk [vmem:[%s6378_s29 + $0x19c] sm:$0xf] %vm406_vm2, %v3779_v5 }
 0x320   : > { %v4006_v6 = vpop.f32.mrf.mxu3 }
 0x321   : > { %v4019_v7 = vpack.c.bf16 %v4006_v6, %v4006_v6 }
 0x323   : > { %5620 = vst.msk [vmem:[%s6378_s29 + $0x1b4] sm:$0xf] %vm406_vm2, %v4019_v7  ;;  %v3770_v8 = vpop.f32.mrf.mxu1 }
 0x324   : > { %v3780_v9 = vpack.c.bf16 %v3770_v8, %v3770_v8 }
 0x326   : > { %5525 = vst.msk [vmem:[%s6378_s29 + $0x1a0] sm:$0x7] %vm413_vm3, %v3780_v9 }
 0x328   : > { %v4008_v10 = vpop.f32.mrf.mxu3 }
 0x329   : > { %v4020_v11 = vpack.c.bf16 %v4008_v10, %v4008_v10 }
 0x32b   : > { %5621 = vst.msk [vmem:[%s6378_s29 + $0x1b8] sm:$0xf] %vm406_vm2, %v4020_v11  ;;  %v3772_v12 = vpop.f32.mrf.mxu1 }
 0x330   : > { %v4011_v13 = vpop.f32.mrf.mxu3 }
 0x331   : > { %v4021_v14 = vpack.c.bf16 %v4011_v13, %v4011_v13 }
 0x333   : > { %5622 = vst.msk [vmem:[%s6378_s29 + $0x1bc] sm:$0x7] %vm413_vm3, %v4021_v14 }
 0x338   : > { %v4013_v15 = vpop.f32.mrf.mxu3 }
 0x339 PF: > { %s13_s12 = sadd.s32 1, %s5913_s12  }
 0x33a   : > { %p10_p4 = scmp.ge.s32.totalorder %s13_s12, 4  }
 0x33c   :  { %12 = sbr.rel (!%p10_p4) target bundleno = 1 (0x1), region = 92 }

// kernel: lenet_forward.9
= control target key start
LH: loop header
LB: loop body
LE: loop exit
PB: predicated region body
PF: predicated region fallthrough
CT: control target
= control target key end

     0   :  { %s2602_s24 = smov 0   ;;  %s2825_s0 = inlined_call_operand.vmem [shape: bf16[8,47104], index: 0, kind: input, shape index: {}]   ;;  %s2826_s1 = inlined_call_operand.vmem [shape: bf16[47104,128], index: 1, kind: input, shape index: {}]   ;;  %s2827_s2 = inlined_call_operand.vmem [shape: f32[1,128], index: 2, kind: input, shape index: {}]   ;;  %s2828_s3 = inlined_call_operand.vmem [shape: bf16[128,128], index: 3, kind: input, shape index: {}]   ;;  %s2829_s4 = inlined_call_operand.vmem [shape: f32[1,128], index: 4, kind: input, shape index: {}]   ;;  %s2830_s5 = inlined_call_operand.vmem [shape: bf16[128,128], index: 5, kind: input, shape index: {}]   ;;  %s2831_s6 = inlined_call_operand.vmem [shape: f32[1,128], index: 6, kind: input, shape index: {}]   ;;  %s2832_s7 = inlined_call_operand.vmem [shape: f32[8,128], index: 7, kind: output, shape index: {}]  }
   0x1 LB: > { %s2608_s25 = sadd.s32 4294967295, %s2559_s24   ;;  %p1812_p0 = scmp.ge.s32.totalorder %s2559_s24, 1  ;;  %s2559_s24 = sphi %s2602_s24, %s17_s24  }
   0x2   : > { %p244_p1 = scmp.lt.s32.totalorder %s2559_s24, 24 }
   0x4   : > { %p245_p2 = pnand %p1812_p0, %p244_p1 }
   0x5   : > { %s1813_s26 = sshll.u32 (!%p245_p2), %s2608_s25, 4  ;;  %s1815_s27 = sshll.u32 (!%p245_p2), %s2608_s25, 8 }
   0x6   : > { %248 = sbr.rel (%p245_p2) target bundleno = 590 (0x24e), region = 48  ;;  %p277_p3 = scmp.lt.s32.totalorder (!%p245_p2), %s1813_s26, 367 }
   0x7   : > { %p283_p4 = scmp.lt.s32.totalorder (!%p245_p2), %s1815_s27, 5887  ;;  %p1817_p5 = scmp.ne.s32.totalorder (!%p245_p2), %s2608_s25, 0 }
   0xb   : > { %s2834_s26 = smov (!%p277_p3, %s1813_s26), 367  ;;  %s2836_s27 = smov (!%p283_p4, %s1815_s27), 5887 }
   0xc   : > { %s1814_s28 = sshll.u32 %s2834_s26, 2  ;;  %s1816_s9 = sshll.u32 %s2836_s27, 2 }
   0xd   : > { %s2617_s8 = scalar_lea.vmem %s2825_s0, %s1814_s28  ;;  %s2622_s12 = scalar_lea.vmem %s2826_s1, %s1816_s9 }
   0xe   : > { %291 = sbr.rel (%p1817_p5) target bundleno = 21 (0x15), region = 52 }
  0x13   : > { %v2561_v0 = vmov 0.0  }
  0x14   : > { %292 = vst [vmem:[#allocation2] sm:$0xff] %v2561_v0 }
  0x15 PF: > { %v2404_v1 = vld [vmem:[%s2622_s12 + $0x38] sm:$0xff]  ;;  %v2403_v5 = vld [vmem:[%s2622_s12 + $0x30] sm:$0xff]  ;;  %v2402_v9 = vld [vmem:[%s2622_s12 + $0x28] sm:$0xff]  ;;  %p2330_p6 = scmp.ne.s32.totalorder %s2608_s25, 22 }
  0x16   : > { %v2412_v2 = vld [vmem:[%s2622_s12 + $0x78] sm:$0xff]  ;;  %1382 = vmatpush.bf16.msra.mxu0 %v2404_v1  ;;  %v2411_v6 = vld [vmem:[%s2622_s12 + $0x70] sm:$0xff]  ;;  %v2410_v10 = vld [vmem:[%s2622_s12 + $0x68] sm:$0xff] }
  0x17   : > { %v2420_v3 = vld [vmem:[%s2622_s12 + $0xb8] sm:$0xff]  ;;  %1395 = vmatpush.bf16.msra.mxu1 %v2412_v2  ;;  %v2419_v7 = vld [vmem:[%s2622_s12 + $0xb0] sm:$0xff]  ;;  %v2418_v11 = vld [vmem:[%s2622_s12 + $0xa8] sm:$0xff] }
  0x18   : > { %v2428_v4 = vld [vmem:[%s2622_s12 + $0xf8] sm:$0xff]  ;;  %1408 = vmatpush.bf16.msra.mxu2 %v2420_v3  ;;  %v2427_v8 = vld [vmem:[%s2622_s12 + $0xf0] sm:$0xff]  ;;  %v2426_v12 = vld [vmem:[%s2622_s12 + $0xe8] sm:$0xff] }
  0x19   : > { %1421 = vmatpush.bf16.msra.mxu3 %v2428_v4  ;;  %v2401_v13 = vld [vmem:[%s2622_s12 + $0x20] sm:$0xff]  ;;  %v2400_v17 = vld [vmem:[%s2622_s12 + $0x18] sm:$0xff]  ;;  %v2399_v21 = vld [vmem:[%s2622_s12 + $0x10] sm:$0xff] }
  0x1a   : > { %1383 = vmatpush.bf16.msra.mxu0 %v2403_v5  ;;  %v2409_v14 = vld [vmem:[%s2622_s12 + $0x60] sm:$0xff]  ;;  %v2408_v18 = vld [vmem:[%s2622_s12 + $0x58] sm:$0xff]  ;;  %v2407_v22 = vld [vmem:[%s2622_s12 + $0x50] sm:$0xff] }
  0x1b   : > { %1396 = vmatpush.bf16.msra.mxu1 %v2411_v6  ;;  %v2417_v15 = vld [vmem:[%s2622_s12 + $0xa0] sm:$0xff]  ;;  %v2416_v19 = vld [vmem:[%s2622_s12 + $0x98] sm:$0xff]  ;;  %v2415_v23 = vld [vmem:[%s2622_s12 + $0x90] sm:$0xff] }
  0x1c   : > { %1409 = vmatpush.bf16.msra.mxu2 %v2419_v7  ;;  %v2425_v16 = vld [vmem:[%s2622_s12 + $0xe0] sm:$0xff]  ;;  %v2424_v20 = vld [vmem:[%s2622_s12 + $0xd8] sm:$0xff]  ;;  %v2423_v24 = vld [vmem:[%s2622_s12 + $0xd0] sm:$0xff] }
  0x1d   : > { %1422 = vmatpush.bf16.msra.mxu3 %v2427_v8  ;;  %v2398_v25 = vld [vmem:[%s2622_s12 + $0x8] sm:$0xff]  ;;  %v294_v30 = vld [vmem:[%s2617_s8] sm:$0xff]  ;;  %v2436_v39 = vld [vmem:[%s2622_s12 + $0x138] sm:$0xff] }
  0x1e   : > { %1384 = vmatpush.bf16.msra.mxu0 %v2402_v9  ;;  %v2406_v26 = vld [vmem:[%s2622_s12 + $0x48] sm:$0xff]  ;;  %v2397_v31 = vld [vmem:[%s2622_s12] sm:$0xff]  ;;  %v566_v34 = vunpack.c.l.b16 %v294_v30  ;;  %v567_v38 = vunpack.c.h.b16 %v294_v30  ;;  %v2444_v40 = vld [vmem:[%s2622_s12 + $0x178] sm:$0xff] }
  0x1f   : > { %1397 = vmatpush.bf16.msra.mxu1 %v2410_v10  ;;  %v2414_v27 = vld [vmem:[%s2622_s12 + $0x88] sm:$0xff]  ;;  %v2405_v32 = vld [vmem:[%s2622_s12 + $0x40] sm:$0xff]  ;;  %v2452_v41 = vld [vmem:[%s2622_s12 + $0x1b8] sm:$0xff] }
  0x20   : > { %1410 = vmatpush.bf16.msra.mxu2 %v2418_v11  ;;  %v2422_v28 = vld [vmem:[%s2622_s12 + $0xc8] sm:$0xff]  ;;  %v2413_v35 = vld [vmem:[%s2622_s12 + $0x80] sm:$0xff]  ;;  %v2460_v42 = vld [vmem:[%s2622_s12 + $0x1f8] sm:$0xff]  ;;  %v582_v44 = vpack.c.b16 %v566_v34, %v566_v34  ;;  %v583_v46 = vpack.c.b16 %v567_v38, %v567_v38 }
  0x21   : > { %1423 = vmatpush.bf16.msra.mxu3 %v2426_v12  ;;  %v295_v29 = vld [vmem:[%s2617_s8 + $0x8] sm:$0xff]  ;;  %v2421_v36 = vld [vmem:[%s2622_s12 + $0xc0] sm:$0xff]  ;;  %v2435_v47 = vld [vmem:[%s2622_s12 + $0x130] sm:$0xff] }
  0x22   : > { %1385 = vmatpush.bf16.msra.mxu0 %v2401_v13  ;;  %v568_v33 = vunpack.c.l.b16 %v295_v29  ;;  %v569_v37 = vunpack.c.h.b16 %v295_v29  ;;  %v2443_v48 = vld [vmem:[%s2622_s12 + $0x170] sm:$0xff]  ;;  %v2434_v51 = vld [vmem:[%s2622_s12 + $0x128] sm:$0xff]  ;;  %v2433_v55 = vld [vmem:[%s2622_s12 + $0x120] sm:$0xff] }
  0x23   : > { %1398 = vmatpush.bf16.msra.mxu1 %v2409_v14  ;;  %v2451_v49 = vld [vmem:[%s2622_s12 + $0x1b0] sm:$0xff]  ;;  %v2442_v52 = vld [vmem:[%s2622_s12 + $0x168] sm:$0xff]  ;;  %v2441_v56 = vld [vmem:[%s2622_s12 + $0x160] sm:$0xff] }
  0x24   : > { %1411 = vmatpush.bf16.msra.mxu2 %v2417_v15  ;;  %v584_v43 = vpack.c.b16 %v568_v33, %v568_v33  ;;  %v585_v45 = vpack.c.b16 %v569_v37, %v569_v37  ;;  %v2459_v50 = vld [vmem:[%s2622_s12 + $0x1f0] sm:$0xff]  ;;  %v2450_v53 = vld [vmem:[%s2622_s12 + $0x1a8] sm:$0xff]  ;;  %v2449_v57 = vld [vmem:[%s2622_s12 + $0x1a0] sm:$0xff] }
  0x25   : > { %1424 = vmatpush.bf16.msra.mxu3 %v2425_v16  ;;  %v2458_v54 = vld [vmem:[%s2622_s12 + $0x1e8] sm:$0xff]  ;;  %v2457_v58 = vld [vmem:[%s2622_s12 + $0x1e0] sm:$0xff]  ;;  %v2432_v59 = vld [vmem:[%s2622_s12 + $0x118] sm:$0xff] }
  0x26   : > { %1386 = vmatpush.bf16.msra.mxu0 %v2400_v17  ;;  %v2440_v60 = vld [vmem:[%s2622_s12 + $0x158] sm:$0xff]  ;;  %v2431_v63 = vld [vmem:[%s2622_s12 + $0x110] sm:$0xff]  ;;  %v2430_v3 = vld [vmem:[%s2622_s12 + $0x108] sm:$0xff] }
  0x27   : > { %1399 = vmatpush.bf16.msra.mxu1 %v2408_v18  ;;  %v2448_v61 = vld [vmem:[%s2622_s12 + $0x198] sm:$0xff]  ;;  %v2439_v0 = vld [vmem:[%s2622_s12 + $0x150] sm:$0xff]  ;;  %v2438_v4 = vld [vmem:[%s2622_s12 + $0x148] sm:$0xff] }
  0x28   : > { %1412 = vmatpush.bf16.msra.mxu2 %v2416_v19  ;;  %v2456_v62 = vld [vmem:[%s2622_s12 + $0x1d8] sm:$0xff]  ;;  %v2447_v1 = vld [vmem:[%s2622_s12 + $0x190] sm:$0xff]  ;;  %v2446_v5 = vld [vmem:[%s2622_s12 + $0x188] sm:$0xff] }
  0x29   : > { %1425 = vmatpush.bf16.msra.mxu3 %v2424_v20  ;;  %v2455_v2 = vld [vmem:[%s2622_s12 + $0x1d0] sm:$0xff]  ;;  %v2454_v6 = vld [vmem:[%s2622_s12 + $0x1c8] sm:$0xff]  ;;  %v297_v7 = vld [vmem:[%s2617_s8 + $0x18] sm:$0xff] }
  0x2a   : > { %1387 = vmatpush.bf16.msra.mxu0 %v2399_v21  ;;  %v296_v8 = vld [vmem:[%s2617_s8 + $0x10] sm:$0xff]  ;;  %v2429_v9 = vld [vmem:[%s2622_s12 + $0x100] sm:$0xff]  ;;  %v572_v11 = vunpack.c.l.b16 %v297_v7  ;;  %v573_v15 = vunpack.c.h.b16 %v297_v7  ;;  %v2468_v17 = vld [vmem:[%s2622_s12 + $0x238] sm:$0xff] }
  0x2b   : > { %1400 = vmatpush.bf16.msra.mxu1 %v2407_v22  ;;  %v2437_v10 = vld [vmem:[%s2622_s12 + $0x140] sm:$0xff]  ;;  %v570_v12 = vunpack.c.l.b16 %v296_v8  ;;  %v571_v16 = vunpack.c.h.b16 %v296_v8  ;;  %v2476_v18 = vld [vmem:[%s2622_s12 + $0x278] sm:$0xff]  ;;  %v2466_v29 = vld [vmem:[%s2622_s12 + $0x228] sm:$0xff] }
  0x2c   : > { %1413 = vmatpush.bf16.msra.mxu2 %v2415_v23  ;;  %v2445_v13 = vld [vmem:[%s2622_s12 + $0x180] sm:$0xff]  ;;  %v2484_v19 = vld [vmem:[%s2622_s12 + $0x2b8] sm:$0xff]  ;;  %v588_v21 = vpack.c.b16 %v572_v11, %v572_v11  ;;  %v589_v23 = vpack.c.b16 %v573_v15, %v573_v15  ;;  %v2474_v30 = vld [vmem:[%s2622_s12 + $0x268] sm:$0xff] }
  0x2d   : > { %1426 = vmatpush.bf16.msra.mxu3 %v2423_v24  ;;  %v2453_v14 = vld [vmem:[%s2622_s12 + $0x1c0] sm:$0xff]  ;;  %v2492_v20 = vld [vmem:[%s2622_s12 + $0x2f8] sm:$0xff]  ;;  %v586_v22 = vpack.c.b16 %v570_v12, %v570_v12  ;;  %v587_v24 = vpack.c.b16 %v571_v16, %v571_v16  ;;  %v2498_v7 = vld [vmem:[%s2622_s12 + $0x328] sm:$0xff] }
  0x2e   : > { %1388 = vmatpush.bf16.msra.mxu0 %v2398_v25  ;;  %v2467_v25 = vld [vmem:[%s2622_s12 + $0x230] sm:$0xff]  ;;  %v2465_v33 = vld [vmem:[%s2622_s12 + $0x220] sm:$0xff]  ;;  %v2464_v37 = vld [vmem:[%s2622_s12 + $0x218] sm:$0xff] }
  0x2f   : > { %1401 = vmatpush.bf16.msra.mxu1 %v2406_v26  ;;  %v2475_v26 = vld [vmem:[%s2622_s12 + $0x270] sm:$0xff]  ;;  %v2473_v34 = vld [vmem:[%s2622_s12 + $0x260] sm:$0xff]  ;;  %v2472_v38 = vld [vmem:[%s2622_s12 + $0x258] sm:$0xff] }
  0x30   : > { %1414 = vmatpush.bf16.msra.mxu2 %v2414_v27  ;;  %v2483_v27 = vld [vmem:[%s2622_s12 + $0x2b0] sm:$0xff]  ;;  %v2506_v8 = vld [vmem:[%s2622_s12 + $0x368] sm:$0xff]  ;;  %v2497_v11 = vld [vmem:[%s2622_s12 + $0x320] sm:$0xff] }
  0x31   : > { %1427 = vmatpush.bf16.msra.mxu3 %v2422_v28  ;;  %v2491_v28 = vld [vmem:[%s2622_s12 + $0x2f0] sm:$0xff]  ;;  %v2505_v12 = vld [vmem:[%s2622_s12 + $0x360] sm:$0xff]  ;;  %v2496_v15 = vld [vmem:[%s2622_s12 + $0x318] sm:$0xff] }
  0x32   : > { %1389 = vmatpush.bf16.msra.mxu0 %v2397_v31  ;;  %v2482_v31 = vld [vmem:[%s2622_s12 + $0x2a8] sm:$0xff]  ;;  %v2504_v16 = vld [vmem:[%s2622_s12 + $0x358] sm:$0xff] }
  0x33   : > { %1402 = vmatpush.bf16.msra.mxu1 %v2405_v32  ;;  %v2490_v32 = vld [vmem:[%s2622_s12 + $0x2e8] sm:$0xff] }
  0x34   : > { %1415 = vmatpush.bf16.msra.mxu2 %v2413_v35  ;;  %v2481_v35 = vld [vmem:[%s2622_s12 + $0x2a0] sm:$0xff] }
  0x35   : > { %1428 = vmatpush.bf16.msra.mxu3 %v2421_v36  ;;  %1390 = vmatmul.bf16.vlgmr.msra.gmra.mxu0 %v582_v44  ;;  %v2489_v36 = vld [vmem:[%s2622_s12 + $0x2e0] sm:$0xff]  ;;  %v2487_v44 = vld [vmem:[%s2622_s12 + $0x2d0] sm:$0xff] }
  0x36   : > { %1434 = vmatpush.bf16.msrb.mxu0 %v2436_v39  ;;  %1403 = vmatmul.bf16.vlgmr.msra.gmra.mxu1 %v583_v46  ;;  %v2480_v39 = vld [vmem:[%s2622_s12 + $0x298] sm:$0xff]  ;;  %v2470_v46 = vld [vmem:[%s2622_s12 + $0x248] sm:$0xff] }
  0x37   : > { %1447 = vmatpush.bf16.msrb.mxu1 %v2444_v40  ;;  %1416 = vmatmul.bf16.vlgmr.msra.gmra.mxu2 %v584_v43  ;;  %v2488_v40 = vld [vmem:[%s2622_s12 + $0x2d8] sm:$0xff]  ;;  %v2479_v43 = vld [vmem:[%s2622_s12 + $0x290] sm:$0xff] }
  0x38   : > { %1460 = vmatpush.bf16.msrb.mxu2 %v2452_v41  ;;  %1429 = vmatmul.bf16.vlgmr.msra.gmra.mxu3 %v585_v45  ;;  %v2463_v41 = vld [vmem:[%s2622_s12 + $0x210] sm:$0xff]  ;;  %v2462_v45 = vld [vmem:[%s2622_s12 + $0x208] sm:$0xff] }
  0x39   : > { %1473 = vmatpush.bf16.msrb.mxu3 %v2460_v42  ;;  %v2471_v42 = vld [vmem:[%s2622_s12 + $0x250] sm:$0xff] }
  0x3a   : > { %1435 = vmatpush.bf16.msrb.mxu0 %v2435_v47  ;;  %v2478_v47 = vld [vmem:[%s2622_s12 + $0x288] sm:$0xff] }
  0x3b   : > { %1448 = vmatpush.bf16.msrb.mxu1 %v2443_v48  ;;  %v2486_v48 = vld [vmem:[%s2622_s12 + $0x2c8] sm:$0xff] }
  0x3c   : > { %1461 = vmatpush.bf16.msrb.mxu2 %v2451_v49  ;;  %v298_v49 = vld [vmem:[%s2617_s8 + $0x20] sm:$0xff] }
  0x3d   : > { %1474 = vmatpush.bf16.msrb.mxu3 %v2459_v50  ;;  %v299_v50 = vld [vmem:[%s2617_s8 + $0x28] sm:$0xff] }
  0x3e   : > { %1436 = vmatpush.bf16.msrb.mxu0 %v2434_v51  ;;  %v2461_v51 = vld [vmem:[%s2622_s12 + $0x200] sm:$0xff] }
  0x3f   : > { %1449 = vmatpush.bf16.msrb.mxu1 %v2442_v52  ;;  %v2469_v52 = vld [vmem:[%s2622_s12 + $0x240] sm:$0xff] }
  0x40   : > { %1462 = vmatpush.bf16.msrb.mxu2 %v2450_v53  ;;  %v574_v53 = vunpack.c.l.b16 %v298_v49 }
  0x41   : > { %1475 = vmatpush.bf16.msrb.mxu3 %v2458_v54  ;;  %v576_v54 = vunpack.c.l.b16 %v299_v50 }
  0x42   : > { %1437 = vmatpush.bf16.msrb.mxu0 %v2433_v55  ;;  %v2477_v55 = vld [vmem:[%s2622_s12 + $0x280] sm:$0xff] }
  0x43   : > { %1450 = vmatpush.bf16.msrb.mxu1 %v2441_v56  ;;  %v2485_v56 = vld [vmem:[%s2622_s12 + $0x2c0] sm:$0xff] }
  0x44   : > { %1463 = vmatpush.bf16.msrb.mxu2 %v2449_v57  ;;  %v575_v57 = vunpack.c.h.b16 %v298_v49 }
  0x45   : > { %1476 = vmatpush.bf16.msrb.mxu3 %v2457_v58  ;;  %v577_v58 = vunpack.c.h.b16 %v299_v50 }
  0x46   : > { %1438 = vmatpush.bf16.msrb.mxu0 %v2432_v59  ;;  %v2500_v59 = vld [vmem:[%s2622_s12 + $0x338] sm:$0xff] }
  0x47   : > { %1451 = vmatpush.bf16.msrb.mxu1 %v2440_v60  ;;  %v2508_v60 = vld [vmem:[%s2622_s12 + $0x378] sm:$0xff] }
  0x48   : > { %1464 = vmatpush.bf16.msrb.mxu2 %v2448_v61  ;;  %v2516_v61 = vld [vmem:[%s2622_s12 + $0x3b8] sm:$0xff] }
  0x49   : > { %1477 = vmatpush.bf16.msrb.mxu3 %v2456_v62  ;;  %v2524_v62 = vld [vmem:[%s2622_s12 + $0x3f8] sm:$0xff] }
  0x4a   : > { %1439 = vmatpush.bf16.msrb.mxu0 %v2431_v63  ;;  %v590_v63 = vpack.c.b16 %v574_v53, %v574_v53 }
  0x4b   : > { %1452 = vmatpush.bf16.msrb.mxu1 %v2439_v0  ;;  %v592_v0 = vpack.c.b16 %v576_v54, %v576_v54 }
  0x4c   : > { %1465 = vmatpush.bf16.msrb.mxu2 %v2447_v1  ;;  %v591_v1 = vpack.c.b16 %v575_v57, %v575_v57 }
  0x4d   : > { %1478 = vmatpush.bf16.msrb.mxu3 %v2455_v2  ;;  %v593_v2 = vpack.c.b16 %v577_v58, %v577_v58 }
  0x4e   : > { %1440 = vmatpush.bf16.msrb.mxu0 %v2430_v3  ;;  %v2499_v3 = vld [vmem:[%s2622_s12 + $0x330] sm:$0xff] }
  0x4f   : > { %1453 = vmatpush.bf16.msrb.mxu1 %v2438_v4  ;;  %v2507_v4 = vld [vmem:[%s2622_s12 + $0x370] sm:$0xff] }
  0x50   : > { %1466 = vmatpush.bf16.msrb.mxu2 %v2446_v5  ;;  %v2515_v5 = vld [vmem:[%s2622_s12 + $0x3b0] sm:$0xff] }
  0x51   : > { %1479 = vmatpush.bf16.msrb.mxu3 %v2454_v6  ;;  %v2523_v6 = vld [vmem:[%s2622_s12 + $0x3f0] sm:$0xff] }
  0x52   : > { %1441 = vmatpush.bf16.msrb.mxu0 %v2429_v9  ;;  %v2514_v9 = vld [vmem:[%s2622_s12 + $0x3a8] sm:$0xff] }
  0x53   : > { %1454 = vmatpush.bf16.msrb.mxu1 %v2437_v10  ;;  %v2522_v10 = vld [vmem:[%s2622_s12 + $0x3e8] sm:$0xff] }
  0x54   : > { %1467 = vmatpush.bf16.msrb.mxu2 %v2445_v13  ;;  %v2513_v13 = vld [vmem:[%s2622_s12 + $0x3a0] sm:$0xff] }
  0x55   : > { %1480 = vmatpush.bf16.msrb.mxu3 %v2453_v14  ;;  %1442 = vmatmul.bf16.vlgmr.msrb.gmra.mxu0 %v586_v22  ;;  %v2521_v14 = vld [vmem:[%s2622_s12 + $0x3e0] sm:$0xff]  ;;  %v2519_v22 = vld [vmem:[%s2622_s12 + $0x3d0] sm:$0xff] }
  0x56   : > { %1486 = vmatpush.bf16.msra.mxu0 %v2468_v17  ;;  %1455 = vmatmul.bf16.vlgmr.msrb.gmra.mxu1 %v587_v24  ;;  %v2512_v17 = vld [vmem:[%s2622_s12 + $0x398] sm:$0xff]  ;;  %v2502_v24 = vld [vmem:[%s2622_s12 + $0x348] sm:$0xff] }
  0x57   : > { %1499 = vmatpush.bf16.msra.mxu1 %v2476_v18  ;;  %1468 = vmatmul.bf16.vlgmr.msrb.gmra.mxu2 %v588_v21  ;;  %v2520_v18 = vld [vmem:[%s2622_s12 + $0x3d8] sm:$0xff]  ;;  %v2511_v21 = vld [vmem:[%s2622_s12 + $0x390] sm:$0xff] }
  0x58   : > { %1512 = vmatpush.bf16.msra.mxu2 %v2484_v19  ;;  %1481 = vmatmul.bf16.vlgmr.msrb.gmra.mxu3 %v589_v23  ;;  %v2495_v19 = vld [vmem:[%s2622_s12 + $0x310] sm:$0xff]  ;;  %v2494_v23 = vld [vmem:[%s2622_s12 + $0x308] sm:$0xff] }
  0x59   : > { %1525 = vmatpush.bf16.msra.mxu3 %v2492_v20  ;;  %v2503_v20 = vld [vmem:[%s2622_s12 + $0x350] sm:$0xff] }
  0x5a   : > { %1487 = vmatpush.bf16.msra.mxu0 %v2467_v25  ;;  %v300_v25 = vld [vmem:[%s2617_s8 + $0x30] sm:$0xff] }
  0x5b   : > { %1500 = vmatpush.bf16.msra.mxu1 %v2475_v26  ;;  %v2510_v26 = vld [vmem:[%s2622_s12 + $0x388] sm:$0xff] }
  0x5c   : > { %1513 = vmatpush.bf16.msra.mxu2 %v2483_v27  ;;  %v2518_v27 = vld [vmem:[%s2622_s12 + $0x3c8] sm:$0xff] }
  0x5d   : > { %1526 = vmatpush.bf16.msra.mxu3 %v2491_v28  ;;  %v301_v28 = vld [vmem:[%s2617_s8 + $0x38] sm:$0xff] }
  0x5e   : > { %1488 = vmatpush.bf16.msra.mxu0 %v2466_v29  ;;  %v578_v29 = vunpack.c.l.b16 %v300_v25 }
  0x5f   : > { %1501 = vmatpush.bf16.msra.mxu1 %v2474_v30  ;;  %v579_v30 = vunpack.c.h.b16 %v300_v25 }
  0x60   : > { %1514 = vmatpush.bf16.msra.mxu2 %v2482_v31  ;;  %v2493_v31 = vld [vmem:[%s2622_s12 + $0x300] sm:$0xff] }
  0x61   : > { %1527 = vmatpush.bf16.msra.mxu3 %v2490_v32  ;;  %v2501_v32 = vld [vmem:[%s2622_s12 + $0x340] sm:$0xff] }
  0x62   : > { %1489 = vmatpush.bf16.msra.mxu0 %v2465_v33  ;;  %v580_v33 = vunpack.c.l.b16 %v301_v28 }
  0x63   : > { %1502 = vmatpush.bf16.msra.mxu1 %v2473_v34  ;;  %v581_v34 = vunpack.c.h.b16 %v301_v28 }
  0x64   : > { %1515 = vmatpush.bf16.msra.mxu2 %v2481_v35  ;;  %v2509_v35 = vld [vmem:[%s2622_s12 + $0x380] sm:$0xff] }
  0x65   : > { %1528 = vmatpush.bf16.msra.mxu3 %v2489_v36  ;;  %v2517_v36 = vld [vmem:[%s2622_s12 + $0x3c0] sm:$0xff] }
  0x66   : > { %1490 = vmatpush.bf16.msra.mxu0 %v2464_v37  ;;  %v594_v37 = vpack.c.b16 %v578_v29, %v578_v29 }
  0x67   : > { %1503 = vmatpush.bf16.msra.mxu1 %v2472_v38  ;;  %v595_v38 = vpack.c.b16 %v579_v30, %v579_v30 }
  0x68   : > { %1516 = vmatpush.bf16.msra.mxu2 %v2480_v39  ;;  %v596_v39 = vpack.c.b16 %v580_v33, %v580_v33 }
  0x69   : > { %1529 = vmatpush.bf16.msra.mxu3 %v2488_v40  ;;  %v597_v40 = vpack.c.b16 %v581_v34, %v581_v34 }
  0x6a   : > { %1491 = vmatpush.bf16.msra.mxu0 %v2463_v41 }
  0x6b   : > { %1504 = vmatpush.bf16.msra.mxu1 %v2471_v42 }
  0x6c   : > { %1517 = vmatpush.bf16.msra.mxu2 %v2479_v43 }
  0x6d   : > { %1530 = vmatpush.bf16.msra.mxu3 %v2487_v44 }
  0x6e   : > { %1492 = vmatpush.bf16.msra.mxu0 %v2462_v45 }
  0x6f   : > { %1505 = vmatpush.bf16.msra.mxu1 %v2470_v46 }
  0x70   : > { %1518 = vmatpush.bf16.msra.mxu2 %v2478_v47 }
  0x71   : > { %1531 = vmatpush.bf16.msra.mxu3 %v2486_v48 }
  0x72   : > { %1493 = vmatpush.bf16.msra.mxu0 %v2461_v51 }
  0x73   : > { %1506 = vmatpush.bf16.msra.mxu1 %v2469_v52 }
  0x74   : > { %1519 = vmatpush.bf16.msra.mxu2 %v2477_v55 }
  0x75   : > { %1532 = vmatpush.bf16.msra.mxu3 %v2485_v56  ;;  %1494 = vmatmul.bf16.vlgmr.msra.gmra.mxu0 %v590_v63 }
  0x76   : > { %1538 = vmatpush.bf16.msrb.mxu0 %v2500_v59  ;;  %1507 = vmatmul.bf16.vlgmr.msra.gmra.mxu1 %v591_v1 }
  0x77   : > { %1551 = vmatpush.bf16.msrb.mxu1 %v2508_v60  ;;  %1520 = vmatmul.bf16.vlgmr.msra.gmra.mxu2 %v592_v0 }
  0x78   : > { %1564 = vmatpush.bf16.msrb.mxu2 %v2516_v61  ;;  %1533 = vmatmul.bf16.vlgmr.msra.gmra.mxu3 %v593_v2 }
  0x79   : > { %1577 = vmatpush.bf16.msrb.mxu3 %v2524_v62 }
  0x7a   : > { %1539 = vmatpush.bf16.msrb.mxu0 %v2499_v3 }
  0x7b   : > { %1552 = vmatpush.bf16.msrb.mxu1 %v2507_v4 }
  0x7c   : > { %1565 = vmatpush.bf16.msrb.mxu2 %v2515_v5 }
  0x7d   : > { %1578 = vmatpush.bf16.msrb.mxu3 %v2523_v6 }
  0x7e   : > { %1540 = vmatpush.bf16.msrb.mxu0 %v2498_v7 }
  0x7f   : > { %1553 = vmatpush.bf16.msrb.mxu1 %v2506_v8 }
  0x80   : > { %1566 = vmatpush.bf16.msrb.mxu2 %v2514_v9 }
  0x81   : > { %1579 = vmatpush.bf16.msrb.mxu3 %v2522_v10 }
  0x82   : > { %1541 = vmatpush.bf16.msrb.mxu0 %v2497_v11 }
  0x83   : > { %1554 = vmatpush.bf16.msrb.mxu1 %v2505_v12 }
  0x84   : > { %1567 = vmatpush.bf16.msrb.mxu2 %v2513_v13 }
  0x85   : > { %1580 = vmatpush.bf16.msrb.mxu3 %v2521_v14 }
  0x86   : > { %1542 = vmatpush.bf16.msrb.mxu0 %v2496_v15 }
  0x87   : > { %1555 = vmatpush.bf16.msrb.mxu1 %v2504_v16 }
  0x88   : > { %1568 = vmatpush.bf16.msrb.mxu2 %v2512_v17 }
  0x89   : > { %1581 = vmatpush.bf16.msrb.mxu3 %v2520_v18 }
  0x8a   : > { %1543 = vmatpush.bf16.msrb.mxu0 %v2495_v19 }
  0x8b   : > { %1556 = vmatpush.bf16.msrb.mxu1 %v2503_v20 }
  0x8c   : > { %1569 = vmatpush.bf16.msrb.mxu2 %v2511_v21  ;;  %v293_v21 = vld [vmem:[#allocation2] sm:$0xff] }
  0x8d   : > { %1582 = vmatpush.bf16.msrb.mxu3 %v2519_v22 }
  0x8e   : > { %1544 = vmatpush.bf16.msrb.mxu0 %v2494_v23 }
  0x8f   : > { %1557 = vmatpush.bf16.msrb.mxu1 %v2502_v24 }
  0x90   : > { %1570 = vmatpush.bf16.msrb.mxu2 %v2510_v26 }
  0x91   : > { %1583 = vmatpush.bf16.msrb.mxu3 %v2518_v27 }
  0x92   : > { %1545 = vmatpush.bf16.msrb.mxu0 %v2493_v31 }
  0x93   : > { %1558 = vmatpush.bf16.msrb.mxu1 %v2501_v32 }
  0x94   : > { %1571 = vmatpush.bf16.msrb.mxu2 %v2509_v35 }
  0x95   : > { %1584 = vmatpush.bf16.msrb.mxu3 %v2517_v36  ;;  %1546 = vmatmul.bf16.vlgmr.msrb.gmra.mxu0 %v594_v37 }
  0x96   : > { %1559 = vmatmul.bf16.vlgmr.msrb.gmra.mxu1 %v595_v38 }
  0x97   : > { %1572 = vmatmul.bf16.vlgmr.msrb.gmra.mxu2 %v596_v39 }
  0x98   : > { %1585 = vmatmul.bf16.vlgmr.msrb.gmra.mxu3 %v597_v40 }
  0xb2   : > { %v1391_v41 = vpop.f32.mrf.mxu0 }
  0xb3   : > { %v1404_v42 = vpop.f32.mrf.mxu1 }
  0xb4   : > { %v1405_v43 = vadd.f32 %v1404_v42, %v1391_v41 }
  0xba   : > { %v1417_v44 = vpop.f32.mrf.mxu2  ;;  %v1393_v47 = vpop.f32.mrf.mxu0 }
  0xbb   : > { %v1418_v45 = vadd.f32 %v1417_v44, %v1405_v43  ;;  %v1430_v46 = vpop.f32.mrf.mxu3  ;;  %v1406_v49 = vpop.f32.mrf.mxu1 }
  0xbd   : > { %v1431_v48 = vadd.f32 %v1430_v46, %v1418_v45 }
  0xc2   : > { %v1419_v50 = vpop.f32.mrf.mxu2 }
  0xc3   : > { %v1432_v51 = vpop.f32.mrf.mxu3 }
  0xd2   : > { %v1443_v52 = vpop.f32.mrf.mxu0 }
  0xd3   : > { %v1456_v53 = vpop.f32.mrf.mxu1  ;;  %v1444_v62 = vadd.f32 %v1443_v52, %v1431_v48 }
  0xd5   : > { %v1457_v2 = vadd.f32 %v1456_v53, %v1444_v62 }
  0xda   : > { %v1469_v54 = vpop.f32.mrf.mxu2  ;;  %v1445_v56 = vpop.f32.mrf.mxu0 }
  0xdb   : > { %v1482_v55 = vpop.f32.mrf.mxu3  ;;  %v1458_v57 = vpop.f32.mrf.mxu1  ;;  %v1470_v4 = vadd.f32 %v1469_v54, %v1457_v2 }
  0xdd   : > { %v1483_v7 = vadd.f32 %v1482_v55, %v1470_v4 }
  0xe2   : > { %v1471_v58 = vpop.f32.mrf.mxu2 }
  0xe3   : > { %v1484_v59 = vpop.f32.mrf.mxu3 }
  0xf2   : > { %v1495_v60 = vpop.f32.mrf.mxu0 }
  0xf3   : > { %v1508_v61 = vpop.f32.mrf.mxu1  ;;  %v1496_v8 = vadd.f32 %v1495_v60, %v1483_v7 }
  0xf5   : > { %v1509_v9 = vadd.f32 %v1508_v61, %v1496_v8 }
  0xfa   : > { %v1521_v63 = vpop.f32.mrf.mxu2  ;;  %v1497_v1 = vpop.f32.mrf.mxu0 }
  0xfb   : > { %v1534_v0 = vpop.f32.mrf.mxu3  ;;  %v1510_v3 = vpop.f32.mrf.mxu1  ;;  %v1522_v10 = vadd.f32 %v1521_v63, %v1509_v9 }
  0xfd   : > { %v1535_v11 = vadd.f32 %v1534_v0, %v1522_v10 }
 0x102   : > { %v1523_v5 = vpop.f32.mrf.mxu2 }
 0x103   : > { %v1536_v6 = vpop.f32.mrf.mxu3 }
 0x112   : > { %v1547_v12 = vpop.f32.mrf.mxu0 }
 0x113   : > { %v1560_v13 = vpop.f32.mrf.mxu1  ;;  %v1548_v14 = vadd.f32 %v1547_v12, %v1535_v11 }
 0x115   : > { %v1561_v15 = vadd.f32 %v1560_v13, %v1548_v14 }
 0x11a   : > { %v1573_v16 = vpop.f32.mrf.mxu2  ;;  %v1549_v19 = vpop.f32.mrf.mxu0 }
 0x11b   : > { %v1586_v17 = vpop.f32.mrf.mxu3  ;;  %v1574_v18 = vadd.f32 %v1573_v16, %v1561_v15  ;;  %v1562_v20 = vpop.f32.mrf.mxu1 }
 0x11d   : > { %v1587_v22 = vadd.f32 %v1586_v17, %v1574_v18 }
 0x11f   : > { %v1590_v23 = vadd.f32 %v1587_v22, %v293_v21  ;;  %1595 = sbr.rel (%p2330_p6) target bundleno = 590 (0x24e), region = 56 }
 0x121   : > { %1591 = vst [vmem:[#allocation2] sm:$0xff] %v1590_v23 }
 0x122   : > { %v1575_v24 = vpop.f32.mrf.mxu2 }
 0x123   : > { %v1588_v25 = vpop.f32.mrf.mxu3 }
 0x124   : > { %v2532_v26 = vld [vmem:[%s2828_s3 + $0x38] sm:$0xff]  ;;  %v2531_v27 = vld [vmem:[%s2828_s3 + $0x30] sm:$0xff]  ;;  %v2530_v30 = vld [vmem:[%s2828_s3 + $0x28] sm:$0xff] }
 0x125   : > { %1672 = vmatpush.bf16.msra.mxu0 %v2532_v26  ;;  %v2540_v28 = vld [vmem:[%s2830_s5 + $0x38] sm:$0xff]  ;;  %v2539_v29 = vld [vmem:[%s2830_s5 + $0x30] sm:$0xff]  ;;  %v2538_v31 = vld [vmem:[%s2830_s5 + $0x28] sm:$0xff] }
 0x126   : > { %1755 = vmatpush.bf16.msra.mxu1 %v2540_v28  ;;  %v2529_v32 = vld [vmem:[%s2828_s3 + $0x20] sm:$0xff]  ;;  %v2528_v34 = vld [vmem:[%s2828_s3 + $0x18] sm:$0xff]  ;;  %v2527_v37 = vld [vmem:[%s2828_s3 + $0x10] sm:$0xff] }
 0x127   : > { %v2537_v33 = vld [vmem:[%s2830_s5 + $0x20] sm:$0xff]  ;;  %v2536_v36 = vld [vmem:[%s2830_s5 + $0x18] sm:$0xff]  ;;  %v2535_v40 = vld [vmem:[%s2830_s5 + $0x10] sm:$0xff] }
 0x128   : > { %v2550_v35 = vld [vmem:[%s2827_s2] ss:$0 sm:$0xff]  ;;  %v2526_v41 = vld [vmem:[%s2828_s3 + $0x8] sm:$0xff] }
 0x129   : > { %1673 = vmatpush.bf16.msra.mxu0 %v2531_v27  ;;  %v1596_v38 = vld [vmem:[#allocation2] sm:$0xff]  ;;  %v2534_v45 = vld [vmem:[%s2830_s5 + $0x8] sm:$0xff] }
 0x12a   : > { %1756 = vmatpush.bf16.msra.mxu1 %v2539_v29  ;;  %v1601_v39 = vadd.f32 %v2550_v35, %v1596_v38  ;;  %v2525_v43 = vld [vmem:[%s2828_s3] sm:$0xff] }
 0x12b   : > { %v2533_v46 = vld [vmem:[%s2830_s5] sm:$0xff] }
 0x12c   : > { %v1602_v42 = vmax.f32 %v1601_v39, 0.0  ;;  %v2551_v47 = vld [vmem:[%s2829_s4] ss:$0 sm:$0xff] }
 0x12d   : > { %1674 = vmatpush.bf16.msra.mxu0 %v2530_v30  ;;  %v2552_v53 = vld [vmem:[%s2831_s6] ss:$0 sm:$0xff] }
 0x12e   : > { %1757 = vmatpush.bf16.msra.mxu1 %v2538_v31  ;;  %v1603_v44 = vpack.c.bf16 %v1602_v42, %v1602_v42 }
 0x131   : > { %1675 = vmatpush.bf16.msra.mxu0 %v2529_v32 }
 0x132   : > { %1758 = vmatpush.bf16.msra.mxu1 %v2537_v33 }
 0x135   : > { %1676 = vmatpush.bf16.msra.mxu0 %v2528_v34 }
 0x136   : > { %1759 = vmatpush.bf16.msra.mxu1 %v2536_v36 }
 0x139   : > { %1677 = vmatpush.bf16.msra.mxu0 %v2527_v37 }
 0x13a   : > { %1760 = vmatpush.bf16.msra.mxu1 %v2535_v40 }
 0x13d   : > { %1678 = vmatpush.bf16.msra.mxu0 %v2526_v41 }
 0x13e   : > { %1761 = vmatpush.bf16.msra.mxu1 %v2534_v45 }
 0x141   : > { %1679 = vmatpush.bf16.msra.mxu0 %v2525_v43 }
 0x142   : > { %1762 = vmatpush.bf16.msra.mxu1 %v2533_v46 }
 0x144   : > { %1680 = vmatmul.bf16.vlgmr.msra.gmra.mxu0 %v1603_v44 }
 0x1c1   : > { %v1681_v48 = vpop.f32.mrf.mxu0 }
 0x1c2   : > { %v1682_v49 = vadd.f32 %v2551_v47, %v1681_v48 }
 0x1c4   : > { %v1685_v50 = vmax.f32 %v1682_v49, 0.0 }
 0x1c6   : > { %v1686_v51 = vpack.c.bf16 %v1685_v50, %v1685_v50 }
 0x1c8   : > { %1763 = vmatmul.bf16.vlgmr.msra.gmra.mxu1 %v1686_v51 }
 0x1c9   : > { %v1683_v52 = vpop.f32.mrf.mxu0 }
 0x245   : > { %v1764_v54 = vpop.f32.mrf.mxu1 }
 0x246   : > { %v1765_v55 = vadd.f32 %v2552_v53, %v1764_v54 }
 0x248   : > { %1768 = vst [vmem:[%s2832_s7] sm:$0xff] %v1765_v55 }
 0x24d   : > { %v1766_v56 = vpop.f32.mrf.mxu1 }
 0x24e PF: > { %s17_s24 = sadd.s32 1, %s2559_s24  }
 0x24f   : > { %p14_p7 = scmp.ge.s32.totalorder %s17_s24, 25  }
 0x251   :  { %16 = sbr.rel (!%p14_p7) target bundleno = 1 (0x1), region = 85 }

</bundles_post_ra>
